<compile_context>
chip_gen: v7x
topology: tpu7x:2x2x1
jax: 0.10.0
libtpu: 0.0.40
codegen_flags: <defaults>
</compile_context>

<pallas_src>
import jax
import jax.numpy as jnp
from jax.experimental import pallas as pl
from jax.experimental.pallas import tpu as pltpu


# ----------------------------------------------------------------------------
# Device heuristics
# ----------------------------------------------------------------------------
def _device_kind():
    try:
        return jax.devices()[0].device_kind.lower()
    except Exception:
        return ""


def _default_compute_dtype(kind=None):
    kind = _device_kind() if kind is None else kind
    # bf16 operands halve HBM->VMEM traffic and are the native MXU input dtype
    # on v6e/v7x; v5e keeps f32 (no bf16 VPU/EUP -> the cast tax eats the DMA
    # saving for a head this small).
    if ("v6" in kind) or ("v7" in kind) or ("tpu7" in kind) or ("7x" in kind):
        return jnp.bfloat16
    return jnp.float32


def _num_tensorcores(kind=None):
    kind = _device_kind() if kind is None else kind
    # v7x has 2 TensorCores per chip: keep the grid >= 2 there so
    # dimension_semantics=("parallel",) shards the batch across both cores.
    if ("v7" in kind) or ("tpu7" in kind) or ("7x" in kind):
        return 2
    return 1


# ----------------------------------------------------------------------------
# Kernel
# ----------------------------------------------------------------------------
def classification_kernel(x_ref, w1t_ref, w2t_ref, wc1t_ref, b1_ref,
                          wc2t_ref, b2_ref, out_ref):
    TB, S, H = x_ref.shape
    r = w2t_ref.shape[1]
    wdt = w1t_ref.dtype                       # MXU operand dtype (f32 or bf16)

    x3 = x_ref[...]                                              # (TB, S, H)
    # Fold batch into rows for the shared-weight projections (fills the MXU M
    # dim).  Leading-dim merge only (minor/lane dim H unchanged).
    x2 = x3.reshape(TB * S, H)

    # SelfAttention: softmax(ws2(tanh(ws1(h))), dim=seq)
    t = jnp.tanh(jnp.dot(x2, w1t_ref[...],
                         preferred_element_type=jnp.float32))    # (TB*S, da)
    scores = jnp.dot(t.astype(wdt), w2t_ref[...],
                     preferred_element_type=jnp.float32)         # (TB*S, r)
    scores3 = scores.reshape(TB, S, r)                           # leading split

    # softmax over the sequence axis (torch dim=1 of (B, S, r)), f32 math.
    s_max = jnp.max(scores3, axis=1, keepdims=True)              # (TB, 1, r)
    e = jnp.exp(scores3 - s_max)
    denom = jnp.sum(e, axis=1, keepdims=True)                    # (TB, 1, r)
    attn = e * pl.reciprocal(denom, approx=True)                 # (TB, S, r) f32

    # Attention pooling m_i = attn_i^T x (f32 multiply/accumulate; mixed
    # bf16*f32 promotes to f32, so no persistent f32 copy of the x tile).
    m_parts = []
    for i in range(r):                                           # static unroll
        m_parts.append(jnp.sum(attn[:, :, i:i + 1] * x3, axis=1))   # (TB, H)
    # Lane-concat the r slabs -> (TB, r*H), column order i*H + h matches the
    # torch flatten order, so classifier layer 1 is ONE full-K matmul.
    m_cat = jnp.concatenate(m_parts, axis=-1)                    # (TB, r*H)

    h1 = jnp.dot(m_cat.astype(wdt), wc1t_ref[...],
                 preferred_element_type=jnp.float32) + b1_ref[...]   # (TB, 256)
    h1 = jnp.maximum(h1, 0.0)                                    # ReLU

    # classifier layer 2 (class dim pre-padded to 128 lanes -> dense store)
    out = jnp.dot(h1.astype(wdt), wc2t_ref[...],
                  preferred_element_type=jnp.float32) + b2_ref[...]
    out_ref[...] = out.astype(out_ref.dtype)


# ----------------------------------------------------------------------------
# Wrapper
# ----------------------------------------------------------------------------
def classification_forward(x, params, *, block_b=None, compute_dtype=None):
    """x: (B, S, H) encoder output. Returns logits (B, class_num) in float32."""
    B, S, H = x.shape
    kind = _device_kind()
    if compute_dtype is None:
        compute_dtype = _default_compute_dtype(kind)
    n_cores = _num_tensorcores(kind)

    w1t = params["w1t"].astype(compute_dtype)     # (H, da)
    w2t = params["w2t"].astype(compute_dtype)     # (da, r)
    wc1t = params["wc1t"].astype(compute_dtype)   # (r*H, 256)
    b1 = params["b1"].astype(jnp.float32)         # (1, 256)
    wc2t = params["wc2t"].astype(compute_dtype)   # (256, C)
    b2 = params["b2"].astype(jnp.float32)         # (1, C)

    da = w1t.shape[1]
    r = w2t.shape[1]
    hid = b1.shape[1]
    C = b2.shape[1]

    # Pad class dim to a multiple of 128 so the output store is lane-dense.
    Cp = ((C + 127) // 128) * 128
    if Cp != C:
        wc2t = jnp.pad(wc2t, ((0, 0), (0, Cp - C)))
        b2 = jnp.pad(b2, ((0, 0), (0, Cp - C)))

    itemsize = jnp.dtype(compute_dtype).itemsize
    weight_bytes = ((H * da + da * r + r * H * hid + hid * Cp) * itemsize
                    + (hid + Cp) * 4)

    # Batch tile TB: as large as the VMEM budget allows, and split into
    # n_cores grid steps so v7x uses both TensorCores.  Budget is conservative
    # for the smallest VMEM (v7x: 64 MiB per TensorCore).
    vmem_budget = 40 * 1024 * 1024
    per_seq_bytes = 2 * S * H * itemsize + 2 * Cp * 4   # dbl-buffered x + out
    tb_max = max(8, int((vmem_budget - weight_bytes) // per_seq_bytes))
    tb_max = max(8, (tb_max // 8) * 8)

    tb = pl.cdiv(B, n_cores) if block_b is None else block_b
    tb = min(tb, tb_max)
    tb = max(8, ((tb + 7) // 8) * 8)     # (8, 128) tiling for the (TB, Cp) store

    Bp = pl.cdiv(B, tb) * tb
    xk = x.astype(compute_dtype)
    if Bp != B:
        xk = jnp.pad(xk, ((0, Bp - B), (0, 0), (0, 0)))

    flops = (2 * Bp * S * (H * da + da * r)          # attention projections
             + 2 * Bp * r * S * H                    # attention pooling
             + 2 * Bp * (r * H * hid + hid * Cp))    # classifier
    transcendentals = Bp * S * (da + r)              # tanh + exp
    bytes_accessed = Bp * S * H * itemsize + weight_bytes + Bp * Cp * 4

    est_vmem = (2 * tb * S * H * itemsize + 2 * tb * Cp * 4
                + 2 * weight_bytes + (2 << 20))
    vmem_limit = int(min(96 << 20, max(32 << 20, 2 * est_vmem)))

    args = (xk, w1t, w2t, wc1t, b1, wc2t, b2)

    def build(single_buffer_weights):
        def wspec(shape):
            # Grid-invariant weights: constant index_map; single-buffer them to
            # halve their VMEM footprint (matters when H/hid grow on v7x).
            if single_buffer_weights:
                return pl.BlockSpec(shape, lambda b: (0, 0),
                                    pipeline_mode=pl.Buffered(buffer_count=1))
            return pl.BlockSpec(shape, lambda b: (0, 0))

        grid_spec = pltpu.PrefetchScalarGridSpec(
            num_scalar_prefetch=0,
            grid=(Bp // tb,),
            in_specs=[
                pl.BlockSpec((tb, S, H), lambda b: (b, 0, 0)),   # x (batch tile)
                wspec((H, da)),                                  # ws1^T
                wspec((da, r)),                                  # ws2^T
                wspec((r * H, hid)),                             # classifier W1^T
                wspec((1, hid)),                                 # classifier b1
                wspec((hid, Cp)),                                # classifier W2^T
                wspec((1, Cp)),                                  # classifier b2
            ],
            out_specs=pl.BlockSpec((tb, Cp), lambda b: (b, 0)),
        )
        return pl.pallas_call(
            classification_kernel,
            out_shape=jax.ShapeDtypeStruct((Bp, Cp), jnp.float32),
            grid_spec=grid_spec,
            compiler_params=pltpu.CompilerParams(
                dimension_semantics=("parallel",),
                vmem_limit_bytes=vmem_limit),
            cost_estimate=pl.CostEstimate(
                flops=flops,
                transcendentals=transcendentals,
                bytes_accessed=bytes_accessed),
        )

    try:
        out = build(True)(*args)
    except Exception:
        # Fallback if this jax build rejects pl.Buffered(1) on the weight
        # specs; semantics are identical, just default double buffering.
        out = build(False)(*args)

    return out[:B, :C]


# ----------------------------------------------------------------------------
# Parameters + pure-JAX reference
# ----------------------------------------------------------------------------
def init_params(key, hs=64, da=128, r=4, class_num=6):
    """Deterministic parameter init mirroring the nn.Module shapes."""
    k1, k2, k3, k4 = jax.random.split(key, 4)
    # nn.Linear(hs, da, bias=False).weight  -> (da, hs)
    ws1 = jax.random.normal(k1, (da, hs), jnp.float32) * 0.05
    # nn.Linear(da, r, bias=False).weight   -> (r, da)
    ws2 = jax.random.normal(k2, (r, da), jnp.float32) * 0.05
    # nn.Linear(hs*r, 256).weight/bias      -> (256, hs*r), (256,)
    wc1 = jax.random.normal(k3, (256, hs * r), jnp.float32) * 0.05
    bc1 = jnp.zeros((256,), jnp.float32)
    # nn.Linear(256, class_num).weight/bias -> (class_num, 256), (class_num,)
    wc2 = jax.random.normal(k4, (class_num, 256), jnp.float32) * 0.05
    bc2 = jnp.zeros((class_num,), jnp.float32)

    params = {
        "w1t": ws1.T,                 # (hs, da)
        "w2t": ws2.T,                 # (da, r)
        "wc1t": wc1.T,                # (hs*r, 256), rows ordered i*hs + h
        "b1": bc1.reshape(1, 256),
        "wc2t": wc2.T,                # (256, class_num)
        "b2": bc2.reshape(1, class_num),
    }
    raw = {"ws1": ws1, "ws2": ws2, "wc1": wc1, "bc1": bc1, "wc2": wc2, "bc2": bc2}
    return params, raw


def reference_forward(x, raw):
    """Pure-JAX reference mirroring the PyTorch forward exactly."""
    t = jnp.tanh(jnp.einsum("bsh,dh->bsd", x, raw["ws1"]))       # ws1(h)
    scores = jnp.einsum("bsd,rd->bsr", t, raw["ws2"])            # ws2(.)
    attn = jax.nn.softmax(scores, axis=1)                        # softmax over seq
    attn = jnp.transpose(attn, (0, 2, 1))                        # (B, r, S)
    m = jnp.einsum("brs,bsh->brh", attn, x)                      # bmm
    flat = m.reshape(m.shape[0], -1)                             # (B, r*hs)
    h1 = jnp.maximum(flat @ raw["wc1"].T + raw["bc1"], 0.0)
    return h1 @ raw["wc2"].T + raw["bc2"]


if __name__ == "__main__":
    B, S, hs, da, r, class_num = 32, 8, 64, 128, 4, 6

    key = jax.random.PRNGKey(0)
    kx, kp = jax.random.split(key)
    x = jax.random.normal(kx, (B, S, hs), jnp.float32)           # encoder output
    params, raw = init_params(kp, hs=hs, da=da, r=r, class_num=class_num)
    ref = reference_forward(x, raw)

    # f32 parity path (tolerance limited by the EUP approx reciprocal used for
    # the softmax denominator; use approx=False for exact training parity).
    out_f32 = jax.block_until_ready(
        classification_forward(x, params, compute_dtype=jnp.float32))
    assert out_f32.shape == (B, class_num)
    assert jnp.allclose(out_f32, ref, atol=5e-3, rtol=5e-3), (
        float(jnp.max(jnp.abs(out_f32 - ref))))

    # Auto path: bf16 operand DMA on v6e/v7x (f32 MXU accumulation), f32 on
    # v5e; grid is split across both TensorCores on v7x.
    auto_dtype = _default_compute_dtype()
    out_auto = jax.block_until_ready(classification_forward(x, params))
    tol = 5e-3 if auto_dtype == jnp.float32 else 6e-2
    assert out_auto.shape == (B, class_num)
    assert jnp.allclose(out_auto, ref, atol=tol, rtol=tol), (
        float(jnp.max(jnp.abs(out_auto - ref))))

    print("KERNEL_OK")
</pallas_src>

<mosaic_0001>
module attributes {stable_mosaic.version = 11 : i64} {
  func.func @classification_kernel(%arg0: i32, %arg1: memref<32x8x64xf32, #tpu.memory_space<vmem>>, %arg2: memref<64x128xf32, #tpu.memory_space<vmem>>, %arg3: memref<128x4xf32, #tpu.memory_space<vmem>>, %arg4: memref<256x256xf32, #tpu.memory_space<vmem>>, %arg5: memref<1x256xf32, #tpu.memory_space<vmem>>, %arg6: memref<256x128xf32, #tpu.memory_space<vmem>>, %arg7: memref<1x128xf32, #tpu.memory_space<vmem>>, %arg8: memref<32x128xf32, #tpu.memory_space<vmem>>) attributes {dimension_semantics = [#tpu.dimension_semantics<parallel>], iteration_bounds = array<i64: 1>, scalar_prefetch = 0 : i64, scratch_operands = 0 : i64, tpu.core_type = #tpu.core_type<tc>, window_params = [{transform_indices = @transform_0, window_bounds = array<i64: 32, 8, 64>}, {pipeline_mode = #tpu.pipeline_mode<synchronous>, transform_indices = @transform_1, window_bounds = array<i64: 64, 128>}, {pipeline_mode = #tpu.pipeline_mode<synchronous>, transform_indices = @transform_2, window_bounds = array<i64: 128, 4>}, {pipeline_mode = #tpu.pipeline_mode<synchronous>, transform_indices = @transform_3, window_bounds = array<i64: 256, 256>}, {pipeline_mode = #tpu.pipeline_mode<synchronous>, transform_indices = @transform_4, window_bounds = array<i64: 1, 256>}, {pipeline_mode = #tpu.pipeline_mode<synchronous>, transform_indices = @transform_5, window_bounds = array<i64: 256, 128>}, {pipeline_mode = #tpu.pipeline_mode<synchronous>, transform_indices = @transform_6, window_bounds = array<i64: 1, 128>}, {transform_indices = @transform_7, window_bounds = array<i64: 32, 128>}]} {
    %c0 = arith.constant 0 : index
    %c0_0 = arith.constant 0 : index
    %c0_1 = arith.constant 0 : index
    %0 = vector.load %arg1[%c0, %c0_0, %c0_1] : memref<32x8x64xf32, #tpu.memory_space<vmem>>, vector<32x8x64xf32>
    %1 = vector.shape_cast %0 : vector<32x8x64xf32> to vector<256x64xf32>
    %c0_2 = arith.constant 0 : index
    %c0_3 = arith.constant 0 : index
    %2 = vector.load %arg2[%c0_2, %c0_3] : memref<64x128xf32, #tpu.memory_space<vmem>>, vector<64x128xf32>
    %cst = arith.constant dense<0.000000e+00> : vector<256x128xf32>
    %3 = tpu.matmul %1, %2, %cst {dimension_numbers = #tpu.dot_dimension_numbers<[1], [0], [0], [1], [0, 0, 1, 1], [], []>} : vector<256x64xf32>, vector<64x128xf32>, vector<256x128xf32> -> vector<256x128xf32>
    %4 = math.tanh %3 : vector<256x128xf32>
    %c0_4 = arith.constant 0 : index
    %c0_5 = arith.constant 0 : index
    %5 = vector.load %arg3[%c0_4, %c0_5] : memref<128x4xf32, #tpu.memory_space<vmem>>, vector<128x4xf32>
    %cst_6 = arith.constant dense<0.000000e+00> : vector<256x4xf32>
    %6 = tpu.matmul %4, %5, %cst_6 {dimension_numbers = #tpu.dot_dimension_numbers<[1], [0], [0], [1], [0, 0, 1, 1], [], []>} : vector<256x128xf32>, vector<128x4xf32>, vector<256x4xf32> -> vector<256x4xf32>
    %7 = vector.shape_cast %6 : vector<256x4xf32> to vector<32x8x4xf32>
    %cst_7 = arith.constant dense<0xFF800000> : vector<32x4xf32>
    %8 = vector.multi_reduction <maximumf>, %7, %cst_7 [1] : vector<32x8x4xf32> to vector<32x4xf32>
    %9 = vector.shape_cast %8 : vector<32x4xf32> to vector<32x1x4xf32>
    %10 = vector.broadcast %9 : vector<32x1x4xf32> to vector<32x8x4xf32>
    %11 = arith.subf %7, %10 : vector<32x8x4xf32>
    %12 = math.exp %11 : vector<32x8x4xf32>
    %cst_8 = arith.constant dense<0.000000e+00> : vector<32x4xf32>
    %13 = vector.multi_reduction <add>, %12, %cst_8 [1] : vector<32x8x4xf32> to vector<32x4xf32>
    %14 = vector.shape_cast %13 : vector<32x4xf32> to vector<32x1x4xf32>
    %15 = tpu.reciprocal %14 {approx = true} : vector<32x1x4xf32> -> vector<32x1x4xf32>
    %16 = vector.broadcast %15 : vector<32x1x4xf32> to vector<32x8x4xf32>
    %17 = arith.mulf %12, %16 : vector<32x8x4xf32>
    %18 = vector.extract_strided_slice %17 {offsets = [0, 0, 0], sizes = [32, 8, 1], strides = [1, 1, 1]} : vector<32x8x4xf32> to vector<32x8x1xf32>
    %19 = vector.broadcast %18 : vector<32x8x1xf32> to vector<32x8x64xf32>
    %20 = arith.mulf %19, %0 : vector<32x8x64xf32>
    %cst_9 = arith.constant dense<0.000000e+00> : vector<32x64xf32>
    %21 = vector.multi_reduction <add>, %20, %cst_9 [1] : vector<32x8x64xf32> to vector<32x64xf32>
    %22 = vector.extract_strided_slice %17 {offsets = [0, 0, 1], sizes = [32, 8, 1], strides = [1, 1, 1]} : vector<32x8x4xf32> to vector<32x8x1xf32>
    %23 = vector.broadcast %22 : vector<32x8x1xf32> to vector<32x8x64xf32>
    %24 = arith.mulf %23, %0 : vector<32x8x64xf32>
    %cst_10 = arith.constant dense<0.000000e+00> : vector<32x64xf32>
    %25 = vector.multi_reduction <add>, %24, %cst_10 [1] : vector<32x8x64xf32> to vector<32x64xf32>
    %26 = vector.extract_strided_slice %17 {offsets = [0, 0, 2], sizes = [32, 8, 1], strides = [1, 1, 1]} : vector<32x8x4xf32> to vector<32x8x1xf32>
    %27 = vector.broadcast %26 : vector<32x8x1xf32> to vector<32x8x64xf32>
    %28 = arith.mulf %27, %0 : vector<32x8x64xf32>
    %cst_11 = arith.constant dense<0.000000e+00> : vector<32x64xf32>
    %29 = vector.multi_reduction <add>, %28, %cst_11 [1] : vector<32x8x64xf32> to vector<32x64xf32>
    %30 = vector.extract_strided_slice %17 {offsets = [0, 0, 3], sizes = [32, 8, 1], strides = [1, 1, 1]} : vector<32x8x4xf32> to vector<32x8x1xf32>
    %31 = vector.broadcast %30 : vector<32x8x1xf32> to vector<32x8x64xf32>
    %32 = arith.mulf %31, %0 : vector<32x8x64xf32>
    %cst_12 = arith.constant dense<0.000000e+00> : vector<32x64xf32>
    %33 = vector.multi_reduction <add>, %32, %cst_12 [1] : vector<32x8x64xf32> to vector<32x64xf32>
    %34 = tpu.concatenate %21, %25, %29, %33 in 1 : vector<32x64xf32>, vector<32x64xf32>, vector<32x64xf32>, vector<32x64xf32> -> vector<32x256xf32>
    %c0_13 = arith.constant 0 : index
    %c0_14 = arith.constant 0 : index
    %35 = vector.load %arg4[%c0_13, %c0_14] : memref<256x256xf32, #tpu.memory_space<vmem>>, vector<256x256xf32>
    %cst_15 = arith.constant dense<0.000000e+00> : vector<32x256xf32>
    %36 = tpu.matmul %34, %35, %cst_15 {dimension_numbers = #tpu.dot_dimension_numbers<[1], [0], [0], [1], [0, 0, 1, 1], [], []>} : vector<32x256xf32>, vector<256x256xf32>, vector<32x256xf32> -> vector<32x256xf32>
    %c0_16 = arith.constant 0 : index
    %c0_17 = arith.constant 0 : index
    %37 = vector.load %arg5[%c0_16, %c0_17] : memref<1x256xf32, #tpu.memory_space<vmem>>, vector<1x256xf32>
    %38 = vector.broadcast %37 : vector<1x256xf32> to vector<32x256xf32>
    %39 = arith.addf %36, %38 : vector<32x256xf32>
    %cst_18 = arith.constant 0.000000e+00 : f32
    %40 = vector.broadcast %cst_18 : f32 to vector<32x256xf32>
    %41 = arith.maximumf %39, %40 : vector<32x256xf32>
    %c0_19 = arith.constant 0 : index
    %c0_20 = arith.constant 0 : index
    %42 = vector.load %arg6[%c0_19, %c0_20] : memref<256x128xf32, #tpu.memory_space<vmem>>, vector<256x128xf32>
    %cst_21 = arith.constant dense<0.000000e+00> : vector<32x128xf32>
    %43 = tpu.matmul %41, %42, %cst_21 {dimension_numbers = #tpu.dot_dimension_numbers<[1], [0], [0], [1], [0, 0, 1, 1], [], []>} : vector<32x256xf32>, vector<256x128xf32>, vector<32x128xf32> -> vector<32x128xf32>
    %c0_22 = arith.constant 0 : index
    %c0_23 = arith.constant 0 : index
    %44 = vector.load %arg7[%c0_22, %c0_23] : memref<1x128xf32, #tpu.memory_space<vmem>>, vector<1x128xf32>
    %45 = vector.broadcast %44 : vector<1x128xf32> to vector<32x128xf32>
    %46 = arith.addf %43, %45 : vector<32x128xf32>
    %c0_24 = arith.constant 0 : index
    %c0_25 = arith.constant 0 : index
    %47 = vector.load %arg8[%c0_24, %c0_25] : memref<32x128xf32, #tpu.memory_space<vmem>>, vector<32x128xf32>
    tpu.vector_store %arg8[%c0_24, %c0_25], %46 {strides = array<i32>} : memref<32x128xf32, #tpu.memory_space<vmem>>, vector<32x128xf32>,
    return
  }
  func.func @transform_0(%arg0: i32) -> (i32, i32, i32) {
    %c0_i32 = arith.constant 0 : i32
    %c0_i32_0 = arith.constant 0 : i32
    %c0_i32_1 = arith.constant 0 : i32
    return %arg0, %c0_i32, %c0_i32_0 : i32, i32, i32
  }
  func.func @transform_1(%arg0: i32) -> (i32, i32) {
    %c0_i32 = arith.constant 0 : i32
    %c0_i32_0 = arith.constant 0 : i32
    %c0_i32_1 = arith.constant 0 : i32
    return %c0_i32, %c0_i32_0 : i32, i32
  }
  func.func @transform_2(%arg0: i32) -> (i32, i32) {
    %c0_i32 = arith.constant 0 : i32
    %c0_i32_0 = arith.constant 0 : i32
    %c0_i32_1 = arith.constant 0 : i32
    return %c0_i32, %c0_i32_0 : i32, i32
  }
  func.func @transform_3(%arg0: i32) -> (i32, i32) {
    %c0_i32 = arith.constant 0 : i32
    %c0_i32_0 = arith.constant 0 : i32
    %c0_i32_1 = arith.constant 0 : i32
    return %c0_i32, %c0_i32_0 : i32, i32
  }
  func.func @transform_4(%arg0: i32) -> (i32, i32) {
    %c0_i32 = arith.constant 0 : i32
    %c0_i32_0 = arith.constant 0 : i32
    %c0_i32_1 = arith.constant 0 : i32
    return %c0_i32, %c0_i32_0 : i32, i32
  }
  func.func @transform_5(%arg0: i32) -> (i32, i32) {
    %c0_i32 = arith.constant 0 : i32
    %c0_i32_0 = arith.constant 0 : i32
    %c0_i32_1 = arith.constant 0 : i32
    return %c0_i32, %c0_i32_0 : i32, i32
  }
  func.func @transform_6(%arg0: i32) -> (i32, i32) {
    %c0_i32 = arith.constant 0 : i32
    %c0_i32_0 = arith.constant 0 : i32
    %c0_i32_1 = arith.constant 0 : i32
    return %c0_i32, %c0_i32_0 : i32, i32
  }
  func.func @transform_7(%arg0: i32) -> (i32, i32) {
    %c0_i32 = arith.constant 0 : i32
    %c0_i32_0 = arith.constant 0 : i32
    return %arg0, %c0_i32 : i32, i32
  }
}

module attributes {stable_mosaic.version = 11 : i64} {
  func.func @classification_kernel(%arg0: i32, %arg1: memref<32x8x64xf32, #tpu.memory_space<vmem>>, %arg2: memref<64x128xf32, #tpu.memory_space<vmem>>, %arg3: memref<128x4xf32, #tpu.memory_space<vmem>>, %arg4: memref<256x256xf32, #tpu.memory_space<vmem>>, %arg5: memref<1x256xf32, #tpu.memory_space<vmem>>, %arg6: memref<256x128xf32, #tpu.memory_space<vmem>>, %arg7: memref<1x128xf32, #tpu.memory_space<vmem>>, %arg8: memref<32x128xf32, #tpu.memory_space<vmem>>) attributes {dimension_semantics = [#tpu.dimension_semantics<parallel>], iteration_bounds = array<i64: 1>, scalar_prefetch = 0 : i64, scratch_operands = 0 : i64, tpu.core_type = #tpu.core_type<tc>, window_params = [{transform_indices = @transform_0, window_bounds = array<i64: 32, 8, 64>}, {pipeline_mode = #tpu.pipeline_mode<synchronous>, transform_indices = @transform_1, window_bounds = array<i64: 64, 128>}, {pipeline_mode = #tpu.pipeline_mode<synchronous>, transform_indices = @transform_2, window_bounds = array<i64: 128, 4>}, {pipeline_mode = #tpu.pipeline_mode<synchronous>, transform_indices = @transform_3, window_bounds = array<i64: 256, 256>}, {pipeline_mode = #tpu.pipeline_mode<synchronous>, transform_indices = @transform_4, window_bounds = array<i64: 1, 256>}, {pipeline_mode = #tpu.pipeline_mode<synchronous>, transform_indices = @transform_5, window_bounds = array<i64: 256, 128>}, {pipeline_mode = #tpu.pipeline_mode<synchronous>, transform_indices = @transform_6, window_bounds = array<i64: 1, 128>}, {transform_indices = @transform_7, window_bounds = array<i64: 32, 128>}]} {
    %c0 = arith.constant 0 : index
    %c0_0 = arith.constant 0 : index
    %c0_1 = arith.constant 0 : index
    %0 = vector.load %arg1[%c0, %c0_0, %c0_1] : memref<32x8x64xf32, #tpu.memory_space<vmem>>, vector<32x8x64xf32>
    %1 = vector.shape_cast %0 : vector<32x8x64xf32> to vector<256x64xf32>
    %c0_2 = arith.constant 0 : index
    %c0_3 = arith.constant 0 : index
    %2 = vector.load %arg2[%c0_2, %c0_3] : memref<64x128xf32, #tpu.memory_space<vmem>>, vector<64x128xf32>
    %cst = arith.constant dense<0.000000e+00> : vector<256x128xf32>
    %3 = tpu.matmul %1, %2, %cst {dimension_numbers = #tpu.dot_dimension_numbers<[1], [0], [0], [1], [0, 0, 1, 1], [], []>} : vector<256x64xf32>, vector<64x128xf32>, vector<256x128xf32> -> vector<256x128xf32>
    %4 = math.tanh %3 : vector<256x128xf32>
    %c0_4 = arith.constant 0 : index
    %c0_5 = arith.constant 0 : index
    %5 = vector.load %arg3[%c0_4, %c0_5] : memref<128x4xf32, #tpu.memory_space<vmem>>, vector<128x4xf32>
    %cst_6 = arith.constant dense<0.000000e+00> : vector<256x4xf32>
    %6 = tpu.matmul %4, %5, %cst_6 {dimension_numbers = #tpu.dot_dimension_numbers<[1], [0], [0], [1], [0, 0, 1, 1], [], []>} : vector<256x128xf32>, vector<128x4xf32>, vector<256x4xf32> -> vector<256x4xf32>
    %7 = vector.shape_cast %6 : vector<256x4xf32> to vector<32x8x4xf32>
    %cst_7 = arith.constant dense<0xFF800000> : vector<32x4xf32>
    %8 = vector.multi_reduction <maximumf>, %7, %cst_7 [1] : vector<32x8x4xf32> to vector<32x4xf32>
    %9 = vector.shape_cast %8 : vector<32x4xf32> to vector<32x1x4xf32>
    %10 = vector.broadcast %9 : vector<32x1x4xf32> to vector<32x8x4xf32>
    %11 = arith.subf %7, %10 : vector<32x8x4xf32>
    %12 = math.exp %11 : vector<32x8x4xf32>
    %cst_8 = arith.constant dense<0.000000e+00> : vector<32x4xf32>
    %13 = vector.multi_reduction <add>, %12, %cst_8 [1] : vector<32x8x4xf32> to vector<32x4xf32>
    %14 = vector.shape_cast %13 : vector<32x4xf32> to vector<32x1x4xf32>
    %15 = tpu.reciprocal %14 {approx = true} : vector<32x1x4xf32> -> vector<32x1x4xf32>
    %16 = vector.broadcast %15 : vector<32x1x4xf32> to vector<32x8x4xf32>
    %17 = arith.mulf %12, %16 : vector<32x8x4xf32>
    %18 = vector.extract_strided_slice %17 {offsets = [0, 0, 0], sizes = [32, 8, 1], strides = [1, 1, 1]} : vector<32x8x4xf32> to vector<32x8x1xf32>
    %19 = vector.broadcast %18 : vector<32x8x1xf32> to vector<32x8x64xf32>
    %20 = arith.mulf %19, %0 : vector<32x8x64xf32>
    %cst_9 = arith.constant dense<0.000000e+00> : vector<32x64xf32>
    %21 = vector.multi_reduction <add>, %20, %cst_9 [1] : vector<32x8x64xf32> to vector<32x64xf32>
    %22 = vector.extract_strided_slice %17 {offsets = [0, 0, 1], sizes = [32, 8, 1], strides = [1, 1, 1]} : vector<32x8x4xf32> to vector<32x8x1xf32>
    %23 = vector.broadcast %22 : vector<32x8x1xf32> to vector<32x8x64xf32>
    %24 = arith.mulf %23, %0 : vector<32x8x64xf32>
    %cst_10 = arith.constant dense<0.000000e+00> : vector<32x64xf32>
    %25 = vector.multi_reduction <add>, %24, %cst_10 [1] : vector<32x8x64xf32> to vector<32x64xf32>
    %26 = vector.extract_strided_slice %17 {offsets = [0, 0, 2], sizes = [32, 8, 1], strides = [1, 1, 1]} : vector<32x8x4xf32> to vector<32x8x1xf32>
    %27 = vector.broadcast %26 : vector<32x8x1xf32> to vector<32x8x64xf32>
    %28 = arith.mulf %27, %0 : vector<32x8x64xf32>
    %cst_11 = arith.constant dense<0.000000e+00> : vector<32x64xf32>
    %29 = vector.multi_reduction <add>, %28, %cst_11 [1] : vector<32x8x64xf32> to vector<32x64xf32>
    %30 = vector.extract_strided_slice %17 {offsets = [0, 0, 3], sizes = [32, 8, 1], strides = [1, 1, 1]} : vector<32x8x4xf32> to vector<32x8x1xf32>
    %31 = vector.broadcast %30 : vector<32x8x1xf32> to vector<32x8x64xf32>
    %32 = arith.mulf %31, %0 : vector<32x8x64xf32>
    %cst_12 = arith.constant dense<0.000000e+00> : vector<32x64xf32>
    %33 = vector.multi_reduction <add>, %32, %cst_12 [1] : vector<32x8x64xf32> to vector<32x64xf32>
    %34 = tpu.concatenate %21, %25, %29, %33 in 1 : vector<32x64xf32>, vector<32x64xf32>, vector<32x64xf32>, vector<32x64xf32> -> vector<32x256xf32>
    %c0_13 = arith.constant 0 : index
    %c0_14 = arith.constant 0 : index
    %35 = vector.load %arg4[%c0_13, %c0_14] : memref<256x256xf32, #tpu.memory_space<vmem>>, vector<256x256xf32>
    %cst_15 = arith.constant dense<0.000000e+00> : vector<32x256xf32>
    %36 = tpu.matmul %34, %35, %cst_15 {dimension_numbers = #tpu.dot_dimension_numbers<[1], [0], [0], [1], [0, 0, 1, 1], [], []>} : vector<32x256xf32>, vector<256x256xf32>, vector<32x256xf32> -> vector<32x256xf32>
    %c0_16 = arith.constant 0 : index
    %c0_17 = arith.constant 0 : index
    %37 = vector.load %arg5[%c0_16, %c0_17] : memref<1x256xf32, #tpu.memory_space<vmem>>, vector<1x256xf32>
    %38 = vector.broadcast %37 : vector<1x256xf32> to vector<32x256xf32>
    %39 = arith.addf %36, %38 : vector<32x256xf32>
    %cst_18 = arith.constant 0.000000e+00 : f32
    %40 = vector.broadcast %cst_18 : f32 to vector<32x256xf32>
    %41 = arith.maximumf %39, %40 : vector<32x256xf32>
    %c0_19 = arith.constant 0 : index
    %c0_20 = arith.constant 0 : index
    %42 = vector.load %arg6[%c0_19, %c0_20] : memref<256x128xf32, #tpu.memory_space<vmem>>, vector<256x128xf32>
    %cst_21 = arith.constant dense<0.000000e+00> : vector<32x128xf32>
    %43 = tpu.matmul %41, %42, %cst_21 {dimension_numbers = #tpu.dot_dimension_numbers<[1], [0], [0], [1], [0, 0, 1, 1], [], []>} : vector<32x256xf32>, vector<256x128xf32>, vector<32x128xf32> -> vector<32x128xf32>
    %c0_22 = arith.constant 0 : index
    %c0_23 = arith.constant 0 : index
    %44 = vector.load %arg7[%c0_22, %c0_23] : memref<1x128xf32, #tpu.memory_space<vmem>>, vector<1x128xf32>
    %45 = vector.broadcast %44 : vector<1x128xf32> to vector<32x128xf32>
    %46 = arith.addf %43, %45 : vector<32x128xf32>
    %c0_24 = arith.constant 0 : index
    %c0_25 = arith.constant 0 : index
    %47 = vector.load %arg8[%c0_24, %c0_25] : memref<32x128xf32, #tpu.memory_space<vmem>>, vector<32x128xf32>
    tpu.vector_store %arg8[%c0_24, %c0_25], %46 {strides = array<i32>} : memref<32x128xf32, #tpu.memory_space<vmem>>, vector<32x128xf32>,
    return
  }
  func.func @transform_0(%arg0: i32) -> (i32, i32, i32) {
    %c0_i32 = arith.constant 0 : i32
    %c0_i32_0 = arith.constant 0 : i32
    %c0_i32_1 = arith.constant 0 : i32
    return %arg0, %c0_i32, %c0_i32_0 : i32, i32, i32
  }
  func.func @transform_1(%arg0: i32) -> (i32, i32) {
    %c0_i32 = arith.constant 0 : i32
    %c0_i32_0 = arith.constant 0 : i32
    %c0_i32_1 = arith.constant 0 : i32
    return %c0_i32, %c0_i32_0 : i32, i32
  }
  func.func @transform_2(%arg0: i32) -> (i32, i32) {
    %c0_i32 = arith.constant 0 : i32
    %c0_i32_0 = arith.constant 0 : i32
    %c0_i32_1 = arith.constant 0 : i32
    return %c0_i32, %c0_i32_0 : i32, i32
  }
  func.func @transform_3(%arg0: i32) -> (i32, i32) {
    %c0_i32 = arith.constant 0 : i32
    %c0_i32_0 = arith.constant 0 : i32
    %c0_i32_1 = arith.constant 0 : i32
    return %c0_i32, %c0_i32_0 : i32, i32
  }
  func.func @transform_4(%arg0: i32) -> (i32, i32) {
    %c0_i32 = arith.constant 0 : i32
    %c0_i32_0 = arith.constant 0 : i32
    %c0_i32_1 = arith.constant 0 : i32
    return %c0_i32, %c0_i32_0 : i32, i32
  }
  func.func @transform_5(%arg0: i32) -> (i32, i32) {
    %c0_i32 = arith.constant 0 : i32
    %c0_i32_0 = arith.constant 0 : i32
    %c0_i32_1 = arith.constant 0 : i32
    return %c0_i32, %c0_i32_0 : i32, i32
  }
  func.func @transform_6(%arg0: i32) -> (i32, i32) {
    %c0_i32 = arith.constant 0 : i32
    %c0_i32_0 = arith.constant 0 : i32
    %c0_i32_1 = arith.constant 0 : i32
    return %c0_i32, %c0_i32_0 : i32, i32
  }
  func.func @transform_7(%arg0: i32) -> (i32, i32) {
    %c0_i32 = arith.constant 0 : i32
    %c0_i32_0 = arith.constant 0 : i32
    return %arg0, %c0_i32 : i32, i32
  }
}

</mosaic_0001>

<bundles_post_ra>
// kernel: tpu_custom_call.1
= control target key start
LH: loop header
LB: loop body
LE: loop exit
PB: predicated region body
PF: predicated region fallthrough
CT: control target
= control target key end

     0   :  { %12 = vsyncpa [#allocation3], 0  ;;  %s6036_s0 = inlined_call_operand.hbm [shape: f32[32,8,64], index: 0, kind: input, shape index: {}]   ;;  %s6037_s1 = inlined_call_operand.vmem [shape: f32[64,128], index: 1, kind: input, shape index: {}]   ;;  %s6038_s2 = inlined_call_operand.vmem [shape: f32[128,4], index: 2, kind: input, shape index: {}]   ;;  %s6039_s3 = inlined_call_operand.hbm [shape: f32[256,256], index: 3, kind: input, shape index: {}]   ;;  %s6040_s4 = inlined_call_operand.vmem [shape: f32[1,256], index: 4, kind: input, shape index: {}]   ;;  %s6041_s5 = inlined_call_operand.hbm [shape: f32[256,128], index: 5, kind: input, shape index: {}]   ;;  %s6042_s6 = inlined_call_operand.vmem [shape: f32[1,128], index: 6, kind: input, shape index: {}]   ;;  %s6043_s7 = inlined_call_operand.hbm [shape: f32[32,128], index: 7, kind: output, shape index: {}]  }
   0x1   :  { %13 = vsyncpa [#allocation6], 0 }
   0x2   :  { %14 = vsyncpa [#allocation4], 0  ;;  %s4396_s24 = smov [#allocation5]   ;;  %s4302_s28 = scalar_lea.hbm %s6039_s3, 8192 }
   0x3   :  { %s36_s25 = sshll.u32 %s4396_s24, 4  ;;  %p4303_p0 = scmp.ne.s32.totalorder %s6039_s3, %s4302_s28  ;;  %s37_s25 = int_to_ptr.vmem [resolvable:$true] %s36_s25 }
   0x4   :  { %p4306_p1 = scmp.lt.u32.totalorder %s4302_s28, %s6039_s3 }
   0x6   :  { %p4308_p2 = pnand %p4306_p1, %p4303_p0 }
   0x8   :  { %4311 = shalt.err (!%p4308_p2)
}
   0x9   :  { %s4312_s10 = scalar_lea.vmem %s37_s25, 8192  ;;  %p4317_p4 = scmp.lt.s32.totalorder %s37_s25, %s37_s25 }
   0xa   :  { %p4313_p3 = scmp.ne.s32.totalorder %s37_s25, %s4312_s10  ;;  %p4318_p5 = scmp.lt.s32.totalorder %s4312_s10, %s4312_s10 }
   0xc   :  { %p4319_p6 = por %p4318_p5, %p4317_p4 }
   0xe   :  { %p4320_p7 = pnand %p4319_p6, %p4313_p3 }
  0x10   :  { %4323 = shalt.err (!%p4320_p7)
}
  0x11   :  { %s4397_s11 = smov 256   ;;  %s4398_s12 = smov 16  }
  0x12   :  { %42 = dma.hbm_to_vmem [thread:$0]  %s6039_s3, 8192, %s37_s25, [#allocation6], %s4397_s11, %s4397_s11, %s4398_s12  }
  0x13   :  { %s4399_s15 = smov [#allocation2]   ;;  %s4324_s19 = scalar_lea.hbm %s6036_s0, 4096 }
  0x14   :  { %s20_s16 = sshll.u32 %s4399_s15, 4  ;;  %p4325_p8 = scmp.ne.s32.totalorder %s6036_s0, %s4324_s19  ;;  %s21_s16 = int_to_ptr.vmem [resolvable:$true] %s20_s16 }
  0x15   :  { %p4328_p9 = scmp.lt.u32.totalorder %s4324_s19, %s6036_s0 }
  0x17   :  { %p4330_p10 = pnand %p4328_p9, %p4325_p8 }
  0x19   :  { %4333 = shalt.err (!%p4330_p10)
}
  0x1a   :  { %s4334_s24 = scalar_lea.vmem %s21_s16, 4096  ;;  %p4339_p12 = scmp.lt.s32.totalorder %s21_s16, %s21_s16 }
  0x1b   :  { %p4335_p11 = scmp.ne.s32.totalorder %s21_s16, %s4334_s24  ;;  %p4340_p13 = scmp.lt.s32.totalorder %s4334_s24, %s4334_s24 }
  0x1d   :  { %p4341_p0 = por %p4340_p13, %p4339_p12 }
  0x1f   :  { %p4342_p1 = pnand %p4341_p0, %p4335_p11 }
  0x21   :  { %4345 = shalt.err (!%p4342_p1)
}
  0x22   :  { %s4400_s3 = smov 128   ;;  %s4401_s25 = smov 8  }
  0x23   :  { %26 = dma.hbm_to_vmem [thread:$0]  %s6036_s0, 4096, %s21_s16, [#allocation3], %s4400_s3, %s4400_s3, %s4401_s25  }
  0x24   :  { %s4402_s28 = smov [#allocation7]   ;;  %s4346_s9 = scalar_lea.hbm %s6041_s5, 4096 }
  0x25   :  { %s50_s29 = sshll.u32 %s4402_s28, 4  ;;  %p4347_p2 = scmp.ne.s32.totalorder %s6041_s5, %s4346_s9  ;;  %s51_s29 = int_to_ptr.vmem [resolvable:$true] %s50_s29 }
  0x26   :  { %p4350_p3 = scmp.lt.u32.totalorder %s4346_s9, %s6041_s5 }
  0x28   :  { %p4352_p4 = pnand %p4350_p3, %p4347_p2 }
  0x2a   :  { %4355 = shalt.err (!%p4352_p4)
}
  0x2b   :  { %s4356_s14 = scalar_lea.vmem %s51_s29, 4096  ;;  %p4361_p6 = scmp.lt.s32.totalorder %s51_s29, %s51_s29 }
  0x2c   :  { %p4357_p5 = scmp.ne.s32.totalorder %s51_s29, %s4356_s14  ;;  %p4362_p7 = scmp.lt.s32.totalorder %s4356_s14, %s4356_s14 }
  0x2e   :  { %p4363_p8 = por %p4362_p7, %p4361_p6 }
  0x30   :  { %p4364_p9 = pnand %p4363_p8, %p4357_p5 }
  0x32   :  { %4367 = shalt.err (!%p4364_p9)
}
  0x33   :  { %56 = dma.hbm_to_vmem [thread:$0]  %s6041_s5, 4096, %s51_s29, [#allocation6], %s4400_s3, %s4400_s3, %s4401_s25  }
  0x34   :  { %4390 = dma.done.wait [#allocation3], 4096  }
  0x35   :  { %4391 = vsyncadd [#allocation3], 4294963200 }
  0x36   :  { %4392 = dma.done.wait [#allocation6], 12288  }
  0x37   :  { %4393 = vsyncadd [#allocation6], 4294955008  ;;  %v100_v0 = vld [vmem:[%s6037_s1] sm:$0xff]  ;;  %v101_v1 = vld [vmem:[%s6037_s1 + $0x8] sm:$0xff]  ;;  %vm108_vm0 = vcmask 523264   ;;  %vm703_vm1 = vcmask 31744  }
  0x38   :  { %v102_v2 = vld [vmem:[%s6037_s1 + $0x10] sm:$0xff]  ;;  %v3795_v3 = vpack.c.bf16 %v101_v1, %v100_v0  ;;  %v103_v4 = vld [vmem:[%s6037_s1 + $0x18] sm:$0xff]  ;;  %v104_v6 = vld [vmem:[%s6037_s1 + $0x20] sm:$0xff]  ;;  %vm2912_vm2 = vcmask 1041409   ;;  %vm2914_vm3 = vcmask 1042434   ;;  %vm2916_vm4 = vcmask 1043459  }
  0x39   :  { %v3799_v5 = vpack.c.bf16 %v103_v4, %v102_v2  ;;  %v105_v7 = vld [vmem:[%s6037_s1 + $0x28] sm:$0xff]  ;;  %v68_v8 = vld [vmem:[#allocation2] sm:$0xff]  ;;  %v106_v10 = vld [vmem:[%s6037_s1 + $0x30] sm:$0xff]  ;;  %vm2918_vm5 = vcmask 1044484   ;;  %vm2920_vm6 = vcmask 1045509   ;;  %vm2922_vm7 = vcmask 1046534  }
  0x3a   :  { %3796 = vmatprep.subr.bf16.mxu0 %v3795_v3  ;;  %3667 = vmatprep.mubr.msk.f32.mxu0 %vm108_vm0, %v68_v8  ;;  %v3803_v9 = vpack.c.bf16 %v105_v7, %v104_v6  ;;  %v107_v11 = vld [vmem:[%s6037_s1 + $0x38] sm:$0xff]  ;;  %v462_v13 = vld [vmem:[%s6038_s2] sm:$0xff]  ;;  %v463_v14 = vld [vmem:[%s6038_s2 + $0x8] sm:$0xff]  ;;  %vm2924_vm8 = vcmask 1047559   ;;  %s4408_s17 = smov [#allocation8]  }
  0x3b   :  { %3798 = vmatpush3.bf16.msra.mxu0 %v3795_v3  ;;  %v3807_v12 = vpack.c.bf16 %v107_v11, %v106_v10  ;;  %v3811_v15 = vpack.c.bf16 %v463_v14, %v462_v13  ;;  %v464_v16 = vld [vmem:[%s6038_s2 + $0x10] sm:$0xff]  ;;  %v465_v17 = vld [vmem:[%s6038_s2 + $0x18] sm:$0xff]  ;;  %v466_v19 = vld [vmem:[%s6038_s2 + $0x20] sm:$0xff]  ;;  %s3473_s18 = sshll.u32 %s4408_s17, 4  ;;  %s3474_s18 = int_to_ptr.vmem [resolvable:$true] %s3473_s18 }
  0x3c   :  { %3800 = vmatprep.subr.bf16.mxu0 %v3799_v5  ;;  %v3815_v18 = vpack.c.bf16 %v465_v17, %v464_v16  ;;  %v467_v20 = vld [vmem:[%s6038_s2 + $0x28] sm:$0xff]  ;;  %v70_v22 = vld [vmem:[#allocation2 + $0x10] sm:$0xff]  ;;  %v469_v25 = vld [vmem:[%s6038_s2 + $0x38] sm:$0xff]  ;;  %p4373_p11 = scmp.lt.s32.totalorder %s3474_s18, %s3474_s18 }
  0x3d   :  { %v69_v21 = vld [vmem:[#allocation2 + $0x8] sm:$0xff]  ;;  %3812 = vmatprep.subr.bf16.mxu1 %v3811_v15  ;;  %v3819_v23 = vpack.c.bf16 %v467_v20, %v466_v19  ;;  %v468_v24 = vld [vmem:[%s6038_s2 + $0x30] sm:$0xff]  ;;  %v71_v26 = vld [vmem:[#allocation2 + $0x18] sm:$0xff] }
  0x3e   :  { %3814 = vmatpush3.bf16.msra.mxu1 %v3811_v15  ;;  %v72_v27 = vld [vmem:[#allocation2 + $0x20] sm:$0xff]  ;;  %v3823_v28 = vpack.c.bf16 %v469_v25, %v468_v24  ;;  %v471_v30 = vld [vmem:[%s6038_s2 + $0x48] sm:$0xff]  ;;  %v74_v32 = vld [vmem:[#allocation2 + $0x30] sm:$0xff] }
  0x3f   :  { %3802 = vmatpush3.bf16.msra.mxu0 %v3799_v5  ;;  %3816 = vmatprep.subr.bf16.mxu1 %v3815_v18  ;;  %v470_v29 = vld [vmem:[%s6038_s2 + $0x40] sm:$0xff]  ;;  %v73_v31 = vld [vmem:[#allocation2 + $0x28] sm:$0xff]  ;;  %v75_v34 = vld [vmem:[#allocation2 + $0x38] sm:$0xff] }
  0x40   :  { %3804 = vmatprep.subr.bf16.mxu0 %v3803_v9  ;;  %v3827_v33 = vpack.c.bf16 %v471_v30, %v470_v29  ;;  %v76_v35 = vld [vmem:[#allocation2 + $0x40] sm:$0xff]  ;;  %v77_v36 = vld [vmem:[#allocation2 + $0x48] sm:$0xff]  ;;  %v78_v37 = vld [vmem:[#allocation2 + $0x50] sm:$0xff] }
  0x41   :  { %v79_v38 = vld [vmem:[#allocation2 + $0x58] sm:$0xff]  ;;  %v80_v39 = vld [vmem:[#allocation2 + $0x60] sm:$0xff]  ;;  %v81_v40 = vld [vmem:[#allocation2 + $0x68] sm:$0xff] }
  0x42   :  { %3818 = vmatpush3.bf16.msra.mxu1 %v3815_v18  ;;  %v82_v41 = vld [vmem:[#allocation2 + $0x70] sm:$0xff]  ;;  %v83_v42 = vld [vmem:[#allocation2 + $0x78] sm:$0xff]  ;;  %v84_v43 = vld [vmem:[#allocation2 + $0x80] sm:$0xff] }
  0x43   :  { %3806 = vmatpush3.bf16.msra.mxu0 %v3803_v9  ;;  %3820 = vmatprep.subr.bf16.mxu1 %v3819_v23  ;;  %v85_v44 = vld [vmem:[#allocation2 + $0x88] sm:$0xff]  ;;  %v86_v45 = vld [vmem:[#allocation2 + $0x90] sm:$0xff]  ;;  %v87_v46 = vld [vmem:[#allocation2 + $0x98] sm:$0xff] }
  0x44   :  { %3808 = vmatprep.subr.bf16.mxu0 %v3807_v12  ;;  %v88_v47 = vld [vmem:[#allocation2 + $0xa0] sm:$0xff]  ;;  %v89_v48 = vld [vmem:[#allocation2 + $0xa8] sm:$0xff]  ;;  %v90_v49 = vld [vmem:[#allocation2 + $0xb0] sm:$0xff] }
  0x45   :  { %v91_v50 = vld [vmem:[#allocation2 + $0xb8] sm:$0xff]  ;;  %v92_v51 = vld [vmem:[#allocation2 + $0xc0] sm:$0xff]  ;;  %v93_v52 = vld [vmem:[#allocation2 + $0xc8] sm:$0xff] }
  0x46   :  { %3822 = vmatpush3.bf16.msra.mxu1 %v3819_v23  ;;  %v94_v53 = vld [vmem:[#allocation2 + $0xd0] sm:$0xff]  ;;  %v95_v54 = vld [vmem:[#allocation2 + $0xd8] sm:$0xff]  ;;  %v96_v55 = vld [vmem:[#allocation2 + $0xe0] sm:$0xff] }
  0x47   :  { %3810 = vmatpush3.bf16.msra.mxu0 %v3807_v12  ;;  %3824 = vmatprep.subr.bf16.mxu1 %v3823_v28  ;;  %v97_v56 = vld [vmem:[#allocation2 + $0xe8] sm:$0xff]  ;;  %v98_v57 = vld [vmem:[#allocation2 + $0xf0] sm:$0xff]  ;;  %v99_v58 = vld [vmem:[#allocation2 + $0xf8] sm:$0xff] }
  0x48   :  { %v472_v59 = vld [vmem:[%s6038_s2 + $0x50] sm:$0xff]  ;;  %v473_v60 = vld [vmem:[%s6038_s2 + $0x58] sm:$0xff]  ;;  %v474_v62 = vld [vmem:[%s6038_s2 + $0x60] sm:$0xff] }
  0x49   :  { %v3831_v61 = vpack.c.bf16 %v473_v60, %v472_v59  ;;  %v475_v63 = vld [vmem:[%s6038_s2 + $0x68] sm:$0xff]  ;;  %v476_v1 = vld [vmem:[%s6038_s2 + $0x70] sm:$0xff]  ;;  %v477_v2 = vld [vmem:[%s6038_s2 + $0x78] sm:$0xff]  ;;  %s4407_s2 = smov 64  }
  0x4a   :  { %3668 = vmatmul.mubr.msk.f32.vlgmr.msra.gmra.mrb[0].mxu0 %vm108_vm0, %v69_v21  ;;  %3826 = vmatpush3.bf16.msra.mxu1 %v3823_v28  ;;  %v3835_v0 = vpack.c.bf16 %v475_v63, %v474_v62  ;;  %v3839_v3 = vpack.c.bf16 %v477_v2, %v476_v1 }
  0x4b   :  { %3670 = vmatprep.mubr.msk.f32.mxu0 %vm108_vm0, %v70_v22  ;;  %3828 = vmatprep.subr.bf16.mxu1 %v3827_v33 }
  0x4e   :  { %3671 = vmatmul.mubr.msk.f32.gmra.mrb[2].mxu0 %vm108_vm0, %v71_v26  ;;  %3830 = vmatpush3.bf16.msra.mxu1 %v3827_v33 }
  0x4f   :  { %3673 = vmatprep.mubr.msk.f32.mxu0 %vm108_vm0, %v72_v27  ;;  %3832 = vmatprep.subr.bf16.mxu1 %v3831_v61 }
  0x52   :  { %3674 = vmatmul.mubr.msk.f32.gmra.mrb[4].mxu0 %vm108_vm0, %v73_v31  ;;  %3834 = vmatpush3.bf16.msra.mxu1 %v3831_v61 }
  0x53   :  { %3676 = vmatprep.mubr.msk.f32.mxu0 %vm108_vm0, %v74_v32  ;;  %3836 = vmatprep.subr.bf16.mxu1 %v3835_v0 }
  0x56   :  { %3677 = vmatmul.mubr.msk.f32.gmra.mrb[6].mxu0 %vm108_vm0, %v75_v34  ;;  %3838 = vmatpush3.bf16.msra.mxu1 %v3835_v0 }
  0x57   :  { %3679 = vmatprep.mubr.msk.f32.mxu0 %vm108_vm0, %v76_v35  ;;  %3840 = vmatprep.subr.bf16.mxu1 %v3839_v3 }
  0x5a   :  { %3680 = vmatmul.mubr.msk.f32.gmra.mrb[8].mxu0 %vm108_vm0, %v77_v36  ;;  %3842 = vmatpush3.bf16.msra.mxu1 %v3839_v3 }
  0x5b   :  { %3682 = vmatprep.mubr.msk.f32.mxu0 %vm108_vm0, %v78_v37 }
  0x5e   :  { %3683 = vmatmul.mubr.msk.f32.gmra.mrb[10].mxu0 %vm108_vm0, %v79_v38 }
  0x5f   :  { %3685 = vmatprep.mubr.msk.f32.mxu0 %vm108_vm0, %v80_v39 }
  0x62   :  { %3686 = vmatmul.mubr.msk.f32.gmra.mrb[12].mxu0 %vm108_vm0, %v81_v40 }
  0x63   :  { %3688 = vmatprep.mubr.msk.f32.mxu0 %vm108_vm0, %v82_v41 }
  0x66   :  { %3689 = vmatmul.mubr.msk.f32.gmra.mrb[14].mxu0 %vm108_vm0, %v83_v42 }
  0x67   :  { %3691 = vmatprep.mubr.msk.f32.mxu0 %vm108_vm0, %v84_v43 }
  0x6a   :  { %3692 = vmatmul.mubr.msk.f32.gmra.mrb[16].mxu0 %vm108_vm0, %v85_v44 }
  0x6b   :  { %3694 = vmatprep.mubr.msk.f32.mxu0 %vm108_vm0, %v86_v45 }
  0x6e   :  { %3695 = vmatmul.mubr.msk.f32.gmra.mrb[18].mxu0 %vm108_vm0, %v87_v46 }
  0x6f   :  { %3697 = vmatprep.mubr.msk.f32.mxu0 %vm108_vm0, %v88_v47 }
  0x72   :  { %3698 = vmatmul.mubr.msk.f32.gmra.mrb[20].mxu0 %vm108_vm0, %v89_v48 }
  0x73   :  { %3700 = vmatprep.mubr.msk.f32.mxu0 %vm108_vm0, %v90_v49 }
  0x76   :  { %3701 = vmatmul.mubr.msk.f32.gmra.mrb[22].mxu0 %vm108_vm0, %v91_v50 }
  0x77   :  { %3703 = vmatprep.mubr.msk.f32.mxu0 %vm108_vm0, %v92_v51 }
  0x7a   :  { %3704 = vmatmul.mubr.msk.f32.gmra.mrb[24].mxu0 %vm108_vm0, %v93_v52 }
  0x7b   :  { %3706 = vmatprep.mubr.msk.f32.mxu0 %vm108_vm0, %v94_v53 }
  0x7e   :  { %3707 = vmatmul.mubr.msk.f32.gmra.mrb[26].mxu0 %vm108_vm0, %v95_v54 }
  0x7f   :  { %3709 = vmatprep.mubr.msk.f32.mxu0 %vm108_vm0, %v96_v55 }
  0x82   :  { %3710 = vmatmul.mubr.msk.f32.gmra.mrb[28].mxu0 %vm108_vm0, %v97_v56 }
  0x83   :  { %3712 = vmatprep.mubr.msk.f32.mxu0 %vm108_vm0, %v98_v57 }
  0x86   :  { %3713 = vmatmul.mubr.msk.f32.gmra.mrb[30].mxu0 %vm108_vm0, %v99_v58 }
 0x11d   :  { %v3669_v4 = vpop.f32.mrb[0].mxu0 }
 0x11e   :  { %v271_v5 = vpop.f32.mrb[1].mxu0 }
 0x11f   :  { %4063 = vtanh.f32 %v271_v5  ;;  %v6046_v5 = vmov 1  }
 0x120   :  { %4065 = vtanh.f32 %v3669_v4  ;;  %v6048_v4 = vmov 3   ;;  %3953 = vset.pattern.permute.xlu1 %v6046_v5 }
 0x121   :  { %v3672_v6 = vpop.f32.mrb[2].mxu0  ;;  %3952 = vset.pattern.permute.xlu0 %v6048_v4 }
 0x122   :  { %4067 = vtanh.f32 %v3672_v6  ;;  %v281_v7 = vpop.f32.mrb[3].mxu0 }
 0x123   :  { %4069 = vtanh.f32 %v281_v7 }
 0x125   :  { %v3675_v8 = vpop.f32.mrb[4].mxu0 }
 0x126   :  { %4071 = vtanh.f32 %v3675_v8  ;;  %v291_v9 = vpop.f32.mrb[5].mxu0 }
 0x127   :  { %4073 = vtanh.f32 %v291_v9 }
 0x129   :  { %v4064_v10 = vpop.eup %4063  ;;  %v3678_v11 = vpop.f32.mrb[6].mxu0 }
 0x12a   :  { %v4066_v12 = vpop.eup %4065  ;;  %3747 = vmatprep.mubr.f32.mxu1 %v4064_v10  ;;  %4075 = vtanh.f32 %v3678_v11  ;;  %v301_v13 = vpop.f32.mrb[7].mxu0 }
 0x12b   :  { %3748 = vmatmul.mubr.f32.vlgmr.msra.gmra.mrb[0].mxu1 %v4066_v12  ;;  %4077 = vtanh.f32 %v301_v13 }
 0x12c   :  { %v4068_v14 = vpop.eup %4067 }
 0x12d   :  { %v4070_v15 = vpop.eup %4069  ;;  %v3681_v16 = vpop.f32.mrb[8].mxu0 }
 0x12e   :  { %3750 = vmatprep.mubr.f32.mxu1 %v4070_v15  ;;  %4079 = vtanh.f32 %v3681_v16  ;;  %v311_v17 = vpop.f32.mrb[9].mxu0 }
 0x12f   :  { %3751 = vmatmul.mubr.f32.gmra.mrb[2].mxu1 %v4068_v14  ;;  %4081 = vtanh.f32 %v311_v17 }
 0x130   :  { %v4072_v18 = vpop.eup %4071 }
 0x131   :  { %v4074_v19 = vpop.eup %4073  ;;  %v3684_v20 = vpop.f32.mrb[10].mxu0 }
 0x132   :  { %3753 = vmatprep.mubr.f32.mxu1 %v4074_v19  ;;  %4083 = vtanh.f32 %v3684_v20  ;;  %v321_v21 = vpop.f32.mrb[11].mxu0 }
 0x133   :  { %3754 = vmatmul.mubr.f32.gmra.mrb[4].mxu1 %v4072_v18  ;;  %4085 = vtanh.f32 %v321_v21 }
 0x134   :  { %v4076_v22 = vpop.eup %4075 }
 0x135   :  { %v4078_v23 = vpop.eup %4077  ;;  %v3687_v24 = vpop.f32.mrb[12].mxu0 }
 0x136   :  { %3756 = vmatprep.mubr.f32.mxu1 %v4078_v23  ;;  %4087 = vtanh.f32 %v3687_v24  ;;  %v331_v25 = vpop.f32.mrb[13].mxu0 }
 0x137   :  { %3757 = vmatmul.mubr.f32.gmra.mrb[6].mxu1 %v4076_v22  ;;  %4089 = vtanh.f32 %v331_v25 }
 0x138   :  { %v4080_v26 = vpop.eup %4079 }
 0x139   :  { %v4082_v27 = vpop.eup %4081  ;;  %v3690_v28 = vpop.f32.mrb[14].mxu0 }
 0x13a   :  { %3759 = vmatprep.mubr.f32.mxu1 %v4082_v27  ;;  %4091 = vtanh.f32 %v3690_v28  ;;  %v341_v29 = vpop.f32.mrb[15].mxu0 }
 0x13b   :  { %3760 = vmatmul.mubr.f32.gmra.mrb[8].mxu1 %v4080_v26  ;;  %4093 = vtanh.f32 %v341_v29 }
 0x13c   :  { %v4084_v30 = vpop.eup %4083 }
 0x13d   :  { %v4086_v31 = vpop.eup %4085  ;;  %v3693_v32 = vpop.f32.mrb[16].mxu0 }
 0x13e   :  { %3762 = vmatprep.mubr.f32.mxu1 %v4086_v31  ;;  %4095 = vtanh.f32 %v3693_v32  ;;  %v351_v33 = vpop.f32.mrb[17].mxu0 }
 0x13f   :  { %3763 = vmatmul.mubr.f32.gmra.mrb[10].mxu1 %v4084_v30  ;;  %4097 = vtanh.f32 %v351_v33 }
 0x140   :  { %v4088_v34 = vpop.eup %4087 }
 0x141   :  { %v4090_v35 = vpop.eup %4089  ;;  %v3696_v36 = vpop.f32.mrb[18].mxu0 }
 0x142   :  { %3765 = vmatprep.mubr.f32.mxu1 %v4090_v35  ;;  %4099 = vtanh.f32 %v3696_v36  ;;  %v361_v37 = vpop.f32.mrb[19].mxu0 }
 0x143   :  { %3766 = vmatmul.mubr.f32.gmra.mrb[12].mxu1 %v4088_v34  ;;  %4101 = vtanh.f32 %v361_v37 }
 0x144   :  { %v4092_v38 = vpop.eup %4091 }
 0x145   :  { %v4094_v39 = vpop.eup %4093  ;;  %v3699_v40 = vpop.f32.mrb[20].mxu0 }
 0x146   :  { %3768 = vmatprep.mubr.f32.mxu1 %v4094_v39  ;;  %4103 = vtanh.f32 %v3699_v40  ;;  %v371_v41 = vpop.f32.mrb[21].mxu0 }
 0x147   :  { %3769 = vmatmul.mubr.f32.gmra.mrb[14].mxu1 %v4092_v38  ;;  %4105 = vtanh.f32 %v371_v41 }
 0x148   :  { %v4096_v42 = vpop.eup %4095 }
 0x149   :  { %v4098_v43 = vpop.eup %4097  ;;  %v3702_v44 = vpop.f32.mrb[22].mxu0 }
 0x14a   :  { %3771 = vmatprep.mubr.f32.mxu1 %v4098_v43  ;;  %4107 = vtanh.f32 %v3702_v44  ;;  %v381_v45 = vpop.f32.mrb[23].mxu0 }
 0x14b   :  { %3772 = vmatmul.mubr.f32.gmra.mrb[16].mxu1 %v4096_v42  ;;  %4109 = vtanh.f32 %v381_v45 }
 0x14c   :  { %v4100_v46 = vpop.eup %4099 }
 0x14d   :  { %v4102_v47 = vpop.eup %4101  ;;  %v3705_v48 = vpop.f32.mrb[24].mxu0 }
 0x14e   :  { %3774 = vmatprep.mubr.f32.mxu1 %v4102_v47  ;;  %4111 = vtanh.f32 %v3705_v48  ;;  %v391_v49 = vpop.f32.mrb[25].mxu0 }
 0x14f   :  { %3775 = vmatmul.mubr.f32.gmra.mrb[18].mxu1 %v4100_v46  ;;  %4113 = vtanh.f32 %v391_v49 }
 0x150   :  { %v4104_v50 = vpop.eup %4103 }
 0x151   :  { %v4106_v51 = vpop.eup %4105  ;;  %v3708_v52 = vpop.f32.mrb[26].mxu0 }
 0x152   :  { %4115 = vtanh.f32 %v3708_v52  ;;  %v401_v53 = vpop.f32.mrb[27].mxu0  ;;  %3777 = vmatprep.mubr.f32.mxu1 %v4106_v51 }
 0x153   :  { %4117 = vtanh.f32 %v401_v53  ;;  %3778 = vmatmul.mubr.f32.gmra.mrb[20].mxu1 %v4104_v50 }
 0x154   :  { %v4108_v54 = vpop.eup %4107 }
 0x155   :  { %v4110_v55 = vpop.eup %4109  ;;  %v3711_v56 = vpop.f32.mrb[28].mxu0 }
 0x156   :  { %3780 = vmatprep.mubr.f32.mxu1 %v4110_v55  ;;  %4119 = vtanh.f32 %v3711_v56  ;;  %v411_v57 = vpop.f32.mrb[29].mxu0 }
 0x157   :  { %3781 = vmatmul.mubr.f32.gmra.mrb[22].mxu1 %v4108_v54  ;;  %4121 = vtanh.f32 %v411_v57 }
 0x158   :  { %v4112_v58 = vpop.eup %4111 }
 0x159   :  { %v4114_v59 = vpop.eup %4113  ;;  %v3714_v60 = vpop.f32.mrb[30].mxu0 }
 0x15a   :  { %3783 = vmatprep.mubr.f32.mxu1 %v4114_v59  ;;  %4123 = vtanh.f32 %v3714_v60  ;;  %v421_v61 = vpop.f32.mrb[31].mxu0 }
 0x15b   :  { %3784 = vmatmul.mubr.f32.gmra.mrb[24].mxu1 %v4112_v58  ;;  %4125 = vtanh.f32 %v421_v61 }
 0x15c   :  { %v4116_v62 = vpop.eup %4115 }
 0x15d   :  { %v4118_v63 = vpop.eup %4117 }
 0x15e   :  { %3786 = vmatprep.mubr.f32.mxu1 %v4118_v63 }
 0x15f   :  { %3787 = vmatmul.mubr.f32.gmra.mrb[26].mxu1 %v4116_v62 }
 0x160   :  { %v4120_v0 = vpop.eup %4119 }
 0x161   :  { %v4122_v1 = vpop.eup %4121 }
 0x162   :  { %3789 = vmatprep.mubr.f32.mxu1 %v4122_v1 }
 0x163   :  { %3790 = vmatmul.mubr.f32.gmra.mrb[28].mxu1 %v4120_v0 }
 0x164   :  { %v4124_v2 = vpop.eup %4123 }
 0x165   :  { %v4126_v3 = vpop.eup %4125 }
 0x166   :  { %3792 = vmatprep.mubr.f32.mxu1 %v4126_v3 }
 0x167   :  { %3793 = vmatmul.mubr.f32.gmra.mrb[30].mxu1 %v4124_v2 }
 0x1fe   :  { %v3749_v6 = vpop.f32.mrb[0].mxu1 }
 0x1ff   :  { %v711_v7 = vsel %vm703_vm1, %v3749_v6, -inf  ;;  %v544_v8 = vpop.f32.mrb[1].mxu1 }
 0x200   :  { %v712_v9 = vrot.slane %v711_v7, 4  ;;  %v704_v10 = vsel %vm703_vm1, %v544_v8, -inf }
 0x201   :  { %v705_v11 = vrot.slane %v704_v10, 4 }
 0x202   :  { %v713_v12 = vmax.f32 %v711_v7, %v712_v9  ;;  %v3752_v13 = vpop.f32.mrb[2].mxu1 }
 0x203   :  { %v706_v14 = vmax.f32 %v704_v10, %v705_v11  ;;  %v725_v15 = vsel %vm703_vm1, %v3752_v13, -inf  ;;  %v554_v16 = vpop.f32.mrb[3].mxu1 }
 0x204   :  { %v714_v17 = vrot.slane %v713_v12, 2  ;;  %v726_v18 = vrot.slane %v725_v15, 4  ;;  %v718_v19 = vsel %vm703_vm1, %v554_v16, -inf }
 0x205   :  { %v707_v20 = vrot.slane %v706_v14, 2  ;;  %v719_v21 = vrot.slane %v718_v19, 4 }
 0x206   :  { %v715_v22 = vmax.f32 %v713_v12, %v714_v17  ;;  %v727_v23 = vmax.f32 %v725_v15, %v726_v18  ;;  %v3755_v24 = vpop.f32.mrb[4].mxu1 }
 0x207   :  { %v708_v25 = vmax.f32 %v706_v14, %v707_v20  ;;  %v720_v26 = vmax.f32 %v718_v19, %v719_v21  ;;  %v739_v27 = vsel %vm703_vm1, %v3755_v24, -inf  ;;  %v4602_v28 = vpop.f32.mrb[5].mxu1 }
 0x208   :  { %v716_v29 = vrot.slane %v715_v22, 1  ;;  %v728_v30 = vrot.slane %v727_v23, 2  ;;  %v740_v31 = vrot.slane %v739_v27, 4  ;;  %v732_v32 = vsel %vm703_vm1, %v4602_v28, -inf }
 0x209   :  { %v709_v33 = vrot.slane %v708_v25, 1  ;;  %v721_v34 = vrot.slane %v720_v26, 2  ;;  %v733_v41 = vrot.slane %v732_v32, 4 }
 0x20a   :  { %v717_v35 = vmax.f32 %v715_v22, %v716_v29  ;;  %v729_v36 = vmax.f32 %v727_v23, %v728_v30  ;;  %v741_v37 = vmax.f32 %v739_v27, %v740_v31  ;;  %v4606_v38 = vpop.f32.mrb[6].mxu1 }
 0x20b   :  { %v710_v39 = vmax.f32 %v708_v25, %v709_v33  ;;  %v722_v40 = vmax.f32 %v720_v26, %v721_v34  ;;  %v4608_v42 = vpop.f32.mrb[7].mxu1  ;;  %v734_v54 = vmax.f32 %v732_v32, %v733_v41  ;;  %v753_v59 = vsel %vm703_vm1, %v4606_v38, -inf }
 0x20c   :  { %v929_v43 = vsub.f32 %v3749_v6, %v717_v35  ;;  %v730_v44 = vrot.slane %v729_v36, 1  ;;  %v742_v45 = vrot.slane %v741_v37, 2  ;;  %v754_v2 = vrot.slane %v753_v59, 4 }
 0x20d   :  { %v928_v46 = vsub.f32 %v544_v8, %v710_v39  ;;  %v723_v47 = vrot.slane %v722_v40, 1  ;;  %v735_v63 = vrot.slane %v734_v54, 2  ;;  %v746_v15 = vsel %vm703_vm1, %v4608_v42, -inf }
 0x20e   :  { %v962_v48 = vmul.f32 1.442695, %v929_v43  ;;  %v731_v49 = vmax.f32 %v729_v36, %v730_v44  ;;  %v743_v50 = vmax.f32 %v741_v37, %v742_v45  ;;  %v4610_v51 = vpop.f32.mrb[8].mxu1  ;;  %v755_v9 = vmax.f32 %v753_v59, %v754_v2 }
 0x20f   :  { %v960_v52 = vmul.f32 1.442695, %v928_v46  ;;  %v724_v53 = vmax.f32 %v722_v40, %v723_v47  ;;  %v4612_v55 = vpop.f32.mrb[9].mxu1  ;;  %v736_v6 = vmax.f32 %v734_v54, %v735_v63  ;;  %v747_v31 = vrot.slane %v746_v15, 4 }
 0x210   :  { %4127 = vpow2.f32 %v962_v48  ;;  %v931_v56 = vsub.f32 %v3752_v13, %v731_v49  ;;  %v744_v57 = vrot.slane %v743_v50, 1  ;;  %v756_v21 = vrot.slane %v755_v9, 2 }
 0x211   :  { %4129 = vpow2.f32 %v960_v52  ;;  %v930_v58 = vsub.f32 %v554_v16, %v724_v53  ;;  %v737_v14 = vrot.slane %v736_v6, 1  ;;  %v767_v16 = vsel %vm703_vm1, %v4610_v51, -inf }
 0x212   :  { %v966_v60 = vmul.f32 1.442695, %v931_v56  ;;  %v4616_v61 = vpop.f32.mrb[10].mxu1  ;;  %v745_v1 = vmax.f32 %v743_v50, %v744_v57  ;;  %v768_v25 = vrot.slane %v767_v16, 4  ;;  %v757_v35 = vmax.f32 %v755_v9, %v756_v21 }
 0x213   :  { %v964_v62 = vmul.f32 1.442695, %v930_v58  ;;  %v4618_v0 = vpop.f32.mrb[11].mxu1  ;;  %v738_v30 = vmax.f32 %v736_v6, %v737_v14  ;;  %v748_v49 = vmax.f32 %v746_v15, %v747_v31 }
 0x214   :  { %4131 = vpow2.f32 %v966_v60  ;;  %v933_v8 = vsub.f32 %v3755_v24, %v745_v1  ;;  %v769_v41 = vmax.f32 %v767_v16, %v768_v25  ;;  %v758_v48 = vrot.slane %v757_v35, 1 }
 0x215   :  { %4133 = vpow2.f32 %v964_v62  ;;  %v932_v44 = vsub.f32 %v4602_v28, %v738_v30  ;;  %v774_v56 = vsel %vm703_vm1, %v4618_v0, -inf  ;;  %v749_v62 = vrot.slane %v748_v49, 2 }
 0x216   :  { %v4620_v3 = vpop.f32.mrb[12].mxu1  ;;  %v970_v20 = vmul.f32 1.442695, %v933_v8  ;;  %v770_v54 = vrot.slane %v769_v41, 2  ;;  %v759_v60 = vmax.f32 %v757_v35, %v758_v48  ;;  %v775_v2 = vrot.slane %v774_v56, 4 }
 0x217   :  { %v4622_v7 = vpop.f32.mrb[13].mxu1  ;;  %v968_v59 = vmul.f32 1.442695, %v932_v44  ;;  %v750_v16 = vmax.f32 %v748_v49, %v749_v62 }
 0x218   :  { %4135 = vpow2.f32 %v970_v20  ;;  %v771_v8 = vmax.f32 %v769_v41, %v770_v54  ;;  %v935_v15 = vsub.f32 %v4606_v38, %v759_v60  ;;  %v776_v21 = vmax.f32 %v774_v56, %v775_v2 }
 0x219   :  { %v751_v31 = vrot.slane %v750_v16, 1  ;;  %v6044_v2 = vmov 0  }
 0x21a   :  { %v4624_v10 = vpop.eup %4127  ;;  %v4626_v11 = vpop.f32.mrb[14].mxu1  ;;  %v974_v30 = vmul.f32 1.442695, %v935_v15 }
 0x21b   :  { %v4628_v12 = vpop.eup %4129  ;;  %v1031_v13 = vsel %vm703_vm1, %v4624_v10, 0.0  ;;  %v4636_v17 = vpop.f32.mrb[15].mxu1  ;;  %v809_v35 = vsel %vm703_vm1, %v4626_v11, -inf }
 0x21c   :  { %v1032_v18 = vrot.slane %v1031_v13, 4  ;;  %v1024_v19 = vsel %vm703_vm1, %v4628_v12, 0.0 }
 0x21d   :  { %v1025_v22 = vrot.slane %v1024_v19, 4 }
 0x21e   :  { %v4640_v23 = vpop.eup %4131  ;;  %v1033_v24 = vadd.f32 %v1032_v18, %v1031_v13  ;;  %v4642_v26 = vpop.f32.mrb[16].mxu1 }
 0x21f   :  { %v1026_v27 = vadd.f32 %v1025_v22, %v1024_v19  ;;  %v1045_v29 = vsel %vm703_vm1, %v4640_v23, 0.0  ;;  %v4646_v32 = vpop.f32.mrb[17].mxu1  ;;  %v4648_v36 = vpop.eup %4133  ;;  %v772_v22 = vrot.slane %v771_v8, 1 }
 0x220   :  { %v1034_v33 = vrot.slane %v1033_v24, 2  ;;  %v1046_v34 = vrot.slane %v1045_v29, 4  ;;  %v1038_v47 = vsel %vm703_vm1, %v4648_v36, 0.0 }
 0x221   :  { %v1027_v37 = vrot.slane %v1026_v27, 2  ;;  %v1039_v58 = vrot.slane %v1038_v47, 4  ;;  %v773_v38 = vmax.f32 %v771_v8, %v772_v22 }
 0x222   :  { %v1035_v39 = vadd.f32 %v1034_v33, %v1033_v24  ;;  %v1047_v40 = vadd.f32 %v1046_v34, %v1045_v29  ;;  %v4650_v43 = vpop.f32.mrb[18].mxu1  ;;  %v4663_v6 = vpop.eup %4135  ;;  %v777_v34 = vrot.slane %v776_v21, 2 }
 0x223   :  { %v4653_v45 = vpop.f32.mrb[19].mxu1  ;;  %v1028_v50 = vadd.f32 %v1027_v37, %v1026_v27  ;;  %v1040_v13 = vadd.f32 %v1039_v58, %v1038_v47  ;;  %v1059_v20 = vsel %vm703_vm1, %v4663_v6, 0.0 }
 0x224   :  { %v1036_v46 = vrot.slane %v1035_v39, 1  ;;  %v1048_v52 = vrot.slane %v1047_v40, 2  ;;  %v1060_v29 = vrot.slane %v1059_v20, 4  ;;  %v778_v49 = vmax.f32 %v776_v21, %v777_v34 }
 0x225   :  { %v1029_v63 = vrot.slane %v1028_v50, 1  ;;  %v1041_v25 = vrot.slane %v1040_v13, 2 }
 0x226   :  { %v1037_v53 = vadd.f32 %v1036_v46, %v1035_v39  ;;  %v4659_v57 = vpop.f32.mrb[20].mxu1  ;;  %v1049_v1 = vadd.f32 %v1048_v52, %v1047_v40  ;;  %v1061_v44 = vadd.f32 %v1060_v29, %v1059_v20  ;;  %v752_v46 = vmax.f32 %v750_v16, %v751_v31 }
 0x227   :  { %v4661_v28 = vpop.f32.mrb[21].mxu1  ;;  %v1030_v18 = vadd.f32 %v1029_v63, %v1028_v50  ;;  %v1042_v40 = vadd.f32 %v1041_v25, %v1040_v13  ;;  %v810_v50 = vrot.slane %v809_v35, 4  ;;  %v937_v52 = vsub.f32 %v4610_v51, %v773_v38 }
 0x228   :  { %4137 = vrcp.f32 %v1037_v53  ;;  %v1050_v19 = vrot.slane %v1049_v1, 1  ;;  %v779_v62 = vrot.slane %v778_v49, 1  ;;  %v6050_v51 = vmov 2  }
 0x229   :  { %4139 = vpow2.f32 %v968_v59  ;;  %v1043_v54 = vrot.slane %v1042_v40, 1  ;;  %v811_v56 = vmax.f32 %v809_v35, %v810_v50  ;;  %v1062_v59 = vrot.slane %v1061_v44, 2 }
 0x22a   :  { %v4665_v9 = vpop.f32.mrb[22].mxu1  ;;  %v1051_v33 = vadd.f32 %v1050_v19, %v1049_v1  ;;  %4141 = vrcp.f32 %v1030_v18  ;;  %v978_v1 = vmul.f32 1.442695, %v937_v52  ;;  %v760_v18 = vsel %vm703_vm1, %v4612_v55, -inf }
 0x22b   :  { %v4667_v14 = vpop.f32.mrb[23].mxu1  ;;  %4143 = vpow2.f32 %v974_v30  ;;  %v812_v63 = vrot.slane %v811_v56, 2  ;;  %v1044_v15 = vadd.f32 %v1043_v54, %v1042_v40  ;;  %v1063_v19 = vadd.f32 %v1062_v59, %v1061_v44 }
 0x22c   :  { %4145 = vrcp.f32 %v1051_v33  ;;  %v780_v21 = vmax.f32 %v778_v49, %v779_v62  ;;  %v761_v29 = vrot.slane %v760_v18, 4  ;;  %v816_v31 = vsel %vm703_vm1, %v4646_v32, -inf }
 0x22d   :  { %v813_v22 = vmax.f32 %v811_v56, %v812_v63  ;;  %4147 = vpow2.f32 %v978_v1  ;;  %v817_v38 = vrot.slane %v816_v31, 4  ;;  %v1064_v35 = vrot.slane %v1063_v19, 1 }
 0x22e   :  { %v4672_v24 = vpop.f32.mrb[24].mxu1  ;;  %4149 = vrcp.f32 %v1044_v15  ;;  %v781_v50 = vsel %vm703_vm1, %v4616_v61, -inf }
 0x22f   :  { %v4674_v27 = vpop.f32.mrb[25].mxu1  ;;  %v814_v40 = vrot.slane %v813_v22, 1  ;;  %v818_v44 = vmax.f32 %v816_v31, %v817_v38  ;;  %v1065_v52 = vadd.f32 %v1064_v35, %v1063_v19 }
 0x231   :  { %v819_v54 = vrot.slane %v818_v44, 2 }
 0x232   :  { %v4678_v37 = vpop.f32.mrb[26].mxu1  ;;  %v4138_v39 = vpop.eup %4137 }
 0x233   :  { %v4680_v41 = vpop.f32.mrb[27].mxu1  ;;  %v1281_v47 = vmul.f32 %v4138_v39, %v4624_v10  ;;  %v4683_v48 = vpop.eup %4139  ;;  %v934_v10 = vsub.f32 %v4608_v42, %v752_v46  ;;  %v938_v39 = vsub.f32 %v4618_v0, %v780_v21  ;;  %v762_v46 = vmax.f32 %v760_v18, %v761_v29 }
 0x234   :  { %v1052_v60 = vsel %vm703_vm1, %v4683_v48, 0.0  ;;  %v4142_v13 = vpop.eup %4141  ;;  %v830_v0 = vsel %vm703_vm1, %v4653_v45, -inf  ;;  %v820_v1 = vmax.f32 %v818_v44, %v819_v54 }
 0x235   :  { %1733 = vperm.xlu1 %3953, %v1281_v47   ;;  %2501 = vperm.xlu0 %3952, %v1281_v47   ;;  %v1053_v16 = vrot.slane %v1052_v60, 4  ;;  %v972_v20 = vmul.f32 1.442695, %v934_v10  ;;  %v4701_v25 = vpop.eup %4143  ;;  %v1280_v30 = vmul.f32 %v4142_v13, %v4628_v12  ;;  %v980_v59 = vmul.f32 1.442695, %v938_v39 }
 0x236   :  { %v4686_v53 = vpop.f32.mrb[28].mxu1  ;;  %v4146_v33 = vpop.eup %4145  ;;  %v1073_v12 = vsel %vm703_vm1, %v4701_v25, 0.0  ;;  %v763_v10 = vrot.slane %v762_v46, 2  ;;  %v831_v62 = vrot.slane %v830_v0, 4  ;;  %v821_v31 = vrot.slane %v820_v1, 1 }
 0x237   :  { %v4688_v58 = vpop.f32.mrb[29].mxu1  ;;  %v1054_v34 = vadd.f32 %v1053_v16, %v1052_v60  ;;  %4151 = vpow2.f32 %v972_v20  ;;  %v1074_v56 = vrot.slane %v1073_v12, 4  ;;  %v815_v60 = vmax.f32 %v813_v22, %v814_v40  ;;  %v4720_v13 = vpop.eup %4147 }
 0x238   :  { %4153 = vrcp.f32 %v1065_v52  ;;  %v4150_v15 = vpop.eup %4149  ;;  %v832_v19 = vmax.f32 %v830_v0, %v831_v62  ;;  %v764_v21 = vmax.f32 %v762_v46, %v763_v10 }
 0x239   :  { %3955 = vset.pattern.permute.xlu1 %v6044_v2  ;;  %3954 = vset.pattern.permute.xlu0 %v6050_v51  ;;  %v1055_v49 = vrot.slane %v1054_v34, 2  ;;  %v1075_v16 = vadd.f32 %v1074_v56, %v1073_v12  ;;  %4155 = vpow2.f32 %v980_v59  ;;  %v943_v18 = vsub.f32 %v4626_v11, %v815_v60 }
 0x23a   :  { %v4695_v8 = vpop.f32.mrb[30].mxu1  ;;  %1319 = vperm.xlu1 %3955, %v1281_v47   ;;  %2117 = vperm.xlu0 %3954, %v1281_v47   ;;  %v4712_v47 = vmul.f32 %v4146_v33, %v4640_v23  ;;  %v782_v23 = vrot.slane %v781_v50, 4  ;;  %v1087_v33 = vsel %vm703_vm1, %v4720_v13, 0.0  ;;  %v833_v39 = vrot.slane %v832_v19, 2 }
 0x23b   :  { %v4699_v42 = vpop.f32.mrb[31].mxu1  ;;  %v1056_v63 = vadd.f32 %v1055_v49, %v1054_v34  ;;  %v4731_v34 = vmul.f32 %v4150_v15, %v4648_v36  ;;  %v1076_v38 = vrot.slane %v1075_v16, 2  ;;  %v990_v11 = vmul.f32 1.442695, %v943_v18 }
 0x23c   :  { %v783_v22 = vmax.f32 %v781_v50, %v782_v23  ;;  %v765_v40 = vrot.slane %v764_v21, 1  ;;  %v1088_v12 = vrot.slane %v1087_v33, 4  ;;  %v822_v36 = vmax.f32 %v820_v1, %v821_v31 }
 0x23d   :  { %v1057_v29 = vrot.slane %v1056_v63, 1  ;;  %v865_v49 = vsel %vm703_vm1, %v4665_v9, -inf  ;;  %v1077_v50 = vadd.f32 %v1076_v38, %v1075_v16  ;;  %4157 = vpow2.f32 %v990_v11 }
 0x23e   :  { %3957 = vset.pattern.permute.xlu1 %v6046_v5  ;;  %3956 = vset.pattern.permute.xlu0 %v6048_v4  ;;  %v784_v44 = vrot.slane %v783_v22, 2  ;;  %v834_v52 = vmax.f32 %v832_v19, %v833_v39  ;;  %v766_v0 = vmax.f32 %v764_v21, %v765_v40  ;;  %v1089_v60 = vadd.f32 %v1088_v12, %v1087_v33 }
 0x23f   :  { %1729 = vperm.xlu1 %3957, %v1280_v30   ;;  %2497 = vperm.xlu0 %3956, %v1280_v30   ;;  %v944_v10 = vsub.f32 %v4646_v32, %v822_v36  ;;  %v866_v23 = vrot.slane %v865_v49, 4 }
 0x240   :  { %v785_v56 = vmax.f32 %v783_v22, %v784_v44  ;;  %v835_v1 = vrot.slane %v834_v52, 1  ;;  %v936_v16 = vsub.f32 %v4612_v55, %v766_v0  ;;  %v1090_v22 = vrot.slane %v1089_v60, 2 }
 0x241   :  { %v4726_v20 = vpop.eup %4151  ;;  %v867_v15 = vmax.f32 %v865_v49, %v866_v23  ;;  %v992_v32 = vmul.f32 1.442695, %v944_v10 }
 0x242   :  { %v1066_v35 = vsel %vm703_vm1, %v4726_v20, 0.0  ;;  %v4154_v54 = vpop.eup %4153  ;;  %v786_v18 = vrot.slane %v785_v56, 1  ;;  %v836_v55 = vmax.f32 %v834_v52, %v835_v1  ;;  %v976_v38 = vmul.f32 1.442695, %v936_v16 }
 0x243   :  { %3958 = vset.pattern.permute.xlu1 %v6050_v51  ;;  %2509 = vperm.xlu0 %3956, %v4712_v47   ;;  %v1067_v46 = vrot.slane %v1066_v35, 4  ;;  %v4742_v59 = vpop.eup %4155  ;;  %v4752_v21 = vmul.f32 %v4154_v54, %v4663_v6  ;;  %v1091_v6 = vadd.f32 %v1090_v22, %v1089_v60  ;;  %v795_v54 = vsel %vm703_vm1, %v4620_v3, -inf }
 0x244   :  { %2113 = vperm.xlu1 %3958, %v1280_v30   ;;  %v1094_v19 = vsel %vm703_vm1, %v4742_v59, 0.0  ;;  %v946_v12 = vsub.f32 %v4653_v45, %v836_v55 }
 0x245   :  { %v1068_v62 = vadd.f32 %v1067_v46, %v1066_v35  ;;  %v1095_v33 = vrot.slane %v1094_v19, 4  ;;  %v787_v35 = vmax.f32 %v785_v56, %v786_v18  ;;  %v1092_v49 = vrot.slane %v1091_v6, 1 }
 0x246   :  { %v996_v60 = vmul.f32 1.442695, %v946_v12 }
 0x247   :  { %3961 = vset.pattern.permute.xlu0 %v6050_v51  ;;  %v1069_v31 = vrot.slane %v1068_v62, 2  ;;  %v4758_v11 = vpop.eup %4157  ;;  %v939_v36 = vsub.f32 %v4616_v61, %v787_v35  ;;  %v872_v61 = vsel %vm703_vm1, %v4674_v27, -inf }
 0x248   :  { %3959 = vset.pattern.permute.xlu1 %v6044_v2  ;;  %2125 = vperm.xlu0 %3961, %v4712_v47   ;;  %v1129_v46 = vsel %vm703_vm1, %v4758_v11, 0.0 }
 0x249   :  { %1314 = vperm.xlu1 %3959, %v1280_v30   ;;  %v1058_v30 = vadd.f32 %v1057_v29, %v1056_v63  ;;  %v1078_v63 = vrot.slane %v1077_v50, 1  ;;  %v868_v29 = vrot.slane %v867_v15, 2  ;;  %v1070_v40 = vadd.f32 %v1069_v31, %v1068_v62 }
 0x24a   :  { %v1130_v45 = vrot.slane %v1129_v46, 4  ;;  %v982_v10 = vmul.f32 1.442695, %v939_v36 }
 0x24b   :  { %4159 = vrcp.f32 %v1058_v30  ;;  %v869_v39 = vmax.f32 %v867_v15, %v868_v29  ;;  %v1096_v30 = vadd.f32 %v1095_v33, %v1094_v19  ;;  %v1071_v52 = vrot.slane %v1070_v40, 1 }
 0x24c   :  { %3963 = vset.pattern.permute.xlu0 %v6048_v4  ;;  %4161 = vpow2.f32 %v992_v32  ;;  %v1131_v16 = vadd.f32 %v1130_v45, %v1129_v46 }
 0x24d   :  { %3960 = vset.pattern.permute.xlu1 %v6046_v5  ;;  %2505 = vperm.xlu0 %3963, %v4731_v34   ;;  %v1097_v56 = vrot.slane %v1096_v30, 2  ;;  %v1072_v62 = vadd.f32 %v1071_v52, %v1070_v40 }
 0x24e   :  { %1741 = vperm.xlu1 %3960, %v4712_v47   ;;  %v1132_v55 = vrot.slane %v1131_v16, 2 }
 0x24f   :  { %v1098_v15 = vadd.f32 %v1097_v56, %v1096_v30  ;;  %v788_v30 = vsel %vm703_vm1, %v4622_v7, -inf }
 0x250   :  { %v1133_v36 = vadd.f32 %v1132_v55, %v1131_v16 }
 0x251   :  { %3965 = vset.pattern.permute.xlu0 %v6050_v51  ;;  %v1099_v33 = vrot.slane %v1098_v15, 1 }
 0x252   :  { %3962 = vset.pattern.permute.xlu1 %v6044_v2  ;;  %2121 = vperm.xlu0 %3965, %v4731_v34  }
 0x253   :  { %1329 = vperm.xlu1 %3962, %v4712_v47   ;;  %v1079_v47 = vadd.f32 %v1078_v63, %v1077_v50  ;;  %v870_v50 = vrot.slane %v869_v39, 1  ;;  %v873_v63 = vrot.slane %v872_v61, 4  ;;  %v1100_v12 = vadd.f32 %v1099_v33, %v1098_v15 }
 0x255   :  { %v4160_v44 = vpop.eup %4159  ;;  %4163 = vrcp.f32 %v1079_v47  ;;  %v871_v23 = vmax.f32 %v869_v39, %v870_v50  ;;  %v874_v18 = vmax.f32 %v872_v61, %v873_v63 }
 0x256   :  { %3967 = vset.pattern.permute.xlu0 %v6048_v4  ;;  %4165 = vpow2.f32 %v976_v38  ;;  %v4771_v0 = vmul.f32 %v4160_v44, %v4683_v48  ;;  %v796_v48 = vrot.slane %v795_v54, 4  ;;  %v4779_v1 = vpop.eup %4161 }
 0x257   :  { %3964 = vset.pattern.permute.xlu1 %v6046_v5  ;;  %2517 = vperm.xlu0 %3967, %v4752_v21   ;;  %4167 = vpow2.f32 %v996_v60  ;;  %v951_v22 = vsub.f32 %v4665_v9, %v871_v23  ;;  %v1136_v31 = vsel %vm703_vm1, %v4779_v1, 0.0  ;;  %v875_v47 = vrot.slane %v874_v18, 2 }
 0x258   :  { %1737 = vperm.xlu1 %3964, %v4731_v34   ;;  %4169 = vpow2.f32 %v982_v10  ;;  %v797_v29 = vmax.f32 %v795_v54, %v796_v48  ;;  %v886_v9 = vsel %vm703_vm1, %v4680_v41, -inf  ;;  %v1137_v39 = vrot.slane %v1136_v31, 4 }
 0x259   :  { %v876_v35 = vmax.f32 %v874_v18, %v875_v47  ;;  %v1006_v40 = vmul.f32 1.442695, %v951_v22  ;;  %v887_v44 = vrot.slane %v886_v9, 4  ;;  %v789_v54 = vrot.slane %v788_v30, 4 }
 0x25a   :  { %v1138_v56 = vadd.f32 %v1137_v39, %v1136_v31 }
 0x25b   :  { %3969 = vset.pattern.permute.xlu0 %v6050_v51  ;;  %v888_v46 = vmax.f32 %v886_v9, %v887_v44  ;;  %v790_v16 = vmax.f32 %v788_v30, %v789_v54 }
 0x25c   :  { %3966 = vset.pattern.permute.xlu1 %v6044_v2  ;;  %2133 = vperm.xlu0 %3969, %v4752_v21   ;;  %v1139_v18 = vrot.slane %v1138_v56, 2 }
 0x25d   :  { %1324 = vperm.xlu1 %3966, %v4731_v34   ;;  %v1093_v34 = vadd.f32 %v1092_v49, %v1091_v6  ;;  %v889_v45 = vrot.slane %v888_v46, 2 }
 0x25f   :  { %v4164_v19 = vpop.eup %4163  ;;  %4171 = vrcp.f32 %v1093_v34  ;;  %v1134_v34 = vrot.slane %v1133_v36, 1  ;;  %v890_v15 = vmax.f32 %v888_v46, %v889_v45 }
 0x260   :  { %3971 = vset.pattern.permute.xlu0 %v6048_v4  ;;  %v4785_v32 = vpop.eup %4165  ;;  %4173 = vrcp.f32 %v1072_v62  ;;  %v4791_v38 = vmul.f32 %v4164_v19, %v4701_v25  ;;  %v877_v25 = vrot.slane %v876_v35, 1 }
 0x261   :  { %3968 = vset.pattern.permute.xlu1 %v6046_v5  ;;  %2513 = vperm.xlu0 %3971, %v4771_v0   ;;  %v1080_v6 = vsel %vm703_vm1, %v4785_v32, 0.0  ;;  %v4803_v52 = vpop.eup %4167  ;;  %4175 = vpow2.f32 %v1006_v40  ;;  %v1135_v47 = vadd.f32 %v1134_v34, %v1133_v36 }
 0x262   :  { %1749 = vperm.xlu1 %3968, %v4752_v21   ;;  %v1081_v49 = vrot.slane %v1080_v6, 4  ;;  %v878_v50 = vmax.f32 %v876_v35, %v877_v25  ;;  %v4805_v60 = vpop.eup %4169  ;;  %4177 = vrcp.f32 %v1100_v12  ;;  %v1150_v63 = vsel %vm703_vm1, %v4803_v52, 0.0 }
 0x263   :  { %v1101_v22 = vsel %vm703_vm1, %v4805_v60, 0.0  ;;  %v1151_v33 = vrot.slane %v1150_v63, 4  ;;  %v844_v35 = vsel %vm703_vm1, %v4661_v28, -inf }
 0x264   :  { %v952_v23 = vsub.f32 %v4674_v27, %v878_v50  ;;  %v1082_v48 = vadd.f32 %v1081_v49, %v1080_v6  ;;  %v891_v27 = vrot.slane %v890_v15, 1  ;;  %v1140_v6 = vadd.f32 %v1139_v18, %v1138_v56 }
 0x265   :  { %3973 = vset.pattern.permute.xlu0 %v6050_v51  ;;  %v1102_v39 = vrot.slane %v1101_v22, 4  ;;  %v845_v30 = vrot.slane %v844_v35, 4 }
 0x266   :  { %3970 = vset.pattern.permute.xlu1 %v6044_v2  ;;  %2129 = vperm.xlu0 %3973, %v4771_v0   ;;  %v1008_v19 = vmul.f32 1.442695, %v952_v23  ;;  %v892_v9 = vmax.f32 %v890_v15, %v891_v27  ;;  %v1141_v49 = vrot.slane %v1140_v6, 1 }
 0x267   :  { %1339 = vperm.xlu1 %3970, %v4752_v21   ;;  %v798_v21 = vrot.slane %v797_v29, 2  ;;  %v1103_v50 = vadd.f32 %v1102_v39, %v1101_v22  ;;  %v846_v45 = vmax.f32 %v844_v35, %v845_v30 }
 0x268   :  { %4179 = vpow2.f32 %v1008_v19  ;;  %v954_v44 = vsub.f32 %v4680_v41, %v892_v9 }
 0x269   :  { %v799_v61 = vmax.f32 %v797_v29, %v798_v21  ;;  %v4172_v10 = vpop.eup %4171  ;;  %4181 = vrcp.f32 %v1135_v47  ;;  %v847_v18 = vrot.slane %v846_v45, 2 }
 0x26a   :  { %3975 = vset.pattern.permute.xlu0 %v6048_v4  ;;  %v4174_v62 = vpop.eup %4173  ;;  %v4817_v31 = vmul.f32 %v4172_v10, %v4720_v13  ;;  %v791_v13 = vrot.slane %v790_v16, 2  ;;  %v1012_v12 = vmul.f32 1.442695, %v954_v44 }
 0x26b   :  { %3972 = vset.pattern.permute.xlu1 %v6046_v5  ;;  %2525 = vperm.xlu0 %3975, %v4791_v38   ;;  %v800_v29 = vrot.slane %v799_v61, 1  ;;  %v4821_v55 = vmul.f32 %v4174_v62, %v4726_v20  ;;  %v4829_v21 = vpop.eup %4175  ;;  %v1152_v20 = vadd.f32 %v1151_v33, %v1150_v63  ;;  %v802_v62 = vsel %vm703_vm1, %v4636_v17, -inf }
 0x26c   :  { %1745 = vperm.xlu1 %3972, %v4771_v0   ;;  %v4178_v36 = vpop.eup %4177  ;;  %v792_v46 = vmax.f32 %v790_v16, %v791_v13  ;;  %v1185_v41 = vsel %vm703_vm1, %v4829_v21, 0.0  ;;  %4183 = vpow2.f32 %v1012_v12  ;;  %v1104_v63 = vrot.slane %v1103_v50, 2 }
 0x26d   :  { %v801_v40 = vmax.f32 %v799_v61, %v800_v29  ;;  %v1153_v56 = vrot.slane %v1152_v20, 2  ;;  %v4839_v10 = vmul.f32 %v4178_v36, %v4742_v59  ;;  %v803_v22 = vrot.slane %v802_v62, 4 }
 0x26e   :  { %v793_v23 = vrot.slane %v792_v46, 1  ;;  %v900_v29 = vsel %vm703_vm1, %v4688_v58, -inf  ;;  %v1105_v35 = vadd.f32 %v1104_v63, %v1103_v50  ;;  %v848_v13 = vmax.f32 %v846_v45, %v847_v18 }
 0x26f   :  { %3976 = vset.pattern.permute.xlu0 %v6050_v51  ;;  %v941_v54 = vsub.f32 %v4620_v3, %v801_v40  ;;  %v1186_v3 = vrot.slane %v1185_v41, 4  ;;  %v1154_v59 = vadd.f32 %v1153_v56, %v1152_v20  ;;  %v901_v39 = vrot.slane %v900_v29, 4 }
 0x270   :  { %3974 = vset.pattern.permute.xlu1 %v6044_v2  ;;  %2141 = vperm.xlu0 %3976, %v4791_v38   ;;  %v794_v47 = vmax.f32 %v792_v46, %v793_v23  ;;  %v804_v44 = vmax.f32 %v802_v62, %v803_v22  ;;  %v1106_v46 = vrot.slane %v1105_v35, 1 }
 0x271   :  { %1334 = vperm.xlu1 %3974, %v4771_v0   ;;  %v1083_v0 = vrot.slane %v1082_v48, 2  ;;  %v986_v15 = vmul.f32 1.442695, %v941_v54  ;;  %v1187_v33 = vadd.f32 %v1186_v3, %v1185_v41  ;;  %v1155_v9 = vrot.slane %v1154_v59, 1 }
 0x272   :  { %v4841_v34 = vpop.eup %4179  ;;  %v940_v30 = vsub.f32 %v4622_v7, %v794_v47  ;;  %v849_v41 = vrot.slane %v848_v13, 1  ;;  %v902_v56 = vmax.f32 %v900_v29, %v901_v39  ;;  %v921_v7 = vsel %vm703_vm1, %v4695_v8, -inf }
 0x273   :  { %v1084_v25 = vadd.f32 %v1083_v0, %v1082_v48  ;;  %v1142_v48 = vadd.f32 %v1141_v49, %v1140_v6  ;;  %v1192_v16 = vsel %vm703_vm1, %v4841_v34, 0.0  ;;  %v4182_v27 = vpop.eup %4181  ;;  %v907_v6 = vsel %vm703_vm1, %v4686_v53, -inf }
 0x274   :  { %3981 = vset.pattern.permute.xlu0 %v6048_v4  ;;  %v1193_v0 = vrot.slane %v1192_v16, 4  ;;  %v4862_v20 = vmul.f32 %v4182_v27, %v4758_v11  ;;  %v908_v50 = vrot.slane %v907_v6, 4  ;;  %v1156_v54 = vadd.f32 %v1155_v9, %v1154_v59 }
 0x275   :  { %3977 = vset.pattern.permute.xlu1 %v6048_v4  ;;  %2533 = vperm.xlu0 %3981, %v4817_v31   ;;  %v1085_v61 = vrot.slane %v1084_v25, 1  ;;  %4185 = vrcp.f32 %v1142_v48  ;;  %v823_v11 = vsel %vm703_vm1, %v4642_v26, -inf  ;;  %v984_v45 = vmul.f32 1.442695, %v940_v30 }
 0x276   :  { %2521 = vperm.xlu1 %3977, %v4821_v55   ;;  %4187 = vpow2.f32 %v986_v15  ;;  %v4858_v40 = vpop.eup %4183  ;;  %v1194_v12 = vadd.f32 %v1193_v0, %v1192_v16  ;;  %v1107_v48 = vadd.f32 %v1106_v46, %v1105_v35  ;;  %v909_v3 = vmax.f32 %v907_v6, %v908_v50 }
 0x277   :  { %v1086_v19 = vadd.f32 %v1085_v61, %v1084_v25  ;;  %v1188_v25 = vrot.slane %v1187_v33, 2  ;;  %v1206_v36 = vsel %vm703_vm1, %v4858_v40, 0.0  ;;  %v850_v15 = vmax.f32 %v848_v13, %v849_v41 }
 0x278   :  { %v1207_v49 = vrot.slane %v1206_v36, 4  ;;  %v1195_v23 = vrot.slane %v1194_v12, 2  ;;  %v903_v16 = vrot.slane %v902_v56, 2  ;;  %v922_v59 = vrot.slane %v921_v7, 4 }
 0x279   :  { %3983 = vset.pattern.permute.xlu0 %v6050_v51  ;;  %4189 = vrcp.f32 %v1086_v19  ;;  %v1189_v61 = vadd.f32 %v1188_v25, %v1187_v33  ;;  %v824_v22 = vrot.slane %v823_v11, 4  ;;  %v914_v29 = vsel %vm703_vm1, %v4699_v42, -inf }
 0x27a   :  { %3978 = vset.pattern.permute.xlu1 %v6046_v5  ;;  %2149 = vperm.xlu0 %3983, %v4817_v31   ;;  %v1208_v62 = vadd.f32 %v1207_v49, %v1206_v36  ;;  %4191 = vrcp.f32 %v1156_v54  ;;  %v1196_v47 = vadd.f32 %v1195_v23, %v1194_v12  ;;  %v910_v9 = vrot.slane %v909_v3, 2 }
 0x27b   :  { %1753 = vperm.xlu1 %3978, %v4821_v55   ;;  %4193 = vpow2.f32 %v984_v45  ;;  %v1190_v27 = vrot.slane %v1189_v61, 1  ;;  %v948_v13 = vsub.f32 %v4661_v28, %v850_v15  ;;  %v904_v6 = vmax.f32 %v902_v56, %v903_v16 }
 0x27c   :  { %v1209_v33 = vrot.slane %v1208_v62, 2  ;;  %4195 = vrcp.f32 %v1107_v48  ;;  %v923_v39 = vmax.f32 %v921_v7, %v922_v59  ;;  %v825_v12 = vmax.f32 %v823_v11, %v824_v22 }
 0x27d   :  { %v1191_v36 = vadd.f32 %v1190_v27, %v1189_v61  ;;  %v1197_v46 = vrot.slane %v1196_v47, 1  ;;  %v911_v28 = vmax.f32 %v909_v3, %v910_v9  ;;  %v905_v50 = vrot.slane %v904_v6, 1 }
 0x27e   :  { %3991 = vset.pattern.permute.xlu0 %v6048_v4  ;;  %v1210_v49 = vadd.f32 %v1209_v33, %v1208_v62  ;;  %v924_v54 = vrot.slane %v923_v39, 2  ;;  %v837_v11 = vsel %vm703_vm1, %v4650_v43, -inf  ;;  %v826_v45 = vrot.slane %v825_v12, 2 }
 0x27f   :  { %3979 = vset.pattern.permute.xlu1 %v6050_v51  ;;  %2537 = vperm.xlu0 %3991, %v4839_v10   ;;  %v4186_v63 = vpop.eup %4185  ;;  %4197 = vrcp.f32 %v1191_v36  ;;  %v912_v23 = vrot.slane %v911_v28, 1  ;;  %v906_v48 = vmax.f32 %v904_v6, %v905_v50 }
 0x280   :  { %2137 = vperm.xlu1 %3979, %v4821_v55   ;;  %v4875_v18 = vpop.eup %4187  ;;  %v4884_v35 = vmul.f32 %v4186_v63, %v4779_v1  ;;  %v1211_v61 = vrot.slane %v1210_v49, 1  ;;  %v925_v3 = vmax.f32 %v923_v39, %v924_v54 }
 0x281   :  { %v1115_v30 = vsel %vm703_vm1, %v4875_v18, 0.0  ;;  %v913_v33 = vmax.f32 %v911_v28, %v912_v23  ;;  %v956_v9 = vsub.f32 %v4688_v58, %v906_v48 }
 0x282   :  { %v1116_v56 = vrot.slane %v1115_v30, 4  ;;  %v1212_v27 = vadd.f32 %v1211_v61, %v1210_v49 }
 0x283   :  { %3993 = vset.pattern.permute.xlu0 %v6050_v51  ;;  %v4190_v0 = vpop.eup %4189  ;;  %v1016_v36 = vmul.f32 1.442695, %v956_v9 }
 0x284   :  { %3980 = vset.pattern.permute.xlu1 %v6044_v2  ;;  %2153 = vperm.xlu0 %3993, %v4839_v10   ;;  %v4891_v1 = vmul.f32 %v4190_v0, %v4785_v32  ;;  %v4192_v7 = vpop.eup %4191  ;;  %v1198_v32 = vadd.f32 %v1197_v46, %v1196_v47  ;;  %v1117_v16 = vadd.f32 %v1116_v56, %v1115_v30 }
 0x285   :  { %1344 = vperm.xlu1 %3980, %v4821_v55   ;;  %v805_v55 = vrot.slane %v804_v44, 2  ;;  %v4899_v62 = vpop.eup %4193  ;;  %v4906_v22 = vmul.f32 %v4192_v7, %v4803_v52 }
 0x286   :  { %v4196_v15 = vpop.eup %4195  ;;  %v1108_v47 = vsel %vm703_vm1, %v4899_v62, 0.0  ;;  %v1118_v6 = vrot.slane %v1117_v16, 2 }
 0x287   :  { %v806_v19 = vmax.f32 %v804_v44, %v805_v55  ;;  %v915_v44 = vrot.slane %v914_v29, 4  ;;  %v1291_v0 = vmul.f32 %v4196_v15, %v4805_v60  ;;  %v1109_v52 = vrot.slane %v1108_v47, 4 }
 0x288   :  { %4001 = vset.pattern.permute.xlu0 %v6048_v4  ;;  %v1119_v58 = vadd.f32 %v1118_v6, %v1117_v16 }
 0x289   :  { %3982 = vset.pattern.permute.xlu1 %v6046_v5  ;;  %2557 = vperm.xlu0 %4001, %v4862_v20   ;;  %v807_v25 = vrot.slane %v806_v19, 1  ;;  %v916_v41 = vmax.f32 %v914_v29, %v915_v44  ;;  %v827_v29 = vmax.f32 %v825_v12, %v826_v45  ;;  %v4198_v12 = vpop.eup %4197 }
 0x28a   :  { %1765 = vperm.xlu1 %3982, %v4817_v31  }
 0x28b   :  { %v808_v55 = vmax.f32 %v806_v19, %v807_v25  ;;  %v917_v63 = vrot.slane %v916_v41, 2  ;;  %v838_v19 = vrot.slane %v837_v11, 4  ;;  %v828_v30 = vrot.slane %v827_v29, 1 }
 0x28c   :  { %v957_v25 = vsub.f32 %v4686_v53, %v913_v33  ;;  %v4922_v53 = vmul.f32 %v4198_v12, %v4829_v21 }
 0x28d   :  { %4002 = vset.pattern.permute.xlu0 %v6050_v51  ;;  %v942_v59 = vsub.f32 %v4636_v17, %v808_v55  ;;  %v926_v17 = vrot.slane %v925_v3, 1  ;;  %v839_v44 = vmax.f32 %v837_v11, %v838_v19  ;;  %v829_v50 = vmax.f32 %v827_v29, %v828_v30 }
 0x28e   :  { %3984 = vset.pattern.permute.xlu1 %v6044_v2  ;;  %2173 = vperm.xlu0 %4002, %v4862_v20   ;;  %v1018_v54 = vmul.f32 1.442695, %v957_v25  ;;  %v1120_v11 = vrot.slane %v1119_v58, 1 }
 0x28f   :  { %1359 = vperm.xlu1 %3984, %v4817_v31   ;;  %v1000_v31 = vmul.f32 1.442695, %v948_v13  ;;  %v918_v13 = vmax.f32 %v916_v41, %v917_v63  ;;  %v988_v39 = vmul.f32 1.442695, %v942_v59  ;;  %v927_v60 = vmax.f32 %v925_v3, %v926_v17 }
 0x290   :  { %v840_v49 = vrot.slane %v839_v44, 2  ;;  %v945_v61 = vsub.f32 %v4642_v26, %v829_v50  ;;  %v1121_v63 = vadd.f32 %v1120_v11, %v1119_v58 }
 0x291   :  { %4199 = vpow2.f32 %v1000_v31  ;;  %v919_v46 = vrot.slane %v918_v13, 1  ;;  %v1110_v31 = vadd.f32 %v1109_v52, %v1108_v47  ;;  %v959_v56 = vsub.f32 %v4695_v8, %v927_v60 }
 0x292   :  { %4011 = vset.pattern.permute.xlu0 %v6048_v4  ;;  %4201 = vrcp.f32 %v1198_v32  ;;  %v841_v7 = vmax.f32 %v839_v44, %v840_v49  ;;  %v994_v26 = vmul.f32 1.442695, %v945_v61 }
 0x293   :  { %3985 = vset.pattern.permute.xlu1 %v6048_v4  ;;  %2561 = vperm.xlu0 %4011, %v4884_v35   ;;  %4203 = vrcp.f32 %v1212_v27  ;;  %v920_v55 = vmax.f32 %v918_v13, %v919_v46  ;;  %v1111_v32 = vrot.slane %v1110_v31, 2  ;;  %v1022_v48 = vmul.f32 1.442695, %v959_v56 }
 0x294   :  { %2529 = vperm.xlu1 %3985, %v4891_v1   ;;  %4205 = vpow2.f32 %v988_v39  ;;  %v842_v15 = vrot.slane %v841_v7, 1 }
 0x295   :  { %4207 = vpow2.f32 %v1016_v36  ;;  %v958_v3 = vsub.f32 %v4699_v42, %v920_v55  ;;  %v1112_v16 = vadd.f32 %v1111_v32, %v1110_v31 }
 0x296   :  { %4209 = vpow2.f32 %v1018_v54  ;;  %v843_v42 = vmax.f32 %v841_v7, %v842_v15 }
 0x297   :  { %4012 = vset.pattern.permute.xlu0 %v6050_v51  ;;  %4211 = vpow2.f32 %v1022_v48  ;;  %v1020_v27 = vmul.f32 1.442695, %v958_v3  ;;  %v1113_v33 = vrot.slane %v1112_v16, 1 }
 0x298   :  { %3986 = vset.pattern.permute.xlu1 %v6050_v51  ;;  %2177 = vperm.xlu0 %4012, %v4884_v35   ;;  %4213 = vrcp.f32 %v1121_v63  ;;  %v947_v39 = vsub.f32 %v4650_v43, %v843_v42 }
 0x299   :  { %2145 = vperm.xlu1 %3986, %v4891_v1   ;;  %4215 = vpow2.f32 %v994_v26  ;;  %v1114_v44 = vadd.f32 %v1113_v33, %v1112_v16  ;;  %v858_v26 = vsel %vm703_vm1, %v4667_v14, -inf }
 0x29a   :  { %4217 = vpow2.f32 %v1020_v27  ;;  %v998_v46 = vmul.f32 1.442695, %v947_v39  ;;  %v859_v39 = vrot.slane %v858_v26, 4 }
 0x29b   :  { %v4917_v28 = vpop.eup %4199  ;;  %4219 = vrcp.f32 %v1114_v44 }
 0x29c   :  { %4016 = vset.pattern.permute.xlu0 %v6048_v4  ;;  %v4202_v41 = vpop.eup %4201  ;;  %v1164_v45 = vsel %vm703_vm1, %v4917_v28, 0.0  ;;  %4221 = vpow2.f32 %v998_v46  ;;  %v879_v46 = vsel %vm703_vm1, %v4672_v24, -inf }
 0x29d   :  { %3987 = vset.pattern.permute.xlu1 %v6048_v4  ;;  %2569 = vperm.xlu0 %4016, %v4906_v22   ;;  %v4932_v21 = vmul.f32 %v4202_v41, %v4841_v34  ;;  %v4204_v8 = vpop.eup %4203  ;;  %v1165_v23 = vrot.slane %v1164_v45, 4  ;;  %v851_v34 = vsel %vm703_vm1, %v4659_v57, -inf }
 0x29e   :  { %2541 = vperm.xlu1 %3987, %v1291_v0   ;;  %v4935_v59 = vpop.eup %4205  ;;  %v4939_v19 = vmul.f32 %v4204_v8, %v4858_v40  ;;  %v852_v40 = vrot.slane %v851_v34, 4 }
 0x29f   :  { %v1166_v29 = vadd.f32 %v1165_v23, %v1164_v45  ;;  %v4944_v47 = vpop.eup %4207  ;;  %v1122_v9 = vsel %vm703_vm1, %v4935_v59, 0.0 }
 0x2a0   :  { %6077 = vst [vmem:[#allocation12_spill] sm:$0xff] %v4939_v19  ;;  %v4949_v13 = vpop.eup %4209  ;;  %v1123_v6 = vrot.slane %v1122_v9, 4  ;;  %v853_v52 = vmax.f32 %v851_v34, %v852_v40 }
 0x2a1   :  { %4018 = vset.pattern.permute.xlu0 %v6050_v51  ;;  %v1167_v17 = vrot.slane %v1166_v29, 2  ;;  %v1227_v25 = vsel %vm703_vm1, %v4949_v13, 0.0  ;;  %v4964_v58 = vpop.eup %4211 }
 0x2a2   :  { %3988 = vset.pattern.permute.xlu1 %v6046_v5  ;;  %2185 = vperm.xlu0 %4018, %v4906_v22   ;;  %v1124_v43 = vadd.f32 %v1123_v6, %v1122_v9  ;;  %v4214_v49 = vpop.eup %4213  ;;  %v854_v31 = vrot.slane %v853_v52, 2  ;;  %v1228_v50 = vrot.slane %v1227_v25, 4  ;;  %v1241_v11 = vsel %vm703_vm1, %v4964_v58, 0.0 }
 0x2a3   :  { %1773 = vperm.xlu1 %3988, %v1291_v0   ;;  %v1168_v30 = vadd.f32 %v1167_v17, %v1166_v29  ;;  %v4968_v54 = vpop.eup %4215  ;;  %v4980_v61 = vmul.f32 %v4214_v49, %v4875_v18  ;;  %v1242_v63 = vrot.slane %v1241_v11, 4 }
 0x2a4   :  { %v1125_v55 = vrot.slane %v1124_v43, 2  ;;  %v4977_v32 = vpop.eup %4217  ;;  %v855_v8 = vmax.f32 %v853_v52, %v854_v31  ;;  %v1229_v23 = vadd.f32 %v1228_v50, %v1227_v25 }
 0x2a5   :  { %v1169_v41 = vrot.slane %v1168_v30, 1  ;;  %v1234_v16 = vsel %vm703_vm1, %v4977_v32, 0.0  ;;  %v4220_v33 = vpop.eup %4219  ;;  %v1243_v40 = vadd.f32 %v1242_v63, %v1241_v11 }
 0x2a6   :  { %4023 = vset.pattern.permute.xlu0 %v6048_v4  ;;  %v1126_v15 = vadd.f32 %v1125_v55, %v1124_v43  ;;  %v856_v27 = vrot.slane %v855_v8, 1  ;;  %v1230_v42 = vrot.slane %v1229_v23, 2  ;;  %v1235_v17 = vrot.slane %v1234_v16, 4  ;;  %v4999_v52 = vpop.eup %4221 }
 0x2a7   :  { %3989 = vset.pattern.permute.xlu1 %v6050_v51  ;;  %2589 = vperm.xlu0 %4023, %v4922_v53   ;;  %v1170_v48 = vadd.f32 %v1169_v41, %v1168_v30  ;;  %v5004_v43 = vmul.f32 %v4220_v33, %v4899_v62  ;;  %v1244_v31 = vrot.slane %v1243_v40, 2  ;;  %v1157_v11 = vsel %vm703_vm1, %v4999_v52, 0.0 }
 0x2a8   :  { %2157 = vperm.xlu1 %3989, %v1291_v0   ;;  %v1127_v6 = vrot.slane %v1126_v15, 1  ;;  %v857_v30 = vmax.f32 %v855_v8, %v856_v27  ;;  %v1231_v25 = vadd.f32 %v1230_v42, %v1229_v23  ;;  %v1236_v50 = vadd.f32 %v1235_v17, %v1234_v16  ;;  %v5020_v17 = vld [vmem:[#allocation2] sm:$0xff] }
 0x2a9   :  { %4223 = vrcp.f32 %v1170_v48  ;;  %v1158_v16 = vrot.slane %v1157_v11, 4  ;;  %6082 = vst [vmem:[#allocation17_spill] sm:$0xff] %v5020_v17 }
 0x2aa   :  { %v1128_v41 = vadd.f32 %v1127_v6, %v1126_v15  ;;  %v949_v62 = vsub.f32 %v4659_v57, %v857_v30  ;;  %v1232_v8 = vrot.slane %v1231_v25, 1  ;;  %v1237_v63 = vrot.slane %v1236_v50, 2 }
 0x2ab   :  { %2593 = vperm.xlu0 %4023, %v4932_v21  }
 0x2ac   :  { %3990 = vset.pattern.permute.xlu1 %v6044_v2  ;;  %4225 = vrcp.f32 %v1128_v41  ;;  %v1002_v42 = vmul.f32 1.442695, %v949_v62  ;;  %v1233_v33 = vadd.f32 %v1232_v8, %v1231_v25  ;;  %v1238_v6 = vadd.f32 %v1237_v63, %v1236_v50  ;;  %v5028_v41 = vld [vmem:[#allocation2 + $0x10] sm:$0xff] }
 0x2ad   :  { %1369 = vperm.xlu1 %3990, %v1291_v0   ;;  %v1220_v0 = vsel %vm703_vm1, %v4944_v47, 0.0  ;;  %6084 = vst [vmem:[#allocation19_spill] sm:$0xff] %v5028_v41 }
 0x2ae   :  { %v1221_v12 = vrot.slane %v1220_v0, 4 }
 0x2af   :  { %2601 = vperm.xlu0 %4023, %v4939_v19  }
 0x2b0   :  { %v1222_v56 = vadd.f32 %v1221_v12, %v1220_v0 }
 0x2b1   :  { %3992 = vset.pattern.permute.xlu1 %v6046_v5 }
 0x2b2   :  { %1769 = vperm.xlu1 %3992, %v4839_v10   ;;  %v1223_v3 = vrot.slane %v1222_v56, 2 }
 0x2b3   :  { %4032 = vset.pattern.permute.xlu0 %v6050_v51 }
 0x2b4   :  { %v4959_v36 = vpop.permute.xlu1 %1733  ;;  %v4961_v60 = vpop.permute.xlu0 %2501  ;;  %2209 = vperm.xlu0 %4032, %v4932_v21   ;;  %v1224_v9 = vadd.f32 %v1223_v3, %v1222_v56  ;;  %v860_v56 = vmax.f32 %v858_v26, %v859_v39  ;;  %v1245_v3 = vadd.f32 %v1244_v31, %v1243_v40  ;;  %v5024_v39 = vld [vmem:[#allocation2 + $0x8] sm:$0xff] }
 0x2b5   :  { %6078 = vst [vmem:[#allocation13_spill] sm:$0xff] %v4959_v36  ;;  %v4224_v26 = vpop.eup %4223  ;;  %6083 = vst [vmem:[#allocation18_spill] sm:$0xff] %v5024_v39  ;;  %v2625_v30 = vmul.f32 %v5024_v39, %v4961_v60 }
 0x2b6   :  { %3994 = vset.pattern.permute.xlu1 %v6044_v2  ;;  %v1225_v49 = vrot.slane %v1224_v9, 1  ;;  %v1246_v40 = vrot.slane %v1245_v3, 1 }
 0x2b7   :  { %1364 = vperm.xlu1 %3994, %v4839_v10   ;;  %v1143_v10 = vsel %vm703_vm1, %v4968_v54, 0.0 }
 0x2b8   :  { %2217 = vperm.xlu0 %4032, %v4939_v19   ;;  %v1144_v18 = vrot.slane %v1143_v10, 4  ;;  %v1226_v48 = vadd.f32 %v1225_v49, %v1224_v9  ;;  %v1247_v60 = vadd.f32 %v1246_v40, %v1245_v3 }
 0x2b9   :  { %v4973_v7 = vpop.permute.xlu1 %1319  ;;  %v4975_v45 = vpop.permute.xlu0 %2117 }
 0x2ba   :  { %6079 = vst [vmem:[#allocation14_spill] sm:$0xff] %v4973_v7  ;;  %v1145_v0 = vadd.f32 %v1144_v18, %v1143_v10  ;;  %v880_v10 = vrot.slane %v879_v46, 4  ;;  %v861_v18 = vrot.slane %v860_v56, 2  ;;  %4227 = vrcp.f32 %v1226_v48 }
 0x2bb   :  { %3995 = vset.pattern.permute.xlu1 %v6048_v4  ;;  %4229 = vpow2.f32 %v1002_v42  ;;  %v893_v42 = vsel %vm703_vm1, %v4678_v37, -inf }
 0x2bc   :  { %2549 = vperm.xlu1 %3995, %v4980_v61   ;;  %4035 = vset.pattern.permute.xlu0 %v6046_v5  ;;  %v1146_v55 = vrot.slane %v1145_v0, 2  ;;  %v881_v57 = vmax.f32 %v879_v46, %v880_v10  ;;  %v862_v31 = vmax.f32 %v860_v56, %v861_v18  ;;  %v2663_v56 = vsel %vm108_vm0, %v2625_v30, 0.0 }
 0x2bd   :  { %1761 = vperm.xlu0 %4035, %v4891_v1   ;;  %4231 = vrcp.f32 %v1233_v33  ;;  %v2664_v33 = vrot.slane %v2663_v56, 4 }
 0x2be   :  { %v4992_v34 = vpop.permute.xlu1 %1729  ;;  %v2498_v29 = vpop.permute.xlu0 %2497  ;;  %v1147_v27 = vadd.f32 %v1146_v55, %v1145_v0  ;;  %v1159_v0 = vadd.f32 %v1158_v16, %v1157_v11  ;;  %v1239_v55 = vrot.slane %v1238_v6, 1  ;;  %v863_v62 = vrot.slane %v862_v31, 1  ;;  %v5043_v16 = vld [vmem:[#allocation2 + $0x18] sm:$0xff] }
 0x2bf   :  { %6080 = vst [vmem:[#allocation15_spill] sm:$0xff] %v4992_v34  ;;  %v2624_v9 = vmul.f32 %v5020_v17, %v2498_v29  ;;  %v882_v10 = vrot.slane %v881_v57, 2  ;;  %6086 = vst [vmem:[#allocation21_spill] sm:$0xff] %v5043_v16  ;;  %4233 = vrcp.f32 %v1247_v60 }
 0x2c0   :  { %3996 = vset.pattern.permute.xlu1 %v6046_v5  ;;  %v1148_v29 = vrot.slane %v1147_v27, 1  ;;  %v1160_v11 = vrot.slane %v1159_v0, 2  ;;  %v894_v5 = vrot.slane %v893_v42, 4 }
 0x2c1   :  { %1781 = vperm.xlu1 %3996, %v4980_v61   ;;  %1757 = vperm.xlu0 %4035, %v4791_v38   ;;  %v2656_v50 = vsel %vm108_vm0, %v2624_v9, 0.0  ;;  %v2241_v9 = vmul.f32 %v5024_v39, %v4975_v45 }
 0x2c2   :  { %v4997_v44 = vpop.permute.xlu0 %2509  ;;  %v1149_v48 = vadd.f32 %v1148_v29, %v1147_v27  ;;  %v2657_v63 = vrot.slane %v2656_v50, 4  ;;  %v1240_v27 = vadd.f32 %v1239_v55, %v1238_v6  ;;  %v883_v29 = vmax.f32 %v881_v57, %v882_v10 }
 0x2c3   :  { %v5001_v12 = vpop.permute.xlu1 %2113  ;;  %v2627_v3 = vmul.f32 %v5043_v16, %v4997_v44  ;;  %v1161_v44 = vadd.f32 %v1160_v11, %v1159_v0  ;;  %v2665_v55 = vadd.f32 %v2664_v33, %v2663_v56 }
 0x2c4   :  { %v2240_v40 = vmul.f32 %v5020_v17, %v5001_v12  ;;  %v2658_v45 = vadd.f32 %v2657_v63, %v2656_v50  ;;  %4235 = vrcp.f32 %v1240_v27 }
 0x2c5   :  { %3997 = vset.pattern.permute.xlu1 %v6050_v51  ;;  %1777 = vperm.xlu0 %4035, %v5004_v43   ;;  %v1162_v56 = vrot.slane %v1161_v44, 1  ;;  %4237 = vrcp.f32 %v1149_v48 }
 0x2c6   :  { %2165 = vperm.xlu1 %3997, %v4980_v61   ;;  %v2272_v0 = vsel %vm108_vm0, %v2240_v40, 0.0 }
 0x2c7   :  { %v5014_v23 = vpop.permute.xlu0 %2125  ;;  %v2273_v40 = vrot.slane %v2272_v0, 4  ;;  %v5096_v48 = vadd.f32 %v1162_v56, %v1161_v44 }
 0x2c8   :  { %v5016_v15 = vpop.permute.xlu1 %1314  ;;  %v2243_v50 = vmul.f32 %v5043_v16, %v5014_v23 }
 0x2c9   :  { %6081 = vst [vmem:[#allocation16_spill] sm:$0xff] %v5016_v15  ;;  %1793 = vperm.xlu0 %4035, %v4884_v35   ;;  %v2274_v16 = vadd.f32 %v2273_v40, %v2272_v0  ;;  %v6098_v40 = vmov 2  }
 0x2ca   :  { %3998 = vset.pattern.permute.xlu1 %v6044_v2 }
 0x2cb   :  { %1379 = vperm.xlu1 %3998, %v4980_v61   ;;  %v5035_v61 = vmul.f32 %v4224_v26, %v4917_v28  ;;  %v4226_v26 = vpop.eup %4225 }
 0x2cc   :  { %v2506_v49 = vpop.permute.xlu0 %2505  ;;  %v4228_v2 = vpop.eup %4227  ;;  %v5061_v6 = vmul.f32 %v4226_v26, %v4935_v59 }
 0x2cd   :  { %v2626_v25 = vmul.f32 %v5028_v41, %v2506_v49  ;;  %v5031_v46 = vpop.permute.xlu1 %1741  ;;  %1789 = vperm.xlu0 %4035, %v4862_v20   ;;  %v5073_v59 = vpop.eup %4229  ;;  %v5079_v26 = vmul.f32 %v4228_v2, %v4944_v47 }
 0x2ce   :  { %6085 = vst [vmem:[#allocation20_spill] sm:$0xff] %v5031_v46  ;;  %6090 = vst [vmem:[#allocation25_spill] sm:$0xff] %v5073_v59  ;;  %v4232_v33 = vpop.eup %4231  ;;  %v6095_v46 = vmov 1  }
 0x2cf   :  { %3999 = vset.pattern.permute.xlu1 %v6048_v4  ;;  %v2670_v8 = vsel %vm108_vm0, %v2626_v25, 0.0  ;;  %v864_v25 = vmax.f32 %v862_v31, %v863_v62  ;;  %v2677_v4 = vsel %vm108_vm0, %v2627_v3, 0.0  ;;  %v5065_v31 = vld [vmem:[#allocation2 + $0x28] sm:$0xff]  ;;  %v6091_v3 = vmov 3   ;;  %6092 = vst [vmem:[#allocation26_spill] sm:$0xff] %v5079_v26 }
 0x2d0   :  { %2545 = vperm.xlu1 %3999, %v5004_v43   ;;  %v2671_v30 = vrot.slane %v2670_v8, 4  ;;  %6088 = vst [vmem:[#allocation23_spill] sm:$0xff] %v5065_v31  ;;  %v2678_v10 = vrot.slane %v2677_v4, 4 }
 0x2d1   :  { %v2122_v28 = vpop.permute.xlu0 %2121  ;;  %1809 = vperm.xlu0 %4035, %v5035_v61   ;;  %v950_v27 = vsub.f32 %v4667_v14, %v864_v25  ;;  %v5093_v14 = vmul.f32 %v4232_v33, %v4949_v13 }
 0x2d2   :  { %v5047_v18 = vpop.permute.xlu1 %1329  ;;  %v2242_v49 = vmul.f32 %v5028_v41, %v2122_v28  ;;  %v2279_v28 = vsel %vm108_vm0, %v2241_v9, 0.0  ;;  %v2672_v11 = vadd.f32 %v2671_v30, %v2670_v8  ;;  %v895_v9 = vmax.f32 %v893_v42, %v894_v5  ;;  %v4234_v42 = vpop.eup %4233 }
 0x2d3   :  { %6087 = vst [vmem:[#allocation22_spill] sm:$0xff] %v5047_v18  ;;  %v2280_v23 = vrot.slane %v2279_v28, 4  ;;  %v2659_v8 = vrot.slane %v2658_v45, 2  ;;  %v884_v30 = vrot.slane %v883_v29, 1  ;;  %v5088_v5 = vsel %vm703_vm1, %v5073_v59, 0.0  ;;  %6094 = vst [vmem:[#allocation28_spill] sm:$0xff] %v5093_v14 }
 0x2d4   :  { %4000 = vset.pattern.permute.xlu1 %v6050_v51  ;;  %v2286_v62 = vsel %vm108_vm0, %v2242_v49, 0.0  ;;  %v2666_v49 = vrot.slane %v2665_v55, 2  ;;  %v2293_v51 = vsel %vm108_vm0, %v2243_v50, 0.0  ;;  %v2673_v18 = vrot.slane %v2672_v11, 2 }
 0x2d5   :  { %2161 = vperm.xlu1 %4000, %v5004_v43   ;;  %1825 = vperm.xlu0 %4035, %v4932_v21   ;;  %v2679_v2 = vadd.f32 %v2678_v10, %v2677_v4  ;;  %v896_v25 = vrot.slane %v895_v9, 2  ;;  %v2281_v50 = vadd.f32 %v2280_v23, %v2279_v28  ;;  %v2660_v19 = vadd.f32 %v2659_v8, %v2658_v45  ;;  %v5104_v28 = vld [vmem:[#allocation2 + $0x20] sm:$0xff] }
 0x2d6   :  { %v2518_v12 = vpop.permute.xlu0 %2517  ;;  %v2294_v41 = vrot.slane %v2293_v51, 4  ;;  %v5099_v4 = vmul.f32 1.442695, %v950_v27  ;;  %v5101_v10 = vmax.f32 %v883_v29, %v884_v30  ;;  %v2674_v13 = vadd.f32 %v2673_v18, %v2672_v11 }
 0x2d7   :  { %v2629_v57 = vmul.f32 %v5065_v31, %v2518_v12  ;;  %v5068_v60 = vpop.permute.xlu1 %1737  ;;  %v2287_v12 = vrot.slane %v2286_v62, 4  ;;  %v5113_v29 = vmax.f32 %v895_v9, %v896_v25  ;;  %v2282_v18 = vrot.slane %v2281_v50, 2 }
 0x2d8   :  { %6089 = vst [vmem:[#allocation24_spill] sm:$0xff] %v5068_v60  ;;  %v2275_v11 = vrot.slane %v2274_v16, 2  ;;  %v2675_v27 = vrot.slane %v2674_v13, 1  ;;  %4239 = vpow2.f32 %v5099_v4 }
 0x2d9   :  { %v2691_v63 = vsel %vm108_vm0, %v2629_v57, 0.0  ;;  %4003 = vset.pattern.permute.xlu1 %v6091_v3  ;;  %1821 = vperm.xlu0 %4035, %v4922_v53   ;;  %v2288_v60 = vadd.f32 %v2287_v12, %v2286_v62  ;;  %v4236_v62 = vpop.eup %4235  ;;  %4241 = vrcp.f32 %v5096_v48 }
 0x2da   :  { %2553 = vperm.xlu1 %4003, %v5061_v6   ;;  %v2692_v7 = vrot.slane %v2691_v63, 4  ;;  %v2276_v25 = vadd.f32 %v2275_v11, %v2274_v16 }
 0x2db   :  { %v2134_v57 = vpop.permute.xlu0 %2133  ;;  %v2289_v23 = vrot.slane %v2288_v60, 2 }
 0x2dc   :  { %v5084_v15 = vpop.permute.xlu1 %1324  ;;  %v2245_v47 = vmul.f32 %v5065_v31, %v2134_v57  ;;  %v2693_v33 = vadd.f32 %v2692_v7, %v2691_v63  ;;  %v2680_v31 = vrot.slane %v2679_v2, 2  ;;  %v2661_v7 = vrot.slane %v2660_v19, 1 }
 0x2dd   :  { %6093 = vst [vmem:[#allocation27_spill] sm:$0xff] %v5084_v15  ;;  %1841 = vperm.xlu0 %4035, %v5079_v26   ;;  %v2667_v15 = vadd.f32 %v2666_v49, %v2665_v55  ;;  %v5111_v55 = vmul.f32 %v4234_v42, %v4964_v58  ;;  %v2295_v63 = vadd.f32 %v2294_v41, %v2293_v51  ;;  %v4238_v51 = vpop.eup %4237 }
 0x2de   :  { %4004 = vset.pattern.permute.xlu1 %v6095_v46  ;;  %v2307_v45 = vsel %vm108_vm0, %v2245_v47, 0.0  ;;  %v2694_v30 = vrot.slane %v2693_v33, 2  ;;  %v2681_v58 = vadd.f32 %v2680_v31, %v2679_v2  ;;  %v5120_v47 = vmul.f32 %v4236_v62, %v4977_v32 }
 0x2df   :  { %1785 = vperm.xlu1 %4004, %v5061_v6   ;;  %6097 = vst [vmem:[#allocation30_spill] sm:$0xff] %v5111_v55  ;;  %v2668_v56 = vrot.slane %v2667_v15, 1  ;;  %v2308_v49 = vrot.slane %v2307_v45, 4  ;;  %v2283_v41 = vadd.f32 %v2282_v18, %v2281_v50  ;;  %v2662_v42 = vadd.f32 %v2661_v7, %v2660_v19  ;;  %v5133_v7 = vld [vmem:[#allocation2 + $0x38] sm:$0xff] }
 0x2e0   :  { %v2514_v57 = vpop.permute.xlu0 %2513  ;;  %6099 = vst [vmem:[#allocation31_spill] sm:$0xff] %v5120_v47  ;;  %v2296_v39 = vrot.slane %v2295_v63, 2  ;;  %v2290_v36 = vadd.f32 %v2289_v23, %v2288_v60  ;;  %v2676_v31 = vadd.f32 %v2675_v27, %v2674_v13  ;;  %v2695_v2 = vadd.f32 %v2694_v30, %v2693_v33 }
 0x2e1   :  { %v2628_v44 = vmul.f32 %v5104_v28, %v2514_v57  ;;  %v5107_v0 = vpop.permute.xlu1 %1749  ;;  %1845 = vperm.xlu0 %4035, %v5093_v14   ;;  %v2309_v34 = vadd.f32 %v2308_v49, %v2307_v45  ;;  %v2682_v32 = vrot.slane %v2681_v58, 1  ;;  %v5130_v19 = vmul.f32 %v4238_v51, %v4968_v54 }
 0x2e2   :  { %6096 = vst [vmem:[#allocation29_spill] sm:$0xff] %v5107_v0  ;;  %v2669_v0 = vadd.f32 %v2668_v56, %v2667_v15  ;;  %v2284_v15 = vrot.slane %v2283_v41, 1  ;;  %v2277_v60 = vrot.slane %v2276_v25, 1  ;;  %v2297_v45 = vadd.f32 %v2296_v39, %v2295_v63 }
 0x2e3   :  { %v2684_v8 = vsel %vm108_vm0, %v2628_v44, 0.0  ;;  %4005 = vset.pattern.permute.xlu1 %v6098_v40  ;;  %v2291_v62 = vrot.slane %v2290_v36, 1  ;;  %v2696_v56 = vrot.slane %v2695_v2, 1  ;;  %v2310_v54 = vrot.slane %v2309_v34, 2 }
 0x2e4   :  { %v2685_v12 = vrot.slane %v2684_v8, 4  ;;  %2169 = vperm.xlu1 %4005, %v5061_v6   ;;  %v3119_v16 = vsel %vm2912_vm2, %v2669_v0, %v2662_v42  ;;  %v2285_v39 = vadd.f32 %v2284_v15, %v2283_v41  ;;  %v2278_v63 = vadd.f32 %v2277_v60, %v2276_v25 }
 0x2e5   :  { %v2130_v9 = vpop.permute.xlu0 %2129  ;;  %1853 = vperm.xlu0 %4035, %v5111_v55   ;;  %v6101_v55 = vmov 0   ;;  %v2298_v30 = vrot.slane %v2297_v45, 1  ;;  %v2292_v49 = vadd.f32 %v2291_v62, %v2290_v36  ;;  %v2697_v51 = vadd.f32 %v2696_v56, %v2695_v2 }
 0x2e6   :  { %v2686_v57 = vadd.f32 %v2685_v12, %v2684_v8  ;;  %v5122_v44 = vpop.permute.xlu1 %1339  ;;  %v2244_v17 = vmul.f32 %v5104_v28, %v2130_v9  ;;  %v2683_v8 = vadd.f32 %v2682_v32, %v2681_v58  ;;  %v2311_v42 = vadd.f32 %v2310_v54, %v2309_v34 }
 0x2e7   :  { %6100 = vst [vmem:[#allocation32_spill] sm:$0xff] %v5122_v44  ;;  %v1172_v41 = vrot.slane %v5088_v5, 4  ;;  %v3055_v36 = vsel %vm2912_vm2, %v2285_v39, %v2278_v63  ;;  %v898_v2 = vrot.slane %v5113_v29, 1 }
 0x2e8   :  { %v2687_v59 = vrot.slane %v2686_v57, 2  ;;  %4006 = vset.pattern.permute.xlu1 %v6101_v55  ;;  %v2300_v50 = vsel %vm108_vm0, %v2244_v17, 0.0  ;;  %v3056_v15 = vsel %vm2914_vm3, %v2292_v49, %v3055_v36  ;;  %v2312_v4 = vrot.slane %v2311_v42, 1 }
 0x2e9   :  { %1384 = vperm.xlu1 %4006, %v5061_v6   ;;  %1849 = vperm.xlu0 %4035, %v5120_v47   ;;  %v2301_v18 = vrot.slane %v2300_v50, 4  ;;  %v3120_v6 = vsel %vm2914_vm3, %v2676_v31, %v3119_v16  ;;  %v1173_v56 = vadd.f32 %v1172_v41, %v5088_v5  ;;  %v899_v48 = vmax.f32 %v5113_v29, %v898_v2 }
 0x2ea   :  { %v2688_v13 = vadd.f32 %v2687_v59, %v2686_v57  ;;  %v2526_v33 = vpop.permute.xlu0 %2525  ;;  %v3121_v12 = vsel %vm2916_vm4, %v2683_v8, %v3120_v6  ;;  %v2313_v54 = vadd.f32 %v2312_v4, %v2311_v42 }
 0x2eb   :  { %v2631_v17 = vmul.f32 %v5133_v7, %v2526_v33  ;;  %v5136_v11 = vpop.permute.xlu1 %1745  ;;  %v2302_v0 = vadd.f32 %v2301_v18, %v2300_v50  ;;  %v953_v50 = vsub.f32 %v4672_v24, %v5101_v10  ;;  %v2299_v24 = vadd.f32 %v2298_v30, %v2297_v45  ;;  %v5166_v18 = vld [vmem:[#allocation2 + $0x30] sm:$0xff]  ;;  %v5185_v30 = vpop.eup %4239 }
 0x2ec   :  { %v2689_v23 = vrot.slane %v2688_v13, 1  ;;  %v1174_v63 = vrot.slane %v1173_v56, 2 }
 0x2ed   :  { %v2705_v59 = vsel %vm108_vm0, %v2631_v17, 0.0  ;;  %4007 = vset.pattern.permute.xlu1 %v6091_v3  ;;  %4037 = vset.pattern.permute.xlu0 %v6098_v40  ;;  %v2303_v58 = vrot.slane %v2302_v0, 2  ;;  %v3057_v6 = vsel %vm2916_vm4, %v2299_v24, %v3056_v15 }
 0x2ee   :  { %v2690_v27 = vadd.f32 %v2689_v23, %v2688_v13  ;;  %2565 = vperm.xlu1 %4007, %v5130_v19   ;;  %2205 = vperm.xlu0 %4037, %v4922_v53   ;;  %v2706_v31 = vrot.slane %v2705_v59, 4  ;;  %v1175_v42 = vadd.f32 %v1174_v63, %v1173_v56 }
 0x2ef   :  { %v2142_v9 = vpop.permute.xlu0 %2141  ;;  %v2304_v25 = vadd.f32 %v2303_v58, %v2302_v0  ;;  %v4242_v58 = vpop.eup %4241 }
 0x2f0   :  { %v3122_v57 = vsel %vm2918_vm5, %v2690_v27, %v3121_v12  ;;  %v5146_v32 = vpop.permute.xlu1 %1334  ;;  %v2707_v10 = vadd.f32 %v2706_v31, %v2705_v59  ;;  %v2247_v33 = vmul.f32 %v5133_v7, %v2142_v9  ;;  %v5196_v36 = vmul.f32 %v4242_v58, %v4999_v52 }
 0x2f1   :  { %6102 = vst [vmem:[#allocation33_spill] sm:$0xff] %v5146_v32  ;;  %v5156_v34 = vsel %vm2920_vm6, %v2697_v51, %v3122_v57  ;;  %v2305_v16 = vrot.slane %v2304_v25, 1  ;;  %v1178_v57 = vsel %vm703_vm1, %v5185_v30, 0.0 }
 0x2f2   :  { %4008 = vset.pattern.permute.xlu1 %v6095_v46  ;;  %4038 = vset.pattern.permute.xlu0 %v6101_v55  ;;  %v2708_v23 = vrot.slane %v2707_v10, 2  ;;  %v2321_v0 = vsel %vm108_vm0, %v2247_v33, 0.0 }
 0x2f3   :  { %1797 = vperm.xlu1 %4008, %v5130_v19   ;;  %1354 = vperm.xlu0 %4038, %v4891_v1   ;;  %v2306_v13 = vadd.f32 %v2305_v16, %v2304_v25  ;;  %v1010_v1 = vmul.f32 1.442695, %v953_v50  ;;  %v2322_v12 = vrot.slane %v2321_v0, 4  ;;  %v1176_v16 = vrot.slane %v1175_v42, 1 }
 0x2f4   :  { %v5163_v60 = vpop.permute.xlu0 %2533  ;;  %v2709_v49 = vadd.f32 %v2708_v23, %v2707_v10 }
 0x2f5   :  { %v2522_v62 = vpop.permute.xlu1 %2521  ;;  %v3058_v45 = vsel %vm2918_vm5, %v2306_v13, %v3057_v6  ;;  %4243 = vpow2.f32 %v1010_v1  ;;  %v2323_v25 = vadd.f32 %v2322_v12, %v2321_v0 }
 0x2f6   :  { %v2630_v17 = vmul.f32 %v5166_v18, %v2522_v62  ;;  %v5181_v29 = vsel %vm2920_vm6, %v2313_v54, %v3058_v45 }
 0x2f7   :  { %4009 = vset.pattern.permute.xlu1 %v6098_v40  ;;  %1349 = vperm.xlu0 %4038, %v4791_v38   ;;  %v955_v38 = vsub.f32 %v4678_v37, %v899_v48  ;;  %v2324_v4 = vrot.slane %v2323_v25, 2 }
 0x2f8   :  { %v2698_v8 = vsel %vm108_vm0, %v2630_v17, 0.0  ;;  %2181 = vperm.xlu1 %4009, %v5130_v19  }
 0x2f9   :  { %v2699_v59 = vrot.slane %v2698_v8, 4  ;;  %v2150_v39 = vpop.permute.xlu0 %2149  ;;  %v1014_v37 = vmul.f32 1.442695, %v955_v38  ;;  %v2325_v48 = vadd.f32 %v2324_v4, %v2323_v25 }
 0x2fa   :  { %v5178_v5 = vpop.permute.xlu1 %1753 }
 0x2fb   :  { %v2700_v27 = vadd.f32 %v2699_v59, %v2698_v8  ;;  %1374 = vperm.xlu0 %4038, %v5004_v43   ;;  %v2710_v43 = vrot.slane %v2709_v49, 1  ;;  %4245 = vpow2.f32 %v1014_v37  ;;  %v5220_v59 = vld [vmem:[#allocation2 + $0x48] sm:$0xff]  ;;  %v2326_v38 = vrot.slane %v2325_v48, 1 }
 0x2fc   :  { %4010 = vset.pattern.permute.xlu1 %v6101_v55  ;;  %v2249_v63 = vmul.f32 %v5220_v59, %v2150_v39 }
 0x2fd   :  { %v2701_v9 = vrot.slane %v2700_v27, 2  ;;  %1399 = vperm.xlu1 %4010, %v5130_v19   ;;  %v1179_v19 = vrot.slane %v1178_v57, 4 }
 0x2fe   :  { %v5189_v51 = vpop.permute.xlu0 %2537  ;;  %v2335_v37 = vsel %vm108_vm0, %v2249_v63, 0.0 }
 0x2ff   :  { %v2702_v31 = vadd.f32 %v2701_v9, %v2700_v27  ;;  %v2138_v41 = vpop.permute.xlu1 %2137  ;;  %1394 = vperm.xlu0 %4038, %v4884_v35   ;;  %v2711_v35 = vadd.f32 %v2710_v43, %v2709_v49  ;;  %v5204_v33 = vpop.eup %4243  ;;  %v1180_v17 = vadd.f32 %v1179_v19, %v1178_v57  ;;  %v5225_v49 = vld [vmem:[#allocation2 + $0x50] sm:$0xff] }
 0x300   :  { %v2246_v50 = vmul.f32 %v5166_v18, %v2138_v41  ;;  %v1199_v1 = vsel %vm703_vm1, %v5204_v33, 0.0 }
 0x301   :  { %v2703_v2 = vrot.slane %v2702_v31, 1  ;;  %4013 = vset.pattern.permute.xlu1 %v6091_v3  ;;  %v1181_v23 = vrot.slane %v1180_v17, 2  ;;  %v1200_v0 = vrot.slane %v1199_v1, 4 }
 0x302   :  { %v2314_v15 = vsel %vm108_vm0, %v2246_v50, 0.0  ;;  %2573 = vperm.xlu1 %4013, %v5196_v36  }
 0x303   :  { %v2704_v24 = vadd.f32 %v2703_v2, %v2702_v31  ;;  %1389 = vperm.xlu0 %4038, %v4862_v20   ;;  %v2315_v10 = vrot.slane %v2314_v15, 4  ;;  %v2154_v52 = vpop.permute.xlu0 %2153  ;;  %v1177_v20 = vadd.f32 %v1176_v16, %v1175_v42  ;;  %v1182_v42 = vadd.f32 %v1181_v23, %v1180_v17 }
 0x304   :  { %v5202_v13 = vpop.permute.xlu1 %1344  ;;  %v2250_v12 = vmul.f32 %v5225_v49, %v2154_v52  ;;  %v2327_v31 = vadd.f32 %v2326_v38, %v2325_v48  ;;  %v2336_v2 = vrot.slane %v2335_v37, 4 }
 0x305   :  { %6103 = vst [vmem:[#allocation34_spill] sm:$0xff] %v5202_v13  ;;  %v3124_v62 = vsel %vm2922_vm7, %v2704_v24, %v5156_v34  ;;  %v2316_v6 = vadd.f32 %v2315_v10, %v2314_v15  ;;  %4247 = vrcp.f32 %v1177_v20  ;;  %v5231_v9 = vpop.eup %4245  ;;  %v1183_v50 = vrot.slane %v1182_v42, 1 }
 0x306   :  { %4014 = vset.pattern.permute.xlu1 %v6095_v46  ;;  %v5210_v56 = vsel %vm2924_vm8, %v2711_v35, %v3124_v62  ;;  %v2342_v41 = vsel %vm108_vm0, %v2250_v12, 0.0  ;;  %v1213_v25 = vsel %vm703_vm1, %v5231_v9, 0.0  ;;  %v2337_v10 = vadd.f32 %v2336_v2, %v2335_v37  ;;  %v6108_v37 = vld [vmem:[#allocation17_spill] sm:$0xff]  ;;  %v6111_v2 = vld [vmem:[#allocation24_spill] sm:$0xff] }
 0x307   :  { %6104 = vst [vmem:[#allocation35_spill] sm:$0xff] %v5210_v56  ;;  %1805 = vperm.xlu1 %4014, %v5196_v36   ;;  %1414 = vperm.xlu0 %4038, %v5035_v61   ;;  %v2317_v45 = vrot.slane %v2316_v6, 2  ;;  %v2343_v15 = vrot.slane %v2342_v41, 4  ;;  %v1214_v35 = vrot.slane %v1213_v25, 4  ;;  %v1184_v4 = vadd.f32 %v1183_v50, %v1182_v42 }
 0x308   :  { %v5216_v54 = vpop.permute.xlu0 %2557 }
 0x309   :  { %v5218_v34 = vpop.permute.xlu1 %1765  ;;  %v2318_v8 = vadd.f32 %v2317_v45, %v2316_v6  ;;  %v2344_v52 = vadd.f32 %v2343_v15, %v2342_v41  ;;  %v1215_v6 = vadd.f32 %v1214_v35, %v1213_v25  ;;  %v6106_v45 = vld [vmem:[#allocation25_spill] sm:$0xff]  ;;  %4249 = vrcp.f32 %v1184_v4  ;;  %v6110_v25 = vld [vmem:[#allocation18_spill] sm:$0xff]  ;;  %v6112_v15 = vld [vmem:[#allocation19_spill] sm:$0xff] }
 0x30b   :  { %4015 = vset.pattern.permute.xlu1 %v6098_v40  ;;  %1434 = vperm.xlu0 %4038, %v4932_v21   ;;  %v2319_v27 = vrot.slane %v2318_v8, 1  ;;  %v1201_v21 = vadd.f32 %v1200_v0, %v1199_v1  ;;  %v5257_v1 = vld [vmem:[#allocation2 + $0x40] sm:$0xff]  ;;  %v1216_v38 = vrot.slane %v1215_v6, 2 }
 0x30c   :  { %2189 = vperm.xlu1 %4015, %v5196_v36  }
 0x30d   :  { %v5229_v58 = vpop.permute.xlu0 %2173  ;;  %v2320_v57 = vadd.f32 %v2319_v27, %v2318_v8  ;;  %v1202_v24 = vrot.slane %v1201_v21, 2  ;;  %v2338_v8 = vrot.slane %v2337_v10, 2 }
 0x30e   :  { %v5233_v39 = vpop.permute.xlu1 %1359 }
 0x30f   :  { %1429 = vperm.xlu0 %4038, %v4922_v53   ;;  %v3060_v43 = vsel %vm2922_vm7, %v2320_v57, %v5181_v29  ;;  %v4248_v29 = vpop.eup %4247  ;;  %v1203_v17 = vadd.f32 %v1202_v24, %v1201_v21  ;;  %v6107_v57 = vld [vmem:[#allocation15_spill] sm:$0xff]  ;;  %v1858_v24 = vmul.f32 %v6112_v15, %v6111_v2 }
 0x310   :  { %4017 = vset.pattern.permute.xlu1 %v6095_v46  ;;  %v5247_v53 = vsel %vm2924_vm8, %v2327_v31, %v3060_v43  ;;  %v5261_v23 = vmul.f32 %v4248_v29, %v6106_v45  ;;  %v1856_v21 = vmul.f32 %v6108_v37, %v6107_v57  ;;  %v2339_v31 = vadd.f32 %v2338_v8, %v2337_v10  ;;  %v6109_v43 = vld [vmem:[#allocation13_spill] sm:$0xff]  ;;  %v6113_v29 = vld [vmem:[#allocation30_spill] sm:$0xff] }
 0x311   :  { %1801 = vperm.xlu1 %4017, %v4906_v22   ;;  %6105 = vst [vmem:[#allocation36_spill] sm:$0xff] %v5247_v53  ;;  %v1204_v63 = vrot.slane %v1203_v17, 1  ;;  %v1857_v50 = vmul.f32 %v6110_v25, %v6109_v43  ;;  %v6117_v53 = vld [vmem:[#allocation23_spill] sm:$0xff] }
 0x312   :  { %v5244_v19 = vpop.permute.xlu0 %2561  ;;  %v1888_v10 = vsel %vm108_vm0, %v1856_v21, 0.0  ;;  %v2340_v8 = vrot.slane %v2339_v31, 1  ;;  %v6114_v21 = vld [vmem:[#allocation20_spill] sm:$0xff] }
 0x313   :  { %v5249_v16 = vpop.permute.xlu1 %2529  ;;  %1454 = vperm.xlu0 %4038, %v5079_v26   ;;  %v1205_v4 = vadd.f32 %v1204_v63, %v1203_v17  ;;  %v1895_v57 = vsel %vm108_vm0, %v1857_v50, 0.0  ;;  %v4250_v17 = vpop.eup %4249  ;;  %v1860_v63 = vmul.f32 %v5104_v28, %v5136_v11  ;;  %v1889_v37 = vrot.slane %v1888_v10, 4 }
 0x314   :  { %v1896_v25 = vrot.slane %v1895_v57, 4  ;;  %v2341_v2 = vadd.f32 %v2340_v8, %v2339_v31 }
 0x315   :  { %4019 = vset.pattern.permute.xlu1 %v6101_v55  ;;  %4251 = vrcp.f32 %v1205_v4  ;;  %v5301_v4 = vmul.f32 %v4250_v17, %v5185_v30  ;;  %v1890_v32 = vadd.f32 %v1889_v37, %v1888_v10  ;;  %v2633_v17 = vmul.f32 %v5220_v59, %v5163_v60 }
 0x316   :  { %1404 = vperm.xlu1 %4019, %v4906_v22   ;;  %v2345_v22 = vrot.slane %v2344_v52, 2  ;;  %v1862_v10 = vmul.f32 %v5166_v18, %v5178_v5 }
 0x317   :  { %v5254_v62 = vpop.permute.xlu0 %2177  ;;  %1459 = vperm.xlu0 %4038, %v5093_v14   ;;  %6118 = vst [vmem:[#allocation25_spill] sm:$0xff] %v5301_v4  ;;  %v2719_v60 = vsel %vm108_vm0, %v2633_v17, 0.0 }
 0x318   :  { %v2146_v20 = vpop.permute.xlu1 %2145  ;;  %v2346_v35 = vadd.f32 %v2345_v22, %v2344_v52  ;;  %v1902_v52 = vsel %vm108_vm0, %v1858_v24, 0.0  ;;  %v1930_v18 = vsel %vm108_vm0, %v1862_v10, 0.0 }
 0x319   :  { %v2248_v48 = vmul.f32 %v5257_v1, %v2146_v20  ;;  %v1217_v20 = vadd.f32 %v1216_v38, %v1215_v6  ;;  %v1903_v50 = vrot.slane %v1902_v52, 4 }
 0x31a   :  { %4020 = vset.pattern.permute.xlu1 %v6091_v3  ;;  %v2347_v22 = vrot.slane %v2346_v35, 1 }
 0x31b   :  { %v2328_v0 = vsel %vm108_vm0, %v2248_v48, 0.0  ;;  %2581 = vperm.xlu1 %4020, %v5261_v23   ;;  %1464 = vperm.xlu0 %4038, %v5120_v47   ;;  %v1218_v6 = vrot.slane %v1217_v20, 1 }
 0x31c   :  { %v2329_v27 = vrot.slane %v2328_v0, 4  ;;  %v5267_v12 = vpop.permute.xlu0 %2569  ;;  %v2348_v28 = vadd.f32 %v2347_v22, %v2346_v35  ;;  %v1904_v35 = vadd.f32 %v1903_v50, %v1902_v52  ;;  %v1865_v50 = vmul.f32 %v5220_v59, %v5218_v34 }
 0x31d   :  { %v5269_v42 = vpop.permute.xlu1 %2541  ;;  %v1219_v44 = vadd.f32 %v1218_v6, %v1217_v20 }
 0x31e   :  { %v2330_v41 = vadd.f32 %v2329_v27, %v2328_v0 }
 0x31f   :  { %4021 = vset.pattern.permute.xlu1 %v6095_v46  ;;  %1469 = vperm.xlu0 %4038, %v6113_v29   ;;  %4253 = vrcp.f32 %v1219_v44  ;;  %v2634_v44 = vmul.f32 %v5225_v49, %v5189_v51  ;;  %v2720_v51 = vrot.slane %v2719_v60, 4 }
 0x320   :  { %v2331_v48 = vrot.slane %v2330_v41, 2  ;;  %1813 = vperm.xlu1 %4021, %v5261_v23  }
 0x321   :  { %v5280_v45 = vpop.permute.xlu0 %2185 }
 0x322   :  { %v2332_v0 = vadd.f32 %v2331_v48, %v2330_v41  ;;  %v5283_v27 = vpop.permute.xlu1 %1773  ;;  %v6115_v41 = vld [vmem:[#allocation21_spill] sm:$0xff] }
 0x323   :  { %4062 = vset.pattern.permute.xlu0 %v6091_v3  ;;  %v1859_v43 = vmul.f32 %v6115_v41, %v6114_v21  ;;  %v6116_v48 = vld [vmem:[#allocation29_spill] sm:$0xff]  ;;  %v1916_v21 = vsel %vm108_vm0, %v1860_v63, 0.0  ;;  %v1891_v63 = vrot.slane %v1890_v32, 2 }
 0x324   :  { %v2333_v38 = vrot.slane %v2332_v0, 1  ;;  %4022 = vset.pattern.permute.xlu1 %v6091_v3  ;;  %v1861_v13 = vmul.f32 %v6117_v53, %v6116_v48  ;;  %v1897_v53 = vadd.f32 %v1896_v25, %v1895_v57  ;;  %v1917_v22 = vrot.slane %v1916_v21, 4  ;;  %v4252_v57 = vpop.eup %4251 }
 0x325   :  { %2577 = vperm.xlu1 %4022, %v5035_v61   ;;  %v1909_v31 = vsel %vm108_vm0, %v1859_v43, 0.0  ;;  %v1892_v5 = vadd.f32 %v1891_v63, %v1890_v32 }
 0x326   :  { %v2334_v15 = vadd.f32 %v2333_v38, %v2332_v0  ;;  %v5294_v24 = vpop.permute.xlu0 %2589  ;;  %v1923_v30 = vsel %vm108_vm0, %v1861_v13, 0.0  ;;  %v1910_v20 = vrot.slane %v1909_v31, 4  ;;  %v1898_v52 = vrot.slane %v1897_v53, 2 }
 0x327   :  { %v5298_v11 = vpop.permute.xlu1 %2157  ;;  %v1905_v38 = vrot.slane %v1904_v35, 2  ;;  %v1924_v37 = vrot.slane %v1923_v30, 4  ;;  %v1918_v43 = vadd.f32 %v1917_v22, %v1916_v21  ;;  %v1931_v22 = vrot.slane %v1930_v18, 4 }
 0x328   :  { %v3062_v41 = vsel %vm2912_vm2, %v2341_v2, %v2334_v15  ;;  %v1911_v25 = vadd.f32 %v1910_v20, %v1909_v31  ;;  %v5332_v15 = vmul.f32 %v4252_v57, %v5204_v33  ;;  %v1899_v48 = vadd.f32 %v1898_v52, %v1897_v53 }
 0x329   :  { %2585 = vperm.xlu1 %4022, %v5301_v4   ;;  %v5308_v8 = vsel %vm2914_vm3, %v2348_v28, %v3062_v41  ;;  %v1906_v28 = vadd.f32 %v1905_v38, %v1904_v35  ;;  %v1925_v21 = vadd.f32 %v1924_v37, %v1923_v30  ;;  %v5334_v41 = vld [vmem:[#allocation2 + $0x78] sm:$0xff]  ;;  %v1919_v32 = vrot.slane %v1918_v43, 2  ;;  %v4254_v30 = vpop.eup %4253 }
 0x32a   :  { %v5310_v0 = vpop.permute.xlu0 %2593  ;;  %v2639_v31 = vmul.f32 %v5334_v41, %v5216_v54  ;;  %v1912_v20 = vrot.slane %v1911_v25, 2  ;;  %v1893_v33 = vrot.slane %v1892_v5, 1  ;;  %v2726_v53 = vsel %vm108_vm0, %v2634_v44, 0.0 }
 0x32b   :  { %6119 = vst [vmem:[#allocation15_spill] sm:$0xff] %v5310_v0  ;;  %v1951_v35 = vsel %vm108_vm0, %v1865_v50, 0.0  ;;  %v1900_v17 = vrot.slane %v1899_v48, 1  ;;  %v1907_v10 = vrot.slane %v1906_v28, 1  ;;  %v1926_v63 = vrot.slane %v1925_v21, 2 }
 0x32c   :  { %v5317_v6 = vpop.permute.xlu1 %1369  ;;  %v2761_v54 = vsel %vm108_vm0, %v2639_v31, 0.0  ;;  %v1920_v52 = vadd.f32 %v1919_v32, %v1918_v43  ;;  %v2721_v38 = vadd.f32 %v2720_v51, %v2719_v60  ;;  %v1932_v37 = vadd.f32 %v1931_v22, %v1930_v18 }
 0x32d   :  { %6120 = vst [vmem:[#allocation17_spill] sm:$0xff] %v5317_v6  ;;  %4024 = vset.pattern.permute.xlu1 %v6095_v46  ;;  %v1913_v56 = vadd.f32 %v1912_v20, %v1911_v25  ;;  %v1952_v44 = vrot.slane %v1951_v35, 4  ;;  %v1894_v50 = vadd.f32 %v1893_v33, %v1892_v5  ;;  %v2762_v0 = vrot.slane %v2761_v54, 4  ;;  %v5383_v6 = vld [vmem:[#allocation2 + $0x58] sm:$0xff] }
 0x32e   :  { %1817 = vperm.xlu1 %4024, %v5301_v4   ;;  %v5321_v13 = vpop.permute.xlu0 %2601  ;;  %v2727_v4 = vrot.slane %v2726_v53, 4  ;;  %v5354_v31 = vmul.f32 %v4254_v30, %v5231_v9  ;;  %v1901_v43 = vadd.f32 %v1900_v17, %v1899_v48  ;;  %v1908_v60 = vadd.f32 %v1907_v10, %v1906_v28 }
 0x32f   :  { %6121 = vst [vmem:[#allocation13_spill] sm:$0xff] %v5321_v13  ;;  %v1481_v13 = vmul.f32 %v5220_v59, %v5233_v39  ;;  %v1927_v18 = vadd.f32 %v1926_v63, %v1925_v21  ;;  %v2255_v32 = vmul.f32 %v5334_v41, %v5229_v58  ;;  %v1921_v51 = vrot.slane %v1920_v52, 1 }
 0x330   :  { %6125 = vst [vmem:[#allocation20_spill] sm:$0xff] %v5354_v31  ;;  %v2722_v25 = vrot.slane %v2721_v38, 2  ;;  %v1933_v22 = vrot.slane %v1932_v37, 2  ;;  %v2632_v20 = vmul.f32 %v5257_v1, %v5249_v16  ;;  %v1914_v33 = vrot.slane %v1913_v56, 1 }
 0x331   :  { %v5329_v2 = vpop.permute.xlu1 %1769  ;;  %v2728_v59 = vadd.f32 %v2727_v4, %v2726_v53  ;;  %v1953_v39 = vadd.f32 %v1952_v44, %v1951_v35  ;;  %v2983_v48 = vsel %vm2912_vm2, %v1901_v43, %v1894_v50  ;;  %v1567_v28 = vsel %vm108_vm0, %v1481_v13, 0.0  ;;  %v5373_v43 = vld [vmem:[#allocation2 + $0x80] sm:$0xff] }
 0x332   :  { %4025 = vset.pattern.permute.xlu1 %v6091_v3  ;;  %v2763_v21 = vadd.f32 %v2762_v0, %v2761_v54  ;;  %v2984_v58 = vsel %vm2914_vm3, %v1908_v60, %v2983_v48  ;;  %v1928_v30 = vrot.slane %v1927_v18, 1  ;;  %v2377_v16 = vsel %vm108_vm0, %v2255_v32, 0.0 }
 0x333   :  { %2597 = vperm.xlu1 %4025, %v5332_v15   ;;  %v5340_v34 = vpop.permute.xlu0 %2209  ;;  %v1922_v17 = vadd.f32 %v1921_v51, %v1920_v52  ;;  %v2723_v10 = vadd.f32 %v2722_v25, %v2721_v38  ;;  %v1934_v63 = vadd.f32 %v1933_v22, %v1932_v37  ;;  %v2712_v4 = vsel %vm108_vm0, %v2632_v20, 0.0 }
 0x334   :  { %6122 = vst [vmem:[#allocation18_spill] sm:$0xff] %v5340_v34  ;;  %v1915_v53 = vadd.f32 %v1914_v33, %v1913_v56  ;;  %v2729_v35 = vrot.slane %v2728_v59, 2  ;;  %v1954_v44 = vrot.slane %v1953_v39, 2  ;;  %v2764_v0 = vrot.slane %v2763_v21, 2 }
 0x335   :  { %v2378_v54 = vrot.slane %v2377_v16, 4  ;;  %v2640_v60 = vmul.f32 %v5373_v43, %v5244_v19  ;;  %v2713_v38 = vrot.slane %v2712_v4, 4  ;;  %v1929_v56 = vadd.f32 %v1928_v30, %v1927_v18 }
 0x336   :  { %v5345_v57 = vpop.permute.xlu1 %1364  ;;  %v2985_v52 = vsel %vm2916_vm4, %v1915_v53, %v2984_v58  ;;  %v2724_v32 = vrot.slane %v2723_v10, 1  ;;  %v1935_v51 = vrot.slane %v1934_v63, 1  ;;  %v2730_v25 = vadd.f32 %v2729_v35, %v2728_v59 }
 0x337   :  { %6123 = vst [vmem:[#allocation24_spill] sm:$0xff] %v5345_v57  ;;  %4026 = vset.pattern.permute.xlu1 %v6095_v46  ;;  %v5348_v34 = vpop.permute.xlu0 %2217  ;;  %v2986_v37 = vsel %vm2918_vm5, %v1922_v17, %v2985_v52  ;;  %v1955_v22 = vadd.f32 %v1954_v44, %v1953_v39  ;;  %v2765_v57 = vadd.f32 %v2764_v0, %v2763_v21  ;;  %v6126_v17 = vld [vmem:[#allocation12_spill] sm:$0xff] }
 0x338   :  { %6124 = vst [vmem:[#allocation19_spill] sm:$0xff] %v5348_v34  ;;  %1829 = vperm.xlu1 %4026, %v5332_v15   ;;  %v1568_v34 = vrot.slane %v1567_v28, 4  ;;  %v2379_v19 = vadd.f32 %v2378_v54, %v2377_v16  ;;  %v2251_v58 = vmul.f32 %v5383_v6, %v5298_v11  ;;  %v2714_v30 = vadd.f32 %v2713_v38, %v2712_v4 }
 0x339   :  { %v5390_v59 = vadd.f32 %v2724_v32, %v2723_v10  ;;  %v2731_v39 = vrot.slane %v2730_v25, 1  ;;  %v1956_v53 = vrot.slane %v1955_v22, 1  ;;  %v2766_v35 = vrot.slane %v2765_v57, 1  ;;  %v5418_v32 = vld [vmem:[#allocation2 + $0x60] sm:$0xff] }
 0x33a   :  { %v1569_v20 = vadd.f32 %v1568_v34, %v1567_v28  ;;  %v1936_v34 = vadd.f32 %v1935_v51, %v1934_v63  ;;  %v2380_v11 = vrot.slane %v2379_v19, 2  ;;  %v2349_v44 = vsel %vm108_vm0, %v2251_v58, 0.0  ;;  %6130 = vst [vmem:[#allocation37_spill] sm:$0xff] %v5418_v32 }
 0x33b   :  { %v5360_v5 = vpop.permute.xlu1 %2549  ;;  %v2715_v4 = vrot.slane %v2714_v30, 2  ;;  %v2256_v10 = vmul.f32 %v5373_v43, %v5254_v62  ;;  %v2635_v63 = vmul.f32 %v5383_v6, %v5269_v42  ;;  %v1866_v0 = vmul.f32 %v5225_v49, %v5329_v2 }
 0x33c   :  { %4027 = vset.pattern.permute.xlu1 %v6091_v3  ;;  %v1762_v9 = vpop.permute.xlu0 %1761  ;;  %v1867_v38 = vmul.f32 %v5383_v6, %v5283_v27  ;;  %v5425_v27 = vadd.f32 %v2766_v35, %v2765_v57  ;;  %v5427_v58 = vadd.f32 %v2380_v11, %v2379_v19 }
 0x33d   :  { %2605 = vperm.xlu1 %4027, %v5354_v31   ;;  %v1864_v33 = vmul.f32 %v5257_v1, %v1762_v9  ;;  %v2987_v1 = vsel %vm2920_vm6, %v1929_v56, %v2986_v37  ;;  %v1570_v9 = vrot.slane %v1569_v20, 2  ;;  %v2350_v37 = vrot.slane %v2349_v44, 4 }
 0x33e   :  { %v5414_v62 = vsel %vm2922_vm7, %v1936_v34, %v2987_v1  ;;  %6131 = vst [vmem:[#allocation38_spill] sm:$0xff] %v5427_v58  ;;  %v2384_v34 = vsel %vm108_vm0, %v2256_v10, 0.0 }
 0x33f   :  { %v1944_v21 = vsel %vm108_vm0, %v1864_v33, 0.0  ;;  %6128 = vst [vmem:[#allocation29_spill] sm:$0xff] %v5414_v62  ;;  %v5416_v42 = vadd.f32 %v1570_v9, %v1569_v20  ;;  %v5421_v33 = vadd.f32 %v2731_v39, %v2730_v25  ;;  %v2733_v20 = vsel %vm108_vm0, %v2635_v63, 0.0  ;;  %v5434_v25 = vld [vmem:[#allocation2 + $0x68] sm:$0xff] }
 0x340   :  { %v5369_v50 = vpop.permute.xlu1 %1781  ;;  %v5371_v13 = vpop.permute.xlu0 %1757  ;;  %v1945_v56 = vrot.slane %v1944_v21, 4  ;;  %v2351_v39 = vadd.f32 %v2350_v37, %v2349_v44  ;;  %v2385_v35 = vrot.slane %v2384_v34, 4  ;;  %v2734_v11 = vrot.slane %v2733_v20, 4 }
 0x341   :  { %4028 = vset.pattern.permute.xlu1 %v6095_v46  ;;  %v2768_v46 = vsel %vm108_vm0, %v2640_v60, 0.0  ;;  %v5406_v60 = vld [vmem:[#allocation2 + $0x90] sm:$0xff]  ;;  %6129 = vst [vmem:[#allocation23_spill] sm:$0xff] %v5416_v42  ;;  %v1869_v57 = vmul.f32 %v5434_v25, %v5369_v50  ;;  %v2637_v50 = vmul.f32 %v5434_v25, %v5360_v5 }
 0x342   :  { %1837 = vperm.xlu1 %4028, %v5354_v31   ;;  %v2769_v28 = vrot.slane %v2768_v46, 4  ;;  %6127 = vst [vmem:[#allocation21_spill] sm:$0xff] %v5406_v60  ;;  %v2642_v52 = vmul.f32 %v5406_v60, %v5267_v12  ;;  %v5423_v12 = vadd.f32 %v1956_v53, %v1955_v22  ;;  %v1946_v9 = vadd.f32 %v1945_v56, %v1944_v21 }
 0x343   :  { %v2352_v19 = vrot.slane %v2351_v39, 2  ;;  %v5454_v31 = vadd.f32 %v2385_v35, %v2384_v34  ;;  %v2735_v5 = vadd.f32 %v2734_v11, %v2733_v20  ;;  %v5464_v34 = vmul.f32 %v5406_v60, %v5280_v45 }
 0x344   :  { %v1778_v48 = vpop.permute.xlu0 %1777  ;;  %v2770_v2 = vadd.f32 %v2769_v28, %v2768_v46  ;;  %v1958_v46 = vsel %vm108_vm0, %v1866_v0, 0.0  ;;  %v2782_v1 = vsel %vm108_vm0, %v2642_v52, 0.0  ;;  %v1947_v52 = vrot.slane %v1946_v9, 2 }
 0x345   :  { %v5387_v18 = vpop.permute.xlu1 %2165  ;;  %v2783_v63 = vrot.slane %v2782_v1, 4  ;;  %v2353_v20 = vadd.f32 %v2352_v19, %v2351_v39 }
 0x346   :  { %1833 = vperm.xlu1 %4028, %v6126_v17  }
 0x348   :  { %v5394_v16 = vpop.permute.xlu0 %1793 }
 0x34a   :  { %v5403_v54 = vpop.permute.xlu1 %1379  ;;  %4029 = vset.pattern.permute.xlu1 %v6091_v3  ;;  %v1868_v3 = vmul.f32 %v5418_v32, %v1778_v48  ;;  %v1965_v48 = vsel %vm108_vm0, %v1867_v38, 0.0  ;;  %v1979_v38 = vsel %vm108_vm0, %v1869_v57, 0.0 }
 0x34b   :  { %2613 = vperm.xlu1 %4029, %v5093_v14   ;;  %v2716_v14 = vadd.f32 %v2715_v4, %v2714_v30  ;;  %v2771_v30 = vrot.slane %v2770_v2, 2  ;;  %v1959_v4 = vrot.slane %v1958_v46, 4  ;;  %v1966_v0 = vrot.slane %v1965_v48, 4 }
 0x34c   :  { %v1790_v51 = vpop.permute.xlu0 %1789  ;;  %v1972_v28 = vsel %vm108_vm0, %v1868_v3, 0.0 }
 0x34d   :  { %v2717_v10 = vrot.slane %v2716_v14, 1  ;;  %v1973_v56 = vrot.slane %v1972_v28, 4  ;;  %v5450_v3 = vadd.f32 %v2771_v30, %v2770_v2  ;;  %v1960_v17 = vadd.f32 %v1959_v4, %v1958_v46  ;;  %v5470_v4 = vld [vmem:[#allocation2 + $0x70] sm:$0xff] }
 0x34e   :  { %v1871_v57 = vmul.f32 %v5334_v41, %v1790_v51  ;;  %v1967_v42 = vadd.f32 %v1966_v0, %v1965_v48  ;;  %v5459_v2 = vadd.f32 %v2783_v63, %v2782_v1  ;;  %v1948_v30 = vadd.f32 %v1947_v52, %v1946_v9 }
 0x34f   :  { %v2546_v22 = vpop.permute.xlu1 %2545  ;;  %2609 = vperm.xlu1 %4029, %v5079_v26   ;;  %v2718_v37 = vadd.f32 %v2717_v10, %v2716_v14  ;;  %v1974_v58 = vadd.f32 %v1973_v56, %v1972_v28  ;;  %v1961_v48 = vrot.slane %v1960_v17, 2  ;;  %v2736_v9 = vrot.slane %v2735_v5, 2 }
 0x350   :  { %v5441_v53 = vpop.permute.xlu0 %1809  ;;  %v2636_v21 = vmul.f32 %v5418_v32, %v2546_v22  ;;  %v1968_v28 = vrot.slane %v1967_v42, 2  ;;  %v2354_v63 = vrot.slane %v2353_v20, 1 }
 0x351   :  { %6132 = vst [vmem:[#allocation39_spill] sm:$0xff] %v5441_v53  ;;  %v1980_v53 = vrot.slane %v1979_v38, 4  ;;  %v5475_v19 = vsel %vm2912_vm2, %v5390_v59, %v2718_v37  ;;  %v1975_v39 = vrot.slane %v1974_v58, 2  ;;  %v1962_v56 = vadd.f32 %v1961_v48, %v1960_v17 }
 0x352   :  { %v2740_v44 = vsel %vm108_vm0, %v2636_v21, 0.0  ;;  %v2747_v21 = vsel %vm108_vm0, %v2637_v50, 0.0  ;;  %v2737_v37 = vadd.f32 %v2736_v9, %v2735_v5 }
 0x353   :  { %2621 = vperm.xlu1 %4029, %v6113_v29   ;;  %v2741_v22 = vrot.slane %v2740_v44, 4  ;;  %v2748_v35 = vrot.slane %v2747_v21, 4  ;;  %v1981_v11 = vadd.f32 %v1980_v53, %v1979_v38  ;;  %v1963_v17 = vrot.slane %v1962_v56, 1 }
 0x354   :  { %v2162_v26 = vpop.permute.xlu1 %2161  ;;  %v5452_v62 = vpop.permute.xlu0 %1825 }
 0x355   :  { %6133 = vst [vmem:[#allocation40_spill] sm:$0xff] %v5452_v62  ;;  %v2252_v29 = vmul.f32 %v5418_v32, %v2162_v26  ;;  %v2742_v46 = vadd.f32 %v2741_v22, %v2740_v44  ;;  %v1993_v26 = vsel %vm108_vm0, %v1871_v57, 0.0  ;;  %v2749_v44 = vadd.f32 %v2748_v35, %v2747_v21 }
 0x356   :  { %v1994_v0 = vrot.slane %v1993_v26, 4  ;;  %v1969_v22 = vadd.f32 %v1968_v28, %v1967_v42  ;;  %v1982_v57 = vrot.slane %v1981_v11, 2 }
 0x357   :  { %2617 = vperm.xlu1 %4029, %v5120_v47   ;;  %v2356_v41 = vsel %vm108_vm0, %v2252_v29, 0.0  ;;  %v1949_v29 = vrot.slane %v1948_v30, 1  ;;  %v2743_v50 = vrot.slane %v2742_v46, 2  ;;  %v1976_v47 = vadd.f32 %v1975_v39, %v1974_v58 }
 0x358   :  { %v5467_v51 = vpop.permute.xlu0 %1821  ;;  %v2357_v14 = vrot.slane %v2356_v41, 4  ;;  %v1995_v62 = vadd.f32 %v1994_v0, %v1993_v26  ;;  %v2750_v21 = vrot.slane %v2749_v44, 2  ;;  %v1970_v58 = vrot.slane %v1969_v22, 1 }
 0x359   :  { %6134 = vst [vmem:[#allocation41_spill] sm:$0xff] %v5467_v51  ;;  %v2554_v1 = vpop.permute.xlu1 %2553  ;;  %v1977_v26 = vrot.slane %v1976_v47, 1 }
 0x35a   :  { %v2638_v45 = vmul.f32 %v5470_v4, %v2554_v1  ;;  %v2358_v10 = vadd.f32 %v2357_v14, %v2356_v41  ;;  %v1950_v1 = vadd.f32 %v1949_v29, %v1948_v30  ;;  %v2738_v30 = vrot.slane %v2737_v37, 1 }
 0x35b   :  { %4030 = vset.pattern.permute.xlu1 %v6101_v55  ;;  %v1996_v29 = vrot.slane %v1995_v62, 2 }
 0x35c   :  { %v2754_v52 = vsel %vm108_vm0, %v2638_v45, 0.0  ;;  %1409 = vperm.xlu1 %4030, %v5196_v36   ;;  %v5480_v53 = vpop.permute.xlu0 %1841  ;;  %v2359_v59 = vrot.slane %v2358_v10, 2  ;;  %v2355_v45 = vadd.f32 %v2354_v63, %v2353_v20  ;;  %v2744_v36 = vadd.f32 %v2743_v50, %v2742_v46 }
 0x35d   :  { %v2755_v41 = vrot.slane %v2754_v52, 4  ;;  %v2990_v20 = vsel %vm2912_vm2, %v5423_v12, %v1950_v1  ;;  %v1983_v46 = vadd.f32 %v1982_v57, %v1981_v11  ;;  %v2751_v50 = vadd.f32 %v2750_v21, %v2749_v44 }
 0x35e   :  { %v1786_v14 = vpop.permute.xlu1 %1785  ;;  %v2360_v32 = vadd.f32 %v2359_v59, %v2358_v10  ;;  %v2745_v39 = vrot.slane %v2744_v36, 1  ;;  %v3064_v12 = vsel %vm2916_vm4, %v2355_v45, %v5308_v8  ;;  %v2739_v11 = vadd.f32 %v2738_v30, %v2737_v37 }
 0x35f   :  { %v1870_v60 = vmul.f32 %v5470_v4, %v1786_v14  ;;  %v2756_v51 = vadd.f32 %v2755_v41, %v2754_v52  ;;  %v1971_v57 = vadd.f32 %v1970_v58, %v1969_v22  ;;  %v1978_v44 = vadd.f32 %v1977_v26, %v1976_v47 }
 0x360   :  { %4031 = vset.pattern.permute.xlu1 %v6098_v40  ;;  %v5485_v38 = vpop.permute.xlu0 %1845  ;;  %v2361_v5 = vrot.slane %v2360_v32, 1  ;;  %v1997_v41 = vadd.f32 %v1996_v29, %v1995_v62  ;;  %v2746_v14 = vadd.f32 %v2745_v39, %v2744_v36  ;;  %v2773_v45 = vrot.slane %v5450_v3, 1  ;;  %v6136_v29 = vld [vmem:[#allocation17_spill] sm:$0xff] }
 0x361   :  { %v1986_v42 = vsel %vm108_vm0, %v1870_v60, 0.0  ;;  %2193 = vperm.xlu1 %4031, %v5035_v61   ;;  %v2757_v48 = vrot.slane %v2756_v51, 2  ;;  %v2398_v61 = vsel %vm108_vm0, %v5464_v34, 0.0  ;;  %v1964_v60 = vadd.f32 %v1963_v17, %v1962_v56 }
 0x362   :  { %v1987_v35 = vrot.slane %v1986_v42, 4  ;;  %v2362_v9 = vadd.f32 %v2361_v5, %v2360_v32  ;;  %v5500_v32 = vld [vmem:[#allocation2 + $0xb8] sm:$0xff]  ;;  %v1984_v56 = vrot.slane %v1983_v46, 1  ;;  %v2399_v21 = vrot.slane %v2398_v61, 4 }
 0x363   :  { %v5491_v28 = vpop.permute.xlu1 %2169  ;;  %v2758_v10 = vadd.f32 %v2757_v48, %v2756_v51  ;;  %v2647_v52 = vmul.f32 %v5500_v32, %v5294_v24  ;;  %v2991_v34 = vsel %vm2914_vm3, %v1964_v60, %v2990_v20  ;;  %v3127_v24 = vsel %vm2914_vm3, %v5421_v33, %v5475_v19 }
 0x364   :  { %v1988_v63 = vadd.f32 %v1987_v35, %v1986_v42  ;;  %v5493_v0 = vpop.permute.xlu0 %1853  ;;  %v5505_v59 = vsel %vm2918_vm5, %v2362_v9, %v3064_v12  ;;  %v2752_v22 = vrot.slane %v2751_v50, 1  ;;  %v6135_v47 = vrot.slane %v5459_v2, 2  ;;  %v5536_v12 = vld [vmem:[#allocation2 + $0x88] sm:$0xff] }
 0x365   :  { %2197 = vperm.xlu1 %4031, %v5261_v23   ;;  %v2759_v1 = vrot.slane %v2758_v10, 1  ;;  %v2817_v36 = vsel %vm108_vm0, %v2647_v52, 0.0  ;;  %v2992_v5 = vsel %vm2916_vm4, %v1971_v57, %v2991_v34  ;;  %v3128_v30 = vsel %vm2916_vm4, %v2739_v11, %v3127_v24  ;;  %v6138_v52 = vld [vmem:[#allocation24_spill] sm:$0xff]  ;;  %v3168_v57 = vld [vmem:[#allocation5 + $0x8] sm:$0xff]  ;;  %v3170_v34 = vld [vmem:[#allocation5 + $0x18] sm:$0xff] }
 0x366   :  { %v1989_v51 = vrot.slane %v1988_v63, 2  ;;  %v2786_v62 = vadd.f32 %v6135_v47, %v5459_v2  ;;  %v1985_v58 = vadd.f32 %v1984_v56, %v1983_v46  ;;  %v1863_v48 = vmul.f32 %v5133_v7, %v5371_v13 }
 0x367   :  { %v2993_v33 = vsel %vm2918_vm5, %v1978_v44, %v2992_v5  ;;  %v1998_v19 = vrot.slane %v1997_v41, 1  ;;  %v3129_v35 = vsel %vm2918_vm5, %v2746_v14, %v3128_v30  ;;  %v2760_v20 = vadd.f32 %v2759_v1, %v2758_v10  ;;  %v3169_v5 = vld [vmem:[#allocation5 + $0x10] sm:$0xff] }
 0x368   :  { %v1990_v17 = vadd.f32 %v1989_v51, %v1988_v63  ;;  %v5508_v8 = vpop.permute.xlu1 %1384  ;;  %v5510_v37 = vpop.permute.xlu0 %1849  ;;  %v5528_v2 = vadd.f32 %v2773_v45, %v5450_v3  ;;  %v2387_v9 = vrot.slane %v5454_v31, 2  ;;  %v1483_v39 = vmul.f32 %v5383_v6, %v6136_v29  ;;  %v6140_v29 = vld [vmem:[#allocation13_spill] sm:$0xff] }
 0x369   :  { %2213 = vperm.xlu1 %4031, %v5332_v15   ;;  %v2753_v63 = vadd.f32 %v2752_v22, %v2751_v50  ;;  %v2400_v7 = vadd.f32 %v2399_v21, %v2398_v61  ;;  %v2818_v13 = vrot.slane %v2817_v36, 4  ;;  %v2994_v3 = vsel %vm2920_vm6, %v1985_v58, %v2993_v33 }
 0x36a   :  { %v1991_v42 = vrot.slane %v1990_v17, 1  ;;  %v2787_v11 = vrot.slane %v2786_v62, 1  ;;  %v1482_v6 = vmul.f32 %v5225_v49, %v6138_v52  ;;  %v1937_v61 = vsel %vm108_vm0, %v1863_v48, 0.0  ;;  %v3174_v48 = vld [vmem:[#allocation5 + $0x38] sm:$0xff] }
 0x36b   :  { %v3130_v51 = vsel %vm2920_vm6, %v2753_v63, %v3129_v35  ;;  %v1999_v56 = vadd.f32 %v1998_v19, %v1997_v41  ;;  %v1581_v1 = vsel %vm108_vm0, %v1483_v39, 0.0  ;;  %v2253_v49 = vmul.f32 %v5434_v25, %v5387_v18  ;;  %v5567_v35 = vld [vmem:[#allocation2 + $0xc0] sm:$0xff] }
 0x36c   :  { %v1992_v26 = vadd.f32 %v1991_v42, %v1990_v17  ;;  %v3131_v14 = vsel %vm2922_vm7, %v2760_v20, %v3130_v51  ;;  %v2401_v45 = vrot.slane %v2400_v7, 2  ;;  %v5554_v24 = vadd.f32 %v2818_v13, %v2817_v36  ;;  %v3172_v36 = vld [vmem:[#allocation5 + $0x28] sm:$0xff]  ;;  %v6139_v20 = vld [vmem:[#allocation15_spill] sm:$0xff]  ;;  %v3171_v13 = vld [vmem:[#allocation5 + $0x20] sm:$0xff] }
 0x36d   :  { %v2566_v46 = vpop.permute.xlu1 %2565  ;;  %v5533_v60 = vpop.permute.xlu0 %2205  ;;  %4033 = vset.pattern.permute.xlu1 %v6101_v55  ;;  %v3843_v47 = vpack.c.bf16 %v3170_v34, %v3168_v57  ;;  %v1574_v42 = vsel %vm108_vm0, %v1482_v6, 0.0  ;;  %v1938_v30 = vrot.slane %v1937_v61, 4  ;;  %v3132_v18 = vsel %vm2924_vm8, %v5425_v27, %v3131_v14 }
 0x36e   :  { %6137 = vst [vmem:[#allocation17_spill] sm:$0xff] %v5533_v60  ;;  %v2641_v10 = vmul.f32 %v5536_v12, %v2566_v46  ;;  %1419 = vperm.xlu1 %4033, %v5261_v23   ;;  %v2995_v50 = vsel %vm2922_vm7, %v1992_v26, %v2994_v3  ;;  %v5549_v23 = vadd.f32 %v2387_v9, %v5454_v31  ;;  %v3167_v31 = vld [vmem:[#allocation5] sm:$0xff]  ;;  %v1582_v19 = vrot.slane %v1581_v1, 4  ;;  %v5571_v9 = vld [vmem:[#allocation2 + $0xd0] sm:$0xff] }
 0x36f   :  { %v2996_v41 = vsel %vm2924_vm8, %v1999_v56, %v2995_v50  ;;  %v5565_v33 = vadd.f32 %v2787_v11, %v2786_v62  ;;  %3844 = vmatprep.subr.bf16.mxu0 %v3843_v47  ;;  %v2650_v39 = vmul.f32 %v5571_v9, %v6140_v29  ;;  %v2363_v63 = vsel %vm108_vm0, %v2253_v49, 0.0  ;;  %v3173_v62 = vld [vmem:[#allocation5 + $0x30] sm:$0xff]  ;;  %v3176_v49 = vld [vmem:[#allocation5 + $0x48] sm:$0xff]  ;;  %v5595_v29 = vld [vmem:[#allocation2 + $0xa0] sm:$0xff] }
 0x370   :  { %v2775_v44 = vsel %vm108_vm0, %v2641_v10, 0.0  ;;  %v4047_v26 = vpack.i.bf16 %v2996_v41, %v3132_v18  ;;  %v3845_v46 = vpack.c.bf16 %v3169_v5, %v3167_v31  ;;  %v1575_v10 = vrot.slane %v1574_v42, 4  ;;  %v3175_v41 = vld [vmem:[#allocation5 + $0x40] sm:$0xff]  ;;  %v3177_v31 = vld [vmem:[#allocation5 + $0x50] sm:$0xff] }
 0x371   :  { %v2776_v17 = vrot.slane %v2775_v44, 4  ;;  %v1872_v3 = vmul.f32 %v5373_v43, %v5394_v16  ;;  %v1485_v11 = vmul.f32 %v5434_v25, %v5403_v54  ;;  %v3847_v6 = vpack.c.bf16 %v3174_v48, %v3172_v36 }
 0x372   :  { %v5556_v21 = vpop.permute.xlu1 %1797  ;;  %v5559_v22 = vpop.permute.xlu0 %1354  ;;  %1439 = vperm.xlu1 %4033, %v5332_v15   ;;  %v2648_v15 = vmul.f32 %v5567_v35, %v6139_v20  ;;  %4048 = vrot.lane.b32.xlu0 %v4047_v26, %s4407_s2  ;;  %v5584_v50 = vadd.f32 %v2401_v45, %v2400_v7  ;;  %v2820_v51 = vrot.slane %v5554_v24, 2  ;;  %v1939_v57 = vadd.f32 %v1938_v30, %v1937_v61 }
 0x373   :  { %v2777_v58 = vadd.f32 %v2776_v17, %v2775_v44  ;;  %v6142_v44 = vld [vmem:[#allocation25_spill] sm:$0xff]  ;;  %3846 = vmatpush1.bf16.msra.mxu0 %v3845_v46  ;;  %v2364_v54 = vrot.slane %v2363_v63, 4  ;;  %v3849_v14 = vpack.c.bf16 %v3173_v62, %v3171_v13  ;;  %v3178_v17 = vld [vmem:[#allocation5 + $0x58] sm:$0xff]  ;;  %v1583_v7 = vadd.f32 %v1582_v19, %v1581_v1 }
 0x374   :  { %v2824_v16 = vsel %vm108_vm0, %v2648_v15, 0.0  ;;  %3848 = vmatprep.subr.bf16.mxu0 %v3847_v6  ;;  %v2838_v45 = vsel %vm108_vm0, %v2650_v39, 0.0  ;;  %v3851_v61 = vpack.c.bf16 %v3178_v17, %v3176_v49  ;;  %v1576_v5 = vadd.f32 %v1575_v10, %v1574_v42  ;;  %v3180_v1 = vld [vmem:[#allocation5 + $0x68] sm:$0xff]  ;;  %v3182_v19 = vld [vmem:[#allocation5 + $0x78] sm:$0xff] }
 0x375   :  { %v2778_v27 = vrot.slane %v2777_v58, 2  ;;  %v2000_v30 = vsel %vm108_vm0, %v1872_v3, 0.0  ;;  %v2825_v36 = vrot.slane %v2824_v16, 4  ;;  %v1940_v48 = vrot.slane %v1939_v57, 2  ;;  %v6143_v39 = vld [vmem:[#allocation39_spill] sm:$0xff] }
 0x376   :  { %v5581_v52 = vpop.permute.xlu0 %1349  ;;  %4034 = vset.pattern.permute.xlu1 %v6098_v40  ;;  %v3853_v15 = vpack.c.bf16 %v3177_v31, %v3175_v41  ;;  %v2365_v26 = vadd.f32 %v2364_v54, %v2363_v63  ;;  %v1876_v42 = vmul.f32 %v5595_v29, %v6143_v39  ;;  %v3855_v62 = vpack.c.bf16 %v3182_v19, %v3180_v1  ;;  %v6144_v49 = vld [vmem:[#allocation23_spill] sm:$0xff] }
 0x377   :  { %6141 = vst [vmem:[#allocation24_spill] sm:$0xff] %v5581_v52  ;;  %v2779_v34 = vadd.f32 %v2778_v27, %v2777_v58  ;;  %v2182_v56 = vpop.permute.xlu1 %2181  ;;  %2201 = vperm.xlu1 %4034, %v6142_v44   ;;  %v1595_v58 = vsel %vm108_vm0, %v1485_v11, 0.0  ;;  %3850 = vmatpush1.bf16.msra.mxu0 %v3849_v14  ;;  %v2839_v10 = vrot.slane %v2838_v45, 4  ;;  %v2001_v3 = vrot.slane %v2000_v30, 4  ;;  %v3181_v14 = vld [vmem:[#allocation5 + $0x70] sm:$0xff] }
 0x378   :  { %v2257_v25 = vmul.f32 %v5536_v12, %v2182_v56  ;;  %3852 = vmatprep.subr.bf16.mxu0 %v3851_v61  ;;  %v1596_v11 = vrot.slane %v1595_v58, 4  ;;  %v1584_v63 = vrot.slane %v1583_v7, 2  ;;  %v2389_v41 = vrot.slane %v5549_v23, 1 }
 0x379   :  { %v2780_v47 = vrot.slane %v2779_v34, 1  ;;  %v1941_v61 = vadd.f32 %v1940_v48, %v1939_v57  ;;  %v2366_v31 = vrot.slane %v2365_v26, 2  ;;  %v2403_v1 = vrot.slane %v5584_v50, 1 }
 0x37a   :  { %v2391_v18 = vsel %vm108_vm0, %v2257_v25, 0.0  ;;  %v5599_v46 = vpop.permute.xlu0 %1374  ;;  %v3179_v25 = vld [vmem:[#allocation5 + $0x60] sm:$0xff]  ;;  %v2002_v19 = vadd.f32 %v2001_v3, %v2000_v30  ;;  %v1597_v39 = vadd.f32 %v1596_v11, %v1595_v58  ;;  %v2390_v30 = vadd.f32 %v2389_v41, %v5549_v23 }
 0x37b   :  { %v2781_v20 = vadd.f32 %v2780_v47, %v2779_v34  ;;  %4036 = vset.pattern.permute.xlu1 %v6101_v55  ;;  %v2392_v27 = vrot.slane %v2391_v18, 4  ;;  %v1577_v34 = vrot.slane %v1576_v5, 2  ;;  %v2821_v47 = vadd.f32 %v2820_v51, %v5554_v24  ;;  %3854 = vmatpush1.bf16.msra.mxu0 %v3853_v15 }
 0x37c   :  { %v1400_v13 = vpop.permute.xlu1 %1399  ;;  %1424 = vperm.xlu1 %4036, %v6142_v44   ;;  %v6145_v44 = vrot.slane %v6144_v49, 1  ;;  %3856 = vmatprep.subr.bf16.mxu0 %v3855_v62  ;;  %v2367_v3 = vadd.f32 %v2366_v31, %v2365_v26 }
 0x37d   :  { %v3133_v6 = vsel %vm2912_vm2, %v2781_v20, %v5528_v2  ;;  %v2393_v56 = vadd.f32 %v2392_v27, %v2391_v18  ;;  %v2826_v2 = vadd.f32 %v2825_v36, %v2824_v16  ;;  %v2028_v18 = vsel %vm108_vm0, %v1876_v42, 0.0  ;;  %v6147_v16 = vld [vmem:[#allocation38_spill] sm:$0xff] }
 0x37e   :  { %v5606_v54 = vsel %vm2914_vm3, %v5565_v33, %v3133_v6  ;;  %v5611_v17 = vadd.f32 %v6145_v44, %v6144_v49  ;;  %v6146_v33 = vld [vmem:[#allocation12_spill] sm:$0xff]  ;;  %v3857_v6 = vpack.c.bf16 %v3181_v14, %v3179_v25  ;;  %v1585_v49 = vadd.f32 %v1584_v63, %v1583_v7  ;;  %v1395_v57 = vpop.permute.xlu0 %1394 }
 0x37f   :  { %v2394_v20 = vrot.slane %v2393_v56, 2  ;;  %v2840_v44 = vadd.f32 %v2839_v10, %v2838_v45  ;;  %v1578_v24 = vadd.f32 %v1577_v34, %v1576_v5  ;;  %v6148_v36 = vrot.slane %v6147_v16, 1  ;;  %v6149_v63 = vld [vmem:[#allocation20_spill] sm:$0xff] }
 0x380   :  { %1444 = vperm.xlu1 %4036, %v6146_v33   ;;  %v2822_v15 = vrot.slane %v2821_v47, 1  ;;  %v1942_v42 = vrot.slane %v1941_v61, 1  ;;  %v2029_v62 = vrot.slane %v2028_v18, 4  ;;  %3858 = vmatpush1.bf16.msra.mxu0 %v3857_v6  ;;  %v2827_v58 = vrot.slane %v2826_v2, 2 }
 0x381   :  { %v5618_v27 = vpop.permute.xlu1 %2573  ;;  %v2395_v51 = vadd.f32 %v2394_v20, %v2393_v56  ;;  %v5623_v48 = vadd.f32 %v6148_v36, %v6147_v16  ;;  %v2404_v7 = vadd.f32 %v2403_v1, %v5584_v50  ;;  %v2003_v45 = vrot.slane %v2002_v19, 2  ;;  %v6150_v1 = vld [vmem:[#allocation41_spill] sm:$0xff] }
 0x382   :  { %v1598_v5 = vrot.slane %v1597_v39, 2  ;;  %v1488_v10 = vmul.f32 %v5373_v43, %v1395_v57  ;;  %v1586_v34 = vrot.slane %v1585_v49, 1  ;;  %v2841_v56 = vrot.slane %v2840_v44, 2 }
 0x383   :  { %v2396_v11 = vrot.slane %v2395_v51, 1  ;;  %v1579_v25 = vrot.slane %v1578_v24, 1  ;;  %v5632_v23 = vadd.f32 %v2822_v15, %v2821_v47  ;;  %v1943_v26 = vadd.f32 %v1942_v42, %v1941_v61  ;;  %v3184_v61 = vld [vmem:[#allocation5 + $0x88] sm:$0xff] }
 0x384   :  { %4039 = vset.pattern.permute.xlu1 %v6098_v40  ;;  %v2030_v41 = vadd.f32 %v2029_v62, %v2028_v18  ;;  %v1489_v31 = vmul.f32 %v5536_v12, %v1400_v13  ;;  %v5635_v33 = vadd.f32 %v2827_v58, %v2826_v2  ;;  %v2368_v50 = vrot.slane %v2367_v3, 1  ;;  %v3186_v18 = vld [vmem:[#allocation5 + $0x98] sm:$0xff]  ;;  %v6151_v42 = vld [vmem:[#allocation29_spill] sm:$0xff]  ;;  %v3185_v62 = vld [vmem:[#allocation5 + $0x90] sm:$0xff] }
 0x385   :  { %2221 = vperm.xlu1 %4039, %v6149_v63   ;;  %v2397_v14 = vadd.f32 %v2396_v11, %v2395_v51  ;;  %v1879_v43 = vmul.f32 %v5500_v32, %v6150_v1  ;;  %v2004_v57 = vadd.f32 %v2003_v45, %v2002_v19  ;;  %v1599_v16 = vadd.f32 %v1598_v5, %v1597_v39  ;;  %v4278_v39 = vld [vmem:[#allocation2 + $0x40] sm:$0xff]  ;;  %v5661_v58 = vld [vmem:[#allocation2 + $0x98] sm:$0xff]  ;;  %v6153_v1 = vld [vmem:[#allocation26_spill] sm:$0xff] }
 0x386   :  { %v5630_v20 = vpop.permute.xlu1 %1805  ;;  %v2254_v51 = vmul.f32 %v5470_v4, %v5491_v28  ;;  %v1616_v47 = vsel %vm108_vm0, %v1488_v10, 0.0  ;;  %v5644_v13 = vadd.f32 %v1586_v34, %v1585_v49  ;;  %v5646_v2 = vadd.f32 %v2841_v56, %v2840_v44  ;;  %v3183_v44 = vld [vmem:[#allocation5 + $0x80] sm:$0xff] }
 0x387   :  { %v3069_v6 = vsel %vm2912_vm2, %v2397_v14, %v2390_v30  ;;  %v5648_v36 = vadd.f32 %v1579_v25, %v1578_v24  ;;  %v2031_v19 = vrot.slane %v2030_v41, 2  ;;  %v1480_v28 = vmul.f32 %v4278_v39, %v5559_v22 }
 0x388   :  { %v5652_v32 = vsel %vm2914_vm3, %v2404_v7, %v3069_v6  ;;  %v1623_v15 = vsel %vm108_vm0, %v1489_v31, 0.0  ;;  %v5658_v49 = vsel %vm2924_vm8, %v1943_v26, %v6151_v42  ;;  %v2049_v24 = vsel %vm108_vm0, %v1879_v43, 0.0  ;;  %v6152_v26 = vld [vmem:[#allocation40_spill] sm:$0xff] }
 0x389   :  { %4040 = vset.pattern.permute.xlu1 %v6101_v55  ;;  %v1617_v30 = vrot.slane %v1616_v47, 4  ;;  %v3859_v7 = vpack.c.bf16 %v3186_v18, %v3184_v61  ;;  %v5664_v45 = vadd.f32 %v2368_v50, %v2367_v3  ;;  %v2005_v22 = vrot.slane %v2004_v57, 1  ;;  %v6154_v18 = vld [vmem:[#allocation21_spill] sm:$0xff] }
 0x38a   :  { %1449 = vperm.xlu1 %4040, %v6149_v63   ;;  %v1600_v5 = vrot.slane %v1599_v16, 1  ;;  %v2370_v10 = vsel %vm108_vm0, %v2254_v51, 0.0  ;;  %v1873_v63 = vmul.f32 %v5536_v12, %v5556_v21  ;;  %v1624_v34 = vrot.slane %v1623_v15, 4 }
 0x38b   :  { %v2190_v55 = vpop.permute.xlu1 %2189  ;;  %3860 = vmatprep.subr.bf16.mxu0 %v3859_v7  ;;  %v3861_v25 = vpack.c.bf16 %v3185_v62, %v3183_v44  ;;  %v5671_v14 = vadd.f32 %v2031_v19, %v2030_v41  ;;  %v5675_v3 = vmul.f32 %v5567_v35, %v6152_v26  ;;  %v2050_v31 = vrot.slane %v2049_v24, 4  ;;  %v6156_v44 = vld [vmem:[#allocation28_spill] sm:$0xff] }
 0x38c   :  { %v2259_v11 = vmul.f32 %v5661_v58, %v2190_v55  ;;  %v1560_v50 = vsel %vm108_vm0, %v1480_v28, 0.0  ;;  %v1486_v12 = vmul.f32 %v5470_v4, %v5508_v8  ;;  %v1618_v21 = vadd.f32 %v1617_v30, %v1616_v47 }
 0x38d   :  { %3862 = vmatpush1.bf16.msra.mxu0 %v3861_v25  ;;  %v5683_v41 = vadd.f32 %v2005_v22, %v2004_v57  ;;  %v5685_v51 = vadd.f32 %v1600_v5, %v1599_v16  ;;  %v2371_v61 = vrot.slane %v2370_v10, 4  ;;  %v2007_v39 = vsel %vm108_vm0, %v1873_v63, 0.0  ;;  %v6157_v57 = vld [vmem:[#allocation35_spill] sm:$0xff] }
 0x38e   :  { %v2405_v56 = vsel %vm108_vm0, %v2259_v11, 0.0  ;;  %4041 = vset.pattern.permute.xlu1 %v6098_v40  ;;  %v2643_v40 = vmul.f32 %v5661_v58, %v5618_v27  ;;  %v1561_v28 = vrot.slane %v1560_v50, 4  ;;  %v1625_v55 = vadd.f32 %v1624_v34, %v1623_v15  ;;  %v6155_v27 = vld [vmem:[#allocation37_spill] sm:$0xff] }
 0x38f   :  { %2225 = vperm.xlu1 %4041, %v6153_v1   ;;  %v2406_v43 = vrot.slane %v2405_v56, 4  ;;  %v2033_v4 = vrot.slane %v5671_v14, 1  ;;  %v5690_v8 = vadd.f32 %v2050_v31, %v2049_v24  ;;  %v1484_v47 = vmul.f32 %v6155_v27, %v5599_v46 }
 0x390   :  { %v1802_v6 = vpop.permute.xlu1 %1801  ;;  %v4042_v16 = vpack.i.bf16 %v5658_v49, %v6157_v57  ;;  %v1602_v62 = vsel %vm108_vm0, %v1486_v12, 0.0  ;;  %v1619_v30 = vrot.slane %v1618_v21, 2  ;;  %v2789_v11 = vsel %vm108_vm0, %v2643_v40, 0.0  ;;  %v6158_v12 = vld [vmem:[#allocation31_spill] sm:$0xff] }
 0x391   :  { %v1874_v19 = vmul.f32 %v6154_v18, %v1802_v6  ;;  %v2407_v42 = vadd.f32 %v2406_v43, %v2405_v56  ;;  %v2372_v15 = vadd.f32 %v2371_v61, %v2370_v10  ;;  %v2008_v22 = vrot.slane %v2007_v39, 4 }
 0x392   :  { %v1875_v24 = vmul.f32 %v5661_v58, %v5630_v20  ;;  %v1562_v46 = vadd.f32 %v1561_v28, %v1560_v50  ;;  %v1626_v34 = vrot.slane %v1625_v55, 2  ;;  %v2052_v49 = vrot.slane %v5690_v8, 2 }
 0x393   :  { %2229 = vperm.xlu1 %4041, %v6156_v44   ;;  %v2408_v7 = vrot.slane %v2407_v42, 2  ;;  %v2014_v5 = vsel %vm108_vm0, %v1874_v19, 0.0  ;;  %v1603_v26 = vrot.slane %v1602_v62, 4  ;;  %v1588_v31 = vsel %vm108_vm0, %v1484_v47, 0.0 }
 0x394   :  { %v2790_v1 = vrot.slane %v2789_v11, 4  ;;  %v1620_v10 = vadd.f32 %v1619_v30, %v1618_v21  ;;  %v2015_v43 = vrot.slane %v2014_v5, 4  ;;  %v2373_v6 = vrot.slane %v2372_v15, 2  ;;  %v6159_v21 = vld [vmem:[#allocation30_spill] sm:$0xff] }
 0x395   :  { %v1405_v63 = vpop.permute.xlu1 %1404  ;;  %v2409_v56 = vadd.f32 %v2408_v7, %v2407_v42  ;;  %v2009_v61 = vadd.f32 %v2008_v22, %v2007_v39  ;;  %v2021_v50 = vsel %vm108_vm0, %v1875_v24, 0.0  ;;  %v1563_v28 = vrot.slane %v1562_v46, 2 }
 0x396   :  { %v1490_v25 = vmul.f32 %v6154_v18, %v1405_v63  ;;  %v1589_v18 = vrot.slane %v1588_v31, 4  ;;  %v1627_v42 = vadd.f32 %v1626_v34, %v1625_v55  ;;  %v1604_v57 = vadd.f32 %v1603_v26, %v1602_v62  ;;  %v4280_v63 = vld [vmem:[#allocation2 + $0xa8] sm:$0xff] }
 0x397   :  { %2233 = vperm.xlu1 %4041, %v6158_v12   ;;  %v2410_v40 = vrot.slane %v2409_v56, 1  ;;  %v2791_v47 = vadd.f32 %v2790_v1, %v2789_v11  ;;  %v1621_v30 = vrot.slane %v1620_v10, 1  ;;  %v2022_v60 = vrot.slane %v2021_v50, 4 }
 0x398   :  { %v1630_v20 = vsel %vm108_vm0, %v1490_v25, 0.0  ;;  %v2016_v22 = vadd.f32 %v2015_v43, %v2014_v5  ;;  %v5713_v24 = vadd.f32 %v2373_v6, %v2372_v15  ;;  %v2010_v25 = vrot.slane %v2009_v61, 2 }
 0x399   :  { %v1631_v19 = vrot.slane %v1630_v20, 4  ;;  %v2411_v27 = vadd.f32 %v2410_v40, %v2409_v56  ;;  %v1564_v62 = vadd.f32 %v1563_v28, %v1562_v46  ;;  %v1590_v11 = vadd.f32 %v1589_v18, %v1588_v31 }
 0x39a   :  { %v2582_v44 = vpop.permute.xlu1 %2581  ;;  %v1628_v56 = vrot.slane %v1627_v42, 1  ;;  %v5717_v1 = vadd.f32 %v2033_v4, %v5671_v14  ;;  %v1605_v40 = vrot.slane %v1604_v57, 2  ;;  %v2023_v15 = vadd.f32 %v2022_v60, %v2021_v50  ;;  %v3189_v50 = vld [vmem:[#allocation5 + $0xb0] sm:$0xff] }
 0x39b   :  { %v1632_v7 = vadd.f32 %v1631_v19, %v1630_v20  ;;  %v2645_v12 = vmul.f32 %v4280_v63, %v2582_v44  ;;  %2237 = vperm.xlu1 %4041, %v6159_v21   ;;  %v5711_v39 = vsel %vm2916_vm4, %v2411_v27, %v5652_v32  ;;  %v2792_v20 = vrot.slane %v2791_v47, 2 }
 0x39c   :  { %6160 = vst [vmem:[#allocation15_spill] sm:$0xff] %v5711_v39  ;;  %v1622_v32 = vadd.f32 %v1621_v30, %v1620_v10  ;;  %v2017_v5 = vrot.slane %v2016_v22, 2  ;;  %v5721_v6 = vadd.f32 %v2052_v49, %v5690_v8  ;;  %v2375_v46 = vrot.slane %v5713_v24, 1  ;;  %v3187_v10 = vld [vmem:[#allocation5 + $0xa0] sm:$0xff] }
 0x39d   :  { %v1633_v55 = vrot.slane %v1632_v7, 2  ;;  %v2803_v34 = vsel %vm108_vm0, %v2645_v12, 0.0  ;;  %v2011_v18 = vadd.f32 %v2010_v25, %v2009_v61  ;;  %v1565_v14 = vrot.slane %v1564_v62, 1  ;;  %v3188_v12 = vld [vmem:[#allocation5 + $0xa8] sm:$0xff]  ;;  %v3194_v61 = vld [vmem:[#allocation5 + $0xd8] sm:$0xff] }
 0x39e   :  { %v2804_v26 = vrot.slane %v2803_v34, 4  ;;  %v1591_v4 = vrot.slane %v1590_v11, 2  ;;  %v1629_v27 = vadd.f32 %v1628_v56, %v1627_v42  ;;  %v1606_v21 = vadd.f32 %v1605_v40, %v1604_v57  ;;  %v3191_v56 = vld [vmem:[#allocation5 + $0xc0] sm:$0xff] }
 0x39f   :  { %v1634_v19 = vadd.f32 %v1633_v55, %v1632_v7  ;;  %v1814_v44 = vpop.permute.xlu1 %1813  ;;  %4043 = vrot.lane.b32.xlu1 %v4042_v16, %s4407_s2  ;;  %v3190_v7 = vld [vmem:[#allocation5 + $0xb8] sm:$0xff]  ;;  %v2793_v55 = vadd.f32 %v2792_v20, %v2791_v47  ;;  %v2024_v49 = vrot.slane %v2023_v15, 2  ;;  %v2012_v40 = vrot.slane %v2011_v18, 1 }
 0x3a0   :  { %v1877_v43 = vmul.f32 %v4280_v63, %v1814_v44  ;;  %v2805_v28 = vadd.f32 %v2804_v26, %v2803_v34  ;;  %v2933_v8 = vsel %vm2912_vm2, %v1629_v27, %v1622_v32  ;;  %v2018_v63 = vadd.f32 %v2017_v5, %v2016_v22  ;;  %v3192_v34 = vld [vmem:[#allocation5 + $0xc8] sm:$0xff]  ;;  %v3193_v26 = vld [vmem:[#allocation5 + $0xd0] sm:$0xff] }
 0x3a1   :  { %v1635_v31 = vrot.slane %v1634_v19, 1  ;;  %v3863_v47 = vpack.c.bf16 %v3190_v7, %v3188_v12  ;;  %v1566_v20 = vadd.f32 %v1565_v14, %v1564_v62  ;;  %v3196_v32 = vld [vmem:[#allocation5 + $0xe8] sm:$0xff]  ;;  %v2794_v22 = vrot.slane %v2793_v55, 1  ;;  %v3195_v14 = vld [vmem:[#allocation5 + $0xe0] sm:$0xff] }
 0x3a2   :  { %v2035_v60 = vsel %vm108_vm0, %v1877_v43, 0.0  ;;  %v2806_v42 = vrot.slane %v2805_v28, 2  ;;  %v3865_v43 = vpack.c.bf16 %v3189_v50, %v3187_v10  ;;  %v3867_v39 = vpack.c.bf16 %v3194_v61, %v3192_v34 }
 0x3a3   :  { %v1636_v16 = vadd.f32 %v1635_v31, %v1634_v19  ;;  %v2036_v30 = vrot.slane %v2035_v60, 4  ;;  %v1592_v19 = vadd.f32 %v1591_v4, %v1590_v11  ;;  %v3198_v31 = vld [vmem:[#allocation5 + $0xf8] sm:$0xff]  ;;  %3864 = vmatprep.subr.bf16.mxu0 %v3863_v47  ;;  %v2019_v12 = vrot.slane %v2018_v63, 1  ;;  %v3197_v4 = vld [vmem:[#allocation5 + $0xf0] sm:$0xff] }
 0x3a4   :  { %v2578_v44 = vpop.permute.xlu1 %2577  ;;  %3866 = vmatpush1.bf16.msra.mxu0 %v3865_v43  ;;  %v2807_v7 = vadd.f32 %v2806_v42, %v2805_v28  ;;  %v3871_v11 = vpack.c.bf16 %v3198_v31, %v3196_v32  ;;  %v2013_v10 = vadd.f32 %v2012_v40, %v2011_v18  ;;  %v2795_v28 = vadd.f32 %v2794_v22, %v2793_v55  ;;  %v3204_v32 = vld [vmem:[#allocation5 + $0x128] sm:$0xff]  ;;  %v3206_v31 = vld [vmem:[#allocation5 + $0x138] sm:$0xff] }
 0x3a5   :  { %v5727_v25 = vsel %vm2914_vm3, %v1636_v16, %v2933_v8  ;;  %v2644_v57 = vmul.f32 %v5595_v29, %v2578_v44  ;;  %v2037_v5 = vadd.f32 %v2036_v30, %v2035_v60  ;;  %v1607_v16 = vrot.slane %v1606_v21, 1  ;;  %v5731_v44 = vld [vmem:[#allocation2 + $0xb0] sm:$0xff]  ;;  %3868 = vmatprep.subr.bf16.mxu0 %v3867_v39  ;;  %v3202_v30 = vld [vmem:[#allocation5 + $0x118] sm:$0xff] }
 0x3a6   :  { %6161 = vst [vmem:[#allocation13_spill] sm:$0xff] %v5727_v25  ;;  %v2025_v8 = vadd.f32 %v2024_v49, %v2023_v15  ;;  %v3869_v29 = vpack.c.bf16 %v3193_v26, %v3191_v56  ;;  %v5735_v60 = vadd.f32 %v2375_v46, %v5713_v24  ;;  %v2926_v15 = vsel %vm2912_vm2, %v5611_v17, %v1566_v20  ;;  %v3200_v49 = vld [vmem:[#allocation5 + $0x108] sm:$0xff]  ;;  %v3201_v26 = vld [vmem:[#allocation5 + $0x110] sm:$0xff] }
 0x3a7   :  { %v2796_v27 = vsel %vm108_vm0, %v2644_v57, 0.0  ;;  %v1593_v34 = vrot.slane %v1592_v19, 1  ;;  %v2038_v61 = vrot.slane %v2037_v5, 2  ;;  %v3873_v47 = vpack.c.bf16 %v3197_v4, %v3195_v14 }
 0x3a8   :  { %v2797_v52 = vrot.slane %v2796_v27, 4  ;;  %v2586_v25 = vpop.permute.xlu1 %2585  ;;  %3870 = vmatpush1.bf16.msra.mxu0 %v3869_v29  ;;  %v5740_v56 = vadd.f32 %v1607_v16, %v1606_v21  ;;  %v2020_v24 = vadd.f32 %v2019_v12, %v2018_v63  ;;  %v2808_v46 = vrot.slane %v2807_v7, 1  ;;  %v3203_v16 = vld [vmem:[#allocation5 + $0x120] sm:$0xff]  ;;  %v3205_v29 = vld [vmem:[#allocation5 + $0x130] sm:$0xff] }
 0x3a9   :  { %v2646_v62 = vmul.f32 %v5731_v44, %v2586_v25  ;;  %v2026_v25 = vrot.slane %v2025_v8, 1  ;;  %3872 = vmatprep.subr.bf16.mxu0 %v3871_v11  ;;  %v3875_v17 = vpack.c.bf16 %v3202_v30, %v3200_v49  ;;  %v2997_v55 = vsel %vm2912_vm2, %v2013_v10, %v5683_v41  ;;  %v3208_v49 = vld [vmem:[#allocation5 + $0x148] sm:$0xff]  ;;  %v3210_v30 = vld [vmem:[#allocation5 + $0x158] sm:$0xff] }
 0x3aa   :  { %v2798_v50 = vadd.f32 %v2797_v52, %v2796_v27  ;;  %v3199_v52 = vld [vmem:[#allocation5 + $0x100] sm:$0xff]  ;;  %v2927_v40 = vsel %vm2914_vm3, %v5648_v36, %v2926_v15  ;;  %v1594_v22 = vadd.f32 %v1593_v34, %v1592_v19  ;;  %v3135_v21 = vsel %vm2916_vm4, %v2795_v28, %v5606_v54 }
 0x3ab   :  { %v2810_v42 = vsel %vm108_vm0, %v2646_v62, 0.0  ;;  %v2039_v63 = vadd.f32 %v2038_v61, %v2037_v5  ;;  %v2027_v12 = vadd.f32 %v2026_v25, %v2025_v8  ;;  %v3877_v41 = vpack.c.bf16 %v3201_v26, %v3199_v52  ;;  %v5751_v8 = vld [vmem:[#allocation2 + $0xc8] sm:$0xff] }
 0x3ac   :  { %v2799_v39 = vrot.slane %v2798_v50, 2  ;;  %v2811_v57 = vrot.slane %v2810_v42, 4  ;;  %3874 = vmatpush1.bf16.msra.mxu0 %v3873_v47  ;;  %v2998_v36 = vsel %vm2914_vm3, %v2020_v24, %v2997_v55  ;;  %v2809_v14 = vadd.f32 %v2808_v46, %v2807_v7  ;;  %v3209_v47 = vld [vmem:[#allocation5 + $0x150] sm:$0xff]  ;;  %v3212_v26 = vld [vmem:[#allocation5 + $0x168] sm:$0xff]  ;;  %v3214_v55 = vld [vmem:[#allocation5 + $0x178] sm:$0xff] }
 0x3ad   :  { %v1818_v18 = vpop.permute.xlu1 %1817  ;;  %3876 = vmatprep.subr.bf16.mxu0 %v3875_v17  ;;  %v3879_v19 = vpack.c.bf16 %v3206_v31, %v3204_v32  ;;  %v2040_v34 = vrot.slane %v2039_v63, 1  ;;  %v3066_v7 = vsel %vm2920_vm6, %v5664_v45, %v5505_v59  ;;  %v2928_v61 = vsel %vm2916_vm4, %v5644_v13, %v2927_v40 }
 0x3ae   :  { %v2800_v20 = vadd.f32 %v2799_v39, %v2798_v50  ;;  %v2812_v43 = vadd.f32 %v2811_v57, %v2810_v42  ;;  %v1878_v27 = vmul.f32 %v5731_v44, %v1818_v18  ;;  %v3881_v50 = vpack.c.bf16 %v3205_v29, %v3203_v16  ;;  %v3207_v57 = vld [vmem:[#allocation5 + $0x140] sm:$0xff] }
 0x3af   :  { %v3067_v24 = vsel %vm2922_vm7, %v5735_v60, %v3066_v7  ;;  %v3883_v18 = vpack.c.bf16 %v3210_v30, %v3208_v49  ;;  %v2929_v13 = vsel %vm2918_vm5, %v1594_v22, %v2928_v61  ;;  %v2999_v60 = vsel %vm2916_vm4, %v2027_v12, %v2998_v36  ;;  %v3216_v36 = vld [vmem:[#allocation5 + $0x188] sm:$0xff] }
 0x3b0   :  { %v2801_v62 = vrot.slane %v2800_v20, 1  ;;  %v2813_v11 = vrot.slane %v2812_v43, 2  ;;  %v2042_v4 = vsel %vm108_vm0, %v1878_v27, 0.0  ;;  %3878 = vmatpush1.bf16.msra.mxu0 %v3877_v41  ;;  %v5765_v59 = vsel %vm2924_vm8, %v5623_v48, %v3067_v24 }
 0x3b1   :  { %v2043_v54 = vrot.slane %v2042_v4, 4  ;;  %3880 = vmatprep.subr.bf16.mxu0 %v3879_v19  ;;  %v2930_v40 = vsel %vm2920_vm6, %v5685_v51, %v2929_v13  ;;  %v3885_v32 = vpack.c.bf16 %v3209_v47, %v3207_v57  ;;  %v2054_v16 = vrot.slane %v5721_v6, 1 }
 0x3b2   :  { %v2802_v10 = vadd.f32 %v2801_v62, %v2800_v20  ;;  %v2814_v15 = vadd.f32 %v2813_v11, %v2812_v43  ;;  %v2598_v5 = vpop.permute.xlu1 %2597  ;;  %v5774_v48 = vsel %vm2922_vm7, %v5740_v56, %v2930_v40  ;;  %v2041_v51 = vadd.f32 %v2040_v34, %v2039_v63  ;;  %v3211_v62 = vld [vmem:[#allocation5 + $0x160] sm:$0xff]  ;;  %v3213_v11 = vld [vmem:[#allocation5 + $0x170] sm:$0xff] }
 0x3b3   :  { %v2649_v28 = vmul.f32 %v5751_v8, %v2598_v5  ;;  %v2044_v39 = vadd.f32 %v2043_v54, %v2042_v4  ;;  %v3887_v12 = vpack.c.bf16 %v3214_v55, %v3212_v26  ;;  %v2829_v4 = vrot.slane %v5635_v33, 1  ;;  %v3219_v26 = vld [vmem:[#allocation5 + $0x1a0] sm:$0xff]  ;;  %v3221_v55 = vld [vmem:[#allocation5 + $0x1b0] sm:$0xff] }
 0x3b4   :  { %v3136_v42 = vsel %vm2918_vm5, %v2802_v10, %v3135_v21  ;;  %v2815_v25 = vrot.slane %v2814_v15, 1  ;;  %3882 = vmatpush1.bf16.msra.mxu0 %v3881_v50  ;;  %v2056_v19 = vsel %vm108_vm0, %v5675_v3, 0.0  ;;  %v3000_v10 = vsel %vm2918_vm5, %v5717_v1, %v2999_v60  ;;  %v3217_v3 = vld [vmem:[#allocation5 + $0x190] sm:$0xff] }
 0x3b5   :  { %v2831_v46 = vsel %vm108_vm0, %v2649_v28, 0.0  ;;  %v2045_v17 = vrot.slane %v2044_v39, 2  ;;  %v3137_v43 = vsel %vm2920_vm6, %v2809_v14, %v3136_v42  ;;  %3884 = vmatprep.subr.bf16.mxu0 %v3883_v18  ;;  %v3218_v14 = vld [vmem:[#allocation5 + $0x198] sm:$0xff]  ;;  %v3889_v5 = vpack.c.bf16 %v3213_v11, %v3211_v62  ;;  %v3215_v28 = vld [vmem:[#allocation5 + $0x180] sm:$0xff]  ;;  %v3220_v42 = vld [vmem:[#allocation5 + $0x1a8] sm:$0xff] }
 0x3b6   :  { %v2816_v45 = vadd.f32 %v2815_v25, %v2814_v15  ;;  %v2832_v52 = vrot.slane %v2831_v46, 4  ;;  %v2843_v50 = vrot.slane %v5646_v2, 1  ;;  %v2055_v49 = vadd.f32 %v2054_v16, %v5721_v6  ;;  %v3222_v25 = vld [vmem:[#allocation5 + $0x1b8] sm:$0xff]  ;;  %v5812_v16 = vld [vmem:[#allocation2 + $0xf0] sm:$0xff] }
 0x3b7   :  { %v1830_v20 = vpop.permute.xlu1 %1829  ;;  %v2046_v31 = vadd.f32 %v2045_v17, %v2044_v39  ;;  %v3001_v30 = vsel %vm2920_vm6, %v2041_v51, %v3000_v10  ;;  %v3891_v34 = vpack.c.bf16 %v3218_v14, %v3216_v36  ;;  %v2057_v7 = vrot.slane %v2056_v19, 4  ;;  %v5791_v39 = vld [vmem:[#allocation2 + $0xe0] sm:$0xff]  ;;  %v3225_v36 = vld [vmem:[#allocation5 + $0x1d0] sm:$0xff]  ;;  %v3230_v10 = vld [vmem:[#allocation5 + $0x1f8] sm:$0xff] }
 0x3b8   :  { %v2833_v22 = vadd.f32 %v2832_v52, %v2831_v46  ;;  %v1881_v21 = vmul.f32 %v5751_v8, %v1830_v20  ;;  %v3138_v27 = vsel %vm2922_vm7, %v2816_v45, %v3137_v43  ;;  %3886 = vmatpush1.bf16.msra.mxu0 %v3885_v32  ;;  %v1884_v57 = vmul.f32 %v5791_v39, %v5480_v53  ;;  %v5799_v53 = vld [vmem:[#allocation2 + $0xd8] sm:$0xff]  ;;  %v3224_v43 = vld [vmem:[#allocation5 + $0x1c8] sm:$0xff] }
 0x3b9   :  { %v3139_v29 = vsel %vm2924_vm8, %v5632_v23, %v3138_v27  ;;  %v2047_v41 = vrot.slane %v2046_v31, 1  ;;  %3888 = vmatprep.subr.bf16.mxu0 %v3887_v12  ;;  %v2830_v24 = vadd.f32 %v2829_v4, %v5635_v33  ;;  %v3893_v13 = vpack.c.bf16 %v3217_v3, %v3215_v28  ;;  %v3226_v32 = vld [vmem:[#allocation5 + $0x1d8] sm:$0xff] }
 0x3ba   :  { %v2834_v56 = vrot.slane %v2833_v22, 2  ;;  %v2063_v23 = vsel %vm108_vm0, %v1881_v21, 0.0  ;;  %v2844_v45 = vadd.f32 %v2843_v50, %v5646_v2  ;;  %v3895_v52 = vpack.c.bf16 %v3222_v25, %v3220_v42 }
 0x3bb   :  { %v2048_v63 = vadd.f32 %v2047_v41, %v2046_v31  ;;  %v2064_v47 = vrot.slane %v2063_v23, 4  ;;  %v2058_v40 = vadd.f32 %v2057_v7, %v2056_v19  ;;  %v2084_v2 = vsel %vm108_vm0, %v1884_v57, 0.0  ;;  %v5805_v31 = vld [vmem:[#allocation2 + $0xe8] sm:$0xff]  ;;  %v3227_v7 = vld [vmem:[#allocation5 + $0x1e0] sm:$0xff] }
 0x3bc   :  { %v2835_v15 = vadd.f32 %v2834_v56, %v2833_v22  ;;  %v2606_v54 = vpop.permute.xlu1 %2605  ;;  %3890 = vmatpush1.bf16.msra.mxu0 %v3889_v5  ;;  %v1885_v22 = vmul.f32 %v5805_v31, %v5485_v38  ;;  %v1886_v51 = vmul.f32 %v5812_v16, %v5510_v37  ;;  %v3897_v12 = vpack.c.bf16 %v3221_v55, %v3219_v26  ;;  %v3223_v56 = vld [vmem:[#allocation5 + $0x1c0] sm:$0xff]  ;;  %v3228_v19 = vld [vmem:[#allocation5 + $0x1e8] sm:$0xff] }
 0x3bd   :  { %v3002_v1 = vsel %vm2922_vm7, %v2048_v63, %v3001_v30  ;;  %3892 = vmatprep.subr.bf16.mxu0 %v3891_v34  ;;  %v2651_v20 = vmul.f32 %v5799_v53, %v2606_v54  ;;  %v2065_v21 = vadd.f32 %v2064_v47, %v2063_v23  ;;  %v3899_v41 = vpack.c.bf16 %v3226_v32, %v3224_v43  ;;  %v5820_v23 = vld [vmem:[#allocation2 + $0xf8] sm:$0xff] }
 0x3be   :  { %v2836_v61 = vrot.slane %v2835_v15, 1  ;;  %v3003_v6 = vsel %vm2924_vm8, %v2055_v49, %v3002_v1  ;;  %v2085_v38 = vrot.slane %v2084_v2, 4  ;;  %v2059_v63 = vrot.slane %v2058_v40, 2 }
 0x3bf   :  { %v4052_v18 = vpack.i.bf16 %v3003_v6, %v3139_v29  ;;  %v2845_v14 = vsel %vm108_vm0, %v2651_v20, 0.0  ;;  %v2091_v37 = vsel %vm108_vm0, %v1885_v22, 0.0  ;;  %v1887_v54 = vmul.f32 %v5820_v23, %v5493_v0 }
 0x3c0   :  { %v2837_v46 = vadd.f32 %v2836_v61, %v2835_v15  ;;  %3894 = vmatpush1.bf16.msra.mxu0 %v3893_v13  ;;  %v2066_v15 = vrot.slane %v2065_v21, 2  ;;  %v2098_v5 = vsel %vm108_vm0, %v1886_v51, 0.0  ;;  %v3901_v49 = vpack.c.bf16 %v3225_v36, %v3223_v56  ;;  %v3229_v61 = vld [vmem:[#allocation5 + $0x1f0] sm:$0xff] }
 0x3c1   :  { %v1838_v17 = vpop.permute.xlu1 %1837  ;;  %4053 = vrot.lane.b32.xlu1 %v4052_v18, %s4407_s2  ;;  %3896 = vmatprep.subr.bf16.mxu0 %v3895_v52  ;;  %v2846_v30 = vrot.slane %v2845_v14, 4  ;;  %v3903_v3 = vpack.c.bf16 %v3230_v10, %v3228_v19  ;;  %v2086_v1 = vadd.f32 %v2085_v38, %v2084_v2  ;;  %v2092_v42 = vrot.slane %v2091_v37, 4 }
 0x3c2   :  { %v3140_v60 = vsel %vm2912_vm2, %v2837_v46, %v2830_v24  ;;  %v1883_v33 = vmul.f32 %v5799_v53, %v1838_v17  ;;  %v2067_v57 = vadd.f32 %v2066_v15, %v2065_v21  ;;  %v2060_v6 = vadd.f32 %v2059_v63, %v2058_v40 }
 0x3c3   :  { %v5810_v27 = vsel %vm2914_vm3, %v2844_v45, %v3140_v60  ;;  %v2105_v24 = vsel %vm108_vm0, %v1887_v54, 0.0  ;;  %v2099_v46 = vrot.slane %v2098_v5, 4  ;;  %v3905_v18 = vpack.c.bf16 %v3229_v61, %v3227_v7 }
 0x3c4   :  { %v2077_v29 = vsel %vm108_vm0, %v1883_v33, 0.0  ;;  %3898 = vmatpush1.bf16.msra.mxu0 %v3897_v12  ;;  %v2847_v13 = vadd.f32 %v2846_v30, %v2845_v14  ;;  %v2087_v26 = vrot.slane %v2086_v1, 2  ;;  %v2093_v55 = vadd.f32 %v2092_v42, %v2091_v37 }
 0x3c5   :  { %v2078_v62 = vrot.slane %v2077_v29, 4  ;;  %v1834_v11 = vpop.permute.xlu1 %1833  ;;  %3900 = vmatprep.subr.bf16.mxu0 %v3899_v41  ;;  %v2068_v20 = vrot.slane %v2067_v57, 1  ;;  %v2061_v40 = vrot.slane %v2060_v6, 1  ;;  %v2106_v2 = vrot.slane %v2105_v24, 4 }
 0x3c6   :  { %v1882_v4 = vmul.f32 %v5571_v9, %v1834_v11  ;;  %v2100_v22 = vadd.f32 %v2099_v46, %v2098_v5  ;;  %v2848_v21 = vrot.slane %v2847_v13, 2  ;;  %v2088_v41 = vadd.f32 %v2087_v26, %v2086_v1  ;;  %v5834_v5 = vpop.permute.xlu0 %1389 }
 0x3c7   :  { %v2079_v34 = vadd.f32 %v2078_v62, %v2077_v29  ;;  %v6162_v62 = vld [vmem:[#allocation18_spill] sm:$0xff]  ;;  %v2094_v38 = vrot.slane %v2093_v55, 2  ;;  %v2069_v14 = vadd.f32 %v2068_v20, %v2067_v57  ;;  %v2062_v10 = vadd.f32 %v2061_v40, %v2060_v6 }
 0x3c8   :  { %v2070_v50 = vsel %vm108_vm0, %v1882_v4, 0.0  ;;  %3902 = vmatpush1.bf16.msra.mxu0 %v3901_v49  ;;  %v2264_v11 = vmul.f32 %v5567_v35, %v6162_v62  ;;  %v2107_v63 = vadd.f32 %v2106_v2, %v2105_v24  ;;  %v2101_v54 = vrot.slane %v2100_v22, 2  ;;  %v6163_v35 = vld [vmem:[#allocation19_spill] sm:$0xff] }
 0x3c9   :  { %v2071_v28 = vrot.slane %v2070_v50, 4  ;;  %v2080_v45 = vrot.slane %v2079_v34, 2  ;;  %3904 = vmatprep.subr.bf16.mxu0 %v3903_v3  ;;  %v2095_v1 = vadd.f32 %v2094_v38, %v2093_v55  ;;  %v3004_v42 = vsel %vm2912_vm2, %v2069_v14, %v2062_v10 }
 0x3ca   :  { %v2614_v25 = vpop.permute.xlu1 %2613  ;;  %v2102_v46 = vadd.f32 %v2101_v54, %v2100_v22  ;;  %v2440_v26 = vsel %vm108_vm0, %v2264_v11, 0.0 }
 0x3cb   :  { %v2072_v47 = vadd.f32 %v2071_v28, %v2070_v50  ;;  %v2653_v0 = vmul.f32 %v5805_v31, %v2614_v25  ;;  %v2081_v51 = vadd.f32 %v2080_v45, %v2079_v34  ;;  %v2849_v50 = vadd.f32 %v2848_v21, %v2847_v13 }
 0x3cc   :  { %3906 = vmatpush1.bf16.msra.mxu0 %v3905_v18  ;;  %v2266_v34 = vmul.f32 %v5571_v9, %v6163_v35  ;;  %v2089_v28 = vrot.slane %v2088_v41, 1  ;;  %v2096_v55 = vrot.slane %v2095_v1, 1  ;;  %v3357_v35 = vld [vmem:[#allocation7 + $0x88] sm:$0xff] }
 0x3cd   :  { %v2073_v17 = vrot.slane %v2072_v47, 2  ;;  %v2859_v52 = vsel %vm108_vm0, %v2653_v0, 0.0  ;;  %v2082_v49 = vrot.slane %v2081_v51, 1  ;;  %v2850_v18 = vrot.slane %v2849_v50, 1 }
 0x3ce   :  { %v2610_v60 = vpop.permute.xlu1 %2609  ;;  %v2860_v43 = vrot.slane %v2859_v52, 4  ;;  %v2454_v21 = vsel %vm108_vm0, %v2266_v34, 0.0  ;;  %v2097_v38 = vadd.f32 %v2096_v55, %v2095_v1  ;;  %v3340_v34 = vld [vmem:[#allocation7] sm:$0xff]  ;;  %v3341_v1 = vld [vmem:[#allocation7 + $0x8] sm:$0xff] }
 0x3cf   :  { %v2074_v33 = vadd.f32 %v2073_v17, %v2072_v47  ;;  %v2652_v32 = vmul.f32 %v5791_v39, %v2610_v60  ;;  %v2108_v47 = vrot.slane %v2107_v63, 2  ;;  %v2083_v13 = vadd.f32 %v2082_v49, %v2081_v51  ;;  %v5844_v60 = vpop.permute.xlu0 %1414  ;;  %v3361_v55 = vld [vmem:[#allocation7 + $0xa8] sm:$0xff] }
 0x3d0   :  { %v2861_v4 = vadd.f32 %v2860_v43, %v2859_v52  ;;  %v2103_v51 = vrot.slane %v2102_v46, 1 }
 0x3d1   :  { %v2075_v29 = vrot.slane %v2074_v33, 1  ;;  %v2852_v12 = vsel %vm108_vm0, %v2652_v32, 0.0  ;;  %v2090_v32 = vadd.f32 %v2089_v28, %v2088_v41  ;;  %v2109_v40 = vadd.f32 %v2108_v47, %v2107_v63 }
 0x3d2   :  { %v2853_v56 = vrot.slane %v2852_v12, 4  ;;  %v2622_v36 = vpop.permute.xlu1 %2621  ;;  %v2862_v25 = vrot.slane %v2861_v4, 2  ;;  %v2455_v41 = vrot.slane %v2454_v21, 4  ;;  %v2104_v28 = vadd.f32 %v2103_v51, %v2102_v46  ;;  %v3344_v51 = vld [vmem:[#allocation7 + $0x20] sm:$0xff] }
 0x3d3   :  { %v2655_v19 = vmul.f32 %v5820_v23, %v2622_v36  ;;  %v2076_v37 = vadd.f32 %v2075_v29, %v2074_v33  ;;  %v2851_v29 = vadd.f32 %v2850_v18, %v2849_v50  ;;  %v2110_v10 = vrot.slane %v2109_v40, 1  ;;  %v3360_v18 = vld [vmem:[#allocation7 + $0xa0] sm:$0xff] }
 0x3d4   :  { %v2854_v15 = vadd.f32 %v2853_v56, %v2852_v12  ;;  %v2863_v33 = vadd.f32 %v2862_v25, %v2861_v4  ;;  %v3359_v25 = vld [vmem:[#allocation7 + $0x98] sm:$0xff] }
 0x3d5   :  { %v2873_v30 = vsel %vm108_vm0, %v2655_v19, 0.0  ;;  %v3005_v0 = vsel %vm2914_vm3, %v2076_v37, %v3004_v42  ;;  %v2441_v19 = vrot.slane %v2440_v26, 4  ;;  %v3358_v42 = vld [vmem:[#allocation7 + $0x90] sm:$0xff] }
 0x3d6   :  { %v2855_v3 = vrot.slane %v2854_v15, 2  ;;  %v2874_v7 = vrot.slane %v2873_v30, 4  ;;  %v2618_v61 = vpop.permute.xlu1 %2617  ;;  %v3006_v20 = vsel %vm2916_vm4, %v2083_v13, %v3005_v0  ;;  %v2864_v14 = vrot.slane %v2863_v33, 1 }
 0x3d7   :  { %v2654_v57 = vmul.f32 %v5812_v16, %v2618_v61  ;;  %v3007_v36 = vsel %vm2918_vm5, %v2090_v32, %v3006_v20  ;;  %v3909_v0 = vpack.c.bf16 %v3341_v1, %v3340_v34  ;;  %v2111_v13 = vadd.f32 %v2110_v10, %v2109_v40  ;;  %v3364_v34 = vld [vmem:[#allocation7 + $0xc0] sm:$0xff] }
 0x3d8   :  { %v2856_v6 = vadd.f32 %v2855_v3, %v2854_v15  ;;  %v2875_v24 = vadd.f32 %v2874_v7, %v2873_v30  ;;  %v3142_v15 = vsel %vm2916_vm4, %v2851_v29, %v5810_v27  ;;  %v3008_v49 = vsel %vm2920_vm6, %v2097_v38, %v3007_v36  ;;  %v3356_v30 = vld [vmem:[#allocation7 + $0x80] sm:$0xff]  ;;  %v3342_v27 = vld [vmem:[#allocation7 + $0x10] sm:$0xff]  ;;  %v3345_v29 = vld [vmem:[#allocation7 + $0x28] sm:$0xff] }
 0x3d9   :  { %v2866_v9 = vsel %vm108_vm0, %v2654_v57, 0.0  ;;  %v3907_v61 = vpack.c.bf16 %v3357_v35, %v3356_v30  ;;  %v2865_v57 = vadd.f32 %v2864_v14, %v2863_v33  ;;  %v3009_v46 = vsel %vm2922_vm7, %v2104_v28, %v3008_v49  ;;  %v3362_v38 = vld [vmem:[#allocation7 + $0xb0] sm:$0xff]  ;;  %v6164_v49 = vld [vmem:[#allocation13_spill] sm:$0xff] }
 0x3da   :  { %v2857_v45 = vrot.slane %v2856_v6, 1  ;;  %v2876_v17 = vrot.slane %v2875_v24, 2  ;;  %v2867_v52 = vrot.slane %v2866_v9, 4  ;;  %v3915_v40 = vpack.c.bf16 %v3361_v55, %v3360_v18  ;;  %v3365_v28 = vld [vmem:[#allocation7 + $0xc8] sm:$0xff] }
 0x3db   :  { %v1410_v43 = vpop.permute.xlu1 %1409  ;;  %3908 = vmatprep.subr.bf16.mxu1 %v3907_v61  ;;  %v6165_v61 = vld [vmem:[#allocation16_spill] sm:$0xff] }
 0x3dc   :  { %v2868_v2 = vadd.f32 %v2867_v52, %v2866_v9  ;;  %v1491_v22 = vmul.f32 %v5661_v58, %v1410_v43  ;;  %v2877_v12 = vadd.f32 %v2876_v17, %v2875_v24  ;;  %v2858_v62 = vadd.f32 %v2857_v45, %v2856_v6  ;;  %v1435_v58 = vpop.permute.xlu0 %1434  ;;  %v3343_v24 = vld [vmem:[#allocation7 + $0x18] sm:$0xff]  ;;  %v4288_v9 = vld [vmem:[#allocation2 + $0xc0] sm:$0xff]  ;;  %3910 = vmatpush3.bf16.msra.mxu1 %v3909_v0 }
 0x3dd   :  { %v3911_v6 = vpack.c.bf16 %v3359_v25, %v3358_v42  ;;  %v1496_v45 = vmul.f32 %v4288_v9, %v1435_v58  ;;  %v3913_v32 = vpack.c.bf16 %v3343_v24, %v3342_v27  ;;  %v3923_v0 = vpack.c.bf16 %v3365_v28, %v3364_v34  ;;  %v3349_v27 = vld [vmem:[#allocation7 + $0x48] sm:$0xff]  ;;  %v3367_v9 = vld [vmem:[#allocation7 + $0xd8] sm:$0xff] }
 0x3de   :  { %v2869_v56 = vrot.slane %v2868_v2, 2  ;;  %v1637_v11 = vsel %vm108_vm0, %v1491_v22, 0.0  ;;  %v2878_v54 = vrot.slane %v2877_v12, 1  ;;  %v3143_v3 = vsel %vm2918_vm5, %v2858_v62, %v3142_v15  ;;  %v3347_v15 = vld [vmem:[#allocation7 + $0x38] sm:$0xff] }
 0x3df   :  { %v1638_v4 = vrot.slane %v1637_v11, 4  ;;  %v3144_v33 = vsel %vm2920_vm6, %v2865_v57, %v3143_v3  ;;  %3912 = vmatprep.subr.bf16.mxu1 %v3911_v6  ;;  %v2456_v62 = vadd.f32 %v2455_v41, %v2454_v21  ;;  %v1672_v14 = vsel %vm108_vm0, %v1496_v45, 0.0  ;;  %v3346_v41 = vld [vmem:[#allocation7 + $0x30] sm:$0xff]  ;;  %v3348_v6 = vld [vmem:[#allocation7 + $0x40] sm:$0xff]  ;;  %v4290_v45 = vld [vmem:[#allocation2 + $0x8] sm:$0xff] }
 0x3e0   :  { %v2870_v63 = vadd.f32 %v2869_v56, %v2868_v2  ;;  %v5851_v37 = vpop.permute.xlu1 %2193  ;;  %v2879_v20 = vadd.f32 %v2878_v54, %v2877_v12  ;;  %v2442_v2 = vadd.f32 %v2441_v19, %v2440_v26  ;;  %v3363_v12 = vld [vmem:[#allocation7 + $0xb8] sm:$0xff]  ;;  %3914 = vmatpush3.bf16.msra.mxu1 %v3913_v32  ;;  %v3917_v19 = vpack.c.bf16 %v3345_v29, %v3344_v51 }
 0x3e1   :  { %v1639_v50 = vadd.f32 %v1638_v4, %v1637_v11  ;;  %v3010_v11 = vsel %vm2924_vm8, %v2111_v13, %v3009_v46  ;;  %3916 = vmatprep.subr.bf16.mxu1 %v3915_v40  ;;  %v3919_v21 = vpack.c.bf16 %v3363_v12, %v3362_v38  ;;  %v2457_v54 = vrot.slane %v2456_v62, 2  ;;  %v3366_v13 = vld [vmem:[#allocation7 + $0xd0] sm:$0xff]  ;;  %v3368_v12 = vld [vmem:[#allocation7 + $0xe0] sm:$0xff] }
 0x3e2   :  { %v2871_v7 = vrot.slane %v2870_v63, 1  ;;  %v2443_v58 = vrot.slane %v2442_v2, 2  ;;  %v3921_v25 = vpack.c.bf16 %v3347_v15, %v3346_v41 }
 0x3e3   :  { %v1640_v47 = vrot.slane %v1639_v50, 2  ;;  %v2458_v24 = vadd.f32 %v2457_v54, %v2456_v62  ;;  %v3927_v62 = vpack.c.bf16 %v3367_v9, %v3366_v13  ;;  %v4293_v54 = vld [vmem:[#allocation2 + $0x20] sm:$0xff] }
 0x3e4   :  { %v2872_v17 = vadd.f32 %v2871_v7, %v2870_v63  ;;  %v5857_v52 = vpop.permute.xlu1 %2197  ;;  %v4289_v7 = vld [vmem:[#allocation2] sm:$0xff]  ;;  %3918 = vmatpush3.bf16.msra.mxu1 %v3917_v19  ;;  %v2444_v57 = vadd.f32 %v2443_v58, %v2442_v2  ;;  %v3925_v2 = vpack.c.bf16 %v3349_v27, %v3348_v6  ;;  %v4294_v27 = vld [vmem:[#allocation2 + $0x28] sm:$0xff] }
 0x3e5   :  { %v1641_v43 = vadd.f32 %v1640_v47, %v1639_v50  ;;  %v1673_v50 = vrot.slane %v1672_v14, 4  ;;  %v1472_v1 = vmul.f32 %v4289_v7, %v6165_v61  ;;  %3920 = vmatprep.subr.bf16.mxu1 %v3919_v21  ;;  %v6170_v13 = vld [vmem:[#allocation32_spill] sm:$0xff] }
 0x3e6   :  { %v3145_v22 = vsel %vm2922_vm7, %v2872_v17, %v3144_v33  ;;  %v6166_v17 = vld [vmem:[#allocation14_spill] sm:$0xff]  ;;  %v6167_v33 = vld [vmem:[#allocation27_spill] sm:$0xff]  ;;  %v2445_v40 = vrot.slane %v2444_v57, 1  ;;  %v1477_v9 = vmul.f32 %v4294_v27, %v6170_v13 }
 0x3e7   :  { %v1642_v56 = vrot.slane %v1641_v43, 1  ;;  %v3146_v36 = vsel %vm2924_vm8, %v2879_v20, %v3145_v22  ;;  %v1674_v18 = vadd.f32 %v1673_v50, %v1672_v14  ;;  %v1473_v46 = vmul.f32 %v4290_v45, %v6166_v17  ;;  %v3369_v14 = vld [vmem:[#allocation7 + $0xe8] sm:$0xff] }
 0x3e8   :  { %v2214_v4 = vpop.permute.xlu1 %2213  ;;  %v4057_v10 = vpack.i.bf16 %v3010_v11, %v3146_v36  ;;  %v1504_v20 = vsel %vm108_vm0, %v1472_v1, 0.0  ;;  %3922 = vmatpush3.bf16.msra.mxu1 %v3921_v25  ;;  %v3351_v11 = vld [vmem:[#allocation7 + $0x58] sm:$0xff]  ;;  %v2459_v36 = vrot.slane %v2458_v24, 1  ;;  %v6169_v50 = vld [vmem:[#allocation33_spill] sm:$0xff] }
 0x3e9   :  { %v1643_v63 = vadd.f32 %v1642_v56, %v1641_v43  ;;  %v2265_v26 = vmul.f32 %v5751_v8, %v2214_v4  ;;  %v4291_v43 = vld [vmem:[#allocation2 + $0x10] sm:$0xff]  ;;  %3924 = vmatprep.subr.bf16.mxu1 %v3923_v0  ;;  %v1675_v38 = vrot.slane %v1674_v18, 2  ;;  %v1511_v4 = vsel %vm108_vm0, %v1473_v46, 0.0 }
 0x3ea   :  { %4058 = vrot.lane.b32.xlu0 %v4057_v10, %s4407_s2  ;;  %v1474_v32 = vmul.f32 %v4291_v43, %v6167_v33  ;;  %v3350_v56 = vld [vmem:[#allocation7 + $0x50] sm:$0xff]  ;;  %v4292_v10 = vld [vmem:[#allocation2 + $0x18] sm:$0xff]  ;;  %v1505_v21 = vrot.slane %v1504_v20, 4  ;;  %v2460_v7 = vadd.f32 %v2459_v36, %v2458_v24  ;;  %v1512_v25 = vrot.slane %v1511_v4, 4 }
 0x3eb   :  { %v5869_v30 = vsel %vm2916_vm4, %v1643_v63, %v6164_v49  ;;  %v2447_v35 = vsel %vm108_vm0, %v2265_v26, 0.0  ;;  %v6168_v63 = vld [vmem:[#allocation22_spill] sm:$0xff]  ;;  %v3929_v15 = vpack.c.bf16 %v3351_v11, %v3350_v56  ;;  %v1476_v49 = vmul.f32 %v4293_v54, %v6169_v50 }
 0x3ec   :  { %v2448_v3 = vrot.slane %v2447_v35, 4  ;;  %v1475_v26 = vmul.f32 %v4292_v10, %v6168_v63  ;;  %v1518_v41 = vsel %vm108_vm0, %v1474_v32, 0.0  ;;  %3926 = vmatpush3.bf16.msra.mxu1 %v3925_v2  ;;  %v1676_v61 = vadd.f32 %v1675_v38, %v1674_v18  ;;  %v4295_v18 = vld [vmem:[#allocation2 + $0x30] sm:$0xff] }
 0x3ed   :  { %v5873_v42 = vpop.permute.xlu1 %1419  ;;  %3928 = vmatprep.subr.bf16.mxu1 %v3927_v62  ;;  %v1519_v0 = vrot.slane %v1518_v41, 4  ;;  %v1506_v17 = vadd.f32 %v1505_v21, %v1504_v20  ;;  %v1532_v46 = vsel %vm108_vm0, %v1476_v49, 0.0  ;;  %v1513_v2 = vadd.f32 %v1512_v25, %v1511_v4  ;;  %v4297_v21 = vld [vmem:[#allocation2 + $0x38] sm:$0xff]  ;;  %v6172_v4 = vld [vmem:[#allocation24_spill] sm:$0xff] }
 0x3ee   :  { %v2449_v47 = vadd.f32 %v2448_v3, %v2447_v35  ;;  %v2446_v35 = vadd.f32 %v2445_v40, %v2444_v57  ;;  %v3931_v3 = vpack.c.bf16 %v3369_v14, %v3368_v12  ;;  %v1677_v33 = vrot.slane %v1676_v61, 1 }
 0x3ef   :  { %v1520_v40 = vadd.f32 %v1519_v0, %v1518_v41  ;;  %v1507_v56 = vrot.slane %v1506_v17, 2  ;;  %v1514_v14 = vrot.slane %v1513_v2, 2  ;;  %v1479_v41 = vmul.f32 %v4297_v21, %v6172_v4 }
 0x3f0   :  { %v2450_v55 = vrot.slane %v2449_v47, 2  ;;  %3930 = vmatpush3.bf16.msra.mxu1 %v3929_v15  ;;  %v1678_v36 = vadd.f32 %v1677_v33, %v1676_v61 }
 0x3f1   :  { %v1440_v22 = vpop.permute.xlu1 %1439  ;;  %3932 = vmatprep.subr.bf16.mxu1 %v3931_v3  ;;  %v1521_v10 = vrot.slane %v1520_v40, 2  ;;  %v1508_v49 = vadd.f32 %v1507_v56, %v1506_v17  ;;  %v1515_v3 = vadd.f32 %v1514_v14, %v1513_v2 }
 0x3f2   :  { %v2451_v51 = vadd.f32 %v2450_v55, %v2449_v47  ;;  %v1497_v29 = vmul.f32 %v5751_v8, %v1440_v22  ;;  %v1525_v47 = vsel %vm108_vm0, %v1475_v26, 0.0  ;;  %v6171_v55 = vld [vmem:[#allocation34_spill] sm:$0xff] }
 0x3f3   :  { %v1526_v24 = vrot.slane %v1525_v47, 4  ;;  %v1478_v43 = vmul.f32 %v4295_v18, %v6171_v55  ;;  %v4296_v26 = vld [vmem:[#allocation2 + $0xd0] sm:$0xff] }
 0x3f4   :  { %v2452_v19 = vrot.slane %v2451_v51, 1  ;;  %v1679_v58 = vsel %vm108_vm0, %v1497_v29, 0.0  ;;  %v1533_v29 = vrot.slane %v1532_v46, 4 }
 0x3f5   :  { %v1680_v8 = vrot.slane %v1679_v58, 4  ;;  %v1527_v11 = vadd.f32 %v1526_v24, %v1525_v47  ;;  %v1546_v20 = vsel %vm108_vm0, %v1478_v43, 0.0  ;;  %v1553_v47 = vsel %vm108_vm0, %v1479_v41, 0.0 }
 0x3f6   :  { %v2453_v34 = vadd.f32 %v2452_v19, %v2451_v51  ;;  %v5884_v28 = vpop.permute.xlu1 %2201  ;;  %v1539_v51 = vsel %vm108_vm0, %v1477_v9, 0.0  ;;  %v1547_v54 = vrot.slane %v1546_v20, 4  ;;  %v4298_v9 = vld [vmem:[#allocation2 + $0x78] sm:$0xff]  ;;  %v1554_v43 = vrot.slane %v1553_v47, 4 }
 0x3f7   :  { %v1681_v1 = vadd.f32 %v1680_v8, %v1679_v58  ;;  %v1540_v63 = vrot.slane %v1539_v51, 4  ;;  %v1534_v58 = vadd.f32 %v1533_v29, %v1532_v46  ;;  %v5899_v8 = vpop.permute.xlu0 %1429  ;;  %v1509_v46 = vrot.slane %v1508_v49, 1 }
 0x3f8   :  { %v3076_v6 = vsel %vm2912_vm2, %v2453_v34, %v2446_v35  ;;  %v1528_v35 = vrot.slane %v1527_v11, 2  ;;  %v1548_v13 = vadd.f32 %v1547_v54, %v1546_v20 }
 0x3f9   :  { %v1682_v45 = vrot.slane %v1681_v1, 2  ;;  %v5890_v57 = vsel %vm2914_vm3, %v2460_v7, %v3076_v6  ;;  %v1522_v7 = vadd.f32 %v1521_v10, %v1520_v40  ;;  %v1541_v61 = vadd.f32 %v1540_v63, %v1539_v51 }
 0x3fa   :  { %v1535_v25 = vrot.slane %v1534_v58, 2  ;;  %v1529_v17 = vadd.f32 %v1528_v35, %v1527_v11  ;;  %v1555_v10 = vadd.f32 %v1554_v43, %v1553_v47 }
 0x3fb   :  { %v1683_v32 = vadd.f32 %v1682_v45, %v1681_v1  ;;  %v5894_v22 = vpop.permute.xlu1 %1424  ;;  %v5904_v0 = vpop.permute.xlu0 %1454  ;;  %v1487_v45 = vmul.f32 %v4298_v9, %v5834_v5  ;;  %v1523_v55 = vrot.slane %v1522_v7, 1  ;;  %v1542_v2 = vrot.slane %v1541_v61, 2 }
 0x3fc   :  { %v1536_v40 = vadd.f32 %v1535_v25, %v1534_v58  ;;  %v1510_v5 = vadd.f32 %v1509_v46, %v1508_v49  ;;  %v1556_v25 = vrot.slane %v1555_v10, 2  ;;  %v4299_v46 = vld [vmem:[#allocation2 + $0xa0] sm:$0xff] }
 0x3fd   :  { %v1684_v62 = vrot.slane %v1683_v32, 1  ;;  %v1609_v56 = vsel %vm108_vm0, %v1487_v45, 0.0  ;;  %v1524_v14 = vadd.f32 %v1523_v55, %v1522_v7  ;;  %v1492_v55 = vmul.f32 %v4299_v46, %v5844_v60 }
 0x3fe   :  { %v1610_v58 = vrot.slane %v1609_v56, 4  ;;  %v1537_v54 = vrot.slane %v1536_v40, 1 }
 0x3ff   :  { %v1685_v38 = vadd.f32 %v1684_v62, %v1683_v32  ;;  %v1445_v12 = vpop.permute.xlu1 %1444  ;;  %v1516_v32 = vrot.slane %v1515_v3, 1  ;;  %v1549_v62 = vrot.slane %v1548_v13, 2  ;;  %v5911_v11 = vpop.permute.xlu0 %1459 }
 0x400   :  { %v1498_v19 = vmul.f32 %v4296_v26, %v1445_v12  ;;  %v1538_v45 = vadd.f32 %v1537_v54, %v1536_v40  ;;  %v1494_v40 = vmul.f32 %v5731_v44, %v5894_v22 }
 0x401   :  { %v2940_v15 = vsel %vm2912_vm2, %v1685_v38, %v1678_v36  ;;  %v1530_v38 = vrot.slane %v1529_v17, 1  ;;  %v1517_v41 = vadd.f32 %v1516_v32, %v1515_v3 }
 0x402   :  { %v1686_v50 = vsel %vm108_vm0, %v1498_v19, 0.0  ;;  %v1543_v19 = vadd.f32 %v1542_v2, %v1541_v61  ;;  %v1557_v2 = vadd.f32 %v1556_v25, %v1555_v10 }
 0x403   :  { %v1687_v34 = vrot.slane %v1686_v50, 4  ;;  %v1531_v7 = vadd.f32 %v1530_v38, %v1529_v17  ;;  %v5919_v9 = vpop.permute.xlu0 %1464  ;;  %v4300_v17 = vld [vmem:[#allocation2 + $0xa8] sm:$0xff]  ;;  %v4301_v38 = vld [vmem:[#allocation2 + $0xb8] sm:$0xff] }
 0x404   :  { %v2222_v1 = vpop.permute.xlu1 %2221  ;;  %v1544_v61 = vrot.slane %v1543_v19, 1  ;;  %v2261_v43 = vmul.f32 %v4300_v17, %v5857_v52  ;;  %v1558_v10 = vrot.slane %v1557_v2, 1 }
 0x405   :  { %v1688_v6 = vadd.f32 %v1687_v34, %v1686_v50  ;;  %v2267_v27 = vmul.f32 %v5799_v53, %v2222_v1  ;;  %v1550_v50 = vadd.f32 %v1549_v62, %v1548_v13  ;;  %v2913_v1 = vsel %vm2912_vm2, %v1517_v41, %v1510_v5 }
 0x407   :  { %v1689_v24 = vrot.slane %v1688_v6, 2  ;;  %v2461_v18 = vsel %vm108_vm0, %v2267_v27, 0.0  ;;  %v1611_v27 = vadd.f32 %v1610_v58, %v1609_v56  ;;  %v1551_v13 = vrot.slane %v1550_v50, 1  ;;  %v5941_v5 = vpop.permute.xlu0 %1469 }
 0x408   :  { %v2462_v33 = vrot.slane %v2461_v18, 4  ;;  %v1545_v56 = vadd.f32 %v1544_v61, %v1543_v19  ;;  %v1495_v58 = vmul.f32 %v4301_v38, %v5899_v8 }
 0x409   :  { %v1690_v51 = vadd.f32 %v1689_v24, %v1688_v6  ;;  %v1450_v29 = vpop.permute.xlu1 %1449  ;;  %v2915_v6 = vsel %vm2914_vm3, %v1524_v14, %v2913_v1  ;;  %v2260_v24 = vmul.f32 %v4299_v46, %v5851_v37  ;;  %v1612_v60 = vrot.slane %v1611_v27, 2 }
 0x40a   :  { %v2463_v20 = vadd.f32 %v2462_v33, %v2461_v18  ;;  %v1499_v36 = vmul.f32 %v5799_v53, %v1450_v29  ;;  %v1493_v33 = vmul.f32 %v4300_v17, %v5873_v42  ;;  %v2917_v29 = vsel %vm2916_vm4, %v1531_v7, %v2915_v6 }
 0x40b   :  { %v1691_v12 = vrot.slane %v1690_v51, 1  ;;  %v2919_v52 = vsel %vm2918_vm5, %v1538_v45, %v2917_v29  ;;  %v1552_v42 = vadd.f32 %v1551_v13, %v1550_v50  ;;  %v1613_v19 = vadd.f32 %v1612_v60, %v1611_v27  ;;  %v6174_v29 = vld [vmem:[#allocation36_spill] sm:$0xff] }
 0x40c   :  { %v2464_v63 = vrot.slane %v2463_v20, 2  ;;  %v1693_v26 = vsel %vm108_vm0, %v1499_v36, 0.0  ;;  %v2921_v25 = vsel %vm2920_vm6, %v1545_v56, %v2919_v52  ;;  %v1665_v27 = vsel %vm108_vm0, %v1495_v58, 0.0 }
 0x40d   :  { %v1692_v21 = vadd.f32 %v1691_v12, %v1690_v51  ;;  %v1694_v4 = vrot.slane %v1693_v26, 4  ;;  %v2262_v51 = vmul.f32 %v5731_v44, %v5884_v28  ;;  %v1644_v28 = vsel %vm108_vm0, %v1492_v55, 0.0  ;;  %v6173_v12 = vld [vmem:[#allocation17_spill] sm:$0xff] }
 0x40e   :  { %v2465_v35 = vadd.f32 %v2464_v63, %v2463_v20  ;;  %v5914_v34 = vpop.permute.xlu1 %2225  ;;  %v2412_v20 = vsel %vm108_vm0, %v2260_v24, 0.0  ;;  %v2419_v44 = vsel %vm108_vm0, %v2261_v43, 0.0  ;;  %v2263_v14 = vmul.f32 %v4301_v38, %v6173_v12 }
 0x40f   :  { %v2941_v53 = vsel %vm2914_vm3, %v1692_v21, %v2940_v15  ;;  %v1695_v49 = vadd.f32 %v1694_v4, %v1693_v26  ;;  %v2426_v63 = vsel %vm108_vm0, %v2262_v51, 0.0  ;;  %v1658_v26 = vsel %vm108_vm0, %v1494_v40, 0.0 }
 0x410   :  { %v2466_v47 = vrot.slane %v2465_v35, 1  ;;  %v2413_v21 = vrot.slane %v2412_v20, 4  ;;  %v1645_v41 = vrot.slane %v1644_v28, 4  ;;  %v2420_v54 = vrot.slane %v2419_v44, 4 }
 0x411   :  { %v1696_v3 = vrot.slane %v1695_v49, 2  ;;  %v2427_v1 = vrot.slane %v2426_v63, 4  ;;  %v1659_v7 = vrot.slane %v1658_v26, 4  ;;  %v2923_v6 = vsel %vm2922_vm7, %v1552_v42, %v2921_v25 }
 0x412   :  { %v2467_v18 = vadd.f32 %v2466_v47, %v2465_v35  ;;  %v5922_v15 = vpop.permute.xlu1 %2229  ;;  %v1559_v47 = vadd.f32 %v1558_v10, %v1557_v2  ;;  %v2433_v61 = vsel %vm108_vm0, %v2263_v14, 0.0  ;;  %v1614_v8 = vrot.slane %v1613_v19, 1 }
 0x413   :  { %v1697_v32 = vadd.f32 %v1696_v3, %v1695_v49  ;;  %v4049_v49 = vpop.permute.xlu0 %4048  ;;  %v1646_v3 = vadd.f32 %v1645_v41, %v1644_v28  ;;  %v2421_v13 = vadd.f32 %v2420_v54, %v2419_v44  ;;  %v1660_v55 = vadd.f32 %v1659_v7, %v1658_v26 }
 0x414   :  { %v5933_v37 = vsel %vm2916_vm4, %v2467_v18, %v5890_v57  ;;  %v1651_v57 = vsel %vm108_vm0, %v1493_v33, 0.0  ;;  %v4050_v45 = vunpack.i.l.bf16 %v4049_v49  ;;  %v2428_v18 = vadd.f32 %v2427_v1, %v2426_v63 }
 0x415   :  { %v1698_v62 = vrot.slane %v1697_v32, 1  ;;  %v1652_v50 = vrot.slane %v1651_v57, 4  ;;  %v2434_v33 = vrot.slane %v2433_v61, 4  ;;  %v2925_v2 = vsel %vm2924_vm8, %v1559_v47, %v2923_v6 }
 0x416   :  { %v5938_v36 = vpop.permute.xlu1 %2233  ;;  %v1615_v51 = vadd.f32 %v1614_v8, %v1613_v19  ;;  %v4051_v56 = vunpack.i.h.bf16 %v4049_v49  ;;  %v2422_v52 = vrot.slane %v2421_v13, 2  ;;  %v2429_v28 = vrot.slane %v2428_v18, 2 }
 0x417   :  { %v1699_v22 = vadd.f32 %v1698_v62, %v1697_v32  ;;  %v1653_v46 = vadd.f32 %v1652_v50, %v1651_v57  ;;  %v1666_v32 = vrot.slane %v1665_v27, 4  ;;  %v1661_v44 = vrot.slane %v1660_v55, 2 }
 0x418   :  { %v3164_v57 = vsel %vm108_vm0, %v5765_v59, %v4050_v45  ;;  %v2932_v14 = vsel %vm2924_vm8, %v1615_v51, %v5774_v48  ;;  %v2423_v10 = vadd.f32 %v2422_v52, %v2421_v13  ;;  %v2430_v58 = vadd.f32 %v2429_v28, %v2428_v18 }
 0x419   :  { %v5950_v4 = vsel %vm2916_vm4, %v1699_v22, %v2941_v53  ;;  %v2414_v53 = vadd.f32 %v2413_v21, %v2412_v20  ;;  %v1654_v42 = vrot.slane %v1653_v46, 2  ;;  %v1647_v20 = vrot.slane %v1646_v3, 2 }
 0x41a   :  { %v5952_v35 = vpop.permute.xlu1 %2237  ;;  %v2435_v22 = vadd.f32 %v2434_v33, %v2433_v61  ;;  %v1667_v38 = vadd.f32 %v1666_v32, %v1665_v27  ;;  %v3160_v26 = vsel %vm108_vm0, %v2932_v14, %v4051_v56  ;;  %v1662_v21 = vadd.f32 %v1661_v44, %v1660_v55 }
 0x41b   :  { %v2415_v40 = vrot.slane %v2414_v53, 2  ;;  %v1655_v63 = vadd.f32 %v1654_v42, %v1653_v46  ;;  %v1648_v19 = vadd.f32 %v1647_v20, %v1646_v3  ;;  %v2424_v49 = vrot.slane %v2423_v10, 1  ;;  %v6175_v46 = vld [vmem:[#allocation15_spill] sm:$0xff] }
 0x41c   :  { %v2436_v41 = vrot.slane %v2435_v22, 2  ;;  %v1668_v54 = vrot.slane %v1667_v38, 2  ;;  %v2431_v7 = vrot.slane %v2430_v58, 1  ;;  %v1663_v25 = vrot.slane %v1662_v21, 1 }
 0x41d   :  { %v2416_v12 = vadd.f32 %v2415_v40, %v2414_v53  ;;  %v1656_v59 = vrot.slane %v1655_v63, 1  ;;  %v1649_v1 = vrot.slane %v1648_v19, 1  ;;  %v2425_v48 = vadd.f32 %v2424_v49, %v2423_v10 }
 0x41e   :  { %v4044_v24 = vpop.permute.xlu1 %4043  ;;  %v2437_v47 = vadd.f32 %v2436_v41, %v2435_v22  ;;  %v1669_v6 = vadd.f32 %v1668_v54, %v1667_v38  ;;  %v2432_v53 = vadd.f32 %v2431_v7, %v2430_v58  ;;  %v1664_v45 = vadd.f32 %v1663_v25, %v1662_v21 }
 0x41f   :  { %v4046_v17 = vunpack.i.h.bf16 %v4044_v24  ;;  %v4045_v43 = vunpack.i.l.bf16 %v4044_v24  ;;  %v2417_v50 = vrot.slane %v2416_v12, 1  ;;  %v1657_v8 = vadd.f32 %v1656_v59, %v1655_v63 }
 0x420   :  { %v1650_v27 = vadd.f32 %v1649_v1, %v1648_v19  ;;  %v2438_v3 = vrot.slane %v2437_v47, 1  ;;  %v1670_v13 = vrot.slane %v1669_v6, 1  ;;  %v1500_v52 = vmul.f32 %v5791_v39, %v5904_v0 }
 0x421   :  { %v3163_v60 = vsel %vm108_vm0, %v6174_v29, %v4045_v43  ;;  %v3159_v62 = vsel %vm108_vm0, %v2925_v2, %v4046_v17  ;;  %v2418_v61 = vadd.f32 %v2417_v50, %v2416_v12  ;;  %v1501_v42 = vmul.f32 %v5805_v31, %v5911_v11 }
 0x422   :  { %3307 = vmatprep.mubr.f32.mxu0 %v3163_v60  ;;  %v2936_v18 = vsel %vm2918_vm5, %v1650_v27, %v5869_v30  ;;  %v2439_v32 = vadd.f32 %v2438_v3, %v2437_v47  ;;  %v1671_v2 = vadd.f32 %v1670_v13, %v1669_v6  ;;  %v1700_v20 = vsel %vm108_vm0, %v1500_v52, 0.0 }
 0x423   :  { %3308 = vmatmul.mubr.f32.vlgmr.msra.gmra.mrb[32].mxu0 %v3159_v62  ;;  %v3072_v24 = vsel %vm2918_vm5, %v2418_v61, %v6175_v46  ;;  %v2937_v17 = vsel %vm2920_vm6, %v1657_v8, %v2936_v18  ;;  %v2268_v28 = vmul.f32 %v5791_v39, %v5914_v34  ;;  %v2269_v44 = vmul.f32 %v5805_v31, %v5922_v15 }
 0x424   :  { %3313 = vmatprep.mubr.f32.mxu0 %v3164_v57  ;;  %v3073_v55 = vsel %vm2920_vm6, %v2425_v48, %v3072_v24  ;;  %v2938_v33 = vsel %vm2922_vm7, %v1664_v45, %v2937_v17  ;;  %v1502_v57 = vmul.f32 %v5812_v16, %v5919_v9  ;;  %v2270_v22 = vmul.f32 %v5812_v16, %v5938_v36 }
 0x425   :  { %v3074_v43 = vsel %vm2922_vm7, %v2432_v53, %v3073_v55  ;;  %v2939_v62 = vsel %vm2924_vm8, %v1671_v2, %v2938_v33  ;;  %v1701_v0 = vrot.slane %v1700_v20, 4  ;;  %v1707_v38 = vsel %vm108_vm0, %v1501_v42, 0.0 }
 0x426   :  { %v3075_v60 = vsel %vm2924_vm8, %v2439_v32, %v3074_v43  ;;  %v2271_v11 = vmul.f32 %v5820_v23, %v5952_v35  ;;  %v2468_v12 = vsel %vm108_vm0, %v2268_v28, 0.0  ;;  %v1503_v39 = vmul.f32 %v5820_v23, %v5941_v5 }
 0x427   :  { %3314 = vmatmul.mubr.f32.gmra.mrb[34].mxu0 %v3160_v26  ;;  %v2475_v34 = vsel %vm108_vm0, %v2269_v44, 0.0  ;;  %v1708_v31 = vrot.slane %v1707_v38, 4  ;;  %v1714_v15 = vsel %vm108_vm0, %v1502_v57, 0.0  ;;  %v2482_v9 = vsel %vm108_vm0, %v2270_v22, 0.0 }
 0x428   :  { %v1702_v14 = vadd.f32 %v1701_v0, %v1700_v20  ;;  %v2469_v16 = vrot.slane %v2468_v12, 4  ;;  %v2489_v36 = vsel %vm108_vm0, %v2271_v11, 0.0  ;;  %v2476_v10 = vrot.slane %v2475_v34, 4 }
 0x429   :  { %v1715_v63 = vrot.slane %v1714_v15, 4  ;;  %v1721_v35 = vsel %vm108_vm0, %v1503_v39, 0.0  ;;  %v2483_v26 = vrot.slane %v2482_v9, 4  ;;  %v1709_v19 = vadd.f32 %v1708_v31, %v1707_v38 }
 0x42a   :  { %v2490_v58 = vrot.slane %v2489_v36, 4  ;;  %v1703_v21 = vrot.slane %v1702_v14, 2  ;;  %v2470_v23 = vadd.f32 %v2469_v16, %v2468_v12  ;;  %v1722_v5 = vrot.slane %v1721_v35, 4  ;;  %v3371_v16 = vld [vmem:[#allocation7 + $0xf8] sm:$0xff] }
 0x42b   :  { %v2477_v41 = vadd.f32 %v2476_v10, %v2475_v34  ;;  %v1716_v54 = vadd.f32 %v1715_v63, %v1714_v15  ;;  %v2484_v50 = vadd.f32 %v2483_v26, %v2482_v9  ;;  %v1710_v49 = vrot.slane %v1709_v19, 2  ;;  %v3353_v15 = vld [vmem:[#allocation7 + $0x68] sm:$0xff]  ;;  %v3354_v10 = vld [vmem:[#allocation7 + $0x70] sm:$0xff]  ;;  %v3355_v63 = vld [vmem:[#allocation7 + $0x78] sm:$0xff] }
 0x42c   :  { %v2491_v59 = vadd.f32 %v2490_v58, %v2489_v36  ;;  %v1704_v1 = vadd.f32 %v1703_v21, %v1702_v14  ;;  %v2471_v7 = vrot.slane %v2470_v23, 2  ;;  %v1723_v25 = vadd.f32 %v1722_v5, %v1721_v35  ;;  %v3370_v14 = vld [vmem:[#allocation7 + $0xf0] sm:$0xff]  ;;  %v3231_v21 = vld [vmem:[%s6040_s4] sm:$0x3] }
 0x42d   :  { %v2478_v47 = vrot.slane %v2477_v41, 2  ;;  %v1717_v6 = vrot.slane %v1716_v54, 2  ;;  %v2485_v61 = vrot.slane %v2484_v50, 2  ;;  %v1711_v48 = vadd.f32 %v1710_v49, %v1709_v19 }
 0x42e   :  { %v2492_v8 = vrot.slane %v2491_v59, 2  ;;  %v1705_v27 = vrot.slane %v1704_v1, 1  ;;  %v2472_v53 = vadd.f32 %v2471_v7, %v2470_v23  ;;  %v1724_v45 = vrot.slane %v1723_v25, 2 }
 0x42f   :  { %v2479_v3 = vadd.f32 %v2478_v47, %v2477_v41  ;;  %v1718_v13 = vadd.f32 %v1717_v6, %v1716_v54  ;;  %v2486_v46 = vadd.f32 %v2485_v61, %v2484_v50  ;;  %v1712_v24 = vrot.slane %v1711_v48, 1 }
 0x430   :  { %v2493_v18 = vadd.f32 %v2492_v8, %v2491_v59  ;;  %v1706_v55 = vadd.f32 %v1705_v27, %v1704_v1  ;;  %v2473_v17 = vrot.slane %v2472_v53, 1  ;;  %v1725_v43 = vadd.f32 %v1724_v45, %v1723_v25 }
 0x431   :  { %v2480_v33 = vrot.slane %v2479_v3, 1  ;;  %v1719_v32 = vrot.slane %v1718_v13, 1  ;;  %v2487_v2 = vrot.slane %v2486_v46, 1  ;;  %v3935_v36 = vpack.c.bf16 %v3371_v16, %v3370_v14 }
 0x432   :  { %v3937_v35 = vpack.c.bf16 %v3355_v63, %v3354_v10  ;;  %v3233_v26 = vlaneseq }
 0x433   :  { %v4054_v51 = vpop.permute.xlu1 %4053  ;;  %v1720_v52 = vadd.f32 %v1719_v32, %v1718_v13  ;;  %v2488_v42 = vadd.f32 %v2487_v2, %v2486_v46  ;;  %v3518_v2 = vld [vmem:[%s6042_s6] ss:$0 sm:$0xff]  ;;  %s4368_s6 = scalar_lea.vmem %s3474_s18, 512 }
 0x434   :  { %v4056_v40 = vunpack.i.h.bf16 %v4054_v51  ;;  %v4055_v29 = vunpack.i.l.bf16 %v4054_v51  ;;  %v2943_v51 = vsel %vm2918_vm5, %v1706_v55, %v5950_v4  ;;  %v3234_v19 = vshrl.u32 %v3233_v26, 7  ;;  %p4369_p10 = scmp.ne.s32.totalorder %s3474_s18, %s4368_s6  ;;  %p4374_p12 = scmp.lt.s32.totalorder %s4368_s6, %s4368_s6 }
 0x436   :  { %v3165_v56 = vsel %vm108_vm0, %v3075_v60, %v4055_v29  ;;  %v3161_v30 = vsel %vm108_vm0, %v2939_v62, %v4056_v40  ;;  %v1713_v40 = vadd.f32 %v1712_v24, %v1711_v48  ;;  %v2494_v29 = vrot.slane %v2493_v18, 1  ;;  %p4375_p13 = por %p4374_p12, %p4373_p11 }
 0x437   :  { %3319 = vmatprep.mubr.f32.mxu0 %v3165_v56  ;;  %v2474_v60 = vadd.f32 %v2473_v17, %v2472_v53  ;;  %v1726_v62 = vrot.slane %v1725_v43, 1  ;;  %v2481_v56 = vadd.f32 %v2480_v33, %v2479_v3  ;;  %v3235_v58 = vsub.s32 0, %v3234_v19 }
 0x438   :  { %3320 = vmatmul.mubr.f32.gmra.mrb[36].mxu0 %v3161_v30  ;;  %v2944_v30 = vsel %vm2920_vm6, %v1713_v40, %v2943_v51  ;;  %v2495_v20 = vadd.f32 %v2494_v29, %v2493_v18  ;;  %v3239_v23 = vsub.s32 1, %v3234_v19  ;;  %p4376_p0 = pnand %p4375_p13, %p4369_p10 }
 0x439   :  { %v3079_v28 = vsel %vm2918_vm5, %v2474_v60, %v5933_v37  ;;  %v2945_v44 = vsel %vm2922_vm7, %v1720_v52, %v2944_v30  ;;  %v1727_v57 = vadd.f32 %v1726_v62, %v1725_v43  ;;  %v3352_v37 = vld [vmem:[#allocation7 + $0x60] sm:$0xff]  ;;  %v3236_v5 = vrot.slane %v3231_v21, %v3235_v58 }
 0x43a   :  { %v3080_v0 = vsel %vm2920_vm6, %v2481_v56, %v3079_v28  ;;  %v3933_v9 = vpack.c.bf16 %v3353_v15, %v3352_v37  ;;  %v3240_v41 = vrot.slane %v3231_v21, %v3239_v23 }
 0x43b   :  { %v3081_v11 = vsel %vm2922_vm7, %v2488_v42, %v3080_v0  ;;  %v2946_v39 = vsel %vm2924_vm8, %v1727_v57, %v2945_v44 }
 0x43c   :  { %v3082_v12 = vsel %vm2924_vm8, %v2495_v20, %v3081_v11  ;;  %3934 = vmatpush3.bf16.msra.mxu1 %v3933_v9 }
 0x43d   :  { %3936 = vmatprep.subr.bf16.mxu1 %v3935_v36 }
 0x440   :  { %3938 = vmatpush3.bf16.msra.mxu1 %v3937_v35 }
 0x45c   :  { %v4059_v22 = vpop.permute.xlu0 %4058 }
 0x45d   :  { %v4061_v4 = vunpack.i.h.bf16 %v4059_v22  ;;  %v4060_v38 = vunpack.i.l.bf16 %v4059_v22 }
 0x45f   :  { %v3166_v34 = vsel %vm108_vm0, %v3082_v12, %v4060_v38  ;;  %v3162_v31 = vsel %vm108_vm0, %v2946_v39, %v4061_v4 }
 0x460   :  { %3325 = vmatprep.mubr.f32.mxu0 %v3166_v34 }
 0x461   :  { %3326 = vmatmul.mubr.f32.gmra.mrb[38].mxu0 %v3162_v31 }
 0x4f6   :  { %v3309_v54 = vpop.f32.mrb[32].mxu0 }
 0x4f7   :  { %v3310_v50 = vadd.f32 %v3309_v54, %v3236_v5  ;;  %v3311_v49 = vpop.f32.mrb[33].mxu0 }
 0x4f8   :  { %v3312_v59 = vadd.f32 %v3311_v49, %v3240_v41 }
 0x4f9   :  { %v3332_v25 = vmax.f32 %v3310_v50, 0.0 }
 0x4fa   :  { %v3333_v1 = vmax.f32 %v3312_v59, 0.0  ;;  %v3315_v7 = vpop.f32.mrb[34].mxu0 }
 0x4fb   :  { %v3316_v47 = vadd.f32 %v3315_v7, %v3236_v5  ;;  %v3317_v6 = vpop.f32.mrb[35].mxu0 }
 0x4fc   :  { %v3318_v61 = vadd.f32 %v3317_v6, %v3240_v41  ;;  %3443 = vmatprep.mubr.f32.mxu1 %v3333_v1 }
 0x4fd   :  { %3444 = vmatmul.mubr.f32.vlgmr.msra.gmra.mrb[32].mxu1 %v3332_v25  ;;  %v3334_v8 = vmax.f32 %v3316_v47, 0.0 }
 0x4fe   :  { %v3335_v48 = vmax.f32 %v3318_v61, 0.0 }
 0x500   :  { %3448 = vmatprep.mubr.f32.mxu1 %v3335_v48 }
 0x501   :  { %3449 = vmatmul.mubr.f32.gmra.mrb[34].mxu1 %v3334_v8 }
 0x50b   :  { %v3321_v27 = vpop.f32.mrb[36].mxu0 }
 0x50c   :  { %v3322_v53 = vadd.f32 %v3321_v27, %v3236_v5  ;;  %v3323_v45 = vpop.f32.mrb[37].mxu0 }
 0x50d   :  { %v3324_v3 = vadd.f32 %v3323_v45, %v3240_v41 }
 0x50e   :  { %v3336_v46 = vmax.f32 %v3322_v53, 0.0 }
 0x50f   :  { %v3337_v13 = vmax.f32 %v3324_v3, 0.0 }
 0x511   :  { %3453 = vmatprep.mubr.f32.mxu1 %v3337_v13 }
 0x512   :  { %3454 = vmatmul.mubr.f32.gmra.mrb[36].mxu1 %v3336_v46 }
 0x534   :  { %v3327_v24 = vpop.f32.mrb[38].mxu0 }
 0x535   :  { %v3328_v18 = vadd.f32 %v3327_v24, %v3236_v5  ;;  %v3329_v55 = vpop.f32.mrb[39].mxu0 }
 0x536   :  { %v3330_v17 = vadd.f32 %v3329_v55, %v3240_v41 }
 0x537   :  { %v3338_v33 = vmax.f32 %v3328_v18, 0.0 }
 0x538   :  { %v3339_v43 = vmax.f32 %v3330_v17, 0.0 }
 0x53a   :  { %3458 = vmatprep.mubr.f32.mxu1 %v3339_v43 }
 0x53b   :  { %3459 = vmatmul.mubr.f32.gmra.mrb[38].mxu1 %v3338_v33 }
 0x5d0   :  { %v3639_v32 = vpop.f32.mrb[32].mxu1 }
 0x5d1   :  { %v3640_v51 = vpop.f32.mrb[33].mxu1 }
 0x5d2   :  { %v3641_v40 = vadd.f32 %v3640_v51, %v3639_v32 }
 0x5d4   :  { %v3446_v29 = vadd.f32 %v3641_v40, %v3518_v2  ;;  %v3642_v60 = vpop.f32.mrb[34].mxu1 }
 0x5d5   :  { %v3643_v62 = vpop.f32.mrb[35].mxu1 }
 0x5d6   :  { %3464 = vst [vmem:[#allocation8] sm:$0xff] %v3446_v29  ;;  %v3644_v56 = vadd.f32 %v3643_v62, %v3642_v60 }
 0x5d8   :  { %v3451_v30 = vadd.f32 %v3644_v56, %v3518_v2 }
 0x5da   :  { %3465 = vst [vmem:[#allocation8 + $0x8] sm:$0xff] %v3451_v30 }
 0x5e5   :  { %v3645_v52 = vpop.f32.mrb[36].mxu1 }
 0x5e6   :  { %v3646_v42 = vpop.f32.mrb[37].mxu1 }
 0x5e7   :  { %v3647_v20 = vadd.f32 %v3646_v42, %v3645_v52 }
 0x5e9   :  { %v3456_v28 = vadd.f32 %v3647_v20, %v3518_v2 }
 0x5eb   :  { %3466 = vst [vmem:[#allocation8 + $0x10] sm:$0xff] %v3456_v28 }
 0x60e   :  { %v3648_v44 = vpop.f32.mrb[38].mxu1 }
 0x60f   :  { %v3649_v57 = vpop.f32.mrb[39].mxu1 }
 0x610   :  { %v3650_v22 = vadd.f32 %v3649_v57, %v3648_v44 }
 0x612   :  { %v3461_v0 = vadd.f32 %v3650_v22, %v3518_v2 }
 0x614   :  { %3467 = vst [vmem:[#allocation8 + $0x18] sm:$0xff] %v3461_v0 }
 0x615   :  { %4379 = shalt.err (!%p4376_p0)
}
 0x616   :  { %s4380_s21 = scalar_lea.hbm %s6043_s7, 512 }
 0x617   :  { %p4381_p1 = scmp.ne.s32.totalorder %s6043_s7, %s4380_s21  ;;  %p4384_p2 = scmp.lt.u32.totalorder %s4380_s21, %s6043_s7 }
 0x619   :  { %p4386_p3 = pnand %p4384_p2, %p4381_p1 }
 0x61b   :  { %4389 = shalt.err (!%p4386_p3)
}
 0x61c   :  { %3479 = dma.vmem_to_hbm [thread:$0]  %s3474_s18, 512, %s6043_s7, [#allocation4], %s4400_s3, %s4400_s3, %s4401_s25  }
 0x61d   :  { %4394 = dma.done.wait [#allocation4], 512  }
 0x61e   :  { %4395 = vsyncadd [#allocation4], 4294966784 }
 0x61f   :  { %3483 = vsyncpa [#allocation3], 1 }
 0x620   :  { %3484 = vsyncpa [#allocation6], 1 }
 0x621   :  { %3485 = vsyncpa [#allocation4], 1 }

// kernel: tpu_custom_call.1
= control target key start
LH: loop header
LB: loop body
LE: loop exit
PB: predicated region body
PF: predicated region fallthrough
CT: control target
= control target key end

     0   :  { %12 = vsyncpa [#allocation3], 0  ;;  %s6036_s0 = inlined_call_operand.hbm [shape: f32[32,8,64], index: 0, kind: input, shape index: {}]   ;;  %s6037_s1 = inlined_call_operand.vmem [shape: f32[64,128], index: 1, kind: input, shape index: {}]   ;;  %s6038_s2 = inlined_call_operand.vmem [shape: f32[128,4], index: 2, kind: input, shape index: {}]   ;;  %s6039_s3 = inlined_call_operand.hbm [shape: f32[256,256], index: 3, kind: input, shape index: {}]   ;;  %s6040_s4 = inlined_call_operand.vmem [shape: f32[1,256], index: 4, kind: input, shape index: {}]   ;;  %s6041_s5 = inlined_call_operand.hbm [shape: f32[256,128], index: 5, kind: input, shape index: {}]   ;;  %s6042_s6 = inlined_call_operand.vmem [shape: f32[1,128], index: 6, kind: input, shape index: {}]   ;;  %s6043_s7 = inlined_call_operand.hbm [shape: f32[32,128], index: 7, kind: output, shape index: {}]  }
   0x1   :  { %13 = vsyncpa [#allocation6], 0 }
   0x2   :  { %14 = vsyncpa [#allocation4], 0  ;;  %s4396_s24 = smov [#allocation5]   ;;  %s4302_s28 = scalar_lea.hbm %s6039_s3, 8192 }
   0x3   :  { %s36_s25 = sshll.u32 %s4396_s24, 4  ;;  %p4303_p0 = scmp.ne.s32.totalorder %s6039_s3, %s4302_s28  ;;  %s37_s25 = int_to_ptr.vmem [resolvable:$true] %s36_s25 }
   0x4   :  { %p4306_p1 = scmp.lt.u32.totalorder %s4302_s28, %s6039_s3 }
   0x6   :  { %p4308_p2 = pnand %p4306_p1, %p4303_p0 }
   0x8   :  { %4311 = shalt.err (!%p4308_p2)
}
   0x9   :  { %s4312_s10 = scalar_lea.vmem %s37_s25, 8192  ;;  %p4317_p4 = scmp.lt.s32.totalorder %s37_s25, %s37_s25 }
   0xa   :  { %p4313_p3 = scmp.ne.s32.totalorder %s37_s25, %s4312_s10  ;;  %p4318_p5 = scmp.lt.s32.totalorder %s4312_s10, %s4312_s10 }
   0xc   :  { %p4319_p6 = por %p4318_p5, %p4317_p4 }
   0xe   :  { %p4320_p7 = pnand %p4319_p6, %p4313_p3 }
  0x10   :  { %4323 = shalt.err (!%p4320_p7)
}
  0x11   :  { %s4397_s11 = smov 256   ;;  %s4398_s12 = smov 16  }
  0x12   :  { %42 = dma.hbm_to_vmem [thread:$0]  %s6039_s3, 8192, %s37_s25, [#allocation6], %s4397_s11, %s4397_s11, %s4398_s12  }
  0x13   :  { %s4399_s15 = smov [#allocation2]   ;;  %s4324_s19 = scalar_lea.hbm %s6036_s0, 4096 }
  0x14   :  { %s20_s16 = sshll.u32 %s4399_s15, 4  ;;  %p4325_p8 = scmp.ne.s32.totalorder %s6036_s0, %s4324_s19  ;;  %s21_s16 = int_to_ptr.vmem [resolvable:$true] %s20_s16 }
  0x15   :  { %p4328_p9 = scmp.lt.u32.totalorder %s4324_s19, %s6036_s0 }
  0x17   :  { %p4330_p10 = pnand %p4328_p9, %p4325_p8 }
  0x19   :  { %4333 = shalt.err (!%p4330_p10)
}
  0x1a   :  { %s4334_s24 = scalar_lea.vmem %s21_s16, 4096  ;;  %p4339_p12 = scmp.lt.s32.totalorder %s21_s16, %s21_s16 }
  0x1b   :  { %p4335_p11 = scmp.ne.s32.totalorder %s21_s16, %s4334_s24  ;;  %p4340_p13 = scmp.lt.s32.totalorder %s4334_s24, %s4334_s24 }
  0x1d   :  { %p4341_p0 = por %p4340_p13, %p4339_p12 }
  0x1f   :  { %p4342_p1 = pnand %p4341_p0, %p4335_p11 }
  0x21   :  { %4345 = shalt.err (!%p4342_p1)
}
  0x22   :  { %s4400_s3 = smov 128   ;;  %s4401_s25 = smov 8  }
  0x23   :  { %26 = dma.hbm_to_vmem [thread:$0]  %s6036_s0, 4096, %s21_s16, [#allocation3], %s4400_s3, %s4400_s3, %s4401_s25  }
  0x24   :  { %s4402_s28 = smov [#allocation7]   ;;  %s4346_s9 = scalar_lea.hbm %s6041_s5, 4096 }
  0x25   :  { %s50_s29 = sshll.u32 %s4402_s28, 4  ;;  %p4347_p2 = scmp.ne.s32.totalorder %s6041_s5, %s4346_s9  ;;  %s51_s29 = int_to_ptr.vmem [resolvable:$true] %s50_s29 }
  0x26   :  { %p4350_p3 = scmp.lt.u32.totalorder %s4346_s9, %s6041_s5 }
  0x28   :  { %p4352_p4 = pnand %p4350_p3, %p4347_p2 }
  0x2a   :  { %4355 = shalt.err (!%p4352_p4)
}
  0x2b   :  { %s4356_s14 = scalar_lea.vmem %s51_s29, 4096  ;;  %p4361_p6 = scmp.lt.s32.totalorder %s51_s29, %s51_s29 }
  0x2c   :  { %p4357_p5 = scmp.ne.s32.totalorder %s51_s29, %s4356_s14  ;;  %p4362_p7 = scmp.lt.s32.totalorder %s4356_s14, %s4356_s14 }
  0x2e   :  { %p4363_p8 = por %p4362_p7, %p4361_p6 }
  0x30   :  { %p4364_p9 = pnand %p4363_p8, %p4357_p5 }
  0x32   :  { %4367 = shalt.err (!%p4364_p9)
}
  0x33   :  { %56 = dma.hbm_to_vmem [thread:$0]  %s6041_s5, 4096, %s51_s29, [#allocation6], %s4400_s3, %s4400_s3, %s4401_s25  }
  0x34   :  { %4390 = dma.done.wait [#allocation3], 4096  }
  0x35   :  { %4391 = vsyncadd [#allocation3], 4294963200 }
  0x36   :  { %4392 = dma.done.wait [#allocation6], 12288  }
  0x37   :  { %4393 = vsyncadd [#allocation6], 4294955008  ;;  %v100_v0 = vld [vmem:[%s6037_s1] sm:$0xff]  ;;  %v101_v1 = vld [vmem:[%s6037_s1 + $0x8] sm:$0xff]  ;;  %vm108_vm0 = vcmask 523264   ;;  %vm703_vm1 = vcmask 31744  }
  0x38   :  { %v102_v2 = vld [vmem:[%s6037_s1 + $0x10] sm:$0xff]  ;;  %v3795_v3 = vpack.c.bf16 %v101_v1, %v100_v0  ;;  %v103_v4 = vld [vmem:[%s6037_s1 + $0x18] sm:$0xff]  ;;  %v104_v6 = vld [vmem:[%s6037_s1 + $0x20] sm:$0xff]  ;;  %vm2912_vm2 = vcmask 1041409   ;;  %vm2914_vm3 = vcmask 1042434   ;;  %vm2916_vm4 = vcmask 1043459  }
  0x39   :  { %v3799_v5 = vpack.c.bf16 %v103_v4, %v102_v2  ;;  %v105_v7 = vld [vmem:[%s6037_s1 + $0x28] sm:$0xff]  ;;  %v68_v8 = vld [vmem:[#allocation2] sm:$0xff]  ;;  %v106_v10 = vld [vmem:[%s6037_s1 + $0x30] sm:$0xff]  ;;  %vm2918_vm5 = vcmask 1044484   ;;  %vm2920_vm6 = vcmask 1045509   ;;  %vm2922_vm7 = vcmask 1046534  }
  0x3a   :  { %3796 = vmatprep.subr.bf16.mxu0 %v3795_v3  ;;  %3667 = vmatprep.mubr.msk.f32.mxu0 %vm108_vm0, %v68_v8  ;;  %v3803_v9 = vpack.c.bf16 %v105_v7, %v104_v6  ;;  %v107_v11 = vld [vmem:[%s6037_s1 + $0x38] sm:$0xff]  ;;  %v462_v13 = vld [vmem:[%s6038_s2] sm:$0xff]  ;;  %v463_v14 = vld [vmem:[%s6038_s2 + $0x8] sm:$0xff]  ;;  %vm2924_vm8 = vcmask 1047559   ;;  %s4408_s17 = smov [#allocation8]  }
  0x3b   :  { %3798 = vmatpush3.bf16.msra.mxu0 %v3795_v3  ;;  %v3807_v12 = vpack.c.bf16 %v107_v11, %v106_v10  ;;  %v3811_v15 = vpack.c.bf16 %v463_v14, %v462_v13  ;;  %v464_v16 = vld [vmem:[%s6038_s2 + $0x10] sm:$0xff]  ;;  %v465_v17 = vld [vmem:[%s6038_s2 + $0x18] sm:$0xff]  ;;  %v466_v19 = vld [vmem:[%s6038_s2 + $0x20] sm:$0xff]  ;;  %s3473_s18 = sshll.u32 %s4408_s17, 4  ;;  %s3474_s18 = int_to_ptr.vmem [resolvable:$true] %s3473_s18 }
  0x3c   :  { %3800 = vmatprep.subr.bf16.mxu0 %v3799_v5  ;;  %v3815_v18 = vpack.c.bf16 %v465_v17, %v464_v16  ;;  %v467_v20 = vld [vmem:[%s6038_s2 + $0x28] sm:$0xff]  ;;  %v70_v22 = vld [vmem:[#allocation2 + $0x10] sm:$0xff]  ;;  %v469_v25 = vld [vmem:[%s6038_s2 + $0x38] sm:$0xff]  ;;  %p4373_p11 = scmp.lt.s32.totalorder %s3474_s18, %s3474_s18 }
  0x3d   :  { %v69_v21 = vld [vmem:[#allocation2 + $0x8] sm:$0xff]  ;;  %3812 = vmatprep.subr.bf16.mxu1 %v3811_v15  ;;  %v3819_v23 = vpack.c.bf16 %v467_v20, %v466_v19  ;;  %v468_v24 = vld [vmem:[%s6038_s2 + $0x30] sm:$0xff]  ;;  %v71_v26 = vld [vmem:[#allocation2 + $0x18] sm:$0xff] }
  0x3e   :  { %3814 = vmatpush3.bf16.msra.mxu1 %v3811_v15  ;;  %v72_v27 = vld [vmem:[#allocation2 + $0x20] sm:$0xff]  ;;  %v3823_v28 = vpack.c.bf16 %v469_v25, %v468_v24  ;;  %v471_v30 = vld [vmem:[%s6038_s2 + $0x48] sm:$0xff]  ;;  %v74_v32 = vld [vmem:[#allocation2 + $0x30] sm:$0xff] }
  0x3f   :  { %3802 = vmatpush3.bf16.msra.mxu0 %v3799_v5  ;;  %3816 = vmatprep.subr.bf16.mxu1 %v3815_v18  ;;  %v470_v29 = vld [vmem:[%s6038_s2 + $0x40] sm:$0xff]  ;;  %v73_v31 = vld [vmem:[#allocation2 + $0x28] sm:$0xff]  ;;  %v75_v34 = vld [vmem:[#allocation2 + $0x38] sm:$0xff] }
  0x40   :  { %3804 = vmatprep.subr.bf16.mxu0 %v3803_v9  ;;  %v3827_v33 = vpack.c.bf16 %v471_v30, %v470_v29  ;;  %v76_v35 = vld [vmem:[#allocation2 + $0x40] sm:$0xff]  ;;  %v77_v36 = vld [vmem:[#allocation2 + $0x48] sm:$0xff]  ;;  %v78_v37 = vld [vmem:[#allocation2 + $0x50] sm:$0xff] }
  0x41   :  { %v79_v38 = vld [vmem:[#allocation2 + $0x58] sm:$0xff]  ;;  %v80_v39 = vld [vmem:[#allocation2 + $0x60] sm:$0xff]  ;;  %v81_v40 = vld [vmem:[#allocation2 + $0x68] sm:$0xff] }
  0x42   :  { %3818 = vmatpush3.bf16.msra.mxu1 %v3815_v18  ;;  %v82_v41 = vld [vmem:[#allocation2 + $0x70] sm:$0xff]  ;;  %v83_v42 = vld [vmem:[#allocation2 + $0x78] sm:$0xff]  ;;  %v84_v43 = vld [vmem:[#allocation2 + $0x80] sm:$0xff] }
  0x43   :  { %3806 = vmatpush3.bf16.msra.mxu0 %v3803_v9  ;;  %3820 = vmatprep.subr.bf16.mxu1 %v3819_v23  ;;  %v85_v44 = vld [vmem:[#allocation2 + $0x88] sm:$0xff]  ;;  %v86_v45 = vld [vmem:[#allocation2 + $0x90] sm:$0xff]  ;;  %v87_v46 = vld [vmem:[#allocation2 + $0x98] sm:$0xff] }
  0x44   :  { %3808 = vmatprep.subr.bf16.mxu0 %v3807_v12  ;;  %v88_v47 = vld [vmem:[#allocation2 + $0xa0] sm:$0xff]  ;;  %v89_v48 = vld [vmem:[#allocation2 + $0xa8] sm:$0xff]  ;;  %v90_v49 = vld [vmem:[#allocation2 + $0xb0] sm:$0xff] }
  0x45   :  { %v91_v50 = vld [vmem:[#allocation2 + $0xb8] sm:$0xff]  ;;  %v92_v51 = vld [vmem:[#allocation2 + $0xc0] sm:$0xff]  ;;  %v93_v52 = vld [vmem:[#allocation2 + $0xc8] sm:$0xff] }
  0x46   :  { %3822 = vmatpush3.bf16.msra.mxu1 %v3819_v23  ;;  %v94_v53 = vld [vmem:[#allocation2 + $0xd0] sm:$0xff]  ;;  %v95_v54 = vld [vmem:[#allocation2 + $0xd8] sm:$0xff]  ;;  %v96_v55 = vld [vmem:[#allocation2 + $0xe0] sm:$0xff] }
  0x47   :  { %3810 = vmatpush3.bf16.msra.mxu0 %v3807_v12  ;;  %3824 = vmatprep.subr.bf16.mxu1 %v3823_v28  ;;  %v97_v56 = vld [vmem:[#allocation2 + $0xe8] sm:$0xff]  ;;  %v98_v57 = vld [vmem:[#allocation2 + $0xf0] sm:$0xff]  ;;  %v99_v58 = vld [vmem:[#allocation2 + $0xf8] sm:$0xff] }
  0x48   :  { %v472_v59 = vld [vmem:[%s6038_s2 + $0x50] sm:$0xff]  ;;  %v473_v60 = vld [vmem:[%s6038_s2 + $0x58] sm:$0xff]  ;;  %v474_v62 = vld [vmem:[%s6038_s2 + $0x60] sm:$0xff] }
  0x49   :  { %v3831_v61 = vpack.c.bf16 %v473_v60, %v472_v59  ;;  %v475_v63 = vld [vmem:[%s6038_s2 + $0x68] sm:$0xff]  ;;  %v476_v1 = vld [vmem:[%s6038_s2 + $0x70] sm:$0xff]  ;;  %v477_v2 = vld [vmem:[%s6038_s2 + $0x78] sm:$0xff]  ;;  %s4407_s2 = smov 64  }
  0x4a   :  { %3668 = vmatmul.mubr.msk.f32.vlgmr.msra.gmra.mrb[0].mxu0 %vm108_vm0, %v69_v21  ;;  %3826 = vmatpush3.bf16.msra.mxu1 %v3823_v28  ;;  %v3835_v0 = vpack.c.bf16 %v475_v63, %v474_v62  ;;  %v3839_v3 = vpack.c.bf16 %v477_v2, %v476_v1 }
  0x4b   :  { %3670 = vmatprep.mubr.msk.f32.mxu0 %vm108_vm0, %v70_v22  ;;  %3828 = vmatprep.subr.bf16.mxu1 %v3827_v33 }
  0x4e   :  { %3671 = vmatmul.mubr.msk.f32.gmra.mrb[2].mxu0 %vm108_vm0, %v71_v26  ;;  %3830 = vmatpush3.bf16.msra.mxu1 %v3827_v33 }
  0x4f   :  { %3673 = vmatprep.mubr.msk.f32.mxu0 %vm108_vm0, %v72_v27  ;;  %3832 = vmatprep.subr.bf16.mxu1 %v3831_v61 }
  0x52   :  { %3674 = vmatmul.mubr.msk.f32.gmra.mrb[4].mxu0 %vm108_vm0, %v73_v31  ;;  %3834 = vmatpush3.bf16.msra.mxu1 %v3831_v61 }
  0x53   :  { %3676 = vmatprep.mubr.msk.f32.mxu0 %vm108_vm0, %v74_v32  ;;  %3836 = vmatprep.subr.bf16.mxu1 %v3835_v0 }
  0x56   :  { %3677 = vmatmul.mubr.msk.f32.gmra.mrb[6].mxu0 %vm108_vm0, %v75_v34  ;;  %3838 = vmatpush3.bf16.msra.mxu1 %v3835_v0 }
  0x57   :  { %3679 = vmatprep.mubr.msk.f32.mxu0 %vm108_vm0, %v76_v35  ;;  %3840 = vmatprep.subr.bf16.mxu1 %v3839_v3 }
  0x5a   :  { %3680 = vmatmul.mubr.msk.f32.gmra.mrb[8].mxu0 %vm108_vm0, %v77_v36  ;;  %3842 = vmatpush3.bf16.msra.mxu1 %v3839_v3 }
  0x5b   :  { %3682 = vmatprep.mubr.msk.f32.mxu0 %vm108_vm0, %v78_v37 }
  0x5e   :  { %3683 = vmatmul.mubr.msk.f32.gmra.mrb[10].mxu0 %vm108_vm0, %v79_v38 }
  0x5f   :  { %3685 = vmatprep.mubr.msk.f32.mxu0 %vm108_vm0, %v80_v39 }
  0x62   :  { %3686 = vmatmul.mubr.msk.f32.gmra.mrb[12].mxu0 %vm108_vm0, %v81_v40 }
  0x63   :  { %3688 = vmatprep.mubr.msk.f32.mxu0 %vm108_vm0, %v82_v41 }
  0x66   :  { %3689 = vmatmul.mubr.msk.f32.gmra.mrb[14].mxu0 %vm108_vm0, %v83_v42 }
  0x67   :  { %3691 = vmatprep.mubr.msk.f32.mxu0 %vm108_vm0, %v84_v43 }
  0x6a   :  { %3692 = vmatmul.mubr.msk.f32.gmra.mrb[16].mxu0 %vm108_vm0, %v85_v44 }
  0x6b   :  { %3694 = vmatprep.mubr.msk.f32.mxu0 %vm108_vm0, %v86_v45 }
  0x6e   :  { %3695 = vmatmul.mubr.msk.f32.gmra.mrb[18].mxu0 %vm108_vm0, %v87_v46 }
  0x6f   :  { %3697 = vmatprep.mubr.msk.f32.mxu0 %vm108_vm0, %v88_v47 }
  0x72   :  { %3698 = vmatmul.mubr.msk.f32.gmra.mrb[20].mxu0 %vm108_vm0, %v89_v48 }
  0x73   :  { %3700 = vmatprep.mubr.msk.f32.mxu0 %vm108_vm0, %v90_v49 }
  0x76   :  { %3701 = vmatmul.mubr.msk.f32.gmra.mrb[22].mxu0 %vm108_vm0, %v91_v50 }
  0x77   :  { %3703 = vmatprep.mubr.msk.f32.mxu0 %vm108_vm0, %v92_v51 }
  0x7a   :  { %3704 = vmatmul.mubr.msk.f32.gmra.mrb[24].mxu0 %vm108_vm0, %v93_v52 }
  0x7b   :  { %3706 = vmatprep.mubr.msk.f32.mxu0 %vm108_vm0, %v94_v53 }
  0x7e   :  { %3707 = vmatmul.mubr.msk.f32.gmra.mrb[26].mxu0 %vm108_vm0, %v95_v54 }
  0x7f   :  { %3709 = vmatprep.mubr.msk.f32.mxu0 %vm108_vm0, %v96_v55 }
  0x82   :  { %3710 = vmatmul.mubr.msk.f32.gmra.mrb[28].mxu0 %vm108_vm0, %v97_v56 }
  0x83   :  { %3712 = vmatprep.mubr.msk.f32.mxu0 %vm108_vm0, %v98_v57 }
  0x86   :  { %3713 = vmatmul.mubr.msk.f32.gmra.mrb[30].mxu0 %vm108_vm0, %v99_v58 }
 0x11d   :  { %v3669_v4 = vpop.f32.mrb[0].mxu0 }
 0x11e   :  { %v271_v5 = vpop.f32.mrb[1].mxu0 }
 0x11f   :  { %4063 = vtanh.f32 %v271_v5  ;;  %v6046_v5 = vmov 1  }
 0x120   :  { %4065 = vtanh.f32 %v3669_v4  ;;  %v6048_v4 = vmov 3   ;;  %3953 = vset.pattern.permute.xlu1 %v6046_v5 }
 0x121   :  { %v3672_v6 = vpop.f32.mrb[2].mxu0  ;;  %3952 = vset.pattern.permute.xlu0 %v6048_v4 }
 0x122   :  { %4067 = vtanh.f32 %v3672_v6  ;;  %v281_v7 = vpop.f32.mrb[3].mxu0 }
 0x123   :  { %4069 = vtanh.f32 %v281_v7 }
 0x125   :  { %v3675_v8 = vpop.f32.mrb[4].mxu0 }
 0x126   :  { %4071 = vtanh.f32 %v3675_v8  ;;  %v291_v9 = vpop.f32.mrb[5].mxu0 }
 0x127   :  { %4073 = vtanh.f32 %v291_v9 }
 0x129   :  { %v4064_v10 = vpop.eup %4063  ;;  %v3678_v11 = vpop.f32.mrb[6].mxu0 }
 0x12a   :  { %v4066_v12 = vpop.eup %4065  ;;  %3747 = vmatprep.mubr.f32.mxu1 %v4064_v10  ;;  %4075 = vtanh.f32 %v3678_v11  ;;  %v301_v13 = vpop.f32.mrb[7].mxu0 }
 0x12b   :  { %3748 = vmatmul.mubr.f32.vlgmr.msra.gmra.mrb[0].mxu1 %v4066_v12  ;;  %4077 = vtanh.f32 %v301_v13 }
 0x12c   :  { %v4068_v14 = vpop.eup %4067 }
 0x12d   :  { %v4070_v15 = vpop.eup %4069  ;;  %v3681_v16 = vpop.f32.mrb[8].mxu0 }
 0x12e   :  { %3750 = vmatprep.mubr.f32.mxu1 %v4070_v15  ;;  %4079 = vtanh.f32 %v3681_v16  ;;  %v311_v17 = vpop.f32.mrb[9].mxu0 }
 0x12f   :  { %3751 = vmatmul.mubr.f32.gmra.mrb[2].mxu1 %v4068_v14  ;;  %4081 = vtanh.f32 %v311_v17 }
 0x130   :  { %v4072_v18 = vpop.eup %4071 }
 0x131   :  { %v4074_v19 = vpop.eup %4073  ;;  %v3684_v20 = vpop.f32.mrb[10].mxu0 }
 0x132   :  { %3753 = vmatprep.mubr.f32.mxu1 %v4074_v19  ;;  %4083 = vtanh.f32 %v3684_v20  ;;  %v321_v21 = vpop.f32.mrb[11].mxu0 }
 0x133   :  { %3754 = vmatmul.mubr.f32.gmra.mrb[4].mxu1 %v4072_v18  ;;  %4085 = vtanh.f32 %v321_v21 }
 0x134   :  { %v4076_v22 = vpop.eup %4075 }
 0x135   :  { %v4078_v23 = vpop.eup %4077  ;;  %v3687_v24 = vpop.f32.mrb[12].mxu0 }
 0x136   :  { %3756 = vmatprep.mubr.f32.mxu1 %v4078_v23  ;;  %4087 = vtanh.f32 %v3687_v24  ;;  %v331_v25 = vpop.f32.mrb[13].mxu0 }
 0x137   :  { %3757 = vmatmul.mubr.f32.gmra.mrb[6].mxu1 %v4076_v22  ;;  %4089 = vtanh.f32 %v331_v25 }
 0x138   :  { %v4080_v26 = vpop.eup %4079 }
 0x139   :  { %v4082_v27 = vpop.eup %4081  ;;  %v3690_v28 = vpop.f32.mrb[14].mxu0 }
 0x13a   :  { %3759 = vmatprep.mubr.f32.mxu1 %v4082_v27  ;;  %4091 = vtanh.f32 %v3690_v28  ;;  %v341_v29 = vpop.f32.mrb[15].mxu0 }
 0x13b   :  { %3760 = vmatmul.mubr.f32.gmra.mrb[8].mxu1 %v4080_v26  ;;  %4093 = vtanh.f32 %v341_v29 }
 0x13c   :  { %v4084_v30 = vpop.eup %4083 }
 0x13d   :  { %v4086_v31 = vpop.eup %4085  ;;  %v3693_v32 = vpop.f32.mrb[16].mxu0 }
 0x13e   :  { %3762 = vmatprep.mubr.f32.mxu1 %v4086_v31  ;;  %4095 = vtanh.f32 %v3693_v32  ;;  %v351_v33 = vpop.f32.mrb[17].mxu0 }
 0x13f   :  { %3763 = vmatmul.mubr.f32.gmra.mrb[10].mxu1 %v4084_v30  ;;  %4097 = vtanh.f32 %v351_v33 }
 0x140   :  { %v4088_v34 = vpop.eup %4087 }
 0x141   :  { %v4090_v35 = vpop.eup %4089  ;;  %v3696_v36 = vpop.f32.mrb[18].mxu0 }
 0x142   :  { %3765 = vmatprep.mubr.f32.mxu1 %v4090_v35  ;;  %4099 = vtanh.f32 %v3696_v36  ;;  %v361_v37 = vpop.f32.mrb[19].mxu0 }
 0x143   :  { %3766 = vmatmul.mubr.f32.gmra.mrb[12].mxu1 %v4088_v34  ;;  %4101 = vtanh.f32 %v361_v37 }
 0x144   :  { %v4092_v38 = vpop.eup %4091 }
 0x145   :  { %v4094_v39 = vpop.eup %4093  ;;  %v3699_v40 = vpop.f32.mrb[20].mxu0 }
 0x146   :  { %3768 = vmatprep.mubr.f32.mxu1 %v4094_v39  ;;  %4103 = vtanh.f32 %v3699_v40  ;;  %v371_v41 = vpop.f32.mrb[21].mxu0 }
 0x147   :  { %3769 = vmatmul.mubr.f32.gmra.mrb[14].mxu1 %v4092_v38  ;;  %4105 = vtanh.f32 %v371_v41 }
 0x148   :  { %v4096_v42 = vpop.eup %4095 }
 0x149   :  { %v4098_v43 = vpop.eup %4097  ;;  %v3702_v44 = vpop.f32.mrb[22].mxu0 }
 0x14a   :  { %3771 = vmatprep.mubr.f32.mxu1 %v4098_v43  ;;  %4107 = vtanh.f32 %v3702_v44  ;;  %v381_v45 = vpop.f32.mrb[23].mxu0 }
 0x14b   :  { %3772 = vmatmul.mubr.f32.gmra.mrb[16].mxu1 %v4096_v42  ;;  %4109 = vtanh.f32 %v381_v45 }
 0x14c   :  { %v4100_v46 = vpop.eup %4099 }
 0x14d   :  { %v4102_v47 = vpop.eup %4101  ;;  %v3705_v48 = vpop.f32.mrb[24].mxu0 }
 0x14e   :  { %3774 = vmatprep.mubr.f32.mxu1 %v4102_v47  ;;  %4111 = vtanh.f32 %v3705_v48  ;;  %v391_v49 = vpop.f32.mrb[25].mxu0 }
 0x14f   :  { %3775 = vmatmul.mubr.f32.gmra.mrb[18].mxu1 %v4100_v46  ;;  %4113 = vtanh.f32 %v391_v49 }
 0x150   :  { %v4104_v50 = vpop.eup %4103 }
 0x151   :  { %v4106_v51 = vpop.eup %4105  ;;  %v3708_v52 = vpop.f32.mrb[26].mxu0 }
 0x152   :  { %4115 = vtanh.f32 %v3708_v52  ;;  %v401_v53 = vpop.f32.mrb[27].mxu0  ;;  %3777 = vmatprep.mubr.f32.mxu1 %v4106_v51 }
 0x153   :  { %4117 = vtanh.f32 %v401_v53  ;;  %3778 = vmatmul.mubr.f32.gmra.mrb[20].mxu1 %v4104_v50 }
 0x154   :  { %v4108_v54 = vpop.eup %4107 }
 0x155   :  { %v4110_v55 = vpop.eup %4109  ;;  %v3711_v56 = vpop.f32.mrb[28].mxu0 }
 0x156   :  { %3780 = vmatprep.mubr.f32.mxu1 %v4110_v55  ;;  %4119 = vtanh.f32 %v3711_v56  ;;  %v411_v57 = vpop.f32.mrb[29].mxu0 }
 0x157   :  { %3781 = vmatmul.mubr.f32.gmra.mrb[22].mxu1 %v4108_v54  ;;  %4121 = vtanh.f32 %v411_v57 }
 0x158   :  { %v4112_v58 = vpop.eup %4111 }
 0x159   :  { %v4114_v59 = vpop.eup %4113  ;;  %v3714_v60 = vpop.f32.mrb[30].mxu0 }
 0x15a   :  { %3783 = vmatprep.mubr.f32.mxu1 %v4114_v59  ;;  %4123 = vtanh.f32 %v3714_v60  ;;  %v421_v61 = vpop.f32.mrb[31].mxu0 }
 0x15b   :  { %3784 = vmatmul.mubr.f32.gmra.mrb[24].mxu1 %v4112_v58  ;;  %4125 = vtanh.f32 %v421_v61 }
 0x15c   :  { %v4116_v62 = vpop.eup %4115 }
 0x15d   :  { %v4118_v63 = vpop.eup %4117 }
 0x15e   :  { %3786 = vmatprep.mubr.f32.mxu1 %v4118_v63 }
 0x15f   :  { %3787 = vmatmul.mubr.f32.gmra.mrb[26].mxu1 %v4116_v62 }
 0x160   :  { %v4120_v0 = vpop.eup %4119 }
 0x161   :  { %v4122_v1 = vpop.eup %4121 }
 0x162   :  { %3789 = vmatprep.mubr.f32.mxu1 %v4122_v1 }
 0x163   :  { %3790 = vmatmul.mubr.f32.gmra.mrb[28].mxu1 %v4120_v0 }
 0x164   :  { %v4124_v2 = vpop.eup %4123 }
 0x165   :  { %v4126_v3 = vpop.eup %4125 }
 0x166   :  { %3792 = vmatprep.mubr.f32.mxu1 %v4126_v3 }
 0x167   :  { %3793 = vmatmul.mubr.f32.gmra.mrb[30].mxu1 %v4124_v2 }
 0x1fe   :  { %v3749_v6 = vpop.f32.mrb[0].mxu1 }
 0x1ff   :  { %v711_v7 = vsel %vm703_vm1, %v3749_v6, -inf  ;;  %v544_v8 = vpop.f32.mrb[1].mxu1 }
 0x200   :  { %v712_v9 = vrot.slane %v711_v7, 4  ;;  %v704_v10 = vsel %vm703_vm1, %v544_v8, -inf }
 0x201   :  { %v705_v11 = vrot.slane %v704_v10, 4 }
 0x202   :  { %v713_v12 = vmax.f32 %v711_v7, %v712_v9  ;;  %v3752_v13 = vpop.f32.mrb[2].mxu1 }
 0x203   :  { %v706_v14 = vmax.f32 %v704_v10, %v705_v11  ;;  %v725_v15 = vsel %vm703_vm1, %v3752_v13, -inf  ;;  %v554_v16 = vpop.f32.mrb[3].mxu1 }
 0x204   :  { %v714_v17 = vrot.slane %v713_v12, 2  ;;  %v726_v18 = vrot.slane %v725_v15, 4  ;;  %v718_v19 = vsel %vm703_vm1, %v554_v16, -inf }
 0x205   :  { %v707_v20 = vrot.slane %v706_v14, 2  ;;  %v719_v21 = vrot.slane %v718_v19, 4 }
 0x206   :  { %v715_v22 = vmax.f32 %v713_v12, %v714_v17  ;;  %v727_v23 = vmax.f32 %v725_v15, %v726_v18  ;;  %v3755_v24 = vpop.f32.mrb[4].mxu1 }
 0x207   :  { %v708_v25 = vmax.f32 %v706_v14, %v707_v20  ;;  %v720_v26 = vmax.f32 %v718_v19, %v719_v21  ;;  %v739_v27 = vsel %vm703_vm1, %v3755_v24, -inf  ;;  %v4602_v28 = vpop.f32.mrb[5].mxu1 }
 0x208   :  { %v716_v29 = vrot.slane %v715_v22, 1  ;;  %v728_v30 = vrot.slane %v727_v23, 2  ;;  %v740_v31 = vrot.slane %v739_v27, 4  ;;  %v732_v32 = vsel %vm703_vm1, %v4602_v28, -inf }
 0x209   :  { %v709_v33 = vrot.slane %v708_v25, 1  ;;  %v721_v34 = vrot.slane %v720_v26, 2  ;;  %v733_v41 = vrot.slane %v732_v32, 4 }
 0x20a   :  { %v717_v35 = vmax.f32 %v715_v22, %v716_v29  ;;  %v729_v36 = vmax.f32 %v727_v23, %v728_v30  ;;  %v741_v37 = vmax.f32 %v739_v27, %v740_v31  ;;  %v4606_v38 = vpop.f32.mrb[6].mxu1 }
 0x20b   :  { %v710_v39 = vmax.f32 %v708_v25, %v709_v33  ;;  %v722_v40 = vmax.f32 %v720_v26, %v721_v34  ;;  %v4608_v42 = vpop.f32.mrb[7].mxu1  ;;  %v734_v54 = vmax.f32 %v732_v32, %v733_v41  ;;  %v753_v59 = vsel %vm703_vm1, %v4606_v38, -inf }
 0x20c   :  { %v929_v43 = vsub.f32 %v3749_v6, %v717_v35  ;;  %v730_v44 = vrot.slane %v729_v36, 1  ;;  %v742_v45 = vrot.slane %v741_v37, 2  ;;  %v754_v2 = vrot.slane %v753_v59, 4 }
 0x20d   :  { %v928_v46 = vsub.f32 %v544_v8, %v710_v39  ;;  %v723_v47 = vrot.slane %v722_v40, 1  ;;  %v735_v63 = vrot.slane %v734_v54, 2  ;;  %v746_v15 = vsel %vm703_vm1, %v4608_v42, -inf }
 0x20e   :  { %v962_v48 = vmul.f32 1.442695, %v929_v43  ;;  %v731_v49 = vmax.f32 %v729_v36, %v730_v44  ;;  %v743_v50 = vmax.f32 %v741_v37, %v742_v45  ;;  %v4610_v51 = vpop.f32.mrb[8].mxu1  ;;  %v755_v9 = vmax.f32 %v753_v59, %v754_v2 }
 0x20f   :  { %v960_v52 = vmul.f32 1.442695, %v928_v46  ;;  %v724_v53 = vmax.f32 %v722_v40, %v723_v47  ;;  %v4612_v55 = vpop.f32.mrb[9].mxu1  ;;  %v736_v6 = vmax.f32 %v734_v54, %v735_v63  ;;  %v747_v31 = vrot.slane %v746_v15, 4 }
 0x210   :  { %4127 = vpow2.f32 %v962_v48  ;;  %v931_v56 = vsub.f32 %v3752_v13, %v731_v49  ;;  %v744_v57 = vrot.slane %v743_v50, 1  ;;  %v756_v21 = vrot.slane %v755_v9, 2 }
 0x211   :  { %4129 = vpow2.f32 %v960_v52  ;;  %v930_v58 = vsub.f32 %v554_v16, %v724_v53  ;;  %v737_v14 = vrot.slane %v736_v6, 1  ;;  %v767_v16 = vsel %vm703_vm1, %v4610_v51, -inf }
 0x212   :  { %v966_v60 = vmul.f32 1.442695, %v931_v56  ;;  %v4616_v61 = vpop.f32.mrb[10].mxu1  ;;  %v745_v1 = vmax.f32 %v743_v50, %v744_v57  ;;  %v768_v25 = vrot.slane %v767_v16, 4  ;;  %v757_v35 = vmax.f32 %v755_v9, %v756_v21 }
 0x213   :  { %v964_v62 = vmul.f32 1.442695, %v930_v58  ;;  %v4618_v0 = vpop.f32.mrb[11].mxu1  ;;  %v738_v30 = vmax.f32 %v736_v6, %v737_v14  ;;  %v748_v49 = vmax.f32 %v746_v15, %v747_v31 }
 0x214   :  { %4131 = vpow2.f32 %v966_v60  ;;  %v933_v8 = vsub.f32 %v3755_v24, %v745_v1  ;;  %v769_v41 = vmax.f32 %v767_v16, %v768_v25  ;;  %v758_v48 = vrot.slane %v757_v35, 1 }
 0x215   :  { %4133 = vpow2.f32 %v964_v62  ;;  %v932_v44 = vsub.f32 %v4602_v28, %v738_v30  ;;  %v774_v56 = vsel %vm703_vm1, %v4618_v0, -inf  ;;  %v749_v62 = vrot.slane %v748_v49, 2 }
 0x216   :  { %v4620_v3 = vpop.f32.mrb[12].mxu1  ;;  %v970_v20 = vmul.f32 1.442695, %v933_v8  ;;  %v770_v54 = vrot.slane %v769_v41, 2  ;;  %v759_v60 = vmax.f32 %v757_v35, %v758_v48  ;;  %v775_v2 = vrot.slane %v774_v56, 4 }
 0x217   :  { %v4622_v7 = vpop.f32.mrb[13].mxu1  ;;  %v968_v59 = vmul.f32 1.442695, %v932_v44  ;;  %v750_v16 = vmax.f32 %v748_v49, %v749_v62 }
 0x218   :  { %4135 = vpow2.f32 %v970_v20  ;;  %v771_v8 = vmax.f32 %v769_v41, %v770_v54  ;;  %v935_v15 = vsub.f32 %v4606_v38, %v759_v60  ;;  %v776_v21 = vmax.f32 %v774_v56, %v775_v2 }
 0x219   :  { %v751_v31 = vrot.slane %v750_v16, 1  ;;  %v6044_v2 = vmov 0  }
 0x21a   :  { %v4624_v10 = vpop.eup %4127  ;;  %v4626_v11 = vpop.f32.mrb[14].mxu1  ;;  %v974_v30 = vmul.f32 1.442695, %v935_v15 }
 0x21b   :  { %v4628_v12 = vpop.eup %4129  ;;  %v1031_v13 = vsel %vm703_vm1, %v4624_v10, 0.0  ;;  %v4636_v17 = vpop.f32.mrb[15].mxu1  ;;  %v809_v35 = vsel %vm703_vm1, %v4626_v11, -inf }
 0x21c   :  { %v1032_v18 = vrot.slane %v1031_v13, 4  ;;  %v1024_v19 = vsel %vm703_vm1, %v4628_v12, 0.0 }
 0x21d   :  { %v1025_v22 = vrot.slane %v1024_v19, 4 }
 0x21e   :  { %v4640_v23 = vpop.eup %4131  ;;  %v1033_v24 = vadd.f32 %v1032_v18, %v1031_v13  ;;  %v4642_v26 = vpop.f32.mrb[16].mxu1 }
 0x21f   :  { %v1026_v27 = vadd.f32 %v1025_v22, %v1024_v19  ;;  %v1045_v29 = vsel %vm703_vm1, %v4640_v23, 0.0  ;;  %v4646_v32 = vpop.f32.mrb[17].mxu1  ;;  %v4648_v36 = vpop.eup %4133  ;;  %v772_v22 = vrot.slane %v771_v8, 1 }
 0x220   :  { %v1034_v33 = vrot.slane %v1033_v24, 2  ;;  %v1046_v34 = vrot.slane %v1045_v29, 4  ;;  %v1038_v47 = vsel %vm703_vm1, %v4648_v36, 0.0 }
 0x221   :  { %v1027_v37 = vrot.slane %v1026_v27, 2  ;;  %v1039_v58 = vrot.slane %v1038_v47, 4  ;;  %v773_v38 = vmax.f32 %v771_v8, %v772_v22 }
 0x222   :  { %v1035_v39 = vadd.f32 %v1034_v33, %v1033_v24  ;;  %v1047_v40 = vadd.f32 %v1046_v34, %v1045_v29  ;;  %v4650_v43 = vpop.f32.mrb[18].mxu1  ;;  %v4663_v6 = vpop.eup %4135  ;;  %v777_v34 = vrot.slane %v776_v21, 2 }
 0x223   :  { %v4653_v45 = vpop.f32.mrb[19].mxu1  ;;  %v1028_v50 = vadd.f32 %v1027_v37, %v1026_v27  ;;  %v1040_v13 = vadd.f32 %v1039_v58, %v1038_v47  ;;  %v1059_v20 = vsel %vm703_vm1, %v4663_v6, 0.0 }
 0x224   :  { %v1036_v46 = vrot.slane %v1035_v39, 1  ;;  %v1048_v52 = vrot.slane %v1047_v40, 2  ;;  %v1060_v29 = vrot.slane %v1059_v20, 4  ;;  %v778_v49 = vmax.f32 %v776_v21, %v777_v34 }
 0x225   :  { %v1029_v63 = vrot.slane %v1028_v50, 1  ;;  %v1041_v25 = vrot.slane %v1040_v13, 2 }
 0x226   :  { %v1037_v53 = vadd.f32 %v1036_v46, %v1035_v39  ;;  %v4659_v57 = vpop.f32.mrb[20].mxu1  ;;  %v1049_v1 = vadd.f32 %v1048_v52, %v1047_v40  ;;  %v1061_v44 = vadd.f32 %v1060_v29, %v1059_v20  ;;  %v752_v46 = vmax.f32 %v750_v16, %v751_v31 }
 0x227   :  { %v4661_v28 = vpop.f32.mrb[21].mxu1  ;;  %v1030_v18 = vadd.f32 %v1029_v63, %v1028_v50  ;;  %v1042_v40 = vadd.f32 %v1041_v25, %v1040_v13  ;;  %v810_v50 = vrot.slane %v809_v35, 4  ;;  %v937_v52 = vsub.f32 %v4610_v51, %v773_v38 }
 0x228   :  { %4137 = vrcp.f32 %v1037_v53  ;;  %v1050_v19 = vrot.slane %v1049_v1, 1  ;;  %v779_v62 = vrot.slane %v778_v49, 1  ;;  %v6050_v51 = vmov 2  }
 0x229   :  { %4139 = vpow2.f32 %v968_v59  ;;  %v1043_v54 = vrot.slane %v1042_v40, 1  ;;  %v811_v56 = vmax.f32 %v809_v35, %v810_v50  ;;  %v1062_v59 = vrot.slane %v1061_v44, 2 }
 0x22a   :  { %v4665_v9 = vpop.f32.mrb[22].mxu1  ;;  %v1051_v33 = vadd.f32 %v1050_v19, %v1049_v1  ;;  %4141 = vrcp.f32 %v1030_v18  ;;  %v978_v1 = vmul.f32 1.442695, %v937_v52  ;;  %v760_v18 = vsel %vm703_vm1, %v4612_v55, -inf }
 0x22b   :  { %v4667_v14 = vpop.f32.mrb[23].mxu1  ;;  %4143 = vpow2.f32 %v974_v30  ;;  %v812_v63 = vrot.slane %v811_v56, 2  ;;  %v1044_v15 = vadd.f32 %v1043_v54, %v1042_v40  ;;  %v1063_v19 = vadd.f32 %v1062_v59, %v1061_v44 }
 0x22c   :  { %4145 = vrcp.f32 %v1051_v33  ;;  %v780_v21 = vmax.f32 %v778_v49, %v779_v62  ;;  %v761_v29 = vrot.slane %v760_v18, 4  ;;  %v816_v31 = vsel %vm703_vm1, %v4646_v32, -inf }
 0x22d   :  { %v813_v22 = vmax.f32 %v811_v56, %v812_v63  ;;  %4147 = vpow2.f32 %v978_v1  ;;  %v817_v38 = vrot.slane %v816_v31, 4  ;;  %v1064_v35 = vrot.slane %v1063_v19, 1 }
 0x22e   :  { %v4672_v24 = vpop.f32.mrb[24].mxu1  ;;  %4149 = vrcp.f32 %v1044_v15  ;;  %v781_v50 = vsel %vm703_vm1, %v4616_v61, -inf }
 0x22f   :  { %v4674_v27 = vpop.f32.mrb[25].mxu1  ;;  %v814_v40 = vrot.slane %v813_v22, 1  ;;  %v818_v44 = vmax.f32 %v816_v31, %v817_v38  ;;  %v1065_v52 = vadd.f32 %v1064_v35, %v1063_v19 }
 0x231   :  { %v819_v54 = vrot.slane %v818_v44, 2 }
 0x232   :  { %v4678_v37 = vpop.f32.mrb[26].mxu1  ;;  %v4138_v39 = vpop.eup %4137 }
 0x233   :  { %v4680_v41 = vpop.f32.mrb[27].mxu1  ;;  %v1281_v47 = vmul.f32 %v4138_v39, %v4624_v10  ;;  %v4683_v48 = vpop.eup %4139  ;;  %v934_v10 = vsub.f32 %v4608_v42, %v752_v46  ;;  %v938_v39 = vsub.f32 %v4618_v0, %v780_v21  ;;  %v762_v46 = vmax.f32 %v760_v18, %v761_v29 }
 0x234   :  { %v1052_v60 = vsel %vm703_vm1, %v4683_v48, 0.0  ;;  %v4142_v13 = vpop.eup %4141  ;;  %v830_v0 = vsel %vm703_vm1, %v4653_v45, -inf  ;;  %v820_v1 = vmax.f32 %v818_v44, %v819_v54 }
 0x235   :  { %1733 = vperm.xlu1 %3953, %v1281_v47   ;;  %2501 = vperm.xlu0 %3952, %v1281_v47   ;;  %v1053_v16 = vrot.slane %v1052_v60, 4  ;;  %v972_v20 = vmul.f32 1.442695, %v934_v10  ;;  %v4701_v25 = vpop.eup %4143  ;;  %v1280_v30 = vmul.f32 %v4142_v13, %v4628_v12  ;;  %v980_v59 = vmul.f32 1.442695, %v938_v39 }
 0x236   :  { %v4686_v53 = vpop.f32.mrb[28].mxu1  ;;  %v4146_v33 = vpop.eup %4145  ;;  %v1073_v12 = vsel %vm703_vm1, %v4701_v25, 0.0  ;;  %v763_v10 = vrot.slane %v762_v46, 2  ;;  %v831_v62 = vrot.slane %v830_v0, 4  ;;  %v821_v31 = vrot.slane %v820_v1, 1 }
 0x237   :  { %v4688_v58 = vpop.f32.mrb[29].mxu1  ;;  %v1054_v34 = vadd.f32 %v1053_v16, %v1052_v60  ;;  %4151 = vpow2.f32 %v972_v20  ;;  %v1074_v56 = vrot.slane %v1073_v12, 4  ;;  %v815_v60 = vmax.f32 %v813_v22, %v814_v40  ;;  %v4720_v13 = vpop.eup %4147 }
 0x238   :  { %4153 = vrcp.f32 %v1065_v52  ;;  %v4150_v15 = vpop.eup %4149  ;;  %v832_v19 = vmax.f32 %v830_v0, %v831_v62  ;;  %v764_v21 = vmax.f32 %v762_v46, %v763_v10 }
 0x239   :  { %3955 = vset.pattern.permute.xlu1 %v6044_v2  ;;  %3954 = vset.pattern.permute.xlu0 %v6050_v51  ;;  %v1055_v49 = vrot.slane %v1054_v34, 2  ;;  %v1075_v16 = vadd.f32 %v1074_v56, %v1073_v12  ;;  %4155 = vpow2.f32 %v980_v59  ;;  %v943_v18 = vsub.f32 %v4626_v11, %v815_v60 }
 0x23a   :  { %v4695_v8 = vpop.f32.mrb[30].mxu1  ;;  %1319 = vperm.xlu1 %3955, %v1281_v47   ;;  %2117 = vperm.xlu0 %3954, %v1281_v47   ;;  %v4712_v47 = vmul.f32 %v4146_v33, %v4640_v23  ;;  %v782_v23 = vrot.slane %v781_v50, 4  ;;  %v1087_v33 = vsel %vm703_vm1, %v4720_v13, 0.0  ;;  %v833_v39 = vrot.slane %v832_v19, 2 }
 0x23b   :  { %v4699_v42 = vpop.f32.mrb[31].mxu1  ;;  %v1056_v63 = vadd.f32 %v1055_v49, %v1054_v34  ;;  %v4731_v34 = vmul.f32 %v4150_v15, %v4648_v36  ;;  %v1076_v38 = vrot.slane %v1075_v16, 2  ;;  %v990_v11 = vmul.f32 1.442695, %v943_v18 }
 0x23c   :  { %v783_v22 = vmax.f32 %v781_v50, %v782_v23  ;;  %v765_v40 = vrot.slane %v764_v21, 1  ;;  %v1088_v12 = vrot.slane %v1087_v33, 4  ;;  %v822_v36 = vmax.f32 %v820_v1, %v821_v31 }
 0x23d   :  { %v1057_v29 = vrot.slane %v1056_v63, 1  ;;  %v865_v49 = vsel %vm703_vm1, %v4665_v9, -inf  ;;  %v1077_v50 = vadd.f32 %v1076_v38, %v1075_v16  ;;  %4157 = vpow2.f32 %v990_v11 }
 0x23e   :  { %3957 = vset.pattern.permute.xlu1 %v6046_v5  ;;  %3956 = vset.pattern.permute.xlu0 %v6048_v4  ;;  %v784_v44 = vrot.slane %v783_v22, 2  ;;  %v834_v52 = vmax.f32 %v832_v19, %v833_v39  ;;  %v766_v0 = vmax.f32 %v764_v21, %v765_v40  ;;  %v1089_v60 = vadd.f32 %v1088_v12, %v1087_v33 }
 0x23f   :  { %1729 = vperm.xlu1 %3957, %v1280_v30   ;;  %2497 = vperm.xlu0 %3956, %v1280_v30   ;;  %v944_v10 = vsub.f32 %v4646_v32, %v822_v36  ;;  %v866_v23 = vrot.slane %v865_v49, 4 }
 0x240   :  { %v785_v56 = vmax.f32 %v783_v22, %v784_v44  ;;  %v835_v1 = vrot.slane %v834_v52, 1  ;;  %v936_v16 = vsub.f32 %v4612_v55, %v766_v0  ;;  %v1090_v22 = vrot.slane %v1089_v60, 2 }
 0x241   :  { %v4726_v20 = vpop.eup %4151  ;;  %v867_v15 = vmax.f32 %v865_v49, %v866_v23  ;;  %v992_v32 = vmul.f32 1.442695, %v944_v10 }
 0x242   :  { %v1066_v35 = vsel %vm703_vm1, %v4726_v20, 0.0  ;;  %v4154_v54 = vpop.eup %4153  ;;  %v786_v18 = vrot.slane %v785_v56, 1  ;;  %v836_v55 = vmax.f32 %v834_v52, %v835_v1  ;;  %v976_v38 = vmul.f32 1.442695, %v936_v16 }
 0x243   :  { %3958 = vset.pattern.permute.xlu1 %v6050_v51  ;;  %2509 = vperm.xlu0 %3956, %v4712_v47   ;;  %v1067_v46 = vrot.slane %v1066_v35, 4  ;;  %v4742_v59 = vpop.eup %4155  ;;  %v4752_v21 = vmul.f32 %v4154_v54, %v4663_v6  ;;  %v1091_v6 = vadd.f32 %v1090_v22, %v1089_v60  ;;  %v795_v54 = vsel %vm703_vm1, %v4620_v3, -inf }
 0x244   :  { %2113 = vperm.xlu1 %3958, %v1280_v30   ;;  %v1094_v19 = vsel %vm703_vm1, %v4742_v59, 0.0  ;;  %v946_v12 = vsub.f32 %v4653_v45, %v836_v55 }
 0x245   :  { %v1068_v62 = vadd.f32 %v1067_v46, %v1066_v35  ;;  %v1095_v33 = vrot.slane %v1094_v19, 4  ;;  %v787_v35 = vmax.f32 %v785_v56, %v786_v18  ;;  %v1092_v49 = vrot.slane %v1091_v6, 1 }
 0x246   :  { %v996_v60 = vmul.f32 1.442695, %v946_v12 }
 0x247   :  { %3961 = vset.pattern.permute.xlu0 %v6050_v51  ;;  %v1069_v31 = vrot.slane %v1068_v62, 2  ;;  %v4758_v11 = vpop.eup %4157  ;;  %v939_v36 = vsub.f32 %v4616_v61, %v787_v35  ;;  %v872_v61 = vsel %vm703_vm1, %v4674_v27, -inf }
 0x248   :  { %3959 = vset.pattern.permute.xlu1 %v6044_v2  ;;  %2125 = vperm.xlu0 %3961, %v4712_v47   ;;  %v1129_v46 = vsel %vm703_vm1, %v4758_v11, 0.0 }
 0x249   :  { %1314 = vperm.xlu1 %3959, %v1280_v30   ;;  %v1058_v30 = vadd.f32 %v1057_v29, %v1056_v63  ;;  %v1078_v63 = vrot.slane %v1077_v50, 1  ;;  %v868_v29 = vrot.slane %v867_v15, 2  ;;  %v1070_v40 = vadd.f32 %v1069_v31, %v1068_v62 }
 0x24a   :  { %v1130_v45 = vrot.slane %v1129_v46, 4  ;;  %v982_v10 = vmul.f32 1.442695, %v939_v36 }
 0x24b   :  { %4159 = vrcp.f32 %v1058_v30  ;;  %v869_v39 = vmax.f32 %v867_v15, %v868_v29  ;;  %v1096_v30 = vadd.f32 %v1095_v33, %v1094_v19  ;;  %v1071_v52 = vrot.slane %v1070_v40, 1 }
 0x24c   :  { %3963 = vset.pattern.permute.xlu0 %v6048_v4  ;;  %4161 = vpow2.f32 %v992_v32  ;;  %v1131_v16 = vadd.f32 %v1130_v45, %v1129_v46 }
 0x24d   :  { %3960 = vset.pattern.permute.xlu1 %v6046_v5  ;;  %2505 = vperm.xlu0 %3963, %v4731_v34   ;;  %v1097_v56 = vrot.slane %v1096_v30, 2  ;;  %v1072_v62 = vadd.f32 %v1071_v52, %v1070_v40 }
 0x24e   :  { %1741 = vperm.xlu1 %3960, %v4712_v47   ;;  %v1132_v55 = vrot.slane %v1131_v16, 2 }
 0x24f   :  { %v1098_v15 = vadd.f32 %v1097_v56, %v1096_v30  ;;  %v788_v30 = vsel %vm703_vm1, %v4622_v7, -inf }
 0x250   :  { %v1133_v36 = vadd.f32 %v1132_v55, %v1131_v16 }
 0x251   :  { %3965 = vset.pattern.permute.xlu0 %v6050_v51  ;;  %v1099_v33 = vrot.slane %v1098_v15, 1 }
 0x252   :  { %3962 = vset.pattern.permute.xlu1 %v6044_v2  ;;  %2121 = vperm.xlu0 %3965, %v4731_v34  }
 0x253   :  { %1329 = vperm.xlu1 %3962, %v4712_v47   ;;  %v1079_v47 = vadd.f32 %v1078_v63, %v1077_v50  ;;  %v870_v50 = vrot.slane %v869_v39, 1  ;;  %v873_v63 = vrot.slane %v872_v61, 4  ;;  %v1100_v12 = vadd.f32 %v1099_v33, %v1098_v15 }
 0x255   :  { %v4160_v44 = vpop.eup %4159  ;;  %4163 = vrcp.f32 %v1079_v47  ;;  %v871_v23 = vmax.f32 %v869_v39, %v870_v50  ;;  %v874_v18 = vmax.f32 %v872_v61, %v873_v63 }
 0x256   :  { %3967 = vset.pattern.permute.xlu0 %v6048_v4  ;;  %4165 = vpow2.f32 %v976_v38  ;;  %v4771_v0 = vmul.f32 %v4160_v44, %v4683_v48  ;;  %v796_v48 = vrot.slane %v795_v54, 4  ;;  %v4779_v1 = vpop.eup %4161 }
 0x257   :  { %3964 = vset.pattern.permute.xlu1 %v6046_v5  ;;  %2517 = vperm.xlu0 %3967, %v4752_v21   ;;  %4167 = vpow2.f32 %v996_v60  ;;  %v951_v22 = vsub.f32 %v4665_v9, %v871_v23  ;;  %v1136_v31 = vsel %vm703_vm1, %v4779_v1, 0.0  ;;  %v875_v47 = vrot.slane %v874_v18, 2 }
 0x258   :  { %1737 = vperm.xlu1 %3964, %v4731_v34   ;;  %4169 = vpow2.f32 %v982_v10  ;;  %v797_v29 = vmax.f32 %v795_v54, %v796_v48  ;;  %v886_v9 = vsel %vm703_vm1, %v4680_v41, -inf  ;;  %v1137_v39 = vrot.slane %v1136_v31, 4 }
 0x259   :  { %v876_v35 = vmax.f32 %v874_v18, %v875_v47  ;;  %v1006_v40 = vmul.f32 1.442695, %v951_v22  ;;  %v887_v44 = vrot.slane %v886_v9, 4  ;;  %v789_v54 = vrot.slane %v788_v30, 4 }
 0x25a   :  { %v1138_v56 = vadd.f32 %v1137_v39, %v1136_v31 }
 0x25b   :  { %3969 = vset.pattern.permute.xlu0 %v6050_v51  ;;  %v888_v46 = vmax.f32 %v886_v9, %v887_v44  ;;  %v790_v16 = vmax.f32 %v788_v30, %v789_v54 }
 0x25c   :  { %3966 = vset.pattern.permute.xlu1 %v6044_v2  ;;  %2133 = vperm.xlu0 %3969, %v4752_v21   ;;  %v1139_v18 = vrot.slane %v1138_v56, 2 }
 0x25d   :  { %1324 = vperm.xlu1 %3966, %v4731_v34   ;;  %v1093_v34 = vadd.f32 %v1092_v49, %v1091_v6  ;;  %v889_v45 = vrot.slane %v888_v46, 2 }
 0x25f   :  { %v4164_v19 = vpop.eup %4163  ;;  %4171 = vrcp.f32 %v1093_v34  ;;  %v1134_v34 = vrot.slane %v1133_v36, 1  ;;  %v890_v15 = vmax.f32 %v888_v46, %v889_v45 }
 0x260   :  { %3971 = vset.pattern.permute.xlu0 %v6048_v4  ;;  %v4785_v32 = vpop.eup %4165  ;;  %4173 = vrcp.f32 %v1072_v62  ;;  %v4791_v38 = vmul.f32 %v4164_v19, %v4701_v25  ;;  %v877_v25 = vrot.slane %v876_v35, 1 }
 0x261   :  { %3968 = vset.pattern.permute.xlu1 %v6046_v5  ;;  %2513 = vperm.xlu0 %3971, %v4771_v0   ;;  %v1080_v6 = vsel %vm703_vm1, %v4785_v32, 0.0  ;;  %v4803_v52 = vpop.eup %4167  ;;  %4175 = vpow2.f32 %v1006_v40  ;;  %v1135_v47 = vadd.f32 %v1134_v34, %v1133_v36 }
 0x262   :  { %1749 = vperm.xlu1 %3968, %v4752_v21   ;;  %v1081_v49 = vrot.slane %v1080_v6, 4  ;;  %v878_v50 = vmax.f32 %v876_v35, %v877_v25  ;;  %v4805_v60 = vpop.eup %4169  ;;  %4177 = vrcp.f32 %v1100_v12  ;;  %v1150_v63 = vsel %vm703_vm1, %v4803_v52, 0.0 }
 0x263   :  { %v1101_v22 = vsel %vm703_vm1, %v4805_v60, 0.0  ;;  %v1151_v33 = vrot.slane %v1150_v63, 4  ;;  %v844_v35 = vsel %vm703_vm1, %v4661_v28, -inf }
 0x264   :  { %v952_v23 = vsub.f32 %v4674_v27, %v878_v50  ;;  %v1082_v48 = vadd.f32 %v1081_v49, %v1080_v6  ;;  %v891_v27 = vrot.slane %v890_v15, 1  ;;  %v1140_v6 = vadd.f32 %v1139_v18, %v1138_v56 }
 0x265   :  { %3973 = vset.pattern.permute.xlu0 %v6050_v51  ;;  %v1102_v39 = vrot.slane %v1101_v22, 4  ;;  %v845_v30 = vrot.slane %v844_v35, 4 }
 0x266   :  { %3970 = vset.pattern.permute.xlu1 %v6044_v2  ;;  %2129 = vperm.xlu0 %3973, %v4771_v0   ;;  %v1008_v19 = vmul.f32 1.442695, %v952_v23  ;;  %v892_v9 = vmax.f32 %v890_v15, %v891_v27  ;;  %v1141_v49 = vrot.slane %v1140_v6, 1 }
 0x267   :  { %1339 = vperm.xlu1 %3970, %v4752_v21   ;;  %v798_v21 = vrot.slane %v797_v29, 2  ;;  %v1103_v50 = vadd.f32 %v1102_v39, %v1101_v22  ;;  %v846_v45 = vmax.f32 %v844_v35, %v845_v30 }
 0x268   :  { %4179 = vpow2.f32 %v1008_v19  ;;  %v954_v44 = vsub.f32 %v4680_v41, %v892_v9 }
 0x269   :  { %v799_v61 = vmax.f32 %v797_v29, %v798_v21  ;;  %v4172_v10 = vpop.eup %4171  ;;  %4181 = vrcp.f32 %v1135_v47  ;;  %v847_v18 = vrot.slane %v846_v45, 2 }
 0x26a   :  { %3975 = vset.pattern.permute.xlu0 %v6048_v4  ;;  %v4174_v62 = vpop.eup %4173  ;;  %v4817_v31 = vmul.f32 %v4172_v10, %v4720_v13  ;;  %v791_v13 = vrot.slane %v790_v16, 2  ;;  %v1012_v12 = vmul.f32 1.442695, %v954_v44 }
 0x26b   :  { %3972 = vset.pattern.permute.xlu1 %v6046_v5  ;;  %2525 = vperm.xlu0 %3975, %v4791_v38   ;;  %v800_v29 = vrot.slane %v799_v61, 1  ;;  %v4821_v55 = vmul.f32 %v4174_v62, %v4726_v20  ;;  %v4829_v21 = vpop.eup %4175  ;;  %v1152_v20 = vadd.f32 %v1151_v33, %v1150_v63  ;;  %v802_v62 = vsel %vm703_vm1, %v4636_v17, -inf }
 0x26c   :  { %1745 = vperm.xlu1 %3972, %v4771_v0   ;;  %v4178_v36 = vpop.eup %4177  ;;  %v792_v46 = vmax.f32 %v790_v16, %v791_v13  ;;  %v1185_v41 = vsel %vm703_vm1, %v4829_v21, 0.0  ;;  %4183 = vpow2.f32 %v1012_v12  ;;  %v1104_v63 = vrot.slane %v1103_v50, 2 }
 0x26d   :  { %v801_v40 = vmax.f32 %v799_v61, %v800_v29  ;;  %v1153_v56 = vrot.slane %v1152_v20, 2  ;;  %v4839_v10 = vmul.f32 %v4178_v36, %v4742_v59  ;;  %v803_v22 = vrot.slane %v802_v62, 4 }
 0x26e   :  { %v793_v23 = vrot.slane %v792_v46, 1  ;;  %v900_v29 = vsel %vm703_vm1, %v4688_v58, -inf  ;;  %v1105_v35 = vadd.f32 %v1104_v63, %v1103_v50  ;;  %v848_v13 = vmax.f32 %v846_v45, %v847_v18 }
 0x26f   :  { %3976 = vset.pattern.permute.xlu0 %v6050_v51  ;;  %v941_v54 = vsub.f32 %v4620_v3, %v801_v40  ;;  %v1186_v3 = vrot.slane %v1185_v41, 4  ;;  %v1154_v59 = vadd.f32 %v1153_v56, %v1152_v20  ;;  %v901_v39 = vrot.slane %v900_v29, 4 }
 0x270   :  { %3974 = vset.pattern.permute.xlu1 %v6044_v2  ;;  %2141 = vperm.xlu0 %3976, %v4791_v38   ;;  %v794_v47 = vmax.f32 %v792_v46, %v793_v23  ;;  %v804_v44 = vmax.f32 %v802_v62, %v803_v22  ;;  %v1106_v46 = vrot.slane %v1105_v35, 1 }
 0x271   :  { %1334 = vperm.xlu1 %3974, %v4771_v0   ;;  %v1083_v0 = vrot.slane %v1082_v48, 2  ;;  %v986_v15 = vmul.f32 1.442695, %v941_v54  ;;  %v1187_v33 = vadd.f32 %v1186_v3, %v1185_v41  ;;  %v1155_v9 = vrot.slane %v1154_v59, 1 }
 0x272   :  { %v4841_v34 = vpop.eup %4179  ;;  %v940_v30 = vsub.f32 %v4622_v7, %v794_v47  ;;  %v849_v41 = vrot.slane %v848_v13, 1  ;;  %v902_v56 = vmax.f32 %v900_v29, %v901_v39  ;;  %v921_v7 = vsel %vm703_vm1, %v4695_v8, -inf }
 0x273   :  { %v1084_v25 = vadd.f32 %v1083_v0, %v1082_v48  ;;  %v1142_v48 = vadd.f32 %v1141_v49, %v1140_v6  ;;  %v1192_v16 = vsel %vm703_vm1, %v4841_v34, 0.0  ;;  %v4182_v27 = vpop.eup %4181  ;;  %v907_v6 = vsel %vm703_vm1, %v4686_v53, -inf }
 0x274   :  { %3981 = vset.pattern.permute.xlu0 %v6048_v4  ;;  %v1193_v0 = vrot.slane %v1192_v16, 4  ;;  %v4862_v20 = vmul.f32 %v4182_v27, %v4758_v11  ;;  %v908_v50 = vrot.slane %v907_v6, 4  ;;  %v1156_v54 = vadd.f32 %v1155_v9, %v1154_v59 }
 0x275   :  { %3977 = vset.pattern.permute.xlu1 %v6048_v4  ;;  %2533 = vperm.xlu0 %3981, %v4817_v31   ;;  %v1085_v61 = vrot.slane %v1084_v25, 1  ;;  %4185 = vrcp.f32 %v1142_v48  ;;  %v823_v11 = vsel %vm703_vm1, %v4642_v26, -inf  ;;  %v984_v45 = vmul.f32 1.442695, %v940_v30 }
 0x276   :  { %2521 = vperm.xlu1 %3977, %v4821_v55   ;;  %4187 = vpow2.f32 %v986_v15  ;;  %v4858_v40 = vpop.eup %4183  ;;  %v1194_v12 = vadd.f32 %v1193_v0, %v1192_v16  ;;  %v1107_v48 = vadd.f32 %v1106_v46, %v1105_v35  ;;  %v909_v3 = vmax.f32 %v907_v6, %v908_v50 }
 0x277   :  { %v1086_v19 = vadd.f32 %v1085_v61, %v1084_v25  ;;  %v1188_v25 = vrot.slane %v1187_v33, 2  ;;  %v1206_v36 = vsel %vm703_vm1, %v4858_v40, 0.0  ;;  %v850_v15 = vmax.f32 %v848_v13, %v849_v41 }
 0x278   :  { %v1207_v49 = vrot.slane %v1206_v36, 4  ;;  %v1195_v23 = vrot.slane %v1194_v12, 2  ;;  %v903_v16 = vrot.slane %v902_v56, 2  ;;  %v922_v59 = vrot.slane %v921_v7, 4 }
 0x279   :  { %3983 = vset.pattern.permute.xlu0 %v6050_v51  ;;  %4189 = vrcp.f32 %v1086_v19  ;;  %v1189_v61 = vadd.f32 %v1188_v25, %v1187_v33  ;;  %v824_v22 = vrot.slane %v823_v11, 4  ;;  %v914_v29 = vsel %vm703_vm1, %v4699_v42, -inf }
 0x27a   :  { %3978 = vset.pattern.permute.xlu1 %v6046_v5  ;;  %2149 = vperm.xlu0 %3983, %v4817_v31   ;;  %v1208_v62 = vadd.f32 %v1207_v49, %v1206_v36  ;;  %4191 = vrcp.f32 %v1156_v54  ;;  %v1196_v47 = vadd.f32 %v1195_v23, %v1194_v12  ;;  %v910_v9 = vrot.slane %v909_v3, 2 }
 0x27b   :  { %1753 = vperm.xlu1 %3978, %v4821_v55   ;;  %4193 = vpow2.f32 %v984_v45  ;;  %v1190_v27 = vrot.slane %v1189_v61, 1  ;;  %v948_v13 = vsub.f32 %v4661_v28, %v850_v15  ;;  %v904_v6 = vmax.f32 %v902_v56, %v903_v16 }
 0x27c   :  { %v1209_v33 = vrot.slane %v1208_v62, 2  ;;  %4195 = vrcp.f32 %v1107_v48  ;;  %v923_v39 = vmax.f32 %v921_v7, %v922_v59  ;;  %v825_v12 = vmax.f32 %v823_v11, %v824_v22 }
 0x27d   :  { %v1191_v36 = vadd.f32 %v1190_v27, %v1189_v61  ;;  %v1197_v46 = vrot.slane %v1196_v47, 1  ;;  %v911_v28 = vmax.f32 %v909_v3, %v910_v9  ;;  %v905_v50 = vrot.slane %v904_v6, 1 }
 0x27e   :  { %3991 = vset.pattern.permute.xlu0 %v6048_v4  ;;  %v1210_v49 = vadd.f32 %v1209_v33, %v1208_v62  ;;  %v924_v54 = vrot.slane %v923_v39, 2  ;;  %v837_v11 = vsel %vm703_vm1, %v4650_v43, -inf  ;;  %v826_v45 = vrot.slane %v825_v12, 2 }
 0x27f   :  { %3979 = vset.pattern.permute.xlu1 %v6050_v51  ;;  %2537 = vperm.xlu0 %3991, %v4839_v10   ;;  %v4186_v63 = vpop.eup %4185  ;;  %4197 = vrcp.f32 %v1191_v36  ;;  %v912_v23 = vrot.slane %v911_v28, 1  ;;  %v906_v48 = vmax.f32 %v904_v6, %v905_v50 }
 0x280   :  { %2137 = vperm.xlu1 %3979, %v4821_v55   ;;  %v4875_v18 = vpop.eup %4187  ;;  %v4884_v35 = vmul.f32 %v4186_v63, %v4779_v1  ;;  %v1211_v61 = vrot.slane %v1210_v49, 1  ;;  %v925_v3 = vmax.f32 %v923_v39, %v924_v54 }
 0x281   :  { %v1115_v30 = vsel %vm703_vm1, %v4875_v18, 0.0  ;;  %v913_v33 = vmax.f32 %v911_v28, %v912_v23  ;;  %v956_v9 = vsub.f32 %v4688_v58, %v906_v48 }
 0x282   :  { %v1116_v56 = vrot.slane %v1115_v30, 4  ;;  %v1212_v27 = vadd.f32 %v1211_v61, %v1210_v49 }
 0x283   :  { %3993 = vset.pattern.permute.xlu0 %v6050_v51  ;;  %v4190_v0 = vpop.eup %4189  ;;  %v1016_v36 = vmul.f32 1.442695, %v956_v9 }
 0x284   :  { %3980 = vset.pattern.permute.xlu1 %v6044_v2  ;;  %2153 = vperm.xlu0 %3993, %v4839_v10   ;;  %v4891_v1 = vmul.f32 %v4190_v0, %v4785_v32  ;;  %v4192_v7 = vpop.eup %4191  ;;  %v1198_v32 = vadd.f32 %v1197_v46, %v1196_v47  ;;  %v1117_v16 = vadd.f32 %v1116_v56, %v1115_v30 }
 0x285   :  { %1344 = vperm.xlu1 %3980, %v4821_v55   ;;  %v805_v55 = vrot.slane %v804_v44, 2  ;;  %v4899_v62 = vpop.eup %4193  ;;  %v4906_v22 = vmul.f32 %v4192_v7, %v4803_v52 }
 0x286   :  { %v4196_v15 = vpop.eup %4195  ;;  %v1108_v47 = vsel %vm703_vm1, %v4899_v62, 0.0  ;;  %v1118_v6 = vrot.slane %v1117_v16, 2 }
 0x287   :  { %v806_v19 = vmax.f32 %v804_v44, %v805_v55  ;;  %v915_v44 = vrot.slane %v914_v29, 4  ;;  %v1291_v0 = vmul.f32 %v4196_v15, %v4805_v60  ;;  %v1109_v52 = vrot.slane %v1108_v47, 4 }
 0x288   :  { %4001 = vset.pattern.permute.xlu0 %v6048_v4  ;;  %v1119_v58 = vadd.f32 %v1118_v6, %v1117_v16 }
 0x289   :  { %3982 = vset.pattern.permute.xlu1 %v6046_v5  ;;  %2557 = vperm.xlu0 %4001, %v4862_v20   ;;  %v807_v25 = vrot.slane %v806_v19, 1  ;;  %v916_v41 = vmax.f32 %v914_v29, %v915_v44  ;;  %v827_v29 = vmax.f32 %v825_v12, %v826_v45  ;;  %v4198_v12 = vpop.eup %4197 }
 0x28a   :  { %1765 = vperm.xlu1 %3982, %v4817_v31  }
 0x28b   :  { %v808_v55 = vmax.f32 %v806_v19, %v807_v25  ;;  %v917_v63 = vrot.slane %v916_v41, 2  ;;  %v838_v19 = vrot.slane %v837_v11, 4  ;;  %v828_v30 = vrot.slane %v827_v29, 1 }
 0x28c   :  { %v957_v25 = vsub.f32 %v4686_v53, %v913_v33  ;;  %v4922_v53 = vmul.f32 %v4198_v12, %v4829_v21 }
 0x28d   :  { %4002 = vset.pattern.permute.xlu0 %v6050_v51  ;;  %v942_v59 = vsub.f32 %v4636_v17, %v808_v55  ;;  %v926_v17 = vrot.slane %v925_v3, 1  ;;  %v839_v44 = vmax.f32 %v837_v11, %v838_v19  ;;  %v829_v50 = vmax.f32 %v827_v29, %v828_v30 }
 0x28e   :  { %3984 = vset.pattern.permute.xlu1 %v6044_v2  ;;  %2173 = vperm.xlu0 %4002, %v4862_v20   ;;  %v1018_v54 = vmul.f32 1.442695, %v957_v25  ;;  %v1120_v11 = vrot.slane %v1119_v58, 1 }
 0x28f   :  { %1359 = vperm.xlu1 %3984, %v4817_v31   ;;  %v1000_v31 = vmul.f32 1.442695, %v948_v13  ;;  %v918_v13 = vmax.f32 %v916_v41, %v917_v63  ;;  %v988_v39 = vmul.f32 1.442695, %v942_v59  ;;  %v927_v60 = vmax.f32 %v925_v3, %v926_v17 }
 0x290   :  { %v840_v49 = vrot.slane %v839_v44, 2  ;;  %v945_v61 = vsub.f32 %v4642_v26, %v829_v50  ;;  %v1121_v63 = vadd.f32 %v1120_v11, %v1119_v58 }
 0x291   :  { %4199 = vpow2.f32 %v1000_v31  ;;  %v919_v46 = vrot.slane %v918_v13, 1  ;;  %v1110_v31 = vadd.f32 %v1109_v52, %v1108_v47  ;;  %v959_v56 = vsub.f32 %v4695_v8, %v927_v60 }
 0x292   :  { %4011 = vset.pattern.permute.xlu0 %v6048_v4  ;;  %4201 = vrcp.f32 %v1198_v32  ;;  %v841_v7 = vmax.f32 %v839_v44, %v840_v49  ;;  %v994_v26 = vmul.f32 1.442695, %v945_v61 }
 0x293   :  { %3985 = vset.pattern.permute.xlu1 %v6048_v4  ;;  %2561 = vperm.xlu0 %4011, %v4884_v35   ;;  %4203 = vrcp.f32 %v1212_v27  ;;  %v920_v55 = vmax.f32 %v918_v13, %v919_v46  ;;  %v1111_v32 = vrot.slane %v1110_v31, 2  ;;  %v1022_v48 = vmul.f32 1.442695, %v959_v56 }
 0x294   :  { %2529 = vperm.xlu1 %3985, %v4891_v1   ;;  %4205 = vpow2.f32 %v988_v39  ;;  %v842_v15 = vrot.slane %v841_v7, 1 }
 0x295   :  { %4207 = vpow2.f32 %v1016_v36  ;;  %v958_v3 = vsub.f32 %v4699_v42, %v920_v55  ;;  %v1112_v16 = vadd.f32 %v1111_v32, %v1110_v31 }
 0x296   :  { %4209 = vpow2.f32 %v1018_v54  ;;  %v843_v42 = vmax.f32 %v841_v7, %v842_v15 }
 0x297   :  { %4012 = vset.pattern.permute.xlu0 %v6050_v51  ;;  %4211 = vpow2.f32 %v1022_v48  ;;  %v1020_v27 = vmul.f32 1.442695, %v958_v3  ;;  %v1113_v33 = vrot.slane %v1112_v16, 1 }
 0x298   :  { %3986 = vset.pattern.permute.xlu1 %v6050_v51  ;;  %2177 = vperm.xlu0 %4012, %v4884_v35   ;;  %4213 = vrcp.f32 %v1121_v63  ;;  %v947_v39 = vsub.f32 %v4650_v43, %v843_v42 }
 0x299   :  { %2145 = vperm.xlu1 %3986, %v4891_v1   ;;  %4215 = vpow2.f32 %v994_v26  ;;  %v1114_v44 = vadd.f32 %v1113_v33, %v1112_v16  ;;  %v858_v26 = vsel %vm703_vm1, %v4667_v14, -inf }
 0x29a   :  { %4217 = vpow2.f32 %v1020_v27  ;;  %v998_v46 = vmul.f32 1.442695, %v947_v39  ;;  %v859_v39 = vrot.slane %v858_v26, 4 }
 0x29b   :  { %v4917_v28 = vpop.eup %4199  ;;  %4219 = vrcp.f32 %v1114_v44 }
 0x29c   :  { %4016 = vset.pattern.permute.xlu0 %v6048_v4  ;;  %v4202_v41 = vpop.eup %4201  ;;  %v1164_v45 = vsel %vm703_vm1, %v4917_v28, 0.0  ;;  %4221 = vpow2.f32 %v998_v46  ;;  %v879_v46 = vsel %vm703_vm1, %v4672_v24, -inf }
 0x29d   :  { %3987 = vset.pattern.permute.xlu1 %v6048_v4  ;;  %2569 = vperm.xlu0 %4016, %v4906_v22   ;;  %v4932_v21 = vmul.f32 %v4202_v41, %v4841_v34  ;;  %v4204_v8 = vpop.eup %4203  ;;  %v1165_v23 = vrot.slane %v1164_v45, 4  ;;  %v851_v34 = vsel %vm703_vm1, %v4659_v57, -inf }
 0x29e   :  { %2541 = vperm.xlu1 %3987, %v1291_v0   ;;  %v4935_v59 = vpop.eup %4205  ;;  %v4939_v19 = vmul.f32 %v4204_v8, %v4858_v40  ;;  %v852_v40 = vrot.slane %v851_v34, 4 }
 0x29f   :  { %v1166_v29 = vadd.f32 %v1165_v23, %v1164_v45  ;;  %v4944_v47 = vpop.eup %4207  ;;  %v1122_v9 = vsel %vm703_vm1, %v4935_v59, 0.0 }
 0x2a0   :  { %6077 = vst [vmem:[#allocation12_spill] sm:$0xff] %v4939_v19  ;;  %v4949_v13 = vpop.eup %4209  ;;  %v1123_v6 = vrot.slane %v1122_v9, 4  ;;  %v853_v52 = vmax.f32 %v851_v34, %v852_v40 }
 0x2a1   :  { %4018 = vset.pattern.permute.xlu0 %v6050_v51  ;;  %v1167_v17 = vrot.slane %v1166_v29, 2  ;;  %v1227_v25 = vsel %vm703_vm1, %v4949_v13, 0.0  ;;  %v4964_v58 = vpop.eup %4211 }
 0x2a2   :  { %3988 = vset.pattern.permute.xlu1 %v6046_v5  ;;  %2185 = vperm.xlu0 %4018, %v4906_v22   ;;  %v1124_v43 = vadd.f32 %v1123_v6, %v1122_v9  ;;  %v4214_v49 = vpop.eup %4213  ;;  %v854_v31 = vrot.slane %v853_v52, 2  ;;  %v1228_v50 = vrot.slane %v1227_v25, 4  ;;  %v1241_v11 = vsel %vm703_vm1, %v4964_v58, 0.0 }
 0x2a3   :  { %1773 = vperm.xlu1 %3988, %v1291_v0   ;;  %v1168_v30 = vadd.f32 %v1167_v17, %v1166_v29  ;;  %v4968_v54 = vpop.eup %4215  ;;  %v4980_v61 = vmul.f32 %v4214_v49, %v4875_v18  ;;  %v1242_v63 = vrot.slane %v1241_v11, 4 }
 0x2a4   :  { %v1125_v55 = vrot.slane %v1124_v43, 2  ;;  %v4977_v32 = vpop.eup %4217  ;;  %v855_v8 = vmax.f32 %v853_v52, %v854_v31  ;;  %v1229_v23 = vadd.f32 %v1228_v50, %v1227_v25 }
 0x2a5   :  { %v1169_v41 = vrot.slane %v1168_v30, 1  ;;  %v1234_v16 = vsel %vm703_vm1, %v4977_v32, 0.0  ;;  %v4220_v33 = vpop.eup %4219  ;;  %v1243_v40 = vadd.f32 %v1242_v63, %v1241_v11 }
 0x2a6   :  { %4023 = vset.pattern.permute.xlu0 %v6048_v4  ;;  %v1126_v15 = vadd.f32 %v1125_v55, %v1124_v43  ;;  %v856_v27 = vrot.slane %v855_v8, 1  ;;  %v1230_v42 = vrot.slane %v1229_v23, 2  ;;  %v1235_v17 = vrot.slane %v1234_v16, 4  ;;  %v4999_v52 = vpop.eup %4221 }
 0x2a7   :  { %3989 = vset.pattern.permute.xlu1 %v6050_v51  ;;  %2589 = vperm.xlu0 %4023, %v4922_v53   ;;  %v1170_v48 = vadd.f32 %v1169_v41, %v1168_v30  ;;  %v5004_v43 = vmul.f32 %v4220_v33, %v4899_v62  ;;  %v1244_v31 = vrot.slane %v1243_v40, 2  ;;  %v1157_v11 = vsel %vm703_vm1, %v4999_v52, 0.0 }
 0x2a8   :  { %2157 = vperm.xlu1 %3989, %v1291_v0   ;;  %v1127_v6 = vrot.slane %v1126_v15, 1  ;;  %v857_v30 = vmax.f32 %v855_v8, %v856_v27  ;;  %v1231_v25 = vadd.f32 %v1230_v42, %v1229_v23  ;;  %v1236_v50 = vadd.f32 %v1235_v17, %v1234_v16  ;;  %v5020_v17 = vld [vmem:[#allocation2] sm:$0xff] }
 0x2a9   :  { %4223 = vrcp.f32 %v1170_v48  ;;  %v1158_v16 = vrot.slane %v1157_v11, 4  ;;  %6082 = vst [vmem:[#allocation17_spill] sm:$0xff] %v5020_v17 }
 0x2aa   :  { %v1128_v41 = vadd.f32 %v1127_v6, %v1126_v15  ;;  %v949_v62 = vsub.f32 %v4659_v57, %v857_v30  ;;  %v1232_v8 = vrot.slane %v1231_v25, 1  ;;  %v1237_v63 = vrot.slane %v1236_v50, 2 }
 0x2ab   :  { %2593 = vperm.xlu0 %4023, %v4932_v21  }
 0x2ac   :  { %3990 = vset.pattern.permute.xlu1 %v6044_v2  ;;  %4225 = vrcp.f32 %v1128_v41  ;;  %v1002_v42 = vmul.f32 1.442695, %v949_v62  ;;  %v1233_v33 = vadd.f32 %v1232_v8, %v1231_v25  ;;  %v1238_v6 = vadd.f32 %v1237_v63, %v1236_v50  ;;  %v5028_v41 = vld [vmem:[#allocation2 + $0x10] sm:$0xff] }
 0x2ad   :  { %1369 = vperm.xlu1 %3990, %v1291_v0   ;;  %v1220_v0 = vsel %vm703_vm1, %v4944_v47, 0.0  ;;  %6084 = vst [vmem:[#allocation19_spill] sm:$0xff] %v5028_v41 }
 0x2ae   :  { %v1221_v12 = vrot.slane %v1220_v0, 4 }
 0x2af   :  { %2601 = vperm.xlu0 %4023, %v4939_v19  }
 0x2b0   :  { %v1222_v56 = vadd.f32 %v1221_v12, %v1220_v0 }
 0x2b1   :  { %3992 = vset.pattern.permute.xlu1 %v6046_v5 }
 0x2b2   :  { %1769 = vperm.xlu1 %3992, %v4839_v10   ;;  %v1223_v3 = vrot.slane %v1222_v56, 2 }
 0x2b3   :  { %4032 = vset.pattern.permute.xlu0 %v6050_v51 }
 0x2b4   :  { %v4959_v36 = vpop.permute.xlu1 %1733  ;;  %v4961_v60 = vpop.permute.xlu0 %2501  ;;  %2209 = vperm.xlu0 %4032, %v4932_v21   ;;  %v1224_v9 = vadd.f32 %v1223_v3, %v1222_v56  ;;  %v860_v56 = vmax.f32 %v858_v26, %v859_v39  ;;  %v1245_v3 = vadd.f32 %v1244_v31, %v1243_v40  ;;  %v5024_v39 = vld [vmem:[#allocation2 + $0x8] sm:$0xff] }
 0x2b5   :  { %6078 = vst [vmem:[#allocation13_spill] sm:$0xff] %v4959_v36  ;;  %v4224_v26 = vpop.eup %4223  ;;  %6083 = vst [vmem:[#allocation18_spill] sm:$0xff] %v5024_v39  ;;  %v2625_v30 = vmul.f32 %v5024_v39, %v4961_v60 }
 0x2b6   :  { %3994 = vset.pattern.permute.xlu1 %v6044_v2  ;;  %v1225_v49 = vrot.slane %v1224_v9, 1  ;;  %v1246_v40 = vrot.slane %v1245_v3, 1 }
 0x2b7   :  { %1364 = vperm.xlu1 %3994, %v4839_v10   ;;  %v1143_v10 = vsel %vm703_vm1, %v4968_v54, 0.0 }
 0x2b8   :  { %2217 = vperm.xlu0 %4032, %v4939_v19   ;;  %v1144_v18 = vrot.slane %v1143_v10, 4  ;;  %v1226_v48 = vadd.f32 %v1225_v49, %v1224_v9  ;;  %v1247_v60 = vadd.f32 %v1246_v40, %v1245_v3 }
 0x2b9   :  { %v4973_v7 = vpop.permute.xlu1 %1319  ;;  %v4975_v45 = vpop.permute.xlu0 %2117 }
 0x2ba   :  { %6079 = vst [vmem:[#allocation14_spill] sm:$0xff] %v4973_v7  ;;  %v1145_v0 = vadd.f32 %v1144_v18, %v1143_v10  ;;  %v880_v10 = vrot.slane %v879_v46, 4  ;;  %v861_v18 = vrot.slane %v860_v56, 2  ;;  %4227 = vrcp.f32 %v1226_v48 }
 0x2bb   :  { %3995 = vset.pattern.permute.xlu1 %v6048_v4  ;;  %4229 = vpow2.f32 %v1002_v42  ;;  %v893_v42 = vsel %vm703_vm1, %v4678_v37, -inf }
 0x2bc   :  { %2549 = vperm.xlu1 %3995, %v4980_v61   ;;  %4035 = vset.pattern.permute.xlu0 %v6046_v5  ;;  %v1146_v55 = vrot.slane %v1145_v0, 2  ;;  %v881_v57 = vmax.f32 %v879_v46, %v880_v10  ;;  %v862_v31 = vmax.f32 %v860_v56, %v861_v18  ;;  %v2663_v56 = vsel %vm108_vm0, %v2625_v30, 0.0 }
 0x2bd   :  { %1761 = vperm.xlu0 %4035, %v4891_v1   ;;  %4231 = vrcp.f32 %v1233_v33  ;;  %v2664_v33 = vrot.slane %v2663_v56, 4 }
 0x2be   :  { %v4992_v34 = vpop.permute.xlu1 %1729  ;;  %v2498_v29 = vpop.permute.xlu0 %2497  ;;  %v1147_v27 = vadd.f32 %v1146_v55, %v1145_v0  ;;  %v1159_v0 = vadd.f32 %v1158_v16, %v1157_v11  ;;  %v1239_v55 = vrot.slane %v1238_v6, 1  ;;  %v863_v62 = vrot.slane %v862_v31, 1  ;;  %v5043_v16 = vld [vmem:[#allocation2 + $0x18] sm:$0xff] }
 0x2bf   :  { %6080 = vst [vmem:[#allocation15_spill] sm:$0xff] %v4992_v34  ;;  %v2624_v9 = vmul.f32 %v5020_v17, %v2498_v29  ;;  %v882_v10 = vrot.slane %v881_v57, 2  ;;  %6086 = vst [vmem:[#allocation21_spill] sm:$0xff] %v5043_v16  ;;  %4233 = vrcp.f32 %v1247_v60 }
 0x2c0   :  { %3996 = vset.pattern.permute.xlu1 %v6046_v5  ;;  %v1148_v29 = vrot.slane %v1147_v27, 1  ;;  %v1160_v11 = vrot.slane %v1159_v0, 2  ;;  %v894_v5 = vrot.slane %v893_v42, 4 }
 0x2c1   :  { %1781 = vperm.xlu1 %3996, %v4980_v61   ;;  %1757 = vperm.xlu0 %4035, %v4791_v38   ;;  %v2656_v50 = vsel %vm108_vm0, %v2624_v9, 0.0  ;;  %v2241_v9 = vmul.f32 %v5024_v39, %v4975_v45 }
 0x2c2   :  { %v4997_v44 = vpop.permute.xlu0 %2509  ;;  %v1149_v48 = vadd.f32 %v1148_v29, %v1147_v27  ;;  %v2657_v63 = vrot.slane %v2656_v50, 4  ;;  %v1240_v27 = vadd.f32 %v1239_v55, %v1238_v6  ;;  %v883_v29 = vmax.f32 %v881_v57, %v882_v10 }
 0x2c3   :  { %v5001_v12 = vpop.permute.xlu1 %2113  ;;  %v2627_v3 = vmul.f32 %v5043_v16, %v4997_v44  ;;  %v1161_v44 = vadd.f32 %v1160_v11, %v1159_v0  ;;  %v2665_v55 = vadd.f32 %v2664_v33, %v2663_v56 }
 0x2c4   :  { %v2240_v40 = vmul.f32 %v5020_v17, %v5001_v12  ;;  %v2658_v45 = vadd.f32 %v2657_v63, %v2656_v50  ;;  %4235 = vrcp.f32 %v1240_v27 }
 0x2c5   :  { %3997 = vset.pattern.permute.xlu1 %v6050_v51  ;;  %1777 = vperm.xlu0 %4035, %v5004_v43   ;;  %v1162_v56 = vrot.slane %v1161_v44, 1  ;;  %4237 = vrcp.f32 %v1149_v48 }
 0x2c6   :  { %2165 = vperm.xlu1 %3997, %v4980_v61   ;;  %v2272_v0 = vsel %vm108_vm0, %v2240_v40, 0.0 }
 0x2c7   :  { %v5014_v23 = vpop.permute.xlu0 %2125  ;;  %v2273_v40 = vrot.slane %v2272_v0, 4  ;;  %v5096_v48 = vadd.f32 %v1162_v56, %v1161_v44 }
 0x2c8   :  { %v5016_v15 = vpop.permute.xlu1 %1314  ;;  %v2243_v50 = vmul.f32 %v5043_v16, %v5014_v23 }
 0x2c9   :  { %6081 = vst [vmem:[#allocation16_spill] sm:$0xff] %v5016_v15  ;;  %1793 = vperm.xlu0 %4035, %v4884_v35   ;;  %v2274_v16 = vadd.f32 %v2273_v40, %v2272_v0  ;;  %v6098_v40 = vmov 2  }
 0x2ca   :  { %3998 = vset.pattern.permute.xlu1 %v6044_v2 }
 0x2cb   :  { %1379 = vperm.xlu1 %3998, %v4980_v61   ;;  %v5035_v61 = vmul.f32 %v4224_v26, %v4917_v28  ;;  %v4226_v26 = vpop.eup %4225 }
 0x2cc   :  { %v2506_v49 = vpop.permute.xlu0 %2505  ;;  %v4228_v2 = vpop.eup %4227  ;;  %v5061_v6 = vmul.f32 %v4226_v26, %v4935_v59 }
 0x2cd   :  { %v2626_v25 = vmul.f32 %v5028_v41, %v2506_v49  ;;  %v5031_v46 = vpop.permute.xlu1 %1741  ;;  %1789 = vperm.xlu0 %4035, %v4862_v20   ;;  %v5073_v59 = vpop.eup %4229  ;;  %v5079_v26 = vmul.f32 %v4228_v2, %v4944_v47 }
 0x2ce   :  { %6085 = vst [vmem:[#allocation20_spill] sm:$0xff] %v5031_v46  ;;  %6090 = vst [vmem:[#allocation25_spill] sm:$0xff] %v5073_v59  ;;  %v4232_v33 = vpop.eup %4231  ;;  %v6095_v46 = vmov 1  }
 0x2cf   :  { %3999 = vset.pattern.permute.xlu1 %v6048_v4  ;;  %v2670_v8 = vsel %vm108_vm0, %v2626_v25, 0.0  ;;  %v864_v25 = vmax.f32 %v862_v31, %v863_v62  ;;  %v2677_v4 = vsel %vm108_vm0, %v2627_v3, 0.0  ;;  %v5065_v31 = vld [vmem:[#allocation2 + $0x28] sm:$0xff]  ;;  %v6091_v3 = vmov 3   ;;  %6092 = vst [vmem:[#allocation26_spill] sm:$0xff] %v5079_v26 }
 0x2d0   :  { %2545 = vperm.xlu1 %3999, %v5004_v43   ;;  %v2671_v30 = vrot.slane %v2670_v8, 4  ;;  %6088 = vst [vmem:[#allocation23_spill] sm:$0xff] %v5065_v31  ;;  %v2678_v10 = vrot.slane %v2677_v4, 4 }
 0x2d1   :  { %v2122_v28 = vpop.permute.xlu0 %2121  ;;  %1809 = vperm.xlu0 %4035, %v5035_v61   ;;  %v950_v27 = vsub.f32 %v4667_v14, %v864_v25  ;;  %v5093_v14 = vmul.f32 %v4232_v33, %v4949_v13 }
 0x2d2   :  { %v5047_v18 = vpop.permute.xlu1 %1329  ;;  %v2242_v49 = vmul.f32 %v5028_v41, %v2122_v28  ;;  %v2279_v28 = vsel %vm108_vm0, %v2241_v9, 0.0  ;;  %v2672_v11 = vadd.f32 %v2671_v30, %v2670_v8  ;;  %v895_v9 = vmax.f32 %v893_v42, %v894_v5  ;;  %v4234_v42 = vpop.eup %4233 }
 0x2d3   :  { %6087 = vst [vmem:[#allocation22_spill] sm:$0xff] %v5047_v18  ;;  %v2280_v23 = vrot.slane %v2279_v28, 4  ;;  %v2659_v8 = vrot.slane %v2658_v45, 2  ;;  %v884_v30 = vrot.slane %v883_v29, 1  ;;  %v5088_v5 = vsel %vm703_vm1, %v5073_v59, 0.0  ;;  %6094 = vst [vmem:[#allocation28_spill] sm:$0xff] %v5093_v14 }
 0x2d4   :  { %4000 = vset.pattern.permute.xlu1 %v6050_v51  ;;  %v2286_v62 = vsel %vm108_vm0, %v2242_v49, 0.0  ;;  %v2666_v49 = vrot.slane %v2665_v55, 2  ;;  %v2293_v51 = vsel %vm108_vm0, %v2243_v50, 0.0  ;;  %v2673_v18 = vrot.slane %v2672_v11, 2 }
 0x2d5   :  { %2161 = vperm.xlu1 %4000, %v5004_v43   ;;  %1825 = vperm.xlu0 %4035, %v4932_v21   ;;  %v2679_v2 = vadd.f32 %v2678_v10, %v2677_v4  ;;  %v896_v25 = vrot.slane %v895_v9, 2  ;;  %v2281_v50 = vadd.f32 %v2280_v23, %v2279_v28  ;;  %v2660_v19 = vadd.f32 %v2659_v8, %v2658_v45  ;;  %v5104_v28 = vld [vmem:[#allocation2 + $0x20] sm:$0xff] }
 0x2d6   :  { %v2518_v12 = vpop.permute.xlu0 %2517  ;;  %v2294_v41 = vrot.slane %v2293_v51, 4  ;;  %v5099_v4 = vmul.f32 1.442695, %v950_v27  ;;  %v5101_v10 = vmax.f32 %v883_v29, %v884_v30  ;;  %v2674_v13 = vadd.f32 %v2673_v18, %v2672_v11 }
 0x2d7   :  { %v2629_v57 = vmul.f32 %v5065_v31, %v2518_v12  ;;  %v5068_v60 = vpop.permute.xlu1 %1737  ;;  %v2287_v12 = vrot.slane %v2286_v62, 4  ;;  %v5113_v29 = vmax.f32 %v895_v9, %v896_v25  ;;  %v2282_v18 = vrot.slane %v2281_v50, 2 }
 0x2d8   :  { %6089 = vst [vmem:[#allocation24_spill] sm:$0xff] %v5068_v60  ;;  %v2275_v11 = vrot.slane %v2274_v16, 2  ;;  %v2675_v27 = vrot.slane %v2674_v13, 1  ;;  %4239 = vpow2.f32 %v5099_v4 }
 0x2d9   :  { %v2691_v63 = vsel %vm108_vm0, %v2629_v57, 0.0  ;;  %4003 = vset.pattern.permute.xlu1 %v6091_v3  ;;  %1821 = vperm.xlu0 %4035, %v4922_v53   ;;  %v2288_v60 = vadd.f32 %v2287_v12, %v2286_v62  ;;  %v4236_v62 = vpop.eup %4235  ;;  %4241 = vrcp.f32 %v5096_v48 }
 0x2da   :  { %2553 = vperm.xlu1 %4003, %v5061_v6   ;;  %v2692_v7 = vrot.slane %v2691_v63, 4  ;;  %v2276_v25 = vadd.f32 %v2275_v11, %v2274_v16 }
 0x2db   :  { %v2134_v57 = vpop.permute.xlu0 %2133  ;;  %v2289_v23 = vrot.slane %v2288_v60, 2 }
 0x2dc   :  { %v5084_v15 = vpop.permute.xlu1 %1324  ;;  %v2245_v47 = vmul.f32 %v5065_v31, %v2134_v57  ;;  %v2693_v33 = vadd.f32 %v2692_v7, %v2691_v63  ;;  %v2680_v31 = vrot.slane %v2679_v2, 2  ;;  %v2661_v7 = vrot.slane %v2660_v19, 1 }
 0x2dd   :  { %6093 = vst [vmem:[#allocation27_spill] sm:$0xff] %v5084_v15  ;;  %1841 = vperm.xlu0 %4035, %v5079_v26   ;;  %v2667_v15 = vadd.f32 %v2666_v49, %v2665_v55  ;;  %v5111_v55 = vmul.f32 %v4234_v42, %v4964_v58  ;;  %v2295_v63 = vadd.f32 %v2294_v41, %v2293_v51  ;;  %v4238_v51 = vpop.eup %4237 }
 0x2de   :  { %4004 = vset.pattern.permute.xlu1 %v6095_v46  ;;  %v2307_v45 = vsel %vm108_vm0, %v2245_v47, 0.0  ;;  %v2694_v30 = vrot.slane %v2693_v33, 2  ;;  %v2681_v58 = vadd.f32 %v2680_v31, %v2679_v2  ;;  %v5120_v47 = vmul.f32 %v4236_v62, %v4977_v32 }
 0x2df   :  { %1785 = vperm.xlu1 %4004, %v5061_v6   ;;  %6097 = vst [vmem:[#allocation30_spill] sm:$0xff] %v5111_v55  ;;  %v2668_v56 = vrot.slane %v2667_v15, 1  ;;  %v2308_v49 = vrot.slane %v2307_v45, 4  ;;  %v2283_v41 = vadd.f32 %v2282_v18, %v2281_v50  ;;  %v2662_v42 = vadd.f32 %v2661_v7, %v2660_v19  ;;  %v5133_v7 = vld [vmem:[#allocation2 + $0x38] sm:$0xff] }
 0x2e0   :  { %v2514_v57 = vpop.permute.xlu0 %2513  ;;  %6099 = vst [vmem:[#allocation31_spill] sm:$0xff] %v5120_v47  ;;  %v2296_v39 = vrot.slane %v2295_v63, 2  ;;  %v2290_v36 = vadd.f32 %v2289_v23, %v2288_v60  ;;  %v2676_v31 = vadd.f32 %v2675_v27, %v2674_v13  ;;  %v2695_v2 = vadd.f32 %v2694_v30, %v2693_v33 }
 0x2e1   :  { %v2628_v44 = vmul.f32 %v5104_v28, %v2514_v57  ;;  %v5107_v0 = vpop.permute.xlu1 %1749  ;;  %1845 = vperm.xlu0 %4035, %v5093_v14   ;;  %v2309_v34 = vadd.f32 %v2308_v49, %v2307_v45  ;;  %v2682_v32 = vrot.slane %v2681_v58, 1  ;;  %v5130_v19 = vmul.f32 %v4238_v51, %v4968_v54 }
 0x2e2   :  { %6096 = vst [vmem:[#allocation29_spill] sm:$0xff] %v5107_v0  ;;  %v2669_v0 = vadd.f32 %v2668_v56, %v2667_v15  ;;  %v2284_v15 = vrot.slane %v2283_v41, 1  ;;  %v2277_v60 = vrot.slane %v2276_v25, 1  ;;  %v2297_v45 = vadd.f32 %v2296_v39, %v2295_v63 }
 0x2e3   :  { %v2684_v8 = vsel %vm108_vm0, %v2628_v44, 0.0  ;;  %4005 = vset.pattern.permute.xlu1 %v6098_v40  ;;  %v2291_v62 = vrot.slane %v2290_v36, 1  ;;  %v2696_v56 = vrot.slane %v2695_v2, 1  ;;  %v2310_v54 = vrot.slane %v2309_v34, 2 }
 0x2e4   :  { %v2685_v12 = vrot.slane %v2684_v8, 4  ;;  %2169 = vperm.xlu1 %4005, %v5061_v6   ;;  %v3119_v16 = vsel %vm2912_vm2, %v2669_v0, %v2662_v42  ;;  %v2285_v39 = vadd.f32 %v2284_v15, %v2283_v41  ;;  %v2278_v63 = vadd.f32 %v2277_v60, %v2276_v25 }
 0x2e5   :  { %v2130_v9 = vpop.permute.xlu0 %2129  ;;  %1853 = vperm.xlu0 %4035, %v5111_v55   ;;  %v6101_v55 = vmov 0   ;;  %v2298_v30 = vrot.slane %v2297_v45, 1  ;;  %v2292_v49 = vadd.f32 %v2291_v62, %v2290_v36  ;;  %v2697_v51 = vadd.f32 %v2696_v56, %v2695_v2 }
 0x2e6   :  { %v2686_v57 = vadd.f32 %v2685_v12, %v2684_v8  ;;  %v5122_v44 = vpop.permute.xlu1 %1339  ;;  %v2244_v17 = vmul.f32 %v5104_v28, %v2130_v9  ;;  %v2683_v8 = vadd.f32 %v2682_v32, %v2681_v58  ;;  %v2311_v42 = vadd.f32 %v2310_v54, %v2309_v34 }
 0x2e7   :  { %6100 = vst [vmem:[#allocation32_spill] sm:$0xff] %v5122_v44  ;;  %v1172_v41 = vrot.slane %v5088_v5, 4  ;;  %v3055_v36 = vsel %vm2912_vm2, %v2285_v39, %v2278_v63  ;;  %v898_v2 = vrot.slane %v5113_v29, 1 }
 0x2e8   :  { %v2687_v59 = vrot.slane %v2686_v57, 2  ;;  %4006 = vset.pattern.permute.xlu1 %v6101_v55  ;;  %v2300_v50 = vsel %vm108_vm0, %v2244_v17, 0.0  ;;  %v3056_v15 = vsel %vm2914_vm3, %v2292_v49, %v3055_v36  ;;  %v2312_v4 = vrot.slane %v2311_v42, 1 }
 0x2e9   :  { %1384 = vperm.xlu1 %4006, %v5061_v6   ;;  %1849 = vperm.xlu0 %4035, %v5120_v47   ;;  %v2301_v18 = vrot.slane %v2300_v50, 4  ;;  %v3120_v6 = vsel %vm2914_vm3, %v2676_v31, %v3119_v16  ;;  %v1173_v56 = vadd.f32 %v1172_v41, %v5088_v5  ;;  %v899_v48 = vmax.f32 %v5113_v29, %v898_v2 }
 0x2ea   :  { %v2688_v13 = vadd.f32 %v2687_v59, %v2686_v57  ;;  %v2526_v33 = vpop.permute.xlu0 %2525  ;;  %v3121_v12 = vsel %vm2916_vm4, %v2683_v8, %v3120_v6  ;;  %v2313_v54 = vadd.f32 %v2312_v4, %v2311_v42 }
 0x2eb   :  { %v2631_v17 = vmul.f32 %v5133_v7, %v2526_v33  ;;  %v5136_v11 = vpop.permute.xlu1 %1745  ;;  %v2302_v0 = vadd.f32 %v2301_v18, %v2300_v50  ;;  %v953_v50 = vsub.f32 %v4672_v24, %v5101_v10  ;;  %v2299_v24 = vadd.f32 %v2298_v30, %v2297_v45  ;;  %v5166_v18 = vld [vmem:[#allocation2 + $0x30] sm:$0xff]  ;;  %v5185_v30 = vpop.eup %4239 }
 0x2ec   :  { %v2689_v23 = vrot.slane %v2688_v13, 1  ;;  %v1174_v63 = vrot.slane %v1173_v56, 2 }
 0x2ed   :  { %v2705_v59 = vsel %vm108_vm0, %v2631_v17, 0.0  ;;  %4007 = vset.pattern.permute.xlu1 %v6091_v3  ;;  %4037 = vset.pattern.permute.xlu0 %v6098_v40  ;;  %v2303_v58 = vrot.slane %v2302_v0, 2  ;;  %v3057_v6 = vsel %vm2916_vm4, %v2299_v24, %v3056_v15 }
 0x2ee   :  { %v2690_v27 = vadd.f32 %v2689_v23, %v2688_v13  ;;  %2565 = vperm.xlu1 %4007, %v5130_v19   ;;  %2205 = vperm.xlu0 %4037, %v4922_v53   ;;  %v2706_v31 = vrot.slane %v2705_v59, 4  ;;  %v1175_v42 = vadd.f32 %v1174_v63, %v1173_v56 }
 0x2ef   :  { %v2142_v9 = vpop.permute.xlu0 %2141  ;;  %v2304_v25 = vadd.f32 %v2303_v58, %v2302_v0  ;;  %v4242_v58 = vpop.eup %4241 }
 0x2f0   :  { %v3122_v57 = vsel %vm2918_vm5, %v2690_v27, %v3121_v12  ;;  %v5146_v32 = vpop.permute.xlu1 %1334  ;;  %v2707_v10 = vadd.f32 %v2706_v31, %v2705_v59  ;;  %v2247_v33 = vmul.f32 %v5133_v7, %v2142_v9  ;;  %v5196_v36 = vmul.f32 %v4242_v58, %v4999_v52 }
 0x2f1   :  { %6102 = vst [vmem:[#allocation33_spill] sm:$0xff] %v5146_v32  ;;  %v5156_v34 = vsel %vm2920_vm6, %v2697_v51, %v3122_v57  ;;  %v2305_v16 = vrot.slane %v2304_v25, 1  ;;  %v1178_v57 = vsel %vm703_vm1, %v5185_v30, 0.0 }
 0x2f2   :  { %4008 = vset.pattern.permute.xlu1 %v6095_v46  ;;  %4038 = vset.pattern.permute.xlu0 %v6101_v55  ;;  %v2708_v23 = vrot.slane %v2707_v10, 2  ;;  %v2321_v0 = vsel %vm108_vm0, %v2247_v33, 0.0 }
 0x2f3   :  { %1797 = vperm.xlu1 %4008, %v5130_v19   ;;  %1354 = vperm.xlu0 %4038, %v4891_v1   ;;  %v2306_v13 = vadd.f32 %v2305_v16, %v2304_v25  ;;  %v1010_v1 = vmul.f32 1.442695, %v953_v50  ;;  %v2322_v12 = vrot.slane %v2321_v0, 4  ;;  %v1176_v16 = vrot.slane %v1175_v42, 1 }
 0x2f4   :  { %v5163_v60 = vpop.permute.xlu0 %2533  ;;  %v2709_v49 = vadd.f32 %v2708_v23, %v2707_v10 }
 0x2f5   :  { %v2522_v62 = vpop.permute.xlu1 %2521  ;;  %v3058_v45 = vsel %vm2918_vm5, %v2306_v13, %v3057_v6  ;;  %4243 = vpow2.f32 %v1010_v1  ;;  %v2323_v25 = vadd.f32 %v2322_v12, %v2321_v0 }
 0x2f6   :  { %v2630_v17 = vmul.f32 %v5166_v18, %v2522_v62  ;;  %v5181_v29 = vsel %vm2920_vm6, %v2313_v54, %v3058_v45 }
 0x2f7   :  { %4009 = vset.pattern.permute.xlu1 %v6098_v40  ;;  %1349 = vperm.xlu0 %4038, %v4791_v38   ;;  %v955_v38 = vsub.f32 %v4678_v37, %v899_v48  ;;  %v2324_v4 = vrot.slane %v2323_v25, 2 }
 0x2f8   :  { %v2698_v8 = vsel %vm108_vm0, %v2630_v17, 0.0  ;;  %2181 = vperm.xlu1 %4009, %v5130_v19  }
 0x2f9   :  { %v2699_v59 = vrot.slane %v2698_v8, 4  ;;  %v2150_v39 = vpop.permute.xlu0 %2149  ;;  %v1014_v37 = vmul.f32 1.442695, %v955_v38  ;;  %v2325_v48 = vadd.f32 %v2324_v4, %v2323_v25 }
 0x2fa   :  { %v5178_v5 = vpop.permute.xlu1 %1753 }
 0x2fb   :  { %v2700_v27 = vadd.f32 %v2699_v59, %v2698_v8  ;;  %1374 = vperm.xlu0 %4038, %v5004_v43   ;;  %v2710_v43 = vrot.slane %v2709_v49, 1  ;;  %4245 = vpow2.f32 %v1014_v37  ;;  %v5220_v59 = vld [vmem:[#allocation2 + $0x48] sm:$0xff]  ;;  %v2326_v38 = vrot.slane %v2325_v48, 1 }
 0x2fc   :  { %4010 = vset.pattern.permute.xlu1 %v6101_v55  ;;  %v2249_v63 = vmul.f32 %v5220_v59, %v2150_v39 }
 0x2fd   :  { %v2701_v9 = vrot.slane %v2700_v27, 2  ;;  %1399 = vperm.xlu1 %4010, %v5130_v19   ;;  %v1179_v19 = vrot.slane %v1178_v57, 4 }
 0x2fe   :  { %v5189_v51 = vpop.permute.xlu0 %2537  ;;  %v2335_v37 = vsel %vm108_vm0, %v2249_v63, 0.0 }
 0x2ff   :  { %v2702_v31 = vadd.f32 %v2701_v9, %v2700_v27  ;;  %v2138_v41 = vpop.permute.xlu1 %2137  ;;  %1394 = vperm.xlu0 %4038, %v4884_v35   ;;  %v2711_v35 = vadd.f32 %v2710_v43, %v2709_v49  ;;  %v5204_v33 = vpop.eup %4243  ;;  %v1180_v17 = vadd.f32 %v1179_v19, %v1178_v57  ;;  %v5225_v49 = vld [vmem:[#allocation2 + $0x50] sm:$0xff] }
 0x300   :  { %v2246_v50 = vmul.f32 %v5166_v18, %v2138_v41  ;;  %v1199_v1 = vsel %vm703_vm1, %v5204_v33, 0.0 }
 0x301   :  { %v2703_v2 = vrot.slane %v2702_v31, 1  ;;  %4013 = vset.pattern.permute.xlu1 %v6091_v3  ;;  %v1181_v23 = vrot.slane %v1180_v17, 2  ;;  %v1200_v0 = vrot.slane %v1199_v1, 4 }
 0x302   :  { %v2314_v15 = vsel %vm108_vm0, %v2246_v50, 0.0  ;;  %2573 = vperm.xlu1 %4013, %v5196_v36  }
 0x303   :  { %v2704_v24 = vadd.f32 %v2703_v2, %v2702_v31  ;;  %1389 = vperm.xlu0 %4038, %v4862_v20   ;;  %v2315_v10 = vrot.slane %v2314_v15, 4  ;;  %v2154_v52 = vpop.permute.xlu0 %2153  ;;  %v1177_v20 = vadd.f32 %v1176_v16, %v1175_v42  ;;  %v1182_v42 = vadd.f32 %v1181_v23, %v1180_v17 }
 0x304   :  { %v5202_v13 = vpop.permute.xlu1 %1344  ;;  %v2250_v12 = vmul.f32 %v5225_v49, %v2154_v52  ;;  %v2327_v31 = vadd.f32 %v2326_v38, %v2325_v48  ;;  %v2336_v2 = vrot.slane %v2335_v37, 4 }
 0x305   :  { %6103 = vst [vmem:[#allocation34_spill] sm:$0xff] %v5202_v13  ;;  %v3124_v62 = vsel %vm2922_vm7, %v2704_v24, %v5156_v34  ;;  %v2316_v6 = vadd.f32 %v2315_v10, %v2314_v15  ;;  %4247 = vrcp.f32 %v1177_v20  ;;  %v5231_v9 = vpop.eup %4245  ;;  %v1183_v50 = vrot.slane %v1182_v42, 1 }
 0x306   :  { %4014 = vset.pattern.permute.xlu1 %v6095_v46  ;;  %v5210_v56 = vsel %vm2924_vm8, %v2711_v35, %v3124_v62  ;;  %v2342_v41 = vsel %vm108_vm0, %v2250_v12, 0.0  ;;  %v1213_v25 = vsel %vm703_vm1, %v5231_v9, 0.0  ;;  %v2337_v10 = vadd.f32 %v2336_v2, %v2335_v37  ;;  %v6108_v37 = vld [vmem:[#allocation17_spill] sm:$0xff]  ;;  %v6111_v2 = vld [vmem:[#allocation24_spill] sm:$0xff] }
 0x307   :  { %6104 = vst [vmem:[#allocation35_spill] sm:$0xff] %v5210_v56  ;;  %1805 = vperm.xlu1 %4014, %v5196_v36   ;;  %1414 = vperm.xlu0 %4038, %v5035_v61   ;;  %v2317_v45 = vrot.slane %v2316_v6, 2  ;;  %v2343_v15 = vrot.slane %v2342_v41, 4  ;;  %v1214_v35 = vrot.slane %v1213_v25, 4  ;;  %v1184_v4 = vadd.f32 %v1183_v50, %v1182_v42 }
 0x308   :  { %v5216_v54 = vpop.permute.xlu0 %2557 }
 0x309   :  { %v5218_v34 = vpop.permute.xlu1 %1765  ;;  %v2318_v8 = vadd.f32 %v2317_v45, %v2316_v6  ;;  %v2344_v52 = vadd.f32 %v2343_v15, %v2342_v41  ;;  %v1215_v6 = vadd.f32 %v1214_v35, %v1213_v25  ;;  %v6106_v45 = vld [vmem:[#allocation25_spill] sm:$0xff]  ;;  %4249 = vrcp.f32 %v1184_v4  ;;  %v6110_v25 = vld [vmem:[#allocation18_spill] sm:$0xff]  ;;  %v6112_v15 = vld [vmem:[#allocation19_spill] sm:$0xff] }
 0x30b   :  { %4015 = vset.pattern.permute.xlu1 %v6098_v40  ;;  %1434 = vperm.xlu0 %4038, %v4932_v21   ;;  %v2319_v27 = vrot.slane %v2318_v8, 1  ;;  %v1201_v21 = vadd.f32 %v1200_v0, %v1199_v1  ;;  %v5257_v1 = vld [vmem:[#allocation2 + $0x40] sm:$0xff]  ;;  %v1216_v38 = vrot.slane %v1215_v6, 2 }
 0x30c   :  { %2189 = vperm.xlu1 %4015, %v5196_v36  }
 0x30d   :  { %v5229_v58 = vpop.permute.xlu0 %2173  ;;  %v2320_v57 = vadd.f32 %v2319_v27, %v2318_v8  ;;  %v1202_v24 = vrot.slane %v1201_v21, 2  ;;  %v2338_v8 = vrot.slane %v2337_v10, 2 }
 0x30e   :  { %v5233_v39 = vpop.permute.xlu1 %1359 }
 0x30f   :  { %1429 = vperm.xlu0 %4038, %v4922_v53   ;;  %v3060_v43 = vsel %vm2922_vm7, %v2320_v57, %v5181_v29  ;;  %v4248_v29 = vpop.eup %4247  ;;  %v1203_v17 = vadd.f32 %v1202_v24, %v1201_v21  ;;  %v6107_v57 = vld [vmem:[#allocation15_spill] sm:$0xff]  ;;  %v1858_v24 = vmul.f32 %v6112_v15, %v6111_v2 }
 0x310   :  { %4017 = vset.pattern.permute.xlu1 %v6095_v46  ;;  %v5247_v53 = vsel %vm2924_vm8, %v2327_v31, %v3060_v43  ;;  %v5261_v23 = vmul.f32 %v4248_v29, %v6106_v45  ;;  %v1856_v21 = vmul.f32 %v6108_v37, %v6107_v57  ;;  %v2339_v31 = vadd.f32 %v2338_v8, %v2337_v10  ;;  %v6109_v43 = vld [vmem:[#allocation13_spill] sm:$0xff]  ;;  %v6113_v29 = vld [vmem:[#allocation30_spill] sm:$0xff] }
 0x311   :  { %1801 = vperm.xlu1 %4017, %v4906_v22   ;;  %6105 = vst [vmem:[#allocation36_spill] sm:$0xff] %v5247_v53  ;;  %v1204_v63 = vrot.slane %v1203_v17, 1  ;;  %v1857_v50 = vmul.f32 %v6110_v25, %v6109_v43  ;;  %v6117_v53 = vld [vmem:[#allocation23_spill] sm:$0xff] }
 0x312   :  { %v5244_v19 = vpop.permute.xlu0 %2561  ;;  %v1888_v10 = vsel %vm108_vm0, %v1856_v21, 0.0  ;;  %v2340_v8 = vrot.slane %v2339_v31, 1  ;;  %v6114_v21 = vld [vmem:[#allocation20_spill] sm:$0xff] }
 0x313   :  { %v5249_v16 = vpop.permute.xlu1 %2529  ;;  %1454 = vperm.xlu0 %4038, %v5079_v26   ;;  %v1205_v4 = vadd.f32 %v1204_v63, %v1203_v17  ;;  %v1895_v57 = vsel %vm108_vm0, %v1857_v50, 0.0  ;;  %v4250_v17 = vpop.eup %4249  ;;  %v1860_v63 = vmul.f32 %v5104_v28, %v5136_v11  ;;  %v1889_v37 = vrot.slane %v1888_v10, 4 }
 0x314   :  { %v1896_v25 = vrot.slane %v1895_v57, 4  ;;  %v2341_v2 = vadd.f32 %v2340_v8, %v2339_v31 }
 0x315   :  { %4019 = vset.pattern.permute.xlu1 %v6101_v55  ;;  %4251 = vrcp.f32 %v1205_v4  ;;  %v5301_v4 = vmul.f32 %v4250_v17, %v5185_v30  ;;  %v1890_v32 = vadd.f32 %v1889_v37, %v1888_v10  ;;  %v2633_v17 = vmul.f32 %v5220_v59, %v5163_v60 }
 0x316   :  { %1404 = vperm.xlu1 %4019, %v4906_v22   ;;  %v2345_v22 = vrot.slane %v2344_v52, 2  ;;  %v1862_v10 = vmul.f32 %v5166_v18, %v5178_v5 }
 0x317   :  { %v5254_v62 = vpop.permute.xlu0 %2177  ;;  %1459 = vperm.xlu0 %4038, %v5093_v14   ;;  %6118 = vst [vmem:[#allocation25_spill] sm:$0xff] %v5301_v4  ;;  %v2719_v60 = vsel %vm108_vm0, %v2633_v17, 0.0 }
 0x318   :  { %v2146_v20 = vpop.permute.xlu1 %2145  ;;  %v2346_v35 = vadd.f32 %v2345_v22, %v2344_v52  ;;  %v1902_v52 = vsel %vm108_vm0, %v1858_v24, 0.0  ;;  %v1930_v18 = vsel %vm108_vm0, %v1862_v10, 0.0 }
 0x319   :  { %v2248_v48 = vmul.f32 %v5257_v1, %v2146_v20  ;;  %v1217_v20 = vadd.f32 %v1216_v38, %v1215_v6  ;;  %v1903_v50 = vrot.slane %v1902_v52, 4 }
 0x31a   :  { %4020 = vset.pattern.permute.xlu1 %v6091_v3  ;;  %v2347_v22 = vrot.slane %v2346_v35, 1 }
 0x31b   :  { %v2328_v0 = vsel %vm108_vm0, %v2248_v48, 0.0  ;;  %2581 = vperm.xlu1 %4020, %v5261_v23   ;;  %1464 = vperm.xlu0 %4038, %v5120_v47   ;;  %v1218_v6 = vrot.slane %v1217_v20, 1 }
 0x31c   :  { %v2329_v27 = vrot.slane %v2328_v0, 4  ;;  %v5267_v12 = vpop.permute.xlu0 %2569  ;;  %v2348_v28 = vadd.f32 %v2347_v22, %v2346_v35  ;;  %v1904_v35 = vadd.f32 %v1903_v50, %v1902_v52  ;;  %v1865_v50 = vmul.f32 %v5220_v59, %v5218_v34 }
 0x31d   :  { %v5269_v42 = vpop.permute.xlu1 %2541  ;;  %v1219_v44 = vadd.f32 %v1218_v6, %v1217_v20 }
 0x31e   :  { %v2330_v41 = vadd.f32 %v2329_v27, %v2328_v0 }
 0x31f   :  { %4021 = vset.pattern.permute.xlu1 %v6095_v46  ;;  %1469 = vperm.xlu0 %4038, %v6113_v29   ;;  %4253 = vrcp.f32 %v1219_v44  ;;  %v2634_v44 = vmul.f32 %v5225_v49, %v5189_v51  ;;  %v2720_v51 = vrot.slane %v2719_v60, 4 }
 0x320   :  { %v2331_v48 = vrot.slane %v2330_v41, 2  ;;  %1813 = vperm.xlu1 %4021, %v5261_v23  }
 0x321   :  { %v5280_v45 = vpop.permute.xlu0 %2185 }
 0x322   :  { %v2332_v0 = vadd.f32 %v2331_v48, %v2330_v41  ;;  %v5283_v27 = vpop.permute.xlu1 %1773  ;;  %v6115_v41 = vld [vmem:[#allocation21_spill] sm:$0xff] }
 0x323   :  { %4062 = vset.pattern.permute.xlu0 %v6091_v3  ;;  %v1859_v43 = vmul.f32 %v6115_v41, %v6114_v21  ;;  %v6116_v48 = vld [vmem:[#allocation29_spill] sm:$0xff]  ;;  %v1916_v21 = vsel %vm108_vm0, %v1860_v63, 0.0  ;;  %v1891_v63 = vrot.slane %v1890_v32, 2 }
 0x324   :  { %v2333_v38 = vrot.slane %v2332_v0, 1  ;;  %4022 = vset.pattern.permute.xlu1 %v6091_v3  ;;  %v1861_v13 = vmul.f32 %v6117_v53, %v6116_v48  ;;  %v1897_v53 = vadd.f32 %v1896_v25, %v1895_v57  ;;  %v1917_v22 = vrot.slane %v1916_v21, 4  ;;  %v4252_v57 = vpop.eup %4251 }
 0x325   :  { %2577 = vperm.xlu1 %4022, %v5035_v61   ;;  %v1909_v31 = vsel %vm108_vm0, %v1859_v43, 0.0  ;;  %v1892_v5 = vadd.f32 %v1891_v63, %v1890_v32 }
 0x326   :  { %v2334_v15 = vadd.f32 %v2333_v38, %v2332_v0  ;;  %v5294_v24 = vpop.permute.xlu0 %2589  ;;  %v1923_v30 = vsel %vm108_vm0, %v1861_v13, 0.0  ;;  %v1910_v20 = vrot.slane %v1909_v31, 4  ;;  %v1898_v52 = vrot.slane %v1897_v53, 2 }
 0x327   :  { %v5298_v11 = vpop.permute.xlu1 %2157  ;;  %v1905_v38 = vrot.slane %v1904_v35, 2  ;;  %v1924_v37 = vrot.slane %v1923_v30, 4  ;;  %v1918_v43 = vadd.f32 %v1917_v22, %v1916_v21  ;;  %v1931_v22 = vrot.slane %v1930_v18, 4 }
 0x328   :  { %v3062_v41 = vsel %vm2912_vm2, %v2341_v2, %v2334_v15  ;;  %v1911_v25 = vadd.f32 %v1910_v20, %v1909_v31  ;;  %v5332_v15 = vmul.f32 %v4252_v57, %v5204_v33  ;;  %v1899_v48 = vadd.f32 %v1898_v52, %v1897_v53 }
 0x329   :  { %2585 = vperm.xlu1 %4022, %v5301_v4   ;;  %v5308_v8 = vsel %vm2914_vm3, %v2348_v28, %v3062_v41  ;;  %v1906_v28 = vadd.f32 %v1905_v38, %v1904_v35  ;;  %v1925_v21 = vadd.f32 %v1924_v37, %v1923_v30  ;;  %v5334_v41 = vld [vmem:[#allocation2 + $0x78] sm:$0xff]  ;;  %v1919_v32 = vrot.slane %v1918_v43, 2  ;;  %v4254_v30 = vpop.eup %4253 }
 0x32a   :  { %v5310_v0 = vpop.permute.xlu0 %2593  ;;  %v2639_v31 = vmul.f32 %v5334_v41, %v5216_v54  ;;  %v1912_v20 = vrot.slane %v1911_v25, 2  ;;  %v1893_v33 = vrot.slane %v1892_v5, 1  ;;  %v2726_v53 = vsel %vm108_vm0, %v2634_v44, 0.0 }
 0x32b   :  { %6119 = vst [vmem:[#allocation15_spill] sm:$0xff] %v5310_v0  ;;  %v1951_v35 = vsel %vm108_vm0, %v1865_v50, 0.0  ;;  %v1900_v17 = vrot.slane %v1899_v48, 1  ;;  %v1907_v10 = vrot.slane %v1906_v28, 1  ;;  %v1926_v63 = vrot.slane %v1925_v21, 2 }
 0x32c   :  { %v5317_v6 = vpop.permute.xlu1 %1369  ;;  %v2761_v54 = vsel %vm108_vm0, %v2639_v31, 0.0  ;;  %v1920_v52 = vadd.f32 %v1919_v32, %v1918_v43  ;;  %v2721_v38 = vadd.f32 %v2720_v51, %v2719_v60  ;;  %v1932_v37 = vadd.f32 %v1931_v22, %v1930_v18 }
 0x32d   :  { %6120 = vst [vmem:[#allocation17_spill] sm:$0xff] %v5317_v6  ;;  %4024 = vset.pattern.permute.xlu1 %v6095_v46  ;;  %v1913_v56 = vadd.f32 %v1912_v20, %v1911_v25  ;;  %v1952_v44 = vrot.slane %v1951_v35, 4  ;;  %v1894_v50 = vadd.f32 %v1893_v33, %v1892_v5  ;;  %v2762_v0 = vrot.slane %v2761_v54, 4  ;;  %v5383_v6 = vld [vmem:[#allocation2 + $0x58] sm:$0xff] }
 0x32e   :  { %1817 = vperm.xlu1 %4024, %v5301_v4   ;;  %v5321_v13 = vpop.permute.xlu0 %2601  ;;  %v2727_v4 = vrot.slane %v2726_v53, 4  ;;  %v5354_v31 = vmul.f32 %v4254_v30, %v5231_v9  ;;  %v1901_v43 = vadd.f32 %v1900_v17, %v1899_v48  ;;  %v1908_v60 = vadd.f32 %v1907_v10, %v1906_v28 }
 0x32f   :  { %6121 = vst [vmem:[#allocation13_spill] sm:$0xff] %v5321_v13  ;;  %v1481_v13 = vmul.f32 %v5220_v59, %v5233_v39  ;;  %v1927_v18 = vadd.f32 %v1926_v63, %v1925_v21  ;;  %v2255_v32 = vmul.f32 %v5334_v41, %v5229_v58  ;;  %v1921_v51 = vrot.slane %v1920_v52, 1 }
 0x330   :  { %6125 = vst [vmem:[#allocation20_spill] sm:$0xff] %v5354_v31  ;;  %v2722_v25 = vrot.slane %v2721_v38, 2  ;;  %v1933_v22 = vrot.slane %v1932_v37, 2  ;;  %v2632_v20 = vmul.f32 %v5257_v1, %v5249_v16  ;;  %v1914_v33 = vrot.slane %v1913_v56, 1 }
 0x331   :  { %v5329_v2 = vpop.permute.xlu1 %1769  ;;  %v2728_v59 = vadd.f32 %v2727_v4, %v2726_v53  ;;  %v1953_v39 = vadd.f32 %v1952_v44, %v1951_v35  ;;  %v2983_v48 = vsel %vm2912_vm2, %v1901_v43, %v1894_v50  ;;  %v1567_v28 = vsel %vm108_vm0, %v1481_v13, 0.0  ;;  %v5373_v43 = vld [vmem:[#allocation2 + $0x80] sm:$0xff] }
 0x332   :  { %4025 = vset.pattern.permute.xlu1 %v6091_v3  ;;  %v2763_v21 = vadd.f32 %v2762_v0, %v2761_v54  ;;  %v2984_v58 = vsel %vm2914_vm3, %v1908_v60, %v2983_v48  ;;  %v1928_v30 = vrot.slane %v1927_v18, 1  ;;  %v2377_v16 = vsel %vm108_vm0, %v2255_v32, 0.0 }
 0x333   :  { %2597 = vperm.xlu1 %4025, %v5332_v15   ;;  %v5340_v34 = vpop.permute.xlu0 %2209  ;;  %v1922_v17 = vadd.f32 %v1921_v51, %v1920_v52  ;;  %v2723_v10 = vadd.f32 %v2722_v25, %v2721_v38  ;;  %v1934_v63 = vadd.f32 %v1933_v22, %v1932_v37  ;;  %v2712_v4 = vsel %vm108_vm0, %v2632_v20, 0.0 }
 0x334   :  { %6122 = vst [vmem:[#allocation18_spill] sm:$0xff] %v5340_v34  ;;  %v1915_v53 = vadd.f32 %v1914_v33, %v1913_v56  ;;  %v2729_v35 = vrot.slane %v2728_v59, 2  ;;  %v1954_v44 = vrot.slane %v1953_v39, 2  ;;  %v2764_v0 = vrot.slane %v2763_v21, 2 }
 0x335   :  { %v2378_v54 = vrot.slane %v2377_v16, 4  ;;  %v2640_v60 = vmul.f32 %v5373_v43, %v5244_v19  ;;  %v2713_v38 = vrot.slane %v2712_v4, 4  ;;  %v1929_v56 = vadd.f32 %v1928_v30, %v1927_v18 }
 0x336   :  { %v5345_v57 = vpop.permute.xlu1 %1364  ;;  %v2985_v52 = vsel %vm2916_vm4, %v1915_v53, %v2984_v58  ;;  %v2724_v32 = vrot.slane %v2723_v10, 1  ;;  %v1935_v51 = vrot.slane %v1934_v63, 1  ;;  %v2730_v25 = vadd.f32 %v2729_v35, %v2728_v59 }
 0x337   :  { %6123 = vst [vmem:[#allocation24_spill] sm:$0xff] %v5345_v57  ;;  %4026 = vset.pattern.permute.xlu1 %v6095_v46  ;;  %v5348_v34 = vpop.permute.xlu0 %2217  ;;  %v2986_v37 = vsel %vm2918_vm5, %v1922_v17, %v2985_v52  ;;  %v1955_v22 = vadd.f32 %v1954_v44, %v1953_v39  ;;  %v2765_v57 = vadd.f32 %v2764_v0, %v2763_v21  ;;  %v6126_v17 = vld [vmem:[#allocation12_spill] sm:$0xff] }
 0x338   :  { %6124 = vst [vmem:[#allocation19_spill] sm:$0xff] %v5348_v34  ;;  %1829 = vperm.xlu1 %4026, %v5332_v15   ;;  %v1568_v34 = vrot.slane %v1567_v28, 4  ;;  %v2379_v19 = vadd.f32 %v2378_v54, %v2377_v16  ;;  %v2251_v58 = vmul.f32 %v5383_v6, %v5298_v11  ;;  %v2714_v30 = vadd.f32 %v2713_v38, %v2712_v4 }
 0x339   :  { %v5390_v59 = vadd.f32 %v2724_v32, %v2723_v10  ;;  %v2731_v39 = vrot.slane %v2730_v25, 1  ;;  %v1956_v53 = vrot.slane %v1955_v22, 1  ;;  %v2766_v35 = vrot.slane %v2765_v57, 1  ;;  %v5418_v32 = vld [vmem:[#allocation2 + $0x60] sm:$0xff] }
 0x33a   :  { %v1569_v20 = vadd.f32 %v1568_v34, %v1567_v28  ;;  %v1936_v34 = vadd.f32 %v1935_v51, %v1934_v63  ;;  %v2380_v11 = vrot.slane %v2379_v19, 2  ;;  %v2349_v44 = vsel %vm108_vm0, %v2251_v58, 0.0  ;;  %6130 = vst [vmem:[#allocation37_spill] sm:$0xff] %v5418_v32 }
 0x33b   :  { %v5360_v5 = vpop.permute.xlu1 %2549  ;;  %v2715_v4 = vrot.slane %v2714_v30, 2  ;;  %v2256_v10 = vmul.f32 %v5373_v43, %v5254_v62  ;;  %v2635_v63 = vmul.f32 %v5383_v6, %v5269_v42  ;;  %v1866_v0 = vmul.f32 %v5225_v49, %v5329_v2 }
 0x33c   :  { %4027 = vset.pattern.permute.xlu1 %v6091_v3  ;;  %v1762_v9 = vpop.permute.xlu0 %1761  ;;  %v1867_v38 = vmul.f32 %v5383_v6, %v5283_v27  ;;  %v5425_v27 = vadd.f32 %v2766_v35, %v2765_v57  ;;  %v5427_v58 = vadd.f32 %v2380_v11, %v2379_v19 }
 0x33d   :  { %2605 = vperm.xlu1 %4027, %v5354_v31   ;;  %v1864_v33 = vmul.f32 %v5257_v1, %v1762_v9  ;;  %v2987_v1 = vsel %vm2920_vm6, %v1929_v56, %v2986_v37  ;;  %v1570_v9 = vrot.slane %v1569_v20, 2  ;;  %v2350_v37 = vrot.slane %v2349_v44, 4 }
 0x33e   :  { %v5414_v62 = vsel %vm2922_vm7, %v1936_v34, %v2987_v1  ;;  %6131 = vst [vmem:[#allocation38_spill] sm:$0xff] %v5427_v58  ;;  %v2384_v34 = vsel %vm108_vm0, %v2256_v10, 0.0 }
 0x33f   :  { %v1944_v21 = vsel %vm108_vm0, %v1864_v33, 0.0  ;;  %6128 = vst [vmem:[#allocation29_spill] sm:$0xff] %v5414_v62  ;;  %v5416_v42 = vadd.f32 %v1570_v9, %v1569_v20  ;;  %v5421_v33 = vadd.f32 %v2731_v39, %v2730_v25  ;;  %v2733_v20 = vsel %vm108_vm0, %v2635_v63, 0.0  ;;  %v5434_v25 = vld [vmem:[#allocation2 + $0x68] sm:$0xff] }
 0x340   :  { %v5369_v50 = vpop.permute.xlu1 %1781  ;;  %v5371_v13 = vpop.permute.xlu0 %1757  ;;  %v1945_v56 = vrot.slane %v1944_v21, 4  ;;  %v2351_v39 = vadd.f32 %v2350_v37, %v2349_v44  ;;  %v2385_v35 = vrot.slane %v2384_v34, 4  ;;  %v2734_v11 = vrot.slane %v2733_v20, 4 }
 0x341   :  { %4028 = vset.pattern.permute.xlu1 %v6095_v46  ;;  %v2768_v46 = vsel %vm108_vm0, %v2640_v60, 0.0  ;;  %v5406_v60 = vld [vmem:[#allocation2 + $0x90] sm:$0xff]  ;;  %6129 = vst [vmem:[#allocation23_spill] sm:$0xff] %v5416_v42  ;;  %v1869_v57 = vmul.f32 %v5434_v25, %v5369_v50  ;;  %v2637_v50 = vmul.f32 %v5434_v25, %v5360_v5 }
 0x342   :  { %1837 = vperm.xlu1 %4028, %v5354_v31   ;;  %v2769_v28 = vrot.slane %v2768_v46, 4  ;;  %6127 = vst [vmem:[#allocation21_spill] sm:$0xff] %v5406_v60  ;;  %v2642_v52 = vmul.f32 %v5406_v60, %v5267_v12  ;;  %v5423_v12 = vadd.f32 %v1956_v53, %v1955_v22  ;;  %v1946_v9 = vadd.f32 %v1945_v56, %v1944_v21 }
 0x343   :  { %v2352_v19 = vrot.slane %v2351_v39, 2  ;;  %v5454_v31 = vadd.f32 %v2385_v35, %v2384_v34  ;;  %v2735_v5 = vadd.f32 %v2734_v11, %v2733_v20  ;;  %v5464_v34 = vmul.f32 %v5406_v60, %v5280_v45 }
 0x344   :  { %v1778_v48 = vpop.permute.xlu0 %1777  ;;  %v2770_v2 = vadd.f32 %v2769_v28, %v2768_v46  ;;  %v1958_v46 = vsel %vm108_vm0, %v1866_v0, 0.0  ;;  %v2782_v1 = vsel %vm108_vm0, %v2642_v52, 0.0  ;;  %v1947_v52 = vrot.slane %v1946_v9, 2 }
 0x345   :  { %v5387_v18 = vpop.permute.xlu1 %2165  ;;  %v2783_v63 = vrot.slane %v2782_v1, 4  ;;  %v2353_v20 = vadd.f32 %v2352_v19, %v2351_v39 }
 0x346   :  { %1833 = vperm.xlu1 %4028, %v6126_v17  }
 0x348   :  { %v5394_v16 = vpop.permute.xlu0 %1793 }
 0x34a   :  { %v5403_v54 = vpop.permute.xlu1 %1379  ;;  %4029 = vset.pattern.permute.xlu1 %v6091_v3  ;;  %v1868_v3 = vmul.f32 %v5418_v32, %v1778_v48  ;;  %v1965_v48 = vsel %vm108_vm0, %v1867_v38, 0.0  ;;  %v1979_v38 = vsel %vm108_vm0, %v1869_v57, 0.0 }
 0x34b   :  { %2613 = vperm.xlu1 %4029, %v5093_v14   ;;  %v2716_v14 = vadd.f32 %v2715_v4, %v2714_v30  ;;  %v2771_v30 = vrot.slane %v2770_v2, 2  ;;  %v1959_v4 = vrot.slane %v1958_v46, 4  ;;  %v1966_v0 = vrot.slane %v1965_v48, 4 }
 0x34c   :  { %v1790_v51 = vpop.permute.xlu0 %1789  ;;  %v1972_v28 = vsel %vm108_vm0, %v1868_v3, 0.0 }
 0x34d   :  { %v2717_v10 = vrot.slane %v2716_v14, 1  ;;  %v1973_v56 = vrot.slane %v1972_v28, 4  ;;  %v5450_v3 = vadd.f32 %v2771_v30, %v2770_v2  ;;  %v1960_v17 = vadd.f32 %v1959_v4, %v1958_v46  ;;  %v5470_v4 = vld [vmem:[#allocation2 + $0x70] sm:$0xff] }
 0x34e   :  { %v1871_v57 = vmul.f32 %v5334_v41, %v1790_v51  ;;  %v1967_v42 = vadd.f32 %v1966_v0, %v1965_v48  ;;  %v5459_v2 = vadd.f32 %v2783_v63, %v2782_v1  ;;  %v1948_v30 = vadd.f32 %v1947_v52, %v1946_v9 }
 0x34f   :  { %v2546_v22 = vpop.permute.xlu1 %2545  ;;  %2609 = vperm.xlu1 %4029, %v5079_v26   ;;  %v2718_v37 = vadd.f32 %v2717_v10, %v2716_v14  ;;  %v1974_v58 = vadd.f32 %v1973_v56, %v1972_v28  ;;  %v1961_v48 = vrot.slane %v1960_v17, 2  ;;  %v2736_v9 = vrot.slane %v2735_v5, 2 }
 0x350   :  { %v5441_v53 = vpop.permute.xlu0 %1809  ;;  %v2636_v21 = vmul.f32 %v5418_v32, %v2546_v22  ;;  %v1968_v28 = vrot.slane %v1967_v42, 2  ;;  %v2354_v63 = vrot.slane %v2353_v20, 1 }
 0x351   :  { %6132 = vst [vmem:[#allocation39_spill] sm:$0xff] %v5441_v53  ;;  %v1980_v53 = vrot.slane %v1979_v38, 4  ;;  %v5475_v19 = vsel %vm2912_vm2, %v5390_v59, %v2718_v37  ;;  %v1975_v39 = vrot.slane %v1974_v58, 2  ;;  %v1962_v56 = vadd.f32 %v1961_v48, %v1960_v17 }
 0x352   :  { %v2740_v44 = vsel %vm108_vm0, %v2636_v21, 0.0  ;;  %v2747_v21 = vsel %vm108_vm0, %v2637_v50, 0.0  ;;  %v2737_v37 = vadd.f32 %v2736_v9, %v2735_v5 }
 0x353   :  { %2621 = vperm.xlu1 %4029, %v6113_v29   ;;  %v2741_v22 = vrot.slane %v2740_v44, 4  ;;  %v2748_v35 = vrot.slane %v2747_v21, 4  ;;  %v1981_v11 = vadd.f32 %v1980_v53, %v1979_v38  ;;  %v1963_v17 = vrot.slane %v1962_v56, 1 }
 0x354   :  { %v2162_v26 = vpop.permute.xlu1 %2161  ;;  %v5452_v62 = vpop.permute.xlu0 %1825 }
 0x355   :  { %6133 = vst [vmem:[#allocation40_spill] sm:$0xff] %v5452_v62  ;;  %v2252_v29 = vmul.f32 %v5418_v32, %v2162_v26  ;;  %v2742_v46 = vadd.f32 %v2741_v22, %v2740_v44  ;;  %v1993_v26 = vsel %vm108_vm0, %v1871_v57, 0.0  ;;  %v2749_v44 = vadd.f32 %v2748_v35, %v2747_v21 }
 0x356   :  { %v1994_v0 = vrot.slane %v1993_v26, 4  ;;  %v1969_v22 = vadd.f32 %v1968_v28, %v1967_v42  ;;  %v1982_v57 = vrot.slane %v1981_v11, 2 }
 0x357   :  { %2617 = vperm.xlu1 %4029, %v5120_v47   ;;  %v2356_v41 = vsel %vm108_vm0, %v2252_v29, 0.0  ;;  %v1949_v29 = vrot.slane %v1948_v30, 1  ;;  %v2743_v50 = vrot.slane %v2742_v46, 2  ;;  %v1976_v47 = vadd.f32 %v1975_v39, %v1974_v58 }
 0x358   :  { %v5467_v51 = vpop.permute.xlu0 %1821  ;;  %v2357_v14 = vrot.slane %v2356_v41, 4  ;;  %v1995_v62 = vadd.f32 %v1994_v0, %v1993_v26  ;;  %v2750_v21 = vrot.slane %v2749_v44, 2  ;;  %v1970_v58 = vrot.slane %v1969_v22, 1 }
 0x359   :  { %6134 = vst [vmem:[#allocation41_spill] sm:$0xff] %v5467_v51  ;;  %v2554_v1 = vpop.permute.xlu1 %2553  ;;  %v1977_v26 = vrot.slane %v1976_v47, 1 }
 0x35a   :  { %v2638_v45 = vmul.f32 %v5470_v4, %v2554_v1  ;;  %v2358_v10 = vadd.f32 %v2357_v14, %v2356_v41  ;;  %v1950_v1 = vadd.f32 %v1949_v29, %v1948_v30  ;;  %v2738_v30 = vrot.slane %v2737_v37, 1 }
 0x35b   :  { %4030 = vset.pattern.permute.xlu1 %v6101_v55  ;;  %v1996_v29 = vrot.slane %v1995_v62, 2 }
 0x35c   :  { %v2754_v52 = vsel %vm108_vm0, %v2638_v45, 0.0  ;;  %1409 = vperm.xlu1 %4030, %v5196_v36   ;;  %v5480_v53 = vpop.permute.xlu0 %1841  ;;  %v2359_v59 = vrot.slane %v2358_v10, 2  ;;  %v2355_v45 = vadd.f32 %v2354_v63, %v2353_v20  ;;  %v2744_v36 = vadd.f32 %v2743_v50, %v2742_v46 }
 0x35d   :  { %v2755_v41 = vrot.slane %v2754_v52, 4  ;;  %v2990_v20 = vsel %vm2912_vm2, %v5423_v12, %v1950_v1  ;;  %v1983_v46 = vadd.f32 %v1982_v57, %v1981_v11  ;;  %v2751_v50 = vadd.f32 %v2750_v21, %v2749_v44 }
 0x35e   :  { %v1786_v14 = vpop.permute.xlu1 %1785  ;;  %v2360_v32 = vadd.f32 %v2359_v59, %v2358_v10  ;;  %v2745_v39 = vrot.slane %v2744_v36, 1  ;;  %v3064_v12 = vsel %vm2916_vm4, %v2355_v45, %v5308_v8  ;;  %v2739_v11 = vadd.f32 %v2738_v30, %v2737_v37 }
 0x35f   :  { %v1870_v60 = vmul.f32 %v5470_v4, %v1786_v14  ;;  %v2756_v51 = vadd.f32 %v2755_v41, %v2754_v52  ;;  %v1971_v57 = vadd.f32 %v1970_v58, %v1969_v22  ;;  %v1978_v44 = vadd.f32 %v1977_v26, %v1976_v47 }
 0x360   :  { %4031 = vset.pattern.permute.xlu1 %v6098_v40  ;;  %v5485_v38 = vpop.permute.xlu0 %1845  ;;  %v2361_v5 = vrot.slane %v2360_v32, 1  ;;  %v1997_v41 = vadd.f32 %v1996_v29, %v1995_v62  ;;  %v2746_v14 = vadd.f32 %v2745_v39, %v2744_v36  ;;  %v2773_v45 = vrot.slane %v5450_v3, 1  ;;  %v6136_v29 = vld [vmem:[#allocation17_spill] sm:$0xff] }
 0x361   :  { %v1986_v42 = vsel %vm108_vm0, %v1870_v60, 0.0  ;;  %2193 = vperm.xlu1 %4031, %v5035_v61   ;;  %v2757_v48 = vrot.slane %v2756_v51, 2  ;;  %v2398_v61 = vsel %vm108_vm0, %v5464_v34, 0.0  ;;  %v1964_v60 = vadd.f32 %v1963_v17, %v1962_v56 }
 0x362   :  { %v1987_v35 = vrot.slane %v1986_v42, 4  ;;  %v2362_v9 = vadd.f32 %v2361_v5, %v2360_v32  ;;  %v5500_v32 = vld [vmem:[#allocation2 + $0xb8] sm:$0xff]  ;;  %v1984_v56 = vrot.slane %v1983_v46, 1  ;;  %v2399_v21 = vrot.slane %v2398_v61, 4 }
 0x363   :  { %v5491_v28 = vpop.permute.xlu1 %2169  ;;  %v2758_v10 = vadd.f32 %v2757_v48, %v2756_v51  ;;  %v2647_v52 = vmul.f32 %v5500_v32, %v5294_v24  ;;  %v2991_v34 = vsel %vm2914_vm3, %v1964_v60, %v2990_v20  ;;  %v3127_v24 = vsel %vm2914_vm3, %v5421_v33, %v5475_v19 }
 0x364   :  { %v1988_v63 = vadd.f32 %v1987_v35, %v1986_v42  ;;  %v5493_v0 = vpop.permute.xlu0 %1853  ;;  %v5505_v59 = vsel %vm2918_vm5, %v2362_v9, %v3064_v12  ;;  %v2752_v22 = vrot.slane %v2751_v50, 1  ;;  %v6135_v47 = vrot.slane %v5459_v2, 2  ;;  %v5536_v12 = vld [vmem:[#allocation2 + $0x88] sm:$0xff] }
 0x365   :  { %2197 = vperm.xlu1 %4031, %v5261_v23   ;;  %v2759_v1 = vrot.slane %v2758_v10, 1  ;;  %v2817_v36 = vsel %vm108_vm0, %v2647_v52, 0.0  ;;  %v2992_v5 = vsel %vm2916_vm4, %v1971_v57, %v2991_v34  ;;  %v3128_v30 = vsel %vm2916_vm4, %v2739_v11, %v3127_v24  ;;  %v6138_v52 = vld [vmem:[#allocation24_spill] sm:$0xff]  ;;  %v3168_v57 = vld [vmem:[#allocation5 + $0x8] sm:$0xff]  ;;  %v3170_v34 = vld [vmem:[#allocation5 + $0x18] sm:$0xff] }
 0x366   :  { %v1989_v51 = vrot.slane %v1988_v63, 2  ;;  %v2786_v62 = vadd.f32 %v6135_v47, %v5459_v2  ;;  %v1985_v58 = vadd.f32 %v1984_v56, %v1983_v46  ;;  %v1863_v48 = vmul.f32 %v5133_v7, %v5371_v13 }
 0x367   :  { %v2993_v33 = vsel %vm2918_vm5, %v1978_v44, %v2992_v5  ;;  %v1998_v19 = vrot.slane %v1997_v41, 1  ;;  %v3129_v35 = vsel %vm2918_vm5, %v2746_v14, %v3128_v30  ;;  %v2760_v20 = vadd.f32 %v2759_v1, %v2758_v10  ;;  %v3169_v5 = vld [vmem:[#allocation5 + $0x10] sm:$0xff] }
 0x368   :  { %v1990_v17 = vadd.f32 %v1989_v51, %v1988_v63  ;;  %v5508_v8 = vpop.permute.xlu1 %1384  ;;  %v5510_v37 = vpop.permute.xlu0 %1849  ;;  %v5528_v2 = vadd.f32 %v2773_v45, %v5450_v3  ;;  %v2387_v9 = vrot.slane %v5454_v31, 2  ;;  %v1483_v39 = vmul.f32 %v5383_v6, %v6136_v29  ;;  %v6140_v29 = vld [vmem:[#allocation13_spill] sm:$0xff] }
 0x369   :  { %2213 = vperm.xlu1 %4031, %v5332_v15   ;;  %v2753_v63 = vadd.f32 %v2752_v22, %v2751_v50  ;;  %v2400_v7 = vadd.f32 %v2399_v21, %v2398_v61  ;;  %v2818_v13 = vrot.slane %v2817_v36, 4  ;;  %v2994_v3 = vsel %vm2920_vm6, %v1985_v58, %v2993_v33 }
 0x36a   :  { %v1991_v42 = vrot.slane %v1990_v17, 1  ;;  %v2787_v11 = vrot.slane %v2786_v62, 1  ;;  %v1482_v6 = vmul.f32 %v5225_v49, %v6138_v52  ;;  %v1937_v61 = vsel %vm108_vm0, %v1863_v48, 0.0  ;;  %v3174_v48 = vld [vmem:[#allocation5 + $0x38] sm:$0xff] }
 0x36b   :  { %v3130_v51 = vsel %vm2920_vm6, %v2753_v63, %v3129_v35  ;;  %v1999_v56 = vadd.f32 %v1998_v19, %v1997_v41  ;;  %v1581_v1 = vsel %vm108_vm0, %v1483_v39, 0.0  ;;  %v2253_v49 = vmul.f32 %v5434_v25, %v5387_v18  ;;  %v5567_v35 = vld [vmem:[#allocation2 + $0xc0] sm:$0xff] }
 0x36c   :  { %v1992_v26 = vadd.f32 %v1991_v42, %v1990_v17  ;;  %v3131_v14 = vsel %vm2922_vm7, %v2760_v20, %v3130_v51  ;;  %v2401_v45 = vrot.slane %v2400_v7, 2  ;;  %v5554_v24 = vadd.f32 %v2818_v13, %v2817_v36  ;;  %v3172_v36 = vld [vmem:[#allocation5 + $0x28] sm:$0xff]  ;;  %v6139_v20 = vld [vmem:[#allocation15_spill] sm:$0xff]  ;;  %v3171_v13 = vld [vmem:[#allocation5 + $0x20] sm:$0xff] }
 0x36d   :  { %v2566_v46 = vpop.permute.xlu1 %2565  ;;  %v5533_v60 = vpop.permute.xlu0 %2205  ;;  %4033 = vset.pattern.permute.xlu1 %v6101_v55  ;;  %v3843_v47 = vpack.c.bf16 %v3170_v34, %v3168_v57  ;;  %v1574_v42 = vsel %vm108_vm0, %v1482_v6, 0.0  ;;  %v1938_v30 = vrot.slane %v1937_v61, 4  ;;  %v3132_v18 = vsel %vm2924_vm8, %v5425_v27, %v3131_v14 }
 0x36e   :  { %6137 = vst [vmem:[#allocation17_spill] sm:$0xff] %v5533_v60  ;;  %v2641_v10 = vmul.f32 %v5536_v12, %v2566_v46  ;;  %1419 = vperm.xlu1 %4033, %v5261_v23   ;;  %v2995_v50 = vsel %vm2922_vm7, %v1992_v26, %v2994_v3  ;;  %v5549_v23 = vadd.f32 %v2387_v9, %v5454_v31  ;;  %v3167_v31 = vld [vmem:[#allocation5] sm:$0xff]  ;;  %v1582_v19 = vrot.slane %v1581_v1, 4  ;;  %v5571_v9 = vld [vmem:[#allocation2 + $0xd0] sm:$0xff] }
 0x36f   :  { %v2996_v41 = vsel %vm2924_vm8, %v1999_v56, %v2995_v50  ;;  %v5565_v33 = vadd.f32 %v2787_v11, %v2786_v62  ;;  %3844 = vmatprep.subr.bf16.mxu0 %v3843_v47  ;;  %v2650_v39 = vmul.f32 %v5571_v9, %v6140_v29  ;;  %v2363_v63 = vsel %vm108_vm0, %v2253_v49, 0.0  ;;  %v3173_v62 = vld [vmem:[#allocation5 + $0x30] sm:$0xff]  ;;  %v3176_v49 = vld [vmem:[#allocation5 + $0x48] sm:$0xff]  ;;  %v5595_v29 = vld [vmem:[#allocation2 + $0xa0] sm:$0xff] }
 0x370   :  { %v2775_v44 = vsel %vm108_vm0, %v2641_v10, 0.0  ;;  %v4047_v26 = vpack.i.bf16 %v2996_v41, %v3132_v18  ;;  %v3845_v46 = vpack.c.bf16 %v3169_v5, %v3167_v31  ;;  %v1575_v10 = vrot.slane %v1574_v42, 4  ;;  %v3175_v41 = vld [vmem:[#allocation5 + $0x40] sm:$0xff]  ;;  %v3177_v31 = vld [vmem:[#allocation5 + $0x50] sm:$0xff] }
 0x371   :  { %v2776_v17 = vrot.slane %v2775_v44, 4  ;;  %v1872_v3 = vmul.f32 %v5373_v43, %v5394_v16  ;;  %v1485_v11 = vmul.f32 %v5434_v25, %v5403_v54  ;;  %v3847_v6 = vpack.c.bf16 %v3174_v48, %v3172_v36 }
 0x372   :  { %v5556_v21 = vpop.permute.xlu1 %1797  ;;  %v5559_v22 = vpop.permute.xlu0 %1354  ;;  %1439 = vperm.xlu1 %4033, %v5332_v15   ;;  %v2648_v15 = vmul.f32 %v5567_v35, %v6139_v20  ;;  %4048 = vrot.lane.b32.xlu0 %v4047_v26, %s4407_s2  ;;  %v5584_v50 = vadd.f32 %v2401_v45, %v2400_v7  ;;  %v2820_v51 = vrot.slane %v5554_v24, 2  ;;  %v1939_v57 = vadd.f32 %v1938_v30, %v1937_v61 }
 0x373   :  { %v2777_v58 = vadd.f32 %v2776_v17, %v2775_v44  ;;  %v6142_v44 = vld [vmem:[#allocation25_spill] sm:$0xff]  ;;  %3846 = vmatpush1.bf16.msra.mxu0 %v3845_v46  ;;  %v2364_v54 = vrot.slane %v2363_v63, 4  ;;  %v3849_v14 = vpack.c.bf16 %v3173_v62, %v3171_v13  ;;  %v3178_v17 = vld [vmem:[#allocation5 + $0x58] sm:$0xff]  ;;  %v1583_v7 = vadd.f32 %v1582_v19, %v1581_v1 }
 0x374   :  { %v2824_v16 = vsel %vm108_vm0, %v2648_v15, 0.0  ;;  %3848 = vmatprep.subr.bf16.mxu0 %v3847_v6  ;;  %v2838_v45 = vsel %vm108_vm0, %v2650_v39, 0.0  ;;  %v3851_v61 = vpack.c.bf16 %v3178_v17, %v3176_v49  ;;  %v1576_v5 = vadd.f32 %v1575_v10, %v1574_v42  ;;  %v3180_v1 = vld [vmem:[#allocation5 + $0x68] sm:$0xff]  ;;  %v3182_v19 = vld [vmem:[#allocation5 + $0x78] sm:$0xff] }
 0x375   :  { %v2778_v27 = vrot.slane %v2777_v58, 2  ;;  %v2000_v30 = vsel %vm108_vm0, %v1872_v3, 0.0  ;;  %v2825_v36 = vrot.slane %v2824_v16, 4  ;;  %v1940_v48 = vrot.slane %v1939_v57, 2  ;;  %v6143_v39 = vld [vmem:[#allocation39_spill] sm:$0xff] }
 0x376   :  { %v5581_v52 = vpop.permute.xlu0 %1349  ;;  %4034 = vset.pattern.permute.xlu1 %v6098_v40  ;;  %v3853_v15 = vpack.c.bf16 %v3177_v31, %v3175_v41  ;;  %v2365_v26 = vadd.f32 %v2364_v54, %v2363_v63  ;;  %v1876_v42 = vmul.f32 %v5595_v29, %v6143_v39  ;;  %v3855_v62 = vpack.c.bf16 %v3182_v19, %v3180_v1  ;;  %v6144_v49 = vld [vmem:[#allocation23_spill] sm:$0xff] }
 0x377   :  { %6141 = vst [vmem:[#allocation24_spill] sm:$0xff] %v5581_v52  ;;  %v2779_v34 = vadd.f32 %v2778_v27, %v2777_v58  ;;  %v2182_v56 = vpop.permute.xlu1 %2181  ;;  %2201 = vperm.xlu1 %4034, %v6142_v44   ;;  %v1595_v58 = vsel %vm108_vm0, %v1485_v11, 0.0  ;;  %3850 = vmatpush1.bf16.msra.mxu0 %v3849_v14  ;;  %v2839_v10 = vrot.slane %v2838_v45, 4  ;;  %v2001_v3 = vrot.slane %v2000_v30, 4  ;;  %v3181_v14 = vld [vmem:[#allocation5 + $0x70] sm:$0xff] }
 0x378   :  { %v2257_v25 = vmul.f32 %v5536_v12, %v2182_v56  ;;  %3852 = vmatprep.subr.bf16.mxu0 %v3851_v61  ;;  %v1596_v11 = vrot.slane %v1595_v58, 4  ;;  %v1584_v63 = vrot.slane %v1583_v7, 2  ;;  %v2389_v41 = vrot.slane %v5549_v23, 1 }
 0x379   :  { %v2780_v47 = vrot.slane %v2779_v34, 1  ;;  %v1941_v61 = vadd.f32 %v1940_v48, %v1939_v57  ;;  %v2366_v31 = vrot.slane %v2365_v26, 2  ;;  %v2403_v1 = vrot.slane %v5584_v50, 1 }
 0x37a   :  { %v2391_v18 = vsel %vm108_vm0, %v2257_v25, 0.0  ;;  %v5599_v46 = vpop.permute.xlu0 %1374  ;;  %v3179_v25 = vld [vmem:[#allocation5 + $0x60] sm:$0xff]  ;;  %v2002_v19 = vadd.f32 %v2001_v3, %v2000_v30  ;;  %v1597_v39 = vadd.f32 %v1596_v11, %v1595_v58  ;;  %v2390_v30 = vadd.f32 %v2389_v41, %v5549_v23 }
 0x37b   :  { %v2781_v20 = vadd.f32 %v2780_v47, %v2779_v34  ;;  %4036 = vset.pattern.permute.xlu1 %v6101_v55  ;;  %v2392_v27 = vrot.slane %v2391_v18, 4  ;;  %v1577_v34 = vrot.slane %v1576_v5, 2  ;;  %v2821_v47 = vadd.f32 %v2820_v51, %v5554_v24  ;;  %3854 = vmatpush1.bf16.msra.mxu0 %v3853_v15 }
 0x37c   :  { %v1400_v13 = vpop.permute.xlu1 %1399  ;;  %1424 = vperm.xlu1 %4036, %v6142_v44   ;;  %v6145_v44 = vrot.slane %v6144_v49, 1  ;;  %3856 = vmatprep.subr.bf16.mxu0 %v3855_v62  ;;  %v2367_v3 = vadd.f32 %v2366_v31, %v2365_v26 }
 0x37d   :  { %v3133_v6 = vsel %vm2912_vm2, %v2781_v20, %v5528_v2  ;;  %v2393_v56 = vadd.f32 %v2392_v27, %v2391_v18  ;;  %v2826_v2 = vadd.f32 %v2825_v36, %v2824_v16  ;;  %v2028_v18 = vsel %vm108_vm0, %v1876_v42, 0.0  ;;  %v6147_v16 = vld [vmem:[#allocation38_spill] sm:$0xff] }
 0x37e   :  { %v5606_v54 = vsel %vm2914_vm3, %v5565_v33, %v3133_v6  ;;  %v5611_v17 = vadd.f32 %v6145_v44, %v6144_v49  ;;  %v6146_v33 = vld [vmem:[#allocation12_spill] sm:$0xff]  ;;  %v3857_v6 = vpack.c.bf16 %v3181_v14, %v3179_v25  ;;  %v1585_v49 = vadd.f32 %v1584_v63, %v1583_v7  ;;  %v1395_v57 = vpop.permute.xlu0 %1394 }
 0x37f   :  { %v2394_v20 = vrot.slane %v2393_v56, 2  ;;  %v2840_v44 = vadd.f32 %v2839_v10, %v2838_v45  ;;  %v1578_v24 = vadd.f32 %v1577_v34, %v1576_v5  ;;  %v6148_v36 = vrot.slane %v6147_v16, 1  ;;  %v6149_v63 = vld [vmem:[#allocation20_spill] sm:$0xff] }
 0x380   :  { %1444 = vperm.xlu1 %4036, %v6146_v33   ;;  %v2822_v15 = vrot.slane %v2821_v47, 1  ;;  %v1942_v42 = vrot.slane %v1941_v61, 1  ;;  %v2029_v62 = vrot.slane %v2028_v18, 4  ;;  %3858 = vmatpush1.bf16.msra.mxu0 %v3857_v6  ;;  %v2827_v58 = vrot.slane %v2826_v2, 2 }
 0x381   :  { %v5618_v27 = vpop.permute.xlu1 %2573  ;;  %v2395_v51 = vadd.f32 %v2394_v20, %v2393_v56  ;;  %v5623_v48 = vadd.f32 %v6148_v36, %v6147_v16  ;;  %v2404_v7 = vadd.f32 %v2403_v1, %v5584_v50  ;;  %v2003_v45 = vrot.slane %v2002_v19, 2  ;;  %v6150_v1 = vld [vmem:[#allocation41_spill] sm:$0xff] }
 0x382   :  { %v1598_v5 = vrot.slane %v1597_v39, 2  ;;  %v1488_v10 = vmul.f32 %v5373_v43, %v1395_v57  ;;  %v1586_v34 = vrot.slane %v1585_v49, 1  ;;  %v2841_v56 = vrot.slane %v2840_v44, 2 }
 0x383   :  { %v2396_v11 = vrot.slane %v2395_v51, 1  ;;  %v1579_v25 = vrot.slane %v1578_v24, 1  ;;  %v5632_v23 = vadd.f32 %v2822_v15, %v2821_v47  ;;  %v1943_v26 = vadd.f32 %v1942_v42, %v1941_v61  ;;  %v3184_v61 = vld [vmem:[#allocation5 + $0x88] sm:$0xff] }
 0x384   :  { %4039 = vset.pattern.permute.xlu1 %v6098_v40  ;;  %v2030_v41 = vadd.f32 %v2029_v62, %v2028_v18  ;;  %v1489_v31 = vmul.f32 %v5536_v12, %v1400_v13  ;;  %v5635_v33 = vadd.f32 %v2827_v58, %v2826_v2  ;;  %v2368_v50 = vrot.slane %v2367_v3, 1  ;;  %v3186_v18 = vld [vmem:[#allocation5 + $0x98] sm:$0xff]  ;;  %v6151_v42 = vld [vmem:[#allocation29_spill] sm:$0xff]  ;;  %v3185_v62 = vld [vmem:[#allocation5 + $0x90] sm:$0xff] }
 0x385   :  { %2221 = vperm.xlu1 %4039, %v6149_v63   ;;  %v2397_v14 = vadd.f32 %v2396_v11, %v2395_v51  ;;  %v1879_v43 = vmul.f32 %v5500_v32, %v6150_v1  ;;  %v2004_v57 = vadd.f32 %v2003_v45, %v2002_v19  ;;  %v1599_v16 = vadd.f32 %v1598_v5, %v1597_v39  ;;  %v4278_v39 = vld [vmem:[#allocation2 + $0x40] sm:$0xff]  ;;  %v5661_v58 = vld [vmem:[#allocation2 + $0x98] sm:$0xff]  ;;  %v6153_v1 = vld [vmem:[#allocation26_spill] sm:$0xff] }
 0x386   :  { %v5630_v20 = vpop.permute.xlu1 %1805  ;;  %v2254_v51 = vmul.f32 %v5470_v4, %v5491_v28  ;;  %v1616_v47 = vsel %vm108_vm0, %v1488_v10, 0.0  ;;  %v5644_v13 = vadd.f32 %v1586_v34, %v1585_v49  ;;  %v5646_v2 = vadd.f32 %v2841_v56, %v2840_v44  ;;  %v3183_v44 = vld [vmem:[#allocation5 + $0x80] sm:$0xff] }
 0x387   :  { %v3069_v6 = vsel %vm2912_vm2, %v2397_v14, %v2390_v30  ;;  %v5648_v36 = vadd.f32 %v1579_v25, %v1578_v24  ;;  %v2031_v19 = vrot.slane %v2030_v41, 2  ;;  %v1480_v28 = vmul.f32 %v4278_v39, %v5559_v22 }
 0x388   :  { %v5652_v32 = vsel %vm2914_vm3, %v2404_v7, %v3069_v6  ;;  %v1623_v15 = vsel %vm108_vm0, %v1489_v31, 0.0  ;;  %v5658_v49 = vsel %vm2924_vm8, %v1943_v26, %v6151_v42  ;;  %v2049_v24 = vsel %vm108_vm0, %v1879_v43, 0.0  ;;  %v6152_v26 = vld [vmem:[#allocation40_spill] sm:$0xff] }
 0x389   :  { %4040 = vset.pattern.permute.xlu1 %v6101_v55  ;;  %v1617_v30 = vrot.slane %v1616_v47, 4  ;;  %v3859_v7 = vpack.c.bf16 %v3186_v18, %v3184_v61  ;;  %v5664_v45 = vadd.f32 %v2368_v50, %v2367_v3  ;;  %v2005_v22 = vrot.slane %v2004_v57, 1  ;;  %v6154_v18 = vld [vmem:[#allocation21_spill] sm:$0xff] }
 0x38a   :  { %1449 = vperm.xlu1 %4040, %v6149_v63   ;;  %v1600_v5 = vrot.slane %v1599_v16, 1  ;;  %v2370_v10 = vsel %vm108_vm0, %v2254_v51, 0.0  ;;  %v1873_v63 = vmul.f32 %v5536_v12, %v5556_v21  ;;  %v1624_v34 = vrot.slane %v1623_v15, 4 }
 0x38b   :  { %v2190_v55 = vpop.permute.xlu1 %2189  ;;  %3860 = vmatprep.subr.bf16.mxu0 %v3859_v7  ;;  %v3861_v25 = vpack.c.bf16 %v3185_v62, %v3183_v44  ;;  %v5671_v14 = vadd.f32 %v2031_v19, %v2030_v41  ;;  %v5675_v3 = vmul.f32 %v5567_v35, %v6152_v26  ;;  %v2050_v31 = vrot.slane %v2049_v24, 4  ;;  %v6156_v44 = vld [vmem:[#allocation28_spill] sm:$0xff] }
 0x38c   :  { %v2259_v11 = vmul.f32 %v5661_v58, %v2190_v55  ;;  %v1560_v50 = vsel %vm108_vm0, %v1480_v28, 0.0  ;;  %v1486_v12 = vmul.f32 %v5470_v4, %v5508_v8  ;;  %v1618_v21 = vadd.f32 %v1617_v30, %v1616_v47 }
 0x38d   :  { %3862 = vmatpush1.bf16.msra.mxu0 %v3861_v25  ;;  %v5683_v41 = vadd.f32 %v2005_v22, %v2004_v57  ;;  %v5685_v51 = vadd.f32 %v1600_v5, %v1599_v16  ;;  %v2371_v61 = vrot.slane %v2370_v10, 4  ;;  %v2007_v39 = vsel %vm108_vm0, %v1873_v63, 0.0  ;;  %v6157_v57 = vld [vmem:[#allocation35_spill] sm:$0xff] }
 0x38e   :  { %v2405_v56 = vsel %vm108_vm0, %v2259_v11, 0.0  ;;  %4041 = vset.pattern.permute.xlu1 %v6098_v40  ;;  %v2643_v40 = vmul.f32 %v5661_v58, %v5618_v27  ;;  %v1561_v28 = vrot.slane %v1560_v50, 4  ;;  %v1625_v55 = vadd.f32 %v1624_v34, %v1623_v15  ;;  %v6155_v27 = vld [vmem:[#allocation37_spill] sm:$0xff] }
 0x38f   :  { %2225 = vperm.xlu1 %4041, %v6153_v1   ;;  %v2406_v43 = vrot.slane %v2405_v56, 4  ;;  %v2033_v4 = vrot.slane %v5671_v14, 1  ;;  %v5690_v8 = vadd.f32 %v2050_v31, %v2049_v24  ;;  %v1484_v47 = vmul.f32 %v6155_v27, %v5599_v46 }
 0x390   :  { %v1802_v6 = vpop.permute.xlu1 %1801  ;;  %v4042_v16 = vpack.i.bf16 %v5658_v49, %v6157_v57  ;;  %v1602_v62 = vsel %vm108_vm0, %v1486_v12, 0.0  ;;  %v1619_v30 = vrot.slane %v1618_v21, 2  ;;  %v2789_v11 = vsel %vm108_vm0, %v2643_v40, 0.0  ;;  %v6158_v12 = vld [vmem:[#allocation31_spill] sm:$0xff] }
 0x391   :  { %v1874_v19 = vmul.f32 %v6154_v18, %v1802_v6  ;;  %v2407_v42 = vadd.f32 %v2406_v43, %v2405_v56  ;;  %v2372_v15 = vadd.f32 %v2371_v61, %v2370_v10  ;;  %v2008_v22 = vrot.slane %v2007_v39, 4 }
 0x392   :  { %v1875_v24 = vmul.f32 %v5661_v58, %v5630_v20  ;;  %v1562_v46 = vadd.f32 %v1561_v28, %v1560_v50  ;;  %v1626_v34 = vrot.slane %v1625_v55, 2  ;;  %v2052_v49 = vrot.slane %v5690_v8, 2 }
 0x393   :  { %2229 = vperm.xlu1 %4041, %v6156_v44   ;;  %v2408_v7 = vrot.slane %v2407_v42, 2  ;;  %v2014_v5 = vsel %vm108_vm0, %v1874_v19, 0.0  ;;  %v1603_v26 = vrot.slane %v1602_v62, 4  ;;  %v1588_v31 = vsel %vm108_vm0, %v1484_v47, 0.0 }
 0x394   :  { %v2790_v1 = vrot.slane %v2789_v11, 4  ;;  %v1620_v10 = vadd.f32 %v1619_v30, %v1618_v21  ;;  %v2015_v43 = vrot.slane %v2014_v5, 4  ;;  %v2373_v6 = vrot.slane %v2372_v15, 2  ;;  %v6159_v21 = vld [vmem:[#allocation30_spill] sm:$0xff] }
 0x395   :  { %v1405_v63 = vpop.permute.xlu1 %1404  ;;  %v2409_v56 = vadd.f32 %v2408_v7, %v2407_v42  ;;  %v2009_v61 = vadd.f32 %v2008_v22, %v2007_v39  ;;  %v2021_v50 = vsel %vm108_vm0, %v1875_v24, 0.0  ;;  %v1563_v28 = vrot.slane %v1562_v46, 2 }
 0x396   :  { %v1490_v25 = vmul.f32 %v6154_v18, %v1405_v63  ;;  %v1589_v18 = vrot.slane %v1588_v31, 4  ;;  %v1627_v42 = vadd.f32 %v1626_v34, %v1625_v55  ;;  %v1604_v57 = vadd.f32 %v1603_v26, %v1602_v62  ;;  %v4280_v63 = vld [vmem:[#allocation2 + $0xa8] sm:$0xff] }
 0x397   :  { %2233 = vperm.xlu1 %4041, %v6158_v12   ;;  %v2410_v40 = vrot.slane %v2409_v56, 1  ;;  %v2791_v47 = vadd.f32 %v2790_v1, %v2789_v11  ;;  %v1621_v30 = vrot.slane %v1620_v10, 1  ;;  %v2022_v60 = vrot.slane %v2021_v50, 4 }
 0x398   :  { %v1630_v20 = vsel %vm108_vm0, %v1490_v25, 0.0  ;;  %v2016_v22 = vadd.f32 %v2015_v43, %v2014_v5  ;;  %v5713_v24 = vadd.f32 %v2373_v6, %v2372_v15  ;;  %v2010_v25 = vrot.slane %v2009_v61, 2 }
 0x399   :  { %v1631_v19 = vrot.slane %v1630_v20, 4  ;;  %v2411_v27 = vadd.f32 %v2410_v40, %v2409_v56  ;;  %v1564_v62 = vadd.f32 %v1563_v28, %v1562_v46  ;;  %v1590_v11 = vadd.f32 %v1589_v18, %v1588_v31 }
 0x39a   :  { %v2582_v44 = vpop.permute.xlu1 %2581  ;;  %v1628_v56 = vrot.slane %v1627_v42, 1  ;;  %v5717_v1 = vadd.f32 %v2033_v4, %v5671_v14  ;;  %v1605_v40 = vrot.slane %v1604_v57, 2  ;;  %v2023_v15 = vadd.f32 %v2022_v60, %v2021_v50  ;;  %v3189_v50 = vld [vmem:[#allocation5 + $0xb0] sm:$0xff] }
 0x39b   :  { %v1632_v7 = vadd.f32 %v1631_v19, %v1630_v20  ;;  %v2645_v12 = vmul.f32 %v4280_v63, %v2582_v44  ;;  %2237 = vperm.xlu1 %4041, %v6159_v21   ;;  %v5711_v39 = vsel %vm2916_vm4, %v2411_v27, %v5652_v32  ;;  %v2792_v20 = vrot.slane %v2791_v47, 2 }
 0x39c   :  { %6160 = vst [vmem:[#allocation15_spill] sm:$0xff] %v5711_v39  ;;  %v1622_v32 = vadd.f32 %v1621_v30, %v1620_v10  ;;  %v2017_v5 = vrot.slane %v2016_v22, 2  ;;  %v5721_v6 = vadd.f32 %v2052_v49, %v5690_v8  ;;  %v2375_v46 = vrot.slane %v5713_v24, 1  ;;  %v3187_v10 = vld [vmem:[#allocation5 + $0xa0] sm:$0xff] }
 0x39d   :  { %v1633_v55 = vrot.slane %v1632_v7, 2  ;;  %v2803_v34 = vsel %vm108_vm0, %v2645_v12, 0.0  ;;  %v2011_v18 = vadd.f32 %v2010_v25, %v2009_v61  ;;  %v1565_v14 = vrot.slane %v1564_v62, 1  ;;  %v3188_v12 = vld [vmem:[#allocation5 + $0xa8] sm:$0xff]  ;;  %v3194_v61 = vld [vmem:[#allocation5 + $0xd8] sm:$0xff] }
 0x39e   :  { %v2804_v26 = vrot.slane %v2803_v34, 4  ;;  %v1591_v4 = vrot.slane %v1590_v11, 2  ;;  %v1629_v27 = vadd.f32 %v1628_v56, %v1627_v42  ;;  %v1606_v21 = vadd.f32 %v1605_v40, %v1604_v57  ;;  %v3191_v56 = vld [vmem:[#allocation5 + $0xc0] sm:$0xff] }
 0x39f   :  { %v1634_v19 = vadd.f32 %v1633_v55, %v1632_v7  ;;  %v1814_v44 = vpop.permute.xlu1 %1813  ;;  %4043 = vrot.lane.b32.xlu1 %v4042_v16, %s4407_s2  ;;  %v3190_v7 = vld [vmem:[#allocation5 + $0xb8] sm:$0xff]  ;;  %v2793_v55 = vadd.f32 %v2792_v20, %v2791_v47  ;;  %v2024_v49 = vrot.slane %v2023_v15, 2  ;;  %v2012_v40 = vrot.slane %v2011_v18, 1 }
 0x3a0   :  { %v1877_v43 = vmul.f32 %v4280_v63, %v1814_v44  ;;  %v2805_v28 = vadd.f32 %v2804_v26, %v2803_v34  ;;  %v2933_v8 = vsel %vm2912_vm2, %v1629_v27, %v1622_v32  ;;  %v2018_v63 = vadd.f32 %v2017_v5, %v2016_v22  ;;  %v3192_v34 = vld [vmem:[#allocation5 + $0xc8] sm:$0xff]  ;;  %v3193_v26 = vld [vmem:[#allocation5 + $0xd0] sm:$0xff] }
 0x3a1   :  { %v1635_v31 = vrot.slane %v1634_v19, 1  ;;  %v3863_v47 = vpack.c.bf16 %v3190_v7, %v3188_v12  ;;  %v1566_v20 = vadd.f32 %v1565_v14, %v1564_v62  ;;  %v3196_v32 = vld [vmem:[#allocation5 + $0xe8] sm:$0xff]  ;;  %v2794_v22 = vrot.slane %v2793_v55, 1  ;;  %v3195_v14 = vld [vmem:[#allocation5 + $0xe0] sm:$0xff] }
 0x3a2   :  { %v2035_v60 = vsel %vm108_vm0, %v1877_v43, 0.0  ;;  %v2806_v42 = vrot.slane %v2805_v28, 2  ;;  %v3865_v43 = vpack.c.bf16 %v3189_v50, %v3187_v10  ;;  %v3867_v39 = vpack.c.bf16 %v3194_v61, %v3192_v34 }
 0x3a3   :  { %v1636_v16 = vadd.f32 %v1635_v31, %v1634_v19  ;;  %v2036_v30 = vrot.slane %v2035_v60, 4  ;;  %v1592_v19 = vadd.f32 %v1591_v4, %v1590_v11  ;;  %v3198_v31 = vld [vmem:[#allocation5 + $0xf8] sm:$0xff]  ;;  %3864 = vmatprep.subr.bf16.mxu0 %v3863_v47  ;;  %v2019_v12 = vrot.slane %v2018_v63, 1  ;;  %v3197_v4 = vld [vmem:[#allocation5 + $0xf0] sm:$0xff] }
 0x3a4   :  { %v2578_v44 = vpop.permute.xlu1 %2577  ;;  %3866 = vmatpush1.bf16.msra.mxu0 %v3865_v43  ;;  %v2807_v7 = vadd.f32 %v2806_v42, %v2805_v28  ;;  %v3871_v11 = vpack.c.bf16 %v3198_v31, %v3196_v32  ;;  %v2013_v10 = vadd.f32 %v2012_v40, %v2011_v18  ;;  %v2795_v28 = vadd.f32 %v2794_v22, %v2793_v55  ;;  %v3204_v32 = vld [vmem:[#allocation5 + $0x128] sm:$0xff]  ;;  %v3206_v31 = vld [vmem:[#allocation5 + $0x138] sm:$0xff] }
 0x3a5   :  { %v5727_v25 = vsel %vm2914_vm3, %v1636_v16, %v2933_v8  ;;  %v2644_v57 = vmul.f32 %v5595_v29, %v2578_v44  ;;  %v2037_v5 = vadd.f32 %v2036_v30, %v2035_v60  ;;  %v1607_v16 = vrot.slane %v1606_v21, 1  ;;  %v5731_v44 = vld [vmem:[#allocation2 + $0xb0] sm:$0xff]  ;;  %3868 = vmatprep.subr.bf16.mxu0 %v3867_v39  ;;  %v3202_v30 = vld [vmem:[#allocation5 + $0x118] sm:$0xff] }
 0x3a6   :  { %6161 = vst [vmem:[#allocation13_spill] sm:$0xff] %v5727_v25  ;;  %v2025_v8 = vadd.f32 %v2024_v49, %v2023_v15  ;;  %v3869_v29 = vpack.c.bf16 %v3193_v26, %v3191_v56  ;;  %v5735_v60 = vadd.f32 %v2375_v46, %v5713_v24  ;;  %v2926_v15 = vsel %vm2912_vm2, %v5611_v17, %v1566_v20  ;;  %v3200_v49 = vld [vmem:[#allocation5 + $0x108] sm:$0xff]  ;;  %v3201_v26 = vld [vmem:[#allocation5 + $0x110] sm:$0xff] }
 0x3a7   :  { %v2796_v27 = vsel %vm108_vm0, %v2644_v57, 0.0  ;;  %v1593_v34 = vrot.slane %v1592_v19, 1  ;;  %v2038_v61 = vrot.slane %v2037_v5, 2  ;;  %v3873_v47 = vpack.c.bf16 %v3197_v4, %v3195_v14 }
 0x3a8   :  { %v2797_v52 = vrot.slane %v2796_v27, 4  ;;  %v2586_v25 = vpop.permute.xlu1 %2585  ;;  %3870 = vmatpush1.bf16.msra.mxu0 %v3869_v29  ;;  %v5740_v56 = vadd.f32 %v1607_v16, %v1606_v21  ;;  %v2020_v24 = vadd.f32 %v2019_v12, %v2018_v63  ;;  %v2808_v46 = vrot.slane %v2807_v7, 1  ;;  %v3203_v16 = vld [vmem:[#allocation5 + $0x120] sm:$0xff]  ;;  %v3205_v29 = vld [vmem:[#allocation5 + $0x130] sm:$0xff] }
 0x3a9   :  { %v2646_v62 = vmul.f32 %v5731_v44, %v2586_v25  ;;  %v2026_v25 = vrot.slane %v2025_v8, 1  ;;  %3872 = vmatprep.subr.bf16.mxu0 %v3871_v11  ;;  %v3875_v17 = vpack.c.bf16 %v3202_v30, %v3200_v49  ;;  %v2997_v55 = vsel %vm2912_vm2, %v2013_v10, %v5683_v41  ;;  %v3208_v49 = vld [vmem:[#allocation5 + $0x148] sm:$0xff]  ;;  %v3210_v30 = vld [vmem:[#allocation5 + $0x158] sm:$0xff] }
 0x3aa   :  { %v2798_v50 = vadd.f32 %v2797_v52, %v2796_v27  ;;  %v3199_v52 = vld [vmem:[#allocation5 + $0x100] sm:$0xff]  ;;  %v2927_v40 = vsel %vm2914_vm3, %v5648_v36, %v2926_v15  ;;  %v1594_v22 = vadd.f32 %v1593_v34, %v1592_v19  ;;  %v3135_v21 = vsel %vm2916_vm4, %v2795_v28, %v5606_v54 }
 0x3ab   :  { %v2810_v42 = vsel %vm108_vm0, %v2646_v62, 0.0  ;;  %v2039_v63 = vadd.f32 %v2038_v61, %v2037_v5  ;;  %v2027_v12 = vadd.f32 %v2026_v25, %v2025_v8  ;;  %v3877_v41 = vpack.c.bf16 %v3201_v26, %v3199_v52  ;;  %v5751_v8 = vld [vmem:[#allocation2 + $0xc8] sm:$0xff] }
 0x3ac   :  { %v2799_v39 = vrot.slane %v2798_v50, 2  ;;  %v2811_v57 = vrot.slane %v2810_v42, 4  ;;  %3874 = vmatpush1.bf16.msra.mxu0 %v3873_v47  ;;  %v2998_v36 = vsel %vm2914_vm3, %v2020_v24, %v2997_v55  ;;  %v2809_v14 = vadd.f32 %v2808_v46, %v2807_v7  ;;  %v3209_v47 = vld [vmem:[#allocation5 + $0x150] sm:$0xff]  ;;  %v3212_v26 = vld [vmem:[#allocation5 + $0x168] sm:$0xff]  ;;  %v3214_v55 = vld [vmem:[#allocation5 + $0x178] sm:$0xff] }
 0x3ad   :  { %v1818_v18 = vpop.permute.xlu1 %1817  ;;  %3876 = vmatprep.subr.bf16.mxu0 %v3875_v17  ;;  %v3879_v19 = vpack.c.bf16 %v3206_v31, %v3204_v32  ;;  %v2040_v34 = vrot.slane %v2039_v63, 1  ;;  %v3066_v7 = vsel %vm2920_vm6, %v5664_v45, %v5505_v59  ;;  %v2928_v61 = vsel %vm2916_vm4, %v5644_v13, %v2927_v40 }
 0x3ae   :  { %v2800_v20 = vadd.f32 %v2799_v39, %v2798_v50  ;;  %v2812_v43 = vadd.f32 %v2811_v57, %v2810_v42  ;;  %v1878_v27 = vmul.f32 %v5731_v44, %v1818_v18  ;;  %v3881_v50 = vpack.c.bf16 %v3205_v29, %v3203_v16  ;;  %v3207_v57 = vld [vmem:[#allocation5 + $0x140] sm:$0xff] }
 0x3af   :  { %v3067_v24 = vsel %vm2922_vm7, %v5735_v60, %v3066_v7  ;;  %v3883_v18 = vpack.c.bf16 %v3210_v30, %v3208_v49  ;;  %v2929_v13 = vsel %vm2918_vm5, %v1594_v22, %v2928_v61  ;;  %v2999_v60 = vsel %vm2916_vm4, %v2027_v12, %v2998_v36  ;;  %v3216_v36 = vld [vmem:[#allocation5 + $0x188] sm:$0xff] }
 0x3b0   :  { %v2801_v62 = vrot.slane %v2800_v20, 1  ;;  %v2813_v11 = vrot.slane %v2812_v43, 2  ;;  %v2042_v4 = vsel %vm108_vm0, %v1878_v27, 0.0  ;;  %3878 = vmatpush1.bf16.msra.mxu0 %v3877_v41  ;;  %v5765_v59 = vsel %vm2924_vm8, %v5623_v48, %v3067_v24 }
 0x3b1   :  { %v2043_v54 = vrot.slane %v2042_v4, 4  ;;  %3880 = vmatprep.subr.bf16.mxu0 %v3879_v19  ;;  %v2930_v40 = vsel %vm2920_vm6, %v5685_v51, %v2929_v13  ;;  %v3885_v32 = vpack.c.bf16 %v3209_v47, %v3207_v57  ;;  %v2054_v16 = vrot.slane %v5721_v6, 1 }
 0x3b2   :  { %v2802_v10 = vadd.f32 %v2801_v62, %v2800_v20  ;;  %v2814_v15 = vadd.f32 %v2813_v11, %v2812_v43  ;;  %v2598_v5 = vpop.permute.xlu1 %2597  ;;  %v5774_v48 = vsel %vm2922_vm7, %v5740_v56, %v2930_v40  ;;  %v2041_v51 = vadd.f32 %v2040_v34, %v2039_v63  ;;  %v3211_v62 = vld [vmem:[#allocation5 + $0x160] sm:$0xff]  ;;  %v3213_v11 = vld [vmem:[#allocation5 + $0x170] sm:$0xff] }
 0x3b3   :  { %v2649_v28 = vmul.f32 %v5751_v8, %v2598_v5  ;;  %v2044_v39 = vadd.f32 %v2043_v54, %v2042_v4  ;;  %v3887_v12 = vpack.c.bf16 %v3214_v55, %v3212_v26  ;;  %v2829_v4 = vrot.slane %v5635_v33, 1  ;;  %v3219_v26 = vld [vmem:[#allocation5 + $0x1a0] sm:$0xff]  ;;  %v3221_v55 = vld [vmem:[#allocation5 + $0x1b0] sm:$0xff] }
 0x3b4   :  { %v3136_v42 = vsel %vm2918_vm5, %v2802_v10, %v3135_v21  ;;  %v2815_v25 = vrot.slane %v2814_v15, 1  ;;  %3882 = vmatpush1.bf16.msra.mxu0 %v3881_v50  ;;  %v2056_v19 = vsel %vm108_vm0, %v5675_v3, 0.0  ;;  %v3000_v10 = vsel %vm2918_vm5, %v5717_v1, %v2999_v60  ;;  %v3217_v3 = vld [vmem:[#allocation5 + $0x190] sm:$0xff] }
 0x3b5   :  { %v2831_v46 = vsel %vm108_vm0, %v2649_v28, 0.0  ;;  %v2045_v17 = vrot.slane %v2044_v39, 2  ;;  %v3137_v43 = vsel %vm2920_vm6, %v2809_v14, %v3136_v42  ;;  %3884 = vmatprep.subr.bf16.mxu0 %v3883_v18  ;;  %v3218_v14 = vld [vmem:[#allocation5 + $0x198] sm:$0xff]  ;;  %v3889_v5 = vpack.c.bf16 %v3213_v11, %v3211_v62  ;;  %v3215_v28 = vld [vmem:[#allocation5 + $0x180] sm:$0xff]  ;;  %v3220_v42 = vld [vmem:[#allocation5 + $0x1a8] sm:$0xff] }
 0x3b6   :  { %v2816_v45 = vadd.f32 %v2815_v25, %v2814_v15  ;;  %v2832_v52 = vrot.slane %v2831_v46, 4  ;;  %v2843_v50 = vrot.slane %v5646_v2, 1  ;;  %v2055_v49 = vadd.f32 %v2054_v16, %v5721_v6  ;;  %v3222_v25 = vld [vmem:[#allocation5 + $0x1b8] sm:$0xff]  ;;  %v5812_v16 = vld [vmem:[#allocation2 + $0xf0] sm:$0xff] }
 0x3b7   :  { %v1830_v20 = vpop.permute.xlu1 %1829  ;;  %v2046_v31 = vadd.f32 %v2045_v17, %v2044_v39  ;;  %v3001_v30 = vsel %vm2920_vm6, %v2041_v51, %v3000_v10  ;;  %v3891_v34 = vpack.c.bf16 %v3218_v14, %v3216_v36  ;;  %v2057_v7 = vrot.slane %v2056_v19, 4  ;;  %v5791_v39 = vld [vmem:[#allocation2 + $0xe0] sm:$0xff]  ;;  %v3225_v36 = vld [vmem:[#allocation5 + $0x1d0] sm:$0xff]  ;;  %v3230_v10 = vld [vmem:[#allocation5 + $0x1f8] sm:$0xff] }
 0x3b8   :  { %v2833_v22 = vadd.f32 %v2832_v52, %v2831_v46  ;;  %v1881_v21 = vmul.f32 %v5751_v8, %v1830_v20  ;;  %v3138_v27 = vsel %vm2922_vm7, %v2816_v45, %v3137_v43  ;;  %3886 = vmatpush1.bf16.msra.mxu0 %v3885_v32  ;;  %v1884_v57 = vmul.f32 %v5791_v39, %v5480_v53  ;;  %v5799_v53 = vld [vmem:[#allocation2 + $0xd8] sm:$0xff]  ;;  %v3224_v43 = vld [vmem:[#allocation5 + $0x1c8] sm:$0xff] }
 0x3b9   :  { %v3139_v29 = vsel %vm2924_vm8, %v5632_v23, %v3138_v27  ;;  %v2047_v41 = vrot.slane %v2046_v31, 1  ;;  %3888 = vmatprep.subr.bf16.mxu0 %v3887_v12  ;;  %v2830_v24 = vadd.f32 %v2829_v4, %v5635_v33  ;;  %v3893_v13 = vpack.c.bf16 %v3217_v3, %v3215_v28  ;;  %v3226_v32 = vld [vmem:[#allocation5 + $0x1d8] sm:$0xff] }
 0x3ba   :  { %v2834_v56 = vrot.slane %v2833_v22, 2  ;;  %v2063_v23 = vsel %vm108_vm0, %v1881_v21, 0.0  ;;  %v2844_v45 = vadd.f32 %v2843_v50, %v5646_v2  ;;  %v3895_v52 = vpack.c.bf16 %v3222_v25, %v3220_v42 }
 0x3bb   :  { %v2048_v63 = vadd.f32 %v2047_v41, %v2046_v31  ;;  %v2064_v47 = vrot.slane %v2063_v23, 4  ;;  %v2058_v40 = vadd.f32 %v2057_v7, %v2056_v19  ;;  %v2084_v2 = vsel %vm108_vm0, %v1884_v57, 0.0  ;;  %v5805_v31 = vld [vmem:[#allocation2 + $0xe8] sm:$0xff]  ;;  %v3227_v7 = vld [vmem:[#allocation5 + $0x1e0] sm:$0xff] }
 0x3bc   :  { %v2835_v15 = vadd.f32 %v2834_v56, %v2833_v22  ;;  %v2606_v54 = vpop.permute.xlu1 %2605  ;;  %3890 = vmatpush1.bf16.msra.mxu0 %v3889_v5  ;;  %v1885_v22 = vmul.f32 %v5805_v31, %v5485_v38  ;;  %v1886_v51 = vmul.f32 %v5812_v16, %v5510_v37  ;;  %v3897_v12 = vpack.c.bf16 %v3221_v55, %v3219_v26  ;;  %v3223_v56 = vld [vmem:[#allocation5 + $0x1c0] sm:$0xff]  ;;  %v3228_v19 = vld [vmem:[#allocation5 + $0x1e8] sm:$0xff] }
 0x3bd   :  { %v3002_v1 = vsel %vm2922_vm7, %v2048_v63, %v3001_v30  ;;  %3892 = vmatprep.subr.bf16.mxu0 %v3891_v34  ;;  %v2651_v20 = vmul.f32 %v5799_v53, %v2606_v54  ;;  %v2065_v21 = vadd.f32 %v2064_v47, %v2063_v23  ;;  %v3899_v41 = vpack.c.bf16 %v3226_v32, %v3224_v43  ;;  %v5820_v23 = vld [vmem:[#allocation2 + $0xf8] sm:$0xff] }
 0x3be   :  { %v2836_v61 = vrot.slane %v2835_v15, 1  ;;  %v3003_v6 = vsel %vm2924_vm8, %v2055_v49, %v3002_v1  ;;  %v2085_v38 = vrot.slane %v2084_v2, 4  ;;  %v2059_v63 = vrot.slane %v2058_v40, 2 }
 0x3bf   :  { %v4052_v18 = vpack.i.bf16 %v3003_v6, %v3139_v29  ;;  %v2845_v14 = vsel %vm108_vm0, %v2651_v20, 0.0  ;;  %v2091_v37 = vsel %vm108_vm0, %v1885_v22, 0.0  ;;  %v1887_v54 = vmul.f32 %v5820_v23, %v5493_v0 }
 0x3c0   :  { %v2837_v46 = vadd.f32 %v2836_v61, %v2835_v15  ;;  %3894 = vmatpush1.bf16.msra.mxu0 %v3893_v13  ;;  %v2066_v15 = vrot.slane %v2065_v21, 2  ;;  %v2098_v5 = vsel %vm108_vm0, %v1886_v51, 0.0  ;;  %v3901_v49 = vpack.c.bf16 %v3225_v36, %v3223_v56  ;;  %v3229_v61 = vld [vmem:[#allocation5 + $0x1f0] sm:$0xff] }
 0x3c1   :  { %v1838_v17 = vpop.permute.xlu1 %1837  ;;  %4053 = vrot.lane.b32.xlu1 %v4052_v18, %s4407_s2  ;;  %3896 = vmatprep.subr.bf16.mxu0 %v3895_v52  ;;  %v2846_v30 = vrot.slane %v2845_v14, 4  ;;  %v3903_v3 = vpack.c.bf16 %v3230_v10, %v3228_v19  ;;  %v2086_v1 = vadd.f32 %v2085_v38, %v2084_v2  ;;  %v2092_v42 = vrot.slane %v2091_v37, 4 }
 0x3c2   :  { %v3140_v60 = vsel %vm2912_vm2, %v2837_v46, %v2830_v24  ;;  %v1883_v33 = vmul.f32 %v5799_v53, %v1838_v17  ;;  %v2067_v57 = vadd.f32 %v2066_v15, %v2065_v21  ;;  %v2060_v6 = vadd.f32 %v2059_v63, %v2058_v40 }
 0x3c3   :  { %v5810_v27 = vsel %vm2914_vm3, %v2844_v45, %v3140_v60  ;;  %v2105_v24 = vsel %vm108_vm0, %v1887_v54, 0.0  ;;  %v2099_v46 = vrot.slane %v2098_v5, 4  ;;  %v3905_v18 = vpack.c.bf16 %v3229_v61, %v3227_v7 }
 0x3c4   :  { %v2077_v29 = vsel %vm108_vm0, %v1883_v33, 0.0  ;;  %3898 = vmatpush1.bf16.msra.mxu0 %v3897_v12  ;;  %v2847_v13 = vadd.f32 %v2846_v30, %v2845_v14  ;;  %v2087_v26 = vrot.slane %v2086_v1, 2  ;;  %v2093_v55 = vadd.f32 %v2092_v42, %v2091_v37 }
 0x3c5   :  { %v2078_v62 = vrot.slane %v2077_v29, 4  ;;  %v1834_v11 = vpop.permute.xlu1 %1833  ;;  %3900 = vmatprep.subr.bf16.mxu0 %v3899_v41  ;;  %v2068_v20 = vrot.slane %v2067_v57, 1  ;;  %v2061_v40 = vrot.slane %v2060_v6, 1  ;;  %v2106_v2 = vrot.slane %v2105_v24, 4 }
 0x3c6   :  { %v1882_v4 = vmul.f32 %v5571_v9, %v1834_v11  ;;  %v2100_v22 = vadd.f32 %v2099_v46, %v2098_v5  ;;  %v2848_v21 = vrot.slane %v2847_v13, 2  ;;  %v2088_v41 = vadd.f32 %v2087_v26, %v2086_v1  ;;  %v5834_v5 = vpop.permute.xlu0 %1389 }
 0x3c7   :  { %v2079_v34 = vadd.f32 %v2078_v62, %v2077_v29  ;;  %v6162_v62 = vld [vmem:[#allocation18_spill] sm:$0xff]  ;;  %v2094_v38 = vrot.slane %v2093_v55, 2  ;;  %v2069_v14 = vadd.f32 %v2068_v20, %v2067_v57  ;;  %v2062_v10 = vadd.f32 %v2061_v40, %v2060_v6 }
 0x3c8   :  { %v2070_v50 = vsel %vm108_vm0, %v1882_v4, 0.0  ;;  %3902 = vmatpush1.bf16.msra.mxu0 %v3901_v49  ;;  %v2264_v11 = vmul.f32 %v5567_v35, %v6162_v62  ;;  %v2107_v63 = vadd.f32 %v2106_v2, %v2105_v24  ;;  %v2101_v54 = vrot.slane %v2100_v22, 2  ;;  %v6163_v35 = vld [vmem:[#allocation19_spill] sm:$0xff] }
 0x3c9   :  { %v2071_v28 = vrot.slane %v2070_v50, 4  ;;  %v2080_v45 = vrot.slane %v2079_v34, 2  ;;  %3904 = vmatprep.subr.bf16.mxu0 %v3903_v3  ;;  %v2095_v1 = vadd.f32 %v2094_v38, %v2093_v55  ;;  %v3004_v42 = vsel %vm2912_vm2, %v2069_v14, %v2062_v10 }
 0x3ca   :  { %v2614_v25 = vpop.permute.xlu1 %2613  ;;  %v2102_v46 = vadd.f32 %v2101_v54, %v2100_v22  ;;  %v2440_v26 = vsel %vm108_vm0, %v2264_v11, 0.0 }
 0x3cb   :  { %v2072_v47 = vadd.f32 %v2071_v28, %v2070_v50  ;;  %v2653_v0 = vmul.f32 %v5805_v31, %v2614_v25  ;;  %v2081_v51 = vadd.f32 %v2080_v45, %v2079_v34  ;;  %v2849_v50 = vadd.f32 %v2848_v21, %v2847_v13 }
 0x3cc   :  { %3906 = vmatpush1.bf16.msra.mxu0 %v3905_v18  ;;  %v2266_v34 = vmul.f32 %v5571_v9, %v6163_v35  ;;  %v2089_v28 = vrot.slane %v2088_v41, 1  ;;  %v2096_v55 = vrot.slane %v2095_v1, 1  ;;  %v3357_v35 = vld [vmem:[#allocation7 + $0x88] sm:$0xff] }
 0x3cd   :  { %v2073_v17 = vrot.slane %v2072_v47, 2  ;;  %v2859_v52 = vsel %vm108_vm0, %v2653_v0, 0.0  ;;  %v2082_v49 = vrot.slane %v2081_v51, 1  ;;  %v2850_v18 = vrot.slane %v2849_v50, 1 }
 0x3ce   :  { %v2610_v60 = vpop.permute.xlu1 %2609  ;;  %v2860_v43 = vrot.slane %v2859_v52, 4  ;;  %v2454_v21 = vsel %vm108_vm0, %v2266_v34, 0.0  ;;  %v2097_v38 = vadd.f32 %v2096_v55, %v2095_v1  ;;  %v3340_v34 = vld [vmem:[#allocation7] sm:$0xff]  ;;  %v3341_v1 = vld [vmem:[#allocation7 + $0x8] sm:$0xff] }
 0x3cf   :  { %v2074_v33 = vadd.f32 %v2073_v17, %v2072_v47  ;;  %v2652_v32 = vmul.f32 %v5791_v39, %v2610_v60  ;;  %v2108_v47 = vrot.slane %v2107_v63, 2  ;;  %v2083_v13 = vadd.f32 %v2082_v49, %v2081_v51  ;;  %v5844_v60 = vpop.permute.xlu0 %1414  ;;  %v3361_v55 = vld [vmem:[#allocation7 + $0xa8] sm:$0xff] }
 0x3d0   :  { %v2861_v4 = vadd.f32 %v2860_v43, %v2859_v52  ;;  %v2103_v51 = vrot.slane %v2102_v46, 1 }
 0x3d1   :  { %v2075_v29 = vrot.slane %v2074_v33, 1  ;;  %v2852_v12 = vsel %vm108_vm0, %v2652_v32, 0.0  ;;  %v2090_v32 = vadd.f32 %v2089_v28, %v2088_v41  ;;  %v2109_v40 = vadd.f32 %v2108_v47, %v2107_v63 }
 0x3d2   :  { %v2853_v56 = vrot.slane %v2852_v12, 4  ;;  %v2622_v36 = vpop.permute.xlu1 %2621  ;;  %v2862_v25 = vrot.slane %v2861_v4, 2  ;;  %v2455_v41 = vrot.slane %v2454_v21, 4  ;;  %v2104_v28 = vadd.f32 %v2103_v51, %v2102_v46  ;;  %v3344_v51 = vld [vmem:[#allocation7 + $0x20] sm:$0xff] }
 0x3d3   :  { %v2655_v19 = vmul.f32 %v5820_v23, %v2622_v36  ;;  %v2076_v37 = vadd.f32 %v2075_v29, %v2074_v33  ;;  %v2851_v29 = vadd.f32 %v2850_v18, %v2849_v50  ;;  %v2110_v10 = vrot.slane %v2109_v40, 1  ;;  %v3360_v18 = vld [vmem:[#allocation7 + $0xa0] sm:$0xff] }
 0x3d4   :  { %v2854_v15 = vadd.f32 %v2853_v56, %v2852_v12  ;;  %v2863_v33 = vadd.f32 %v2862_v25, %v2861_v4  ;;  %v3359_v25 = vld [vmem:[#allocation7 + $0x98] sm:$0xff] }
 0x3d5   :  { %v2873_v30 = vsel %vm108_vm0, %v2655_v19, 0.0  ;;  %v3005_v0 = vsel %vm2914_vm3, %v2076_v37, %v3004_v42  ;;  %v2441_v19 = vrot.slane %v2440_v26, 4  ;;  %v3358_v42 = vld [vmem:[#allocation7 + $0x90] sm:$0xff] }
 0x3d6   :  { %v2855_v3 = vrot.slane %v2854_v15, 2  ;;  %v2874_v7 = vrot.slane %v2873_v30, 4  ;;  %v2618_v61 = vpop.permute.xlu1 %2617  ;;  %v3006_v20 = vsel %vm2916_vm4, %v2083_v13, %v3005_v0  ;;  %v2864_v14 = vrot.slane %v2863_v33, 1 }
 0x3d7   :  { %v2654_v57 = vmul.f32 %v5812_v16, %v2618_v61  ;;  %v3007_v36 = vsel %vm2918_vm5, %v2090_v32, %v3006_v20  ;;  %v3909_v0 = vpack.c.bf16 %v3341_v1, %v3340_v34  ;;  %v2111_v13 = vadd.f32 %v2110_v10, %v2109_v40  ;;  %v3364_v34 = vld [vmem:[#allocation7 + $0xc0] sm:$0xff] }
 0x3d8   :  { %v2856_v6 = vadd.f32 %v2855_v3, %v2854_v15  ;;  %v2875_v24 = vadd.f32 %v2874_v7, %v2873_v30  ;;  %v3142_v15 = vsel %vm2916_vm4, %v2851_v29, %v5810_v27  ;;  %v3008_v49 = vsel %vm2920_vm6, %v2097_v38, %v3007_v36  ;;  %v3356_v30 = vld [vmem:[#allocation7 + $0x80] sm:$0xff]  ;;  %v3342_v27 = vld [vmem:[#allocation7 + $0x10] sm:$0xff]  ;;  %v3345_v29 = vld [vmem:[#allocation7 + $0x28] sm:$0xff] }
 0x3d9   :  { %v2866_v9 = vsel %vm108_vm0, %v2654_v57, 0.0  ;;  %v3907_v61 = vpack.c.bf16 %v3357_v35, %v3356_v30  ;;  %v2865_v57 = vadd.f32 %v2864_v14, %v2863_v33  ;;  %v3009_v46 = vsel %vm2922_vm7, %v2104_v28, %v3008_v49  ;;  %v3362_v38 = vld [vmem:[#allocation7 + $0xb0] sm:$0xff]  ;;  %v6164_v49 = vld [vmem:[#allocation13_spill] sm:$0xff] }
 0x3da   :  { %v2857_v45 = vrot.slane %v2856_v6, 1  ;;  %v2876_v17 = vrot.slane %v2875_v24, 2  ;;  %v2867_v52 = vrot.slane %v2866_v9, 4  ;;  %v3915_v40 = vpack.c.bf16 %v3361_v55, %v3360_v18  ;;  %v3365_v28 = vld [vmem:[#allocation7 + $0xc8] sm:$0xff] }
 0x3db   :  { %v1410_v43 = vpop.permute.xlu1 %1409  ;;  %3908 = vmatprep.subr.bf16.mxu1 %v3907_v61  ;;  %v6165_v61 = vld [vmem:[#allocation16_spill] sm:$0xff] }
 0x3dc   :  { %v2868_v2 = vadd.f32 %v2867_v52, %v2866_v9  ;;  %v1491_v22 = vmul.f32 %v5661_v58, %v1410_v43  ;;  %v2877_v12 = vadd.f32 %v2876_v17, %v2875_v24  ;;  %v2858_v62 = vadd.f32 %v2857_v45, %v2856_v6  ;;  %v1435_v58 = vpop.permute.xlu0 %1434  ;;  %v3343_v24 = vld [vmem:[#allocation7 + $0x18] sm:$0xff]  ;;  %v4288_v9 = vld [vmem:[#allocation2 + $0xc0] sm:$0xff]  ;;  %3910 = vmatpush3.bf16.msra.mxu1 %v3909_v0 }
 0x3dd   :  { %v3911_v6 = vpack.c.bf16 %v3359_v25, %v3358_v42  ;;  %v1496_v45 = vmul.f32 %v4288_v9, %v1435_v58  ;;  %v3913_v32 = vpack.c.bf16 %v3343_v24, %v3342_v27  ;;  %v3923_v0 = vpack.c.bf16 %v3365_v28, %v3364_v34  ;;  %v3349_v27 = vld [vmem:[#allocation7 + $0x48] sm:$0xff]  ;;  %v3367_v9 = vld [vmem:[#allocation7 + $0xd8] sm:$0xff] }
 0x3de   :  { %v2869_v56 = vrot.slane %v2868_v2, 2  ;;  %v1637_v11 = vsel %vm108_vm0, %v1491_v22, 0.0  ;;  %v2878_v54 = vrot.slane %v2877_v12, 1  ;;  %v3143_v3 = vsel %vm2918_vm5, %v2858_v62, %v3142_v15  ;;  %v3347_v15 = vld [vmem:[#allocation7 + $0x38] sm:$0xff] }
 0x3df   :  { %v1638_v4 = vrot.slane %v1637_v11, 4  ;;  %v3144_v33 = vsel %vm2920_vm6, %v2865_v57, %v3143_v3  ;;  %3912 = vmatprep.subr.bf16.mxu1 %v3911_v6  ;;  %v2456_v62 = vadd.f32 %v2455_v41, %v2454_v21  ;;  %v1672_v14 = vsel %vm108_vm0, %v1496_v45, 0.0  ;;  %v3346_v41 = vld [vmem:[#allocation7 + $0x30] sm:$0xff]  ;;  %v3348_v6 = vld [vmem:[#allocation7 + $0x40] sm:$0xff]  ;;  %v4290_v45 = vld [vmem:[#allocation2 + $0x8] sm:$0xff] }
 0x3e0   :  { %v2870_v63 = vadd.f32 %v2869_v56, %v2868_v2  ;;  %v5851_v37 = vpop.permute.xlu1 %2193  ;;  %v2879_v20 = vadd.f32 %v2878_v54, %v2877_v12  ;;  %v2442_v2 = vadd.f32 %v2441_v19, %v2440_v26  ;;  %v3363_v12 = vld [vmem:[#allocation7 + $0xb8] sm:$0xff]  ;;  %3914 = vmatpush3.bf16.msra.mxu1 %v3913_v32  ;;  %v3917_v19 = vpack.c.bf16 %v3345_v29, %v3344_v51 }
 0x3e1   :  { %v1639_v50 = vadd.f32 %v1638_v4, %v1637_v11  ;;  %v3010_v11 = vsel %vm2924_vm8, %v2111_v13, %v3009_v46  ;;  %3916 = vmatprep.subr.bf16.mxu1 %v3915_v40  ;;  %v3919_v21 = vpack.c.bf16 %v3363_v12, %v3362_v38  ;;  %v2457_v54 = vrot.slane %v2456_v62, 2  ;;  %v3366_v13 = vld [vmem:[#allocation7 + $0xd0] sm:$0xff]  ;;  %v3368_v12 = vld [vmem:[#allocation7 + $0xe0] sm:$0xff] }
 0x3e2   :  { %v2871_v7 = vrot.slane %v2870_v63, 1  ;;  %v2443_v58 = vrot.slane %v2442_v2, 2  ;;  %v3921_v25 = vpack.c.bf16 %v3347_v15, %v3346_v41 }
 0x3e3   :  { %v1640_v47 = vrot.slane %v1639_v50, 2  ;;  %v2458_v24 = vadd.f32 %v2457_v54, %v2456_v62  ;;  %v3927_v62 = vpack.c.bf16 %v3367_v9, %v3366_v13  ;;  %v4293_v54 = vld [vmem:[#allocation2 + $0x20] sm:$0xff] }
 0x3e4   :  { %v2872_v17 = vadd.f32 %v2871_v7, %v2870_v63  ;;  %v5857_v52 = vpop.permute.xlu1 %2197  ;;  %v4289_v7 = vld [vmem:[#allocation2] sm:$0xff]  ;;  %3918 = vmatpush3.bf16.msra.mxu1 %v3917_v19  ;;  %v2444_v57 = vadd.f32 %v2443_v58, %v2442_v2  ;;  %v3925_v2 = vpack.c.bf16 %v3349_v27, %v3348_v6  ;;  %v4294_v27 = vld [vmem:[#allocation2 + $0x28] sm:$0xff] }
 0x3e5   :  { %v1641_v43 = vadd.f32 %v1640_v47, %v1639_v50  ;;  %v1673_v50 = vrot.slane %v1672_v14, 4  ;;  %v1472_v1 = vmul.f32 %v4289_v7, %v6165_v61  ;;  %3920 = vmatprep.subr.bf16.mxu1 %v3919_v21  ;;  %v6170_v13 = vld [vmem:[#allocation32_spill] sm:$0xff] }
 0x3e6   :  { %v3145_v22 = vsel %vm2922_vm7, %v2872_v17, %v3144_v33  ;;  %v6166_v17 = vld [vmem:[#allocation14_spill] sm:$0xff]  ;;  %v6167_v33 = vld [vmem:[#allocation27_spill] sm:$0xff]  ;;  %v2445_v40 = vrot.slane %v2444_v57, 1  ;;  %v1477_v9 = vmul.f32 %v4294_v27, %v6170_v13 }
 0x3e7   :  { %v1642_v56 = vrot.slane %v1641_v43, 1  ;;  %v3146_v36 = vsel %vm2924_vm8, %v2879_v20, %v3145_v22  ;;  %v1674_v18 = vadd.f32 %v1673_v50, %v1672_v14  ;;  %v1473_v46 = vmul.f32 %v4290_v45, %v6166_v17  ;;  %v3369_v14 = vld [vmem:[#allocation7 + $0xe8] sm:$0xff] }
 0x3e8   :  { %v2214_v4 = vpop.permute.xlu1 %2213  ;;  %v4057_v10 = vpack.i.bf16 %v3010_v11, %v3146_v36  ;;  %v1504_v20 = vsel %vm108_vm0, %v1472_v1, 0.0  ;;  %3922 = vmatpush3.bf16.msra.mxu1 %v3921_v25  ;;  %v3351_v11 = vld [vmem:[#allocation7 + $0x58] sm:$0xff]  ;;  %v2459_v36 = vrot.slane %v2458_v24, 1  ;;  %v6169_v50 = vld [vmem:[#allocation33_spill] sm:$0xff] }
 0x3e9   :  { %v1643_v63 = vadd.f32 %v1642_v56, %v1641_v43  ;;  %v2265_v26 = vmul.f32 %v5751_v8, %v2214_v4  ;;  %v4291_v43 = vld [vmem:[#allocation2 + $0x10] sm:$0xff]  ;;  %3924 = vmatprep.subr.bf16.mxu1 %v3923_v0  ;;  %v1675_v38 = vrot.slane %v1674_v18, 2  ;;  %v1511_v4 = vsel %vm108_vm0, %v1473_v46, 0.0 }
 0x3ea   :  { %4058 = vrot.lane.b32.xlu0 %v4057_v10, %s4407_s2  ;;  %v1474_v32 = vmul.f32 %v4291_v43, %v6167_v33  ;;  %v3350_v56 = vld [vmem:[#allocation7 + $0x50] sm:$0xff]  ;;  %v4292_v10 = vld [vmem:[#allocation2 + $0x18] sm:$0xff]  ;;  %v1505_v21 = vrot.slane %v1504_v20, 4  ;;  %v2460_v7 = vadd.f32 %v2459_v36, %v2458_v24  ;;  %v1512_v25 = vrot.slane %v1511_v4, 4 }
 0x3eb   :  { %v5869_v30 = vsel %vm2916_vm4, %v1643_v63, %v6164_v49  ;;  %v2447_v35 = vsel %vm108_vm0, %v2265_v26, 0.0  ;;  %v6168_v63 = vld [vmem:[#allocation22_spill] sm:$0xff]  ;;  %v3929_v15 = vpack.c.bf16 %v3351_v11, %v3350_v56  ;;  %v1476_v49 = vmul.f32 %v4293_v54, %v6169_v50 }
 0x3ec   :  { %v2448_v3 = vrot.slane %v2447_v35, 4  ;;  %v1475_v26 = vmul.f32 %v4292_v10, %v6168_v63  ;;  %v1518_v41 = vsel %vm108_vm0, %v1474_v32, 0.0  ;;  %3926 = vmatpush3.bf16.msra.mxu1 %v3925_v2  ;;  %v1676_v61 = vadd.f32 %v1675_v38, %v1674_v18  ;;  %v4295_v18 = vld [vmem:[#allocation2 + $0x30] sm:$0xff] }
 0x3ed   :  { %v5873_v42 = vpop.permute.xlu1 %1419  ;;  %3928 = vmatprep.subr.bf16.mxu1 %v3927_v62  ;;  %v1519_v0 = vrot.slane %v1518_v41, 4  ;;  %v1506_v17 = vadd.f32 %v1505_v21, %v1504_v20  ;;  %v1532_v46 = vsel %vm108_vm0, %v1476_v49, 0.0  ;;  %v1513_v2 = vadd.f32 %v1512_v25, %v1511_v4  ;;  %v4297_v21 = vld [vmem:[#allocation2 + $0x38] sm:$0xff]  ;;  %v6172_v4 = vld [vmem:[#allocation24_spill] sm:$0xff] }
 0x3ee   :  { %v2449_v47 = vadd.f32 %v2448_v3, %v2447_v35  ;;  %v2446_v35 = vadd.f32 %v2445_v40, %v2444_v57  ;;  %v3931_v3 = vpack.c.bf16 %v3369_v14, %v3368_v12  ;;  %v1677_v33 = vrot.slane %v1676_v61, 1 }
 0x3ef   :  { %v1520_v40 = vadd.f32 %v1519_v0, %v1518_v41  ;;  %v1507_v56 = vrot.slane %v1506_v17, 2  ;;  %v1514_v14 = vrot.slane %v1513_v2, 2  ;;  %v1479_v41 = vmul.f32 %v4297_v21, %v6172_v4 }
 0x3f0   :  { %v2450_v55 = vrot.slane %v2449_v47, 2  ;;  %3930 = vmatpush3.bf16.msra.mxu1 %v3929_v15  ;;  %v1678_v36 = vadd.f32 %v1677_v33, %v1676_v61 }
 0x3f1   :  { %v1440_v22 = vpop.permute.xlu1 %1439  ;;  %3932 = vmatprep.subr.bf16.mxu1 %v3931_v3  ;;  %v1521_v10 = vrot.slane %v1520_v40, 2  ;;  %v1508_v49 = vadd.f32 %v1507_v56, %v1506_v17  ;;  %v1515_v3 = vadd.f32 %v1514_v14, %v1513_v2 }
 0x3f2   :  { %v2451_v51 = vadd.f32 %v2450_v55, %v2449_v47  ;;  %v1497_v29 = vmul.f32 %v5751_v8, %v1440_v22  ;;  %v1525_v47 = vsel %vm108_vm0, %v1475_v26, 0.0  ;;  %v6171_v55 = vld [vmem:[#allocation34_spill] sm:$0xff] }
 0x3f3   :  { %v1526_v24 = vrot.slane %v1525_v47, 4  ;;  %v1478_v43 = vmul.f32 %v4295_v18, %v6171_v55  ;;  %v4296_v26 = vld [vmem:[#allocation2 + $0xd0] sm:$0xff] }
 0x3f4   :  { %v2452_v19 = vrot.slane %v2451_v51, 1  ;;  %v1679_v58 = vsel %vm108_vm0, %v1497_v29, 0.0  ;;  %v1533_v29 = vrot.slane %v1532_v46, 4 }
 0x3f5   :  { %v1680_v8 = vrot.slane %v1679_v58, 4  ;;  %v1527_v11 = vadd.f32 %v1526_v24, %v1525_v47  ;;  %v1546_v20 = vsel %vm108_vm0, %v1478_v43, 0.0  ;;  %v1553_v47 = vsel %vm108_vm0, %v1479_v41, 0.0 }
 0x3f6   :  { %v2453_v34 = vadd.f32 %v2452_v19, %v2451_v51  ;;  %v5884_v28 = vpop.permute.xlu1 %2201  ;;  %v1539_v51 = vsel %vm108_vm0, %v1477_v9, 0.0  ;;  %v1547_v54 = vrot.slane %v1546_v20, 4  ;;  %v4298_v9 = vld [vmem:[#allocation2 + $0x78] sm:$0xff]  ;;  %v1554_v43 = vrot.slane %v1553_v47, 4 }
 0x3f7   :  { %v1681_v1 = vadd.f32 %v1680_v8, %v1679_v58  ;;  %v1540_v63 = vrot.slane %v1539_v51, 4  ;;  %v1534_v58 = vadd.f32 %v1533_v29, %v1532_v46  ;;  %v5899_v8 = vpop.permute.xlu0 %1429  ;;  %v1509_v46 = vrot.slane %v1508_v49, 1 }
 0x3f8   :  { %v3076_v6 = vsel %vm2912_vm2, %v2453_v34, %v2446_v35  ;;  %v1528_v35 = vrot.slane %v1527_v11, 2  ;;  %v1548_v13 = vadd.f32 %v1547_v54, %v1546_v20 }
 0x3f9   :  { %v1682_v45 = vrot.slane %v1681_v1, 2  ;;  %v5890_v57 = vsel %vm2914_vm3, %v2460_v7, %v3076_v6  ;;  %v1522_v7 = vadd.f32 %v1521_v10, %v1520_v40  ;;  %v1541_v61 = vadd.f32 %v1540_v63, %v1539_v51 }
 0x3fa   :  { %v1535_v25 = vrot.slane %v1534_v58, 2  ;;  %v1529_v17 = vadd.f32 %v1528_v35, %v1527_v11  ;;  %v1555_v10 = vadd.f32 %v1554_v43, %v1553_v47 }
 0x3fb   :  { %v1683_v32 = vadd.f32 %v1682_v45, %v1681_v1  ;;  %v5894_v22 = vpop.permute.xlu1 %1424  ;;  %v5904_v0 = vpop.permute.xlu0 %1454  ;;  %v1487_v45 = vmul.f32 %v4298_v9, %v5834_v5  ;;  %v1523_v55 = vrot.slane %v1522_v7, 1  ;;  %v1542_v2 = vrot.slane %v1541_v61, 2 }
 0x3fc   :  { %v1536_v40 = vadd.f32 %v1535_v25, %v1534_v58  ;;  %v1510_v5 = vadd.f32 %v1509_v46, %v1508_v49  ;;  %v1556_v25 = vrot.slane %v1555_v10, 2  ;;  %v4299_v46 = vld [vmem:[#allocation2 + $0xa0] sm:$0xff] }
 0x3fd   :  { %v1684_v62 = vrot.slane %v1683_v32, 1  ;;  %v1609_v56 = vsel %vm108_vm0, %v1487_v45, 0.0  ;;  %v1524_v14 = vadd.f32 %v1523_v55, %v1522_v7  ;;  %v1492_v55 = vmul.f32 %v4299_v46, %v5844_v60 }
 0x3fe   :  { %v1610_v58 = vrot.slane %v1609_v56, 4  ;;  %v1537_v54 = vrot.slane %v1536_v40, 1 }
 0x3ff   :  { %v1685_v38 = vadd.f32 %v1684_v62, %v1683_v32  ;;  %v1445_v12 = vpop.permute.xlu1 %1444  ;;  %v1516_v32 = vrot.slane %v1515_v3, 1  ;;  %v1549_v62 = vrot.slane %v1548_v13, 2  ;;  %v5911_v11 = vpop.permute.xlu0 %1459 }
 0x400   :  { %v1498_v19 = vmul.f32 %v4296_v26, %v1445_v12  ;;  %v1538_v45 = vadd.f32 %v1537_v54, %v1536_v40  ;;  %v1494_v40 = vmul.f32 %v5731_v44, %v5894_v22 }
 0x401   :  { %v2940_v15 = vsel %vm2912_vm2, %v1685_v38, %v1678_v36  ;;  %v1530_v38 = vrot.slane %v1529_v17, 1  ;;  %v1517_v41 = vadd.f32 %v1516_v32, %v1515_v3 }
 0x402   :  { %v1686_v50 = vsel %vm108_vm0, %v1498_v19, 0.0  ;;  %v1543_v19 = vadd.f32 %v1542_v2, %v1541_v61  ;;  %v1557_v2 = vadd.f32 %v1556_v25, %v1555_v10 }
 0x403   :  { %v1687_v34 = vrot.slane %v1686_v50, 4  ;;  %v1531_v7 = vadd.f32 %v1530_v38, %v1529_v17  ;;  %v5919_v9 = vpop.permute.xlu0 %1464  ;;  %v4300_v17 = vld [vmem:[#allocation2 + $0xa8] sm:$0xff]  ;;  %v4301_v38 = vld [vmem:[#allocation2 + $0xb8] sm:$0xff] }
 0x404   :  { %v2222_v1 = vpop.permute.xlu1 %2221  ;;  %v1544_v61 = vrot.slane %v1543_v19, 1  ;;  %v2261_v43 = vmul.f32 %v4300_v17, %v5857_v52  ;;  %v1558_v10 = vrot.slane %v1557_v2, 1 }
 0x405   :  { %v1688_v6 = vadd.f32 %v1687_v34, %v1686_v50  ;;  %v2267_v27 = vmul.f32 %v5799_v53, %v2222_v1  ;;  %v1550_v50 = vadd.f32 %v1549_v62, %v1548_v13  ;;  %v2913_v1 = vsel %vm2912_vm2, %v1517_v41, %v1510_v5 }
 0x407   :  { %v1689_v24 = vrot.slane %v1688_v6, 2  ;;  %v2461_v18 = vsel %vm108_vm0, %v2267_v27, 0.0  ;;  %v1611_v27 = vadd.f32 %v1610_v58, %v1609_v56  ;;  %v1551_v13 = vrot.slane %v1550_v50, 1  ;;  %v5941_v5 = vpop.permute.xlu0 %1469 }
 0x408   :  { %v2462_v33 = vrot.slane %v2461_v18, 4  ;;  %v1545_v56 = vadd.f32 %v1544_v61, %v1543_v19  ;;  %v1495_v58 = vmul.f32 %v4301_v38, %v5899_v8 }
 0x409   :  { %v1690_v51 = vadd.f32 %v1689_v24, %v1688_v6  ;;  %v1450_v29 = vpop.permute.xlu1 %1449  ;;  %v2915_v6 = vsel %vm2914_vm3, %v1524_v14, %v2913_v1  ;;  %v2260_v24 = vmul.f32 %v4299_v46, %v5851_v37  ;;  %v1612_v60 = vrot.slane %v1611_v27, 2 }
 0x40a   :  { %v2463_v20 = vadd.f32 %v2462_v33, %v2461_v18  ;;  %v1499_v36 = vmul.f32 %v5799_v53, %v1450_v29  ;;  %v1493_v33 = vmul.f32 %v4300_v17, %v5873_v42  ;;  %v2917_v29 = vsel %vm2916_vm4, %v1531_v7, %v2915_v6 }
 0x40b   :  { %v1691_v12 = vrot.slane %v1690_v51, 1  ;;  %v2919_v52 = vsel %vm2918_vm5, %v1538_v45, %v2917_v29  ;;  %v1552_v42 = vadd.f32 %v1551_v13, %v1550_v50  ;;  %v1613_v19 = vadd.f32 %v1612_v60, %v1611_v27  ;;  %v6174_v29 = vld [vmem:[#allocation36_spill] sm:$0xff] }
 0x40c   :  { %v2464_v63 = vrot.slane %v2463_v20, 2  ;;  %v1693_v26 = vsel %vm108_vm0, %v1499_v36, 0.0  ;;  %v2921_v25 = vsel %vm2920_vm6, %v1545_v56, %v2919_v52  ;;  %v1665_v27 = vsel %vm108_vm0, %v1495_v58, 0.0 }
 0x40d   :  { %v1692_v21 = vadd.f32 %v1691_v12, %v1690_v51  ;;  %v1694_v4 = vrot.slane %v1693_v26, 4  ;;  %v2262_v51 = vmul.f32 %v5731_v44, %v5884_v28  ;;  %v1644_v28 = vsel %vm108_vm0, %v1492_v55, 0.0  ;;  %v6173_v12 = vld [vmem:[#allocation17_spill] sm:$0xff] }
 0x40e   :  { %v2465_v35 = vadd.f32 %v2464_v63, %v2463_v20  ;;  %v5914_v34 = vpop.permute.xlu1 %2225  ;;  %v2412_v20 = vsel %vm108_vm0, %v2260_v24, 0.0  ;;  %v2419_v44 = vsel %vm108_vm0, %v2261_v43, 0.0  ;;  %v2263_v14 = vmul.f32 %v4301_v38, %v6173_v12 }
 0x40f   :  { %v2941_v53 = vsel %vm2914_vm3, %v1692_v21, %v2940_v15  ;;  %v1695_v49 = vadd.f32 %v1694_v4, %v1693_v26  ;;  %v2426_v63 = vsel %vm108_vm0, %v2262_v51, 0.0  ;;  %v1658_v26 = vsel %vm108_vm0, %v1494_v40, 0.0 }
 0x410   :  { %v2466_v47 = vrot.slane %v2465_v35, 1  ;;  %v2413_v21 = vrot.slane %v2412_v20, 4  ;;  %v1645_v41 = vrot.slane %v1644_v28, 4  ;;  %v2420_v54 = vrot.slane %v2419_v44, 4 }
 0x411   :  { %v1696_v3 = vrot.slane %v1695_v49, 2  ;;  %v2427_v1 = vrot.slane %v2426_v63, 4  ;;  %v1659_v7 = vrot.slane %v1658_v26, 4  ;;  %v2923_v6 = vsel %vm2922_vm7, %v1552_v42, %v2921_v25 }
 0x412   :  { %v2467_v18 = vadd.f32 %v2466_v47, %v2465_v35  ;;  %v5922_v15 = vpop.permute.xlu1 %2229  ;;  %v1559_v47 = vadd.f32 %v1558_v10, %v1557_v2  ;;  %v2433_v61 = vsel %vm108_vm0, %v2263_v14, 0.0  ;;  %v1614_v8 = vrot.slane %v1613_v19, 1 }
 0x413   :  { %v1697_v32 = vadd.f32 %v1696_v3, %v1695_v49  ;;  %v4049_v49 = vpop.permute.xlu0 %4048  ;;  %v1646_v3 = vadd.f32 %v1645_v41, %v1644_v28  ;;  %v2421_v13 = vadd.f32 %v2420_v54, %v2419_v44  ;;  %v1660_v55 = vadd.f32 %v1659_v7, %v1658_v26 }
 0x414   :  { %v5933_v37 = vsel %vm2916_vm4, %v2467_v18, %v5890_v57  ;;  %v1651_v57 = vsel %vm108_vm0, %v1493_v33, 0.0  ;;  %v4050_v45 = vunpack.i.l.bf16 %v4049_v49  ;;  %v2428_v18 = vadd.f32 %v2427_v1, %v2426_v63 }
 0x415   :  { %v1698_v62 = vrot.slane %v1697_v32, 1  ;;  %v1652_v50 = vrot.slane %v1651_v57, 4  ;;  %v2434_v33 = vrot.slane %v2433_v61, 4  ;;  %v2925_v2 = vsel %vm2924_vm8, %v1559_v47, %v2923_v6 }
 0x416   :  { %v5938_v36 = vpop.permute.xlu1 %2233  ;;  %v1615_v51 = vadd.f32 %v1614_v8, %v1613_v19  ;;  %v4051_v56 = vunpack.i.h.bf16 %v4049_v49  ;;  %v2422_v52 = vrot.slane %v2421_v13, 2  ;;  %v2429_v28 = vrot.slane %v2428_v18, 2 }
 0x417   :  { %v1699_v22 = vadd.f32 %v1698_v62, %v1697_v32  ;;  %v1653_v46 = vadd.f32 %v1652_v50, %v1651_v57  ;;  %v1666_v32 = vrot.slane %v1665_v27, 4  ;;  %v1661_v44 = vrot.slane %v1660_v55, 2 }
 0x418   :  { %v3164_v57 = vsel %vm108_vm0, %v5765_v59, %v4050_v45  ;;  %v2932_v14 = vsel %vm2924_vm8, %v1615_v51, %v5774_v48  ;;  %v2423_v10 = vadd.f32 %v2422_v52, %v2421_v13  ;;  %v2430_v58 = vadd.f32 %v2429_v28, %v2428_v18 }
 0x419   :  { %v5950_v4 = vsel %vm2916_vm4, %v1699_v22, %v2941_v53  ;;  %v2414_v53 = vadd.f32 %v2413_v21, %v2412_v20  ;;  %v1654_v42 = vrot.slane %v1653_v46, 2  ;;  %v1647_v20 = vrot.slane %v1646_v3, 2 }
 0x41a   :  { %v5952_v35 = vpop.permute.xlu1 %2237  ;;  %v2435_v22 = vadd.f32 %v2434_v33, %v2433_v61  ;;  %v1667_v38 = vadd.f32 %v1666_v32, %v1665_v27  ;;  %v3160_v26 = vsel %vm108_vm0, %v2932_v14, %v4051_v56  ;;  %v1662_v21 = vadd.f32 %v1661_v44, %v1660_v55 }
 0x41b   :  { %v2415_v40 = vrot.slane %v2414_v53, 2  ;;  %v1655_v63 = vadd.f32 %v1654_v42, %v1653_v46  ;;  %v1648_v19 = vadd.f32 %v1647_v20, %v1646_v3  ;;  %v2424_v49 = vrot.slane %v2423_v10, 1  ;;  %v6175_v46 = vld [vmem:[#allocation15_spill] sm:$0xff] }
 0x41c   :  { %v2436_v41 = vrot.slane %v2435_v22, 2  ;;  %v1668_v54 = vrot.slane %v1667_v38, 2  ;;  %v2431_v7 = vrot.slane %v2430_v58, 1  ;;  %v1663_v25 = vrot.slane %v1662_v21, 1 }
 0x41d   :  { %v2416_v12 = vadd.f32 %v2415_v40, %v2414_v53  ;;  %v1656_v59 = vrot.slane %v1655_v63, 1  ;;  %v1649_v1 = vrot.slane %v1648_v19, 1  ;;  %v2425_v48 = vadd.f32 %v2424_v49, %v2423_v10 }
 0x41e   :  { %v4044_v24 = vpop.permute.xlu1 %4043  ;;  %v2437_v47 = vadd.f32 %v2436_v41, %v2435_v22  ;;  %v1669_v6 = vadd.f32 %v1668_v54, %v1667_v38  ;;  %v2432_v53 = vadd.f32 %v2431_v7, %v2430_v58  ;;  %v1664_v45 = vadd.f32 %v1663_v25, %v1662_v21 }
 0x41f   :  { %v4046_v17 = vunpack.i.h.bf16 %v4044_v24  ;;  %v4045_v43 = vunpack.i.l.bf16 %v4044_v24  ;;  %v2417_v50 = vrot.slane %v2416_v12, 1  ;;  %v1657_v8 = vadd.f32 %v1656_v59, %v1655_v63 }
 0x420   :  { %v1650_v27 = vadd.f32 %v1649_v1, %v1648_v19  ;;  %v2438_v3 = vrot.slane %v2437_v47, 1  ;;  %v1670_v13 = vrot.slane %v1669_v6, 1  ;;  %v1500_v52 = vmul.f32 %v5791_v39, %v5904_v0 }
 0x421   :  { %v3163_v60 = vsel %vm108_vm0, %v6174_v29, %v4045_v43  ;;  %v3159_v62 = vsel %vm108_vm0, %v2925_v2, %v4046_v17  ;;  %v2418_v61 = vadd.f32 %v2417_v50, %v2416_v12  ;;  %v1501_v42 = vmul.f32 %v5805_v31, %v5911_v11 }
 0x422   :  { %3307 = vmatprep.mubr.f32.mxu0 %v3163_v60  ;;  %v2936_v18 = vsel %vm2918_vm5, %v1650_v27, %v5869_v30  ;;  %v2439_v32 = vadd.f32 %v2438_v3, %v2437_v47  ;;  %v1671_v2 = vadd.f32 %v1670_v13, %v1669_v6  ;;  %v1700_v20 = vsel %vm108_vm0, %v1500_v52, 0.0 }
 0x423   :  { %3308 = vmatmul.mubr.f32.vlgmr.msra.gmra.mrb[32].mxu0 %v3159_v62  ;;  %v3072_v24 = vsel %vm2918_vm5, %v2418_v61, %v6175_v46  ;;  %v2937_v17 = vsel %vm2920_vm6, %v1657_v8, %v2936_v18  ;;  %v2268_v28 = vmul.f32 %v5791_v39, %v5914_v34  ;;  %v2269_v44 = vmul.f32 %v5805_v31, %v5922_v15 }
 0x424   :  { %3313 = vmatprep.mubr.f32.mxu0 %v3164_v57  ;;  %v3073_v55 = vsel %vm2920_vm6, %v2425_v48, %v3072_v24  ;;  %v2938_v33 = vsel %vm2922_vm7, %v1664_v45, %v2937_v17  ;;  %v1502_v57 = vmul.f32 %v5812_v16, %v5919_v9  ;;  %v2270_v22 = vmul.f32 %v5812_v16, %v5938_v36 }
 0x425   :  { %v3074_v43 = vsel %vm2922_vm7, %v2432_v53, %v3073_v55  ;;  %v2939_v62 = vsel %vm2924_vm8, %v1671_v2, %v2938_v33  ;;  %v1701_v0 = vrot.slane %v1700_v20, 4  ;;  %v1707_v38 = vsel %vm108_vm0, %v1501_v42, 0.0 }
 0x426   :  { %v3075_v60 = vsel %vm2924_vm8, %v2439_v32, %v3074_v43  ;;  %v2271_v11 = vmul.f32 %v5820_v23, %v5952_v35  ;;  %v2468_v12 = vsel %vm108_vm0, %v2268_v28, 0.0  ;;  %v1503_v39 = vmul.f32 %v5820_v23, %v5941_v5 }
 0x427   :  { %3314 = vmatmul.mubr.f32.gmra.mrb[34].mxu0 %v3160_v26  ;;  %v2475_v34 = vsel %vm108_vm0, %v2269_v44, 0.0  ;;  %v1708_v31 = vrot.slane %v1707_v38, 4  ;;  %v1714_v15 = vsel %vm108_vm0, %v1502_v57, 0.0  ;;  %v2482_v9 = vsel %vm108_vm0, %v2270_v22, 0.0 }
 0x428   :  { %v1702_v14 = vadd.f32 %v1701_v0, %v1700_v20  ;;  %v2469_v16 = vrot.slane %v2468_v12, 4  ;;  %v2489_v36 = vsel %vm108_vm0, %v2271_v11, 0.0  ;;  %v2476_v10 = vrot.slane %v2475_v34, 4 }
 0x429   :  { %v1715_v63 = vrot.slane %v1714_v15, 4  ;;  %v1721_v35 = vsel %vm108_vm0, %v1503_v39, 0.0  ;;  %v2483_v26 = vrot.slane %v2482_v9, 4  ;;  %v1709_v19 = vadd.f32 %v1708_v31, %v1707_v38 }
 0x42a   :  { %v2490_v58 = vrot.slane %v2489_v36, 4  ;;  %v1703_v21 = vrot.slane %v1702_v14, 2  ;;  %v2470_v23 = vadd.f32 %v2469_v16, %v2468_v12  ;;  %v1722_v5 = vrot.slane %v1721_v35, 4  ;;  %v3371_v16 = vld [vmem:[#allocation7 + $0xf8] sm:$0xff] }
 0x42b   :  { %v2477_v41 = vadd.f32 %v2476_v10, %v2475_v34  ;;  %v1716_v54 = vadd.f32 %v1715_v63, %v1714_v15  ;;  %v2484_v50 = vadd.f32 %v2483_v26, %v2482_v9  ;;  %v1710_v49 = vrot.slane %v1709_v19, 2  ;;  %v3353_v15 = vld [vmem:[#allocation7 + $0x68] sm:$0xff]  ;;  %v3354_v10 = vld [vmem:[#allocation7 + $0x70] sm:$0xff]  ;;  %v3355_v63 = vld [vmem:[#allocation7 + $0x78] sm:$0xff] }
 0x42c   :  { %v2491_v59 = vadd.f32 %v2490_v58, %v2489_v36  ;;  %v1704_v1 = vadd.f32 %v1703_v21, %v1702_v14  ;;  %v2471_v7 = vrot.slane %v2470_v23, 2  ;;  %v1723_v25 = vadd.f32 %v1722_v5, %v1721_v35  ;;  %v3370_v14 = vld [vmem:[#allocation7 + $0xf0] sm:$0xff]  ;;  %v3231_v21 = vld [vmem:[%s6040_s4] sm:$0x3] }
 0x42d   :  { %v2478_v47 = vrot.slane %v2477_v41, 2  ;;  %v1717_v6 = vrot.slane %v1716_v54, 2  ;;  %v2485_v61 = vrot.slane %v2484_v50, 2  ;;  %v1711_v48 = vadd.f32 %v1710_v49, %v1709_v19 }
 0x42e   :  { %v2492_v8 = vrot.slane %v2491_v59, 2  ;;  %v1705_v27 = vrot.slane %v1704_v1, 1  ;;  %v2472_v53 = vadd.f32 %v2471_v7, %v2470_v23  ;;  %v1724_v45 = vrot.slane %v1723_v25, 2 }
 0x42f   :  { %v2479_v3 = vadd.f32 %v2478_v47, %v2477_v41  ;;  %v1718_v13 = vadd.f32 %v1717_v6, %v1716_v54  ;;  %v2486_v46 = vadd.f32 %v2485_v61, %v2484_v50  ;;  %v1712_v24 = vrot.slane %v1711_v48, 1 }
 0x430   :  { %v2493_v18 = vadd.f32 %v2492_v8, %v2491_v59  ;;  %v1706_v55 = vadd.f32 %v1705_v27, %v1704_v1  ;;  %v2473_v17 = vrot.slane %v2472_v53, 1  ;;  %v1725_v43 = vadd.f32 %v1724_v45, %v1723_v25 }
 0x431   :  { %v2480_v33 = vrot.slane %v2479_v3, 1  ;;  %v1719_v32 = vrot.slane %v1718_v13, 1  ;;  %v2487_v2 = vrot.slane %v2486_v46, 1  ;;  %v3935_v36 = vpack.c.bf16 %v3371_v16, %v3370_v14 }
 0x432   :  { %v3937_v35 = vpack.c.bf16 %v3355_v63, %v3354_v10  ;;  %v3233_v26 = vlaneseq }
 0x433   :  { %v4054_v51 = vpop.permute.xlu1 %4053  ;;  %v1720_v52 = vadd.f32 %v1719_v32, %v1718_v13  ;;  %v2488_v42 = vadd.f32 %v2487_v2, %v2486_v46  ;;  %v3518_v2 = vld [vmem:[%s6042_s6] ss:$0 sm:$0xff]  ;;  %s4368_s6 = scalar_lea.vmem %s3474_s18, 512 }
 0x434   :  { %v4056_v40 = vunpack.i.h.bf16 %v4054_v51  ;;  %v4055_v29 = vunpack.i.l.bf16 %v4054_v51  ;;  %v2943_v51 = vsel %vm2918_vm5, %v1706_v55, %v5950_v4  ;;  %v3234_v19 = vshrl.u32 %v3233_v26, 7  ;;  %p4369_p10 = scmp.ne.s32.totalorder %s3474_s18, %s4368_s6  ;;  %p4374_p12 = scmp.lt.s32.totalorder %s4368_s6, %s4368_s6 }
 0x436   :  { %v3165_v56 = vsel %vm108_vm0, %v3075_v60, %v4055_v29  ;;  %v3161_v30 = vsel %vm108_vm0, %v2939_v62, %v4056_v40  ;;  %v1713_v40 = vadd.f32 %v1712_v24, %v1711_v48  ;;  %v2494_v29 = vrot.slane %v2493_v18, 1  ;;  %p4375_p13 = por %p4374_p12, %p4373_p11 }
 0x437   :  { %3319 = vmatprep.mubr.f32.mxu0 %v3165_v56  ;;  %v2474_v60 = vadd.f32 %v2473_v17, %v2472_v53  ;;  %v1726_v62 = vrot.slane %v1725_v43, 1  ;;  %v2481_v56 = vadd.f32 %v2480_v33, %v2479_v3  ;;  %v3235_v58 = vsub.s32 0, %v3234_v19 }
 0x438   :  { %3320 = vmatmul.mubr.f32.gmra.mrb[36].mxu0 %v3161_v30  ;;  %v2944_v30 = vsel %vm2920_vm6, %v1713_v40, %v2943_v51  ;;  %v2495_v20 = vadd.f32 %v2494_v29, %v2493_v18  ;;  %v3239_v23 = vsub.s32 1, %v3234_v19  ;;  %p4376_p0 = pnand %p4375_p13, %p4369_p10 }
 0x439   :  { %v3079_v28 = vsel %vm2918_vm5, %v2474_v60, %v5933_v37  ;;  %v2945_v44 = vsel %vm2922_vm7, %v1720_v52, %v2944_v30  ;;  %v1727_v57 = vadd.f32 %v1726_v62, %v1725_v43  ;;  %v3352_v37 = vld [vmem:[#allocation7 + $0x60] sm:$0xff]  ;;  %v3236_v5 = vrot.slane %v3231_v21, %v3235_v58 }
 0x43a   :  { %v3080_v0 = vsel %vm2920_vm6, %v2481_v56, %v3079_v28  ;;  %v3933_v9 = vpack.c.bf16 %v3353_v15, %v3352_v37  ;;  %v3240_v41 = vrot.slane %v3231_v21, %v3239_v23 }
 0x43b   :  { %v3081_v11 = vsel %vm2922_vm7, %v2488_v42, %v3080_v0  ;;  %v2946_v39 = vsel %vm2924_vm8, %v1727_v57, %v2945_v44 }
 0x43c   :  { %v3082_v12 = vsel %vm2924_vm8, %v2495_v20, %v3081_v11  ;;  %3934 = vmatpush3.bf16.msra.mxu1 %v3933_v9 }
 0x43d   :  { %3936 = vmatprep.subr.bf16.mxu1 %v3935_v36 }
 0x440   :  { %3938 = vmatpush3.bf16.msra.mxu1 %v3937_v35 }
 0x45c   :  { %v4059_v22 = vpop.permute.xlu0 %4058 }
 0x45d   :  { %v4061_v4 = vunpack.i.h.bf16 %v4059_v22  ;;  %v4060_v38 = vunpack.i.l.bf16 %v4059_v22 }
 0x45f   :  { %v3166_v34 = vsel %vm108_vm0, %v3082_v12, %v4060_v38  ;;  %v3162_v31 = vsel %vm108_vm0, %v2946_v39, %v4061_v4 }
 0x460   :  { %3325 = vmatprep.mubr.f32.mxu0 %v3166_v34 }
 0x461   :  { %3326 = vmatmul.mubr.f32.gmra.mrb[38].mxu0 %v3162_v31 }
 0x4f6   :  { %v3309_v54 = vpop.f32.mrb[32].mxu0 }
 0x4f7   :  { %v3310_v50 = vadd.f32 %v3309_v54, %v3236_v5  ;;  %v3311_v49 = vpop.f32.mrb[33].mxu0 }
 0x4f8   :  { %v3312_v59 = vadd.f32 %v3311_v49, %v3240_v41 }
 0x4f9   :  { %v3332_v25 = vmax.f32 %v3310_v50, 0.0 }
 0x4fa   :  { %v3333_v1 = vmax.f32 %v3312_v59, 0.0  ;;  %v3315_v7 = vpop.f32.mrb[34].mxu0 }
 0x4fb   :  { %v3316_v47 = vadd.f32 %v3315_v7, %v3236_v5  ;;  %v3317_v6 = vpop.f32.mrb[35].mxu0 }
 0x4fc   :  { %v3318_v61 = vadd.f32 %v3317_v6, %v3240_v41  ;;  %3443 = vmatprep.mubr.f32.mxu1 %v3333_v1 }
 0x4fd   :  { %3444 = vmatmul.mubr.f32.vlgmr.msra.gmra.mrb[32].mxu1 %v3332_v25  ;;  %v3334_v8 = vmax.f32 %v3316_v47, 0.0 }
 0x4fe   :  { %v3335_v48 = vmax.f32 %v3318_v61, 0.0 }
 0x500   :  { %3448 = vmatprep.mubr.f32.mxu1 %v3335_v48 }
 0x501   :  { %3449 = vmatmul.mubr.f32.gmra.mrb[34].mxu1 %v3334_v8 }
 0x50b   :  { %v3321_v27 = vpop.f32.mrb[36].mxu0 }
 0x50c   :  { %v3322_v53 = vadd.f32 %v3321_v27, %v3236_v5  ;;  %v3323_v45 = vpop.f32.mrb[37].mxu0 }
 0x50d   :  { %v3324_v3 = vadd.f32 %v3323_v45, %v3240_v41 }
 0x50e   :  { %v3336_v46 = vmax.f32 %v3322_v53, 0.0 }
 0x50f   :  { %v3337_v13 = vmax.f32 %v3324_v3, 0.0 }
 0x511   :  { %3453 = vmatprep.mubr.f32.mxu1 %v3337_v13 }
 0x512   :  { %3454 = vmatmul.mubr.f32.gmra.mrb[36].mxu1 %v3336_v46 }
 0x534   :  { %v3327_v24 = vpop.f32.mrb[38].mxu0 }
 0x535   :  { %v3328_v18 = vadd.f32 %v3327_v24, %v3236_v5  ;;  %v3329_v55 = vpop.f32.mrb[39].mxu0 }
 0x536   :  { %v3330_v17 = vadd.f32 %v3329_v55, %v3240_v41 }
 0x537   :  { %v3338_v33 = vmax.f32 %v3328_v18, 0.0 }
 0x538   :  { %v3339_v43 = vmax.f32 %v3330_v17, 0.0 }
 0x53a   :  { %3458 = vmatprep.mubr.f32.mxu1 %v3339_v43 }
 0x53b   :  { %3459 = vmatmul.mubr.f32.gmra.mrb[38].mxu1 %v3338_v33 }
 0x5d0   :  { %v3639_v32 = vpop.f32.mrb[32].mxu1 }
 0x5d1   :  { %v3640_v51 = vpop.f32.mrb[33].mxu1 }
 0x5d2   :  { %v3641_v40 = vadd.f32 %v3640_v51, %v3639_v32 }
 0x5d4   :  { %v3446_v29 = vadd.f32 %v3641_v40, %v3518_v2  ;;  %v3642_v60 = vpop.f32.mrb[34].mxu1 }
 0x5d5   :  { %v3643_v62 = vpop.f32.mrb[35].mxu1 }
 0x5d6   :  { %3464 = vst [vmem:[#allocation8] sm:$0xff] %v3446_v29  ;;  %v3644_v56 = vadd.f32 %v3643_v62, %v3642_v60 }
 0x5d8   :  { %v3451_v30 = vadd.f32 %v3644_v56, %v3518_v2 }
 0x5da   :  { %3465 = vst [vmem:[#allocation8 + $0x8] sm:$0xff] %v3451_v30 }
 0x5e5   :  { %v3645_v52 = vpop.f32.mrb[36].mxu1 }
 0x5e6   :  { %v3646_v42 = vpop.f32.mrb[37].mxu1 }
 0x5e7   :  { %v3647_v20 = vadd.f32 %v3646_v42, %v3645_v52 }
 0x5e9   :  { %v3456_v28 = vadd.f32 %v3647_v20, %v3518_v2 }
 0x5eb   :  { %3466 = vst [vmem:[#allocation8 + $0x10] sm:$0xff] %v3456_v28 }
 0x60e   :  { %v3648_v44 = vpop.f32.mrb[38].mxu1 }
 0x60f   :  { %v3649_v57 = vpop.f32.mrb[39].mxu1 }
 0x610   :  { %v3650_v22 = vadd.f32 %v3649_v57, %v3648_v44 }
 0x612   :  { %v3461_v0 = vadd.f32 %v3650_v22, %v3518_v2 }
 0x614   :  { %3467 = vst [vmem:[#allocation8 + $0x18] sm:$0xff] %v3461_v0 }
 0x615   :  { %4379 = shalt.err (!%p4376_p0)
}
 0x616   :  { %s4380_s21 = scalar_lea.hbm %s6043_s7, 512 }
 0x617   :  { %p4381_p1 = scmp.ne.s32.totalorder %s6043_s7, %s4380_s21  ;;  %p4384_p2 = scmp.lt.u32.totalorder %s4380_s21, %s6043_s7 }
 0x619   :  { %p4386_p3 = pnand %p4384_p2, %p4381_p1 }
 0x61b   :  { %4389 = shalt.err (!%p4386_p3)
}
 0x61c   :  { %3479 = dma.vmem_to_hbm [thread:$0]  %s3474_s18, 512, %s6043_s7, [#allocation4], %s4400_s3, %s4400_s3, %s4401_s25  }
 0x61d   :  { %4394 = dma.done.wait [#allocation4], 512  }
 0x61e   :  { %4395 = vsyncadd [#allocation4], 4294966784 }
 0x61f   :  { %3483 = vsyncpa [#allocation3], 1 }
 0x620   :  { %3484 = vsyncpa [#allocation6], 1 }
 0x621   :  { %3485 = vsyncpa [#allocation4], 1 }

</bundles_post_ra>
